<compile_context>
chip_gen: v5e
topology: v5e:2x2
jax: 0.10.0
libtpu: 0.0.40
codegen_flags: <defaults>
</compile_context>

<pallas_src>
import functools

import jax
import jax.numpy as jnp
from jax.experimental import pallas as pl
from jax.experimental.pallas import tpu as pltpu


def _round_up(x, m):
    return ((x + m - 1) // m) * m


def _pad_to(a, shape):
    return jnp.pad(a, [(0, s - d) for d, s in zip(a.shape, shape)])


def _drqn_chunk_kernel(x_ref, h0_ref, wi_ref, wh_ref, b_i_ref, b_hn_ref,
                       wout_ref, bout_ref, q_ref, z_ref, h_scr):
    """One (batch-block, time-chunk) grid step of the DRQN forward."""
    tb, tt, _ = x_ref.shape
    hp = h_scr.shape[1]

    # Fresh sequence start for this batch block: load h0 into the carried
    # hidden-state scratch.
    @pl.when(pl.program_id(1) == 0)
    def _():
        h_scr[...] = h0_ref[...]

    # ---- Hoisted input projection for the whole chunk (single MXU call) ----
    # (TB, TT, I) . (I, 3Hp)  -> (TB, TT, 3Hp), f32 accumulate.
    gx = jax.lax.dot_general(x_ref[...], wi_ref[...],
                             (((2,), (0,)), ((), ())),
                             preferred_element_type=jnp.float32)
    gx = gx + b_i_ref[...][None]          # r/z biases already folded (ih+hh)

    wh = wh_ref[...]                                          # (Hp, 3Hp)
    # Hoisted broadcast (done once, not once per timestep).
    b_hn = jnp.broadcast_to(b_hn_ref[...], (tb, hp))          # (TB, Hp) f32

    # ---- Serial recurrence over this chunk ----
    h = h_scr[...]                                            # (TB, Hp) f32
    hs = []
    for t in range(tt):                   # tt is small & static per chunk
        # Single fused recurrent matmul; gate slices fall on vreg boundaries
        # because Hp is a multiple of 128.
        gh = jnp.dot(h.astype(wh.dtype), wh,
                     preferred_element_type=jnp.float32)      # (TB, 3Hp)
        r = jax.nn.sigmoid(gx[:, t, 0:hp] + gh[:, 0:hp])
        zg = jax.nn.sigmoid(gx[:, t, hp:2 * hp] + gh[:, hp:2 * hp])
        n = jnp.tanh(gx[:, t, 2 * hp:3 * hp]
                     + r * (gh[:, 2 * hp:3 * hp] + b_hn))
        h = (1.0 - zg) * n + zg * h
        hs.append(h)
    h_scr[...] = h                        # carry hidden state to next T-chunk

    # ---- Single lane-dense store of the chunk's hidden states ----
    z = jnp.stack(hs, axis=1)                                 # (TB, TT, Hp)
    z_ref[...] = z.astype(z_ref.dtype)

    # ---- Output head, once per chunk (not per timestep) ----
    q = jax.lax.dot_general(z.astype(wout_ref.dtype), wout_ref[...],
                            (((2,), (0,)), ((), ())),
                            preferred_element_type=jnp.float32)
    q_ref[...] = (q + bout_ref[...][None]).astype(q_ref.dtype)


def drqn_forward(xin, hidden, params, *, tb=8, tt=8, mxu_dtype=jnp.float32):
    """Forward pass of DRQN (GRU, batch_first) + Linear head.

    Args:
      xin:    (B, T, input_size) float32
      hidden: (1, B, hidden_size) float32
      params: PyTorch-layout weights:
        'weight_ih' (3H, I), 'weight_hh' (3H, H), 'bias_ih' (3H,),
        'bias_hh' (3H,), 'w_out' (O, H), 'b_out' (O,)
      tb:  batch tile (multiple of 8).
      tt:  time-chunk length (multiple of 8; keep <= ~16, esp. on v7x 64MiB).
      mxu_dtype: jnp.float32 or jnp.bfloat16 — dtype of MXU *operands* only
        (gate math stays f32).  bf16 recommended on v6e/v7x.
    Returns:
      (q, z) with q: (B, T, output_size), z: (B, T, hidden_size)
    """
    B, T, I = xin.shape
    H = params["weight_hh"].shape[1]
    O = params["w_out"].shape[0]
    f32 = jnp.float32

    # Lane/sublane-dense padded sizes (zero padding -> exact results, sliced
    # off after the call; padded hidden columns provably stay 0).
    Hp = _round_up(H, 128)
    Op = _round_up(O, 128)
    Bp = _round_up(B, tb)
    Tp = _round_up(T, tt)

    w_ih = params["weight_ih"].astype(f32)        # (3H, I), gate order [r,z,n]
    w_hh = params["weight_hh"].astype(f32)        # (3H, H)
    b_ih = params["bias_ih"].astype(f32)
    b_hh = params["bias_hh"].astype(f32)

    # Fused, padded, matmul-friendly (in, 3*Hp) layouts.
    wi = jnp.concatenate(
        [_pad_to(w_ih[g * H:(g + 1) * H].T, (I, Hp)) for g in range(3)],
        axis=1)                                               # (I, 3Hp)
    wh = jnp.concatenate(
        [_pad_to(w_hh[g * H:(g + 1) * H].T, (H, Hp)) for g in range(3)],
        axis=1)
    wh = _pad_to(wh, (Hp, 3 * Hp))                            # (Hp, 3Hp)

    # Bias folding: r/z get b_ih + b_hh; n keeps b_hh_n separate.
    b_i = jnp.concatenate([
        _pad_to(b_ih[0:H] + b_hh[0:H], (Hp,)),
        _pad_to(b_ih[H:2 * H] + b_hh[H:2 * H], (Hp,)),
        _pad_to(b_ih[2 * H:3 * H], (Hp,)),
    ]).reshape(1, 3 * Hp)
    b_hn = _pad_to(b_hh[2 * H:3 * H], (Hp,)).reshape(1, Hp)

    wout = _pad_to(params["w_out"].T.astype(f32), (Hp, Op))   # (Hp, Op)
    bout = _pad_to(params["b_out"].astype(f32), (Op,)).reshape(1, Op)

    x_p = _pad_to(xin.astype(f32), (Bp, Tp, I))
    h0_p = _pad_to(hidden[0].astype(f32), (Bp, Hp))

    if mxu_dtype != f32:
        # bf16 MXU operands (halves weight/x DMA + VMEM, doubles MXU rate on
        # v6e/v7x); biases and all gate math stay f32.
        x_p = x_p.astype(mxu_dtype)
        wi = wi.astype(mxu_dtype)
        wh = wh.astype(mxu_dtype)
        wout = wout.astype(mxu_dtype)

    nb, nt = Bp // tb, Tp // tt
    grid = (nb, nt)

    in_specs = [
        pl.BlockSpec((tb, tt, I), lambda b, t: (b, t, 0)),    # x chunk
        pl.BlockSpec((tb, Hp), lambda b, t: (b, 0)),          # h0 (batch blk)
        pl.BlockSpec((I, 3 * Hp), lambda b, t: (0, 0)),       # fused W_ih^T
        pl.BlockSpec((Hp, 3 * Hp), lambda b, t: (0, 0)),      # fused W_hh^T
        pl.BlockSpec((1, 3 * Hp), lambda b, t: (0, 0)),       # folded biases
        pl.BlockSpec((1, Hp), lambda b, t: (0, 0)),           # b_hh_n
        pl.BlockSpec((Hp, Op), lambda b, t: (0, 0)),          # W_out^T
        pl.BlockSpec((1, Op), lambda b, t: (0, 0)),           # b_out
    ]
    out_specs = (
        pl.BlockSpec((tb, tt, Op), lambda b, t: (b, t, 0)),   # q chunk
        pl.BlockSpec((tb, tt, Hp), lambda b, t: (b, t, 0)),   # z chunk
    )

    itemsize = jnp.dtype(mxu_dtype).itemsize
    cost = pl.CostEstimate(
        flops=int(2 * Bp * Tp * (I * 3 * Hp + Hp * 3 * Hp + Hp * Op)),
        transcendentals=int(3 * Bp * Tp * Hp),
        bytes_accessed=int(x_p.size * itemsize
                           + (wi.size + wh.size + wout.size) * itemsize * nb * nt
                           + Bp * Tp * (Hp + Op) * 4),
    )

    q_p, z_p = pl.pallas_call(
        _drqn_chunk_kernel,
        out_shape=(
            jax.ShapeDtypeStruct((Bp, Tp, Op), f32),
            jax.ShapeDtypeStruct((Bp, Tp, Hp), f32),
        ),
        grid_spec=pltpu.PrefetchScalarGridSpec(
            num_scalar_prefetch=0,
            grid=grid,
            in_specs=in_specs,
            out_specs=out_specs,
            scratch_shapes=[pltpu.VMEM((tb, Hp), f32)],       # carried h
        ),
        compiler_params=pltpu.CompilerParams(
            dimension_semantics=("parallel", "arbitrary"),
            vmem_limit_bytes=32 * 1024 * 1024,
        ),
        cost_estimate=cost,
    )(x_p, h0_p, wi, wh, b_i, b_hn, wout, bout)

    return q_p[:B, :T, :O], z_p[:B, :T, :H]


def _reference_forward(xin, hidden, params):
    """Pure-JAX GRU reference (PyTorch semantics) for validation."""
    H = params["weight_hh"].shape[1]
    wi = params["weight_ih"].T
    wh = params["weight_hh"].T
    bih = params["bias_ih"]
    bhh = params["bias_hh"]

    def step(h, x_t):
        gx = x_t @ wi + bih
        gh = h @ wh + bhh
        r = jax.nn.sigmoid(gx[:, :H] + gh[:, :H])
        zg = jax.nn.sigmoid(gx[:, H:2 * H] + gh[:, H:2 * H])
        n = jnp.tanh(gx[:, 2 * H:] + r * gh[:, 2 * H:])
        h_new = (1.0 - zg) * n + zg * h
        return h_new, h_new

    x_tm = jnp.transpose(xin, (1, 0, 2))
    _, z_tm = jax.lax.scan(step, hidden[0], x_tm)
    z = jnp.transpose(z_tm, (1, 0, 2))
    q = z @ params["w_out"].T + params["b_out"]
    return q, z


def _init_params(key, input_size, hidden_size, output_size):
    """Deterministic synthetic init (PyTorch-default-style uniform)."""
    ks = jax.random.split(key, 6)
    bound = 1.0 / jnp.sqrt(hidden_size)
    u = lambda k, shape: jax.random.uniform(k, shape, jnp.float32, -bound, bound)
    return {
        "weight_ih": u(ks[0], (3 * hidden_size, input_size)),
        "weight_hh": u(ks[1], (3 * hidden_size, hidden_size)),
        "bias_ih": u(ks[2], (3 * hidden_size,)),
        "bias_hh": u(ks[3], (3 * hidden_size,)),
        "w_out": u(ks[4], (output_size, hidden_size)),
        "b_out": u(ks[5], (output_size,)),
    }


# TODO(synk): sample_action (epsilon-greedy / softmax Categorical sampling) and
# checkpoint/save/load helpers are host-side policy code, not part of the
# forward pass, and are not implemented as kernels.

if __name__ == "__main__":
    B, T = 2, 8
    input_size, hidden_size, output_size = 16, 32, 4

    key = jax.random.PRNGKey(0)
    k_param, k_x = jax.random.split(key)
    params = _init_params(k_param, input_size, hidden_size, output_size)

    xin = jax.random.normal(k_x, (B, T, input_size), jnp.float32)
    hidden = jnp.zeros((1, B, hidden_size), jnp.float32)  # init_hidden_state(training=True)

    # f32 MXU path (exact).
    q, z = drqn_forward(xin, hidden, params)
    jax.block_until_ready((q, z))

    q_ref, z_ref = _reference_forward(xin, hidden, params)
    assert q.shape == (B, T, output_size) and z.shape == (B, T, hidden_size)
    assert jnp.allclose(q, q_ref, atol=1e-5), "q mismatch vs reference (f32)"
    assert jnp.allclose(z, z_ref, atol=1e-5), "z mismatch vs reference (f32)"

    # bf16 MXU-operand path (recommended on v6e/v7x); gate math stays f32.
    q16, z16 = drqn_forward(xin, hidden, params, mxu_dtype=jnp.bfloat16)
    jax.block_until_ready((q16, z16))
    assert jnp.allclose(q16, q_ref, atol=5e-2), "q mismatch vs reference (bf16)"
    assert jnp.allclose(z16, z_ref, atol=5e-2), "z mismatch vs reference (bf16)"

    print("KERNEL_OK")
</pallas_src>

<mosaic_0001>
module attributes {stable_mosaic.version = 11 : i64} {
  func.func @_drqn_chunk_kernel(%arg0: i32, %arg1: i32, %arg2: memref<8x8x16xf32, #tpu.memory_space<vmem>>, %arg3: memref<8x128xf32, #tpu.memory_space<vmem>>, %arg4: memref<16x384xf32, #tpu.memory_space<vmem>>, %arg5: memref<128x384xf32, #tpu.memory_space<vmem>>, %arg6: memref<1x384xf32, #tpu.memory_space<vmem>>, %arg7: memref<1x128xf32, #tpu.memory_space<vmem>>, %arg8: memref<128x128xf32, #tpu.memory_space<vmem>>, %arg9: memref<1x128xf32, #tpu.memory_space<vmem>>, %arg10: memref<8x8x128xf32, #tpu.memory_space<vmem>>, %arg11: memref<8x8x128xf32, #tpu.memory_space<vmem>>, %arg12: memref<8x128xf32, #tpu.memory_space<vmem>>) attributes {dimension_semantics = [#tpu.dimension_semantics<parallel>, #tpu.dimension_semantics<arbitrary>], iteration_bounds = array<i64: 1, 1>, scalar_prefetch = 0 : i64, scratch_operands = 1 : i64, tpu.core_type = #tpu.core_type<tc>, window_params = [{transform_indices = @transform_0, window_bounds = array<i64: 8, 8, 16>}, {transform_indices = @transform_1, window_bounds = array<i64: 8, 128>}, {pipeline_mode = #tpu.pipeline_mode<synchronous>, transform_indices = @transform_2, window_bounds = array<i64: 16, 384>}, {pipeline_mode = #tpu.pipeline_mode<synchronous>, transform_indices = @transform_3, window_bounds = array<i64: 128, 384>}, {pipeline_mode = #tpu.pipeline_mode<synchronous>, transform_indices = @transform_4, window_bounds = array<i64: 1, 384>}, {pipeline_mode = #tpu.pipeline_mode<synchronous>, transform_indices = @transform_5, window_bounds = array<i64: 1, 128>}, {pipeline_mode = #tpu.pipeline_mode<synchronous>, transform_indices = @transform_6, window_bounds = array<i64: 128, 128>}, {pipeline_mode = #tpu.pipeline_mode<synchronous>, transform_indices = @transform_7, window_bounds = array<i64: 1, 128>}, {transform_indices = @transform_8, window_bounds = array<i64: 8, 8, 128>}, {transform_indices = @transform_9, window_bounds = array<i64: 8, 8, 128>}]} {
    %c0_i32 = arith.constant 0 : i32
    %0 = arith.cmpi eq, %arg1, %c0_i32 : i32
    %1 = arith.extui %0 : i1 to i32
    %c0_i32_0 = arith.constant 0 : i32
    %2 = arith.cmpi ne, %1, %c0_i32_0 : i32
    scf.if %2 {
      %c0_58 = arith.constant 0 : index
      %c0_59 = arith.constant 0 : index
      %281 = vector.load %arg3[%c0_58, %c0_59] : memref<8x128xf32, #tpu.memory_space<vmem>>, vector<8x128xf32>
      %c0_60 = arith.constant 0 : index
      %c0_61 = arith.constant 0 : index
      %282 = vector.load %arg12[%c0_60, %c0_61] : memref<8x128xf32, #tpu.memory_space<vmem>>, vector<8x128xf32>
      tpu.vector_store %arg12[%c0_60, %c0_61], %281 {strides = array<i32>} : memref<8x128xf32, #tpu.memory_space<vmem>>, vector<8x128xf32>,
    } else {
    }
    %c0 = arith.constant 0 : index
    %c0_1 = arith.constant 0 : index
    %c0_2 = arith.constant 0 : index
    %3 = vector.load %arg2[%c0, %c0_1, %c0_2] : memref<8x8x16xf32, #tpu.memory_space<vmem>>, vector<8x8x16xf32>
    %c0_3 = arith.constant 0 : index
    %c0_4 = arith.constant 0 : index
    %4 = vector.load %arg4[%c0_3, %c0_4] : memref<16x384xf32, #tpu.memory_space<vmem>>, vector<16x384xf32>
    %cst = arith.constant dense<0.000000e+00> : vector<8x8x384xf32>
    %5 = tpu.matmul %3, %4, %cst {dimension_numbers = #tpu.dot_dimension_numbers<[2], [0], [0, 1], [1], [0, 0, 0, 1, 1, 1], [], []>} : vector<8x8x16xf32>, vector<16x384xf32>, vector<8x8x384xf32> -> vector<8x8x384xf32>
    %c0_5 = arith.constant 0 : index
    %c0_6 = arith.constant 0 : index
    %6 = vector.load %arg6[%c0_5, %c0_6] : memref<1x384xf32, #tpu.memory_space<vmem>>, vector<1x384xf32>
    %7 = vector.shape_cast %6 : vector<1x384xf32> to vector<1x1x384xf32>
    %8 = vector.broadcast %7 : vector<1x1x384xf32> to vector<8x8x384xf32>
    %9 = arith.addf %5, %8 : vector<8x8x384xf32>
    %c0_7 = arith.constant 0 : index
    %c0_8 = arith.constant 0 : index
    %10 = vector.load %arg5[%c0_7, %c0_8] : memref<128x384xf32, #tpu.memory_space<vmem>>, vector<128x384xf32>
    %c0_9 = arith.constant 0 : index
    %c0_10 = arith.constant 0 : index
    %11 = vector.load %arg7[%c0_9, %c0_10] : memref<1x128xf32, #tpu.memory_space<vmem>>, vector<1x128xf32>
    %12 = vector.shape_cast %11 : vector<1x128xf32> to vector<1x128xf32>
    %13 = vector.broadcast %12 : vector<1x128xf32> to vector<8x128xf32>
    %c0_11 = arith.constant 0 : index
    %c0_12 = arith.constant 0 : index
    %14 = vector.load %arg12[%c0_11, %c0_12] : memref<8x128xf32, #tpu.memory_space<vmem>>, vector<8x128xf32>
    %cst_13 = arith.constant dense<0.000000e+00> : vector<8x384xf32>
    %15 = tpu.matmul %14, %10, %cst_13 {dimension_numbers = #tpu.dot_dimension_numbers<[1], [0], [0], [1], [0, 0, 1, 1], [], []>} : vector<8x128xf32>, vector<128x384xf32>, vector<8x384xf32> -> vector<8x384xf32>
    %16 = vector.extract_strided_slice %9 {offsets = [0, 0, 0], sizes = [8, 1, 128], strides = [1, 1, 1]} : vector<8x8x384xf32> to vector<8x1x128xf32>
    %17 = vector.shape_cast %16 : vector<8x1x128xf32> to vector<8x128xf32>
    %18 = vector.extract_strided_slice %15 {offsets = [0, 0], sizes = [8, 128], strides = [1, 1]} : vector<8x384xf32> to vector<8x128xf32>
    %19 = arith.addf %17, %18 : vector<8x128xf32>
    %20 = arith.negf %19 : vector<8x128xf32>
    %21 = math.exp %20 : vector<8x128xf32>
    %cst_14 = arith.constant 1.000000e+00 : f32
    %22 = vector.broadcast %cst_14 : f32 to vector<8x128xf32>
    %23 = arith.addf %22, %21 : vector<8x128xf32>
    %24 = arith.divf %22, %23 : vector<8x128xf32>
    %25 = vector.extract_strided_slice %9 {offsets = [0, 0, 128], sizes = [8, 1, 128], strides = [1, 1, 1]} : vector<8x8x384xf32> to vector<8x1x128xf32>
    %26 = vector.shape_cast %25 : vector<8x1x128xf32> to vector<8x128xf32>
    %27 = vector.extract_strided_slice %15 {offsets = [0, 128], sizes = [8, 128], strides = [1, 1]} : vector<8x384xf32> to vector<8x128xf32>
    %28 = arith.addf %26, %27 : vector<8x128xf32>
    %29 = arith.negf %28 : vector<8x128xf32>
    %30 = math.exp %29 : vector<8x128xf32>
    %cst_15 = arith.constant 1.000000e+00 : f32
    %31 = vector.broadcast %cst_15 : f32 to vector<8x128xf32>
    %32 = arith.addf %31, %30 : vector<8x128xf32>
    %33 = arith.divf %31, %32 : vector<8x128xf32>
    %34 = vector.extract_strided_slice %9 {offsets = [0, 0, 256], sizes = [8, 1, 128], strides = [1, 1, 1]} : vector<8x8x384xf32> to vector<8x1x128xf32>
    %35 = vector.shape_cast %34 : vector<8x1x128xf32> to vector<8x128xf32>
    %36 = vector.extract_strided_slice %15 {offsets = [0, 256], sizes = [8, 128], strides = [1, 1]} : vector<8x384xf32> to vector<8x128xf32>
    %37 = arith.addf %36, %13 : vector<8x128xf32>
    %38 = arith.mulf %24, %37 : vector<8x128xf32>
    %39 = arith.addf %35, %38 : vector<8x128xf32>
    %40 = math.tanh %39 : vector<8x128xf32>
    %cst_16 = arith.constant 1.000000e+00 : f32
    %41 = vector.broadcast %cst_16 : f32 to vector<8x128xf32>
    %42 = arith.subf %41, %33 : vector<8x128xf32>
    %43 = arith.mulf %42, %40 : vector<8x128xf32>
    %44 = arith.mulf %33, %14 : vector<8x128xf32>
    %45 = arith.addf %43, %44 : vector<8x128xf32>
    %cst_17 = arith.constant dense<0.000000e+00> : vector<8x384xf32>
    %46 = tpu.matmul %45, %10, %cst_17 {dimension_numbers = #tpu.dot_dimension_numbers<[1], [0], [0], [1], [0, 0, 1, 1], [], []>} : vector<8x128xf32>, vector<128x384xf32>, vector<8x384xf32> -> vector<8x384xf32>
    %47 = vector.extract_strided_slice %9 {offsets = [0, 1, 0], sizes = [8, 1, 128], strides = [1, 1, 1]} : vector<8x8x384xf32> to vector<8x1x128xf32>
    %48 = vector.shape_cast %47 : vector<8x1x128xf32> to vector<8x128xf32>
    %49 = vector.extract_strided_slice %46 {offsets = [0, 0], sizes = [8, 128], strides = [1, 1]} : vector<8x384xf32> to vector<8x128xf32>
    %50 = arith.addf %48, %49 : vector<8x128xf32>
    %51 = arith.negf %50 : vector<8x128xf32>
    %52 = math.exp %51 : vector<8x128xf32>
    %cst_18 = arith.constant 1.000000e+00 : f32
    %53 = vector.broadcast %cst_18 : f32 to vector<8x128xf32>
    %54 = arith.addf %53, %52 : vector<8x128xf32>
    %55 = arith.divf %53, %54 : vector<8x128xf32>
    %56 = vector.extract_strided_slice %9 {offsets = [0, 1, 128], sizes = [8, 1, 128], strides = [1, 1, 1]} : vector<8x8x384xf32> to vector<8x1x128xf32>
    %57 = vector.shape_cast %56 : vector<8x1x128xf32> to vector<8x128xf32>
    %58 = vector.extract_strided_slice %46 {offsets = [0, 128], sizes = [8, 128], strides = [1, 1]} : vector<8x384xf32> to vector<8x128xf32>
    %59 = arith.addf %57, %58 : vector<8x128xf32>
    %60 = arith.negf %59 : vector<8x128xf32>
    %61 = math.exp %60 : vector<8x128xf32>
    %cst_19 = arith.constant 1.000000e+00 : f32
    %62 = vector.broadcast %cst_19 : f32 to vector<8x128xf32>
    %63 = arith.addf %62, %61 : vector<8x128xf32>
    %64 = arith.divf %62, %63 : vector<8x128xf32>
    %65 = vector.extract_strided_slice %9 {offsets = [0, 1, 256], sizes = [8, 1, 128], strides = [1, 1, 1]} : vector<8x8x384xf32> to vector<8x1x128xf32>
    %66 = vector.shape_cast %65 : vector<8x1x128xf32> to vector<8x128xf32>
    %67 = vector.extract_strided_slice %46 {offsets = [0, 256], sizes = [8, 128], strides = [1, 1]} : vector<8x384xf32> to vector<8x128xf32>
    %68 = arith.addf %67, %13 : vector<8x128xf32>
    %69 = arith.mulf %55, %68 : vector<8x128xf32>
    %70 = arith.addf %66, %69 : vector<8x128xf32>
    %71 = math.tanh %70 : vector<8x128xf32>
    %cst_20 = arith.constant 1.000000e+00 : f32
    %72 = vector.broadcast %cst_20 : f32 to vector<8x128xf32>
    %73 = arith.subf %72, %64 : vector<8x128xf32>
    %74 = arith.mulf %73, %71 : vector<8x128xf32>
    %75 = arith.mulf %64, %45 : vector<8x128xf32>
    %76 = arith.addf %74, %75 : vector<8x128xf32>
    %cst_21 = arith.constant dense<0.000000e+00> : vector<8x384xf32>
    %77 = tpu.matmul %76, %10, %cst_21 {dimension_numbers = #tpu.dot_dimension_numbers<[1], [0], [0], [1], [0, 0, 1, 1], [], []>} : vector<8x128xf32>, vector<128x384xf32>, vector<8x384xf32> -> vector<8x384xf32>
    %78 = vector.extract_strided_slice %9 {offsets = [0, 2, 0], sizes = [8, 1, 128], strides = [1, 1, 1]} : vector<8x8x384xf32> to vector<8x1x128xf32>
    %79 = vector.shape_cast %78 : vector<8x1x128xf32> to vector<8x128xf32>
    %80 = vector.extract_strided_slice %77 {offsets = [0, 0], sizes = [8, 128], strides = [1, 1]} : vector<8x384xf32> to vector<8x128xf32>
    %81 = arith.addf %79, %80 : vector<8x128xf32>
    %82 = arith.negf %81 : vector<8x128xf32>
    %83 = math.exp %82 : vector<8x128xf32>
    %cst_22 = arith.constant 1.000000e+00 : f32
    %84 = vector.broadcast %cst_22 : f32 to vector<8x128xf32>
    %85 = arith.addf %84, %83 : vector<8x128xf32>
    %86 = arith.divf %84, %85 : vector<8x128xf32>
    %87 = vector.extract_strided_slice %9 {offsets = [0, 2, 128], sizes = [8, 1, 128], strides = [1, 1, 1]} : vector<8x8x384xf32> to vector<8x1x128xf32>
    %88 = vector.shape_cast %87 : vector<8x1x128xf32> to vector<8x128xf32>
    %89 = vector.extract_strided_slice %77 {offsets = [0, 128], sizes = [8, 128], strides = [1, 1]} : vector<8x384xf32> to vector<8x128xf32>
    %90 = arith.addf %88, %89 : vector<8x128xf32>
    %91 = arith.negf %90 : vector<8x128xf32>
    %92 = math.exp %91 : vector<8x128xf32>
    %cst_23 = arith.constant 1.000000e+00 : f32
    %93 = vector.broadcast %cst_23 : f32 to vector<8x128xf32>
    %94 = arith.addf %93, %92 : vector<8x128xf32>
    %95 = arith.divf %93, %94 : vector<8x128xf32>
    %96 = vector.extract_strided_slice %9 {offsets = [0, 2, 256], sizes = [8, 1, 128], strides = [1, 1, 1]} : vector<8x8x384xf32> to vector<8x1x128xf32>
    %97 = vector.shape_cast %96 : vector<8x1x128xf32> to vector<8x128xf32>
    %98 = vector.extract_strided_slice %77 {offsets = [0, 256], sizes = [8, 128], strides = [1, 1]} : vector<8x384xf32> to vector<8x128xf32>
    %99 = arith.addf %98, %13 : vector<8x128xf32>
    %100 = arith.mulf %86, %99 : vector<8x128xf32>
    %101 = arith.addf %97, %100 : vector<8x128xf32>
    %102 = math.tanh %101 : vector<8x128xf32>
    %cst_24 = arith.constant 1.000000e+00 : f32
    %103 = vector.broadcast %cst_24 : f32 to vector<8x128xf32>
    %104 = arith.subf %103, %95 : vector<8x128xf32>
    %105 = arith.mulf %104, %102 : vector<8x128xf32>
    %106 = arith.mulf %95, %76 : vector<8x128xf32>
    %107 = arith.addf %105, %106 : vector<8x128xf32>
    %cst_25 = arith.constant dense<0.000000e+00> : vector<8x384xf32>
    %108 = tpu.matmul %107, %10, %cst_25 {dimension_numbers = #tpu.dot_dimension_numbers<[1], [0], [0], [1], [0, 0, 1, 1], [], []>} : vector<8x128xf32>, vector<128x384xf32>, vector<8x384xf32> -> vector<8x384xf32>
    %109 = vector.extract_strided_slice %9 {offsets = [0, 3, 0], sizes = [8, 1, 128], strides = [1, 1, 1]} : vector<8x8x384xf32> to vector<8x1x128xf32>
    %110 = vector.shape_cast %109 : vector<8x1x128xf32> to vector<8x128xf32>
    %111 = vector.extract_strided_slice %108 {offsets = [0, 0], sizes = [8, 128], strides = [1, 1]} : vector<8x384xf32> to vector<8x128xf32>
    %112 = arith.addf %110, %111 : vector<8x128xf32>
    %113 = arith.negf %112 : vector<8x128xf32>
    %114 = math.exp %113 : vector<8x128xf32>
    %cst_26 = arith.constant 1.000000e+00 : f32
    %115 = vector.broadcast %cst_26 : f32 to vector<8x128xf32>
    %116 = arith.addf %115, %114 : vector<8x128xf32>
    %117 = arith.divf %115, %116 : vector<8x128xf32>
    %118 = vector.extract_strided_slice %9 {offsets = [0, 3, 128], sizes = [8, 1, 128], strides = [1, 1, 1]} : vector<8x8x384xf32> to vector<8x1x128xf32>
    %119 = vector.shape_cast %118 : vector<8x1x128xf32> to vector<8x128xf32>
    %120 = vector.extract_strided_slice %108 {offsets = [0, 128], sizes = [8, 128], strides = [1, 1]} : vector<8x384xf32> to vector<8x128xf32>
    %121 = arith.addf %119, %120 : vector<8x128xf32>
    %122 = arith.negf %121 : vector<8x128xf32>
    %123 = math.exp %122 : vector<8x128xf32>
    %cst_27 = arith.constant 1.000000e+00 : f32
    %124 = vector.broadcast %cst_27 : f32 to vector<8x128xf32>
    %125 = arith.addf %124, %123 : vector<8x128xf32>
    %126 = arith.divf %124, %125 : vector<8x128xf32>
    %127 = vector.extract_strided_slice %9 {offsets = [0, 3, 256], sizes = [8, 1, 128], strides = [1, 1, 1]} : vector<8x8x384xf32> to vector<8x1x128xf32>
    %128 = vector.shape_cast %127 : vector<8x1x128xf32> to vector<8x128xf32>
    %129 = vector.extract_strided_slice %108 {offsets = [0, 256], sizes = [8, 128], strides = [1, 1]} : vector<8x384xf32> to vector<8x128xf32>
    %130 = arith.addf %129, %13 : vector<8x128xf32>
    %131 = arith.mulf %117, %130 : vector<8x128xf32>
    %132 = arith.addf %128, %131 : vector<8x128xf32>
    %133 = math.tanh %132 : vector<8x128xf32>
    %cst_28 = arith.constant 1.000000e+00 : f32
    %134 = vector.broadcast %cst_28 : f32 to vector<8x128xf32>
    %135 = arith.subf %134, %126 : vector<8x128xf32>
    %136 = arith.mulf %135, %133 : vector<8x128xf32>
    %137 = arith.mulf %126, %107 : vector<8x128xf32>
    %138 = arith.addf %136, %137 : vector<8x128xf32>
    %cst_29 = arith.constant dense<0.000000e+00> : vector<8x384xf32>
    %139 = tpu.matmul %138, %10, %cst_29 {dimension_numbers = #tpu.dot_dimension_numbers<[1], [0], [0], [1], [0, 0, 1, 1], [], []>} : vector<8x128xf32>, vector<128x384xf32>, vector<8x384xf32> -> vector<8x384xf32>
    %140 = vector.extract_strided_slice %9 {offsets = [0, 4, 0], sizes = [8, 1, 128], strides = [1, 1, 1]} : vector<8x8x384xf32> to vector<8x1x128xf32>
    %141 = vector.shape_cast %140 : vector<8x1x128xf32> to vector<8x128xf32>
    %142 = vector.extract_strided_slice %139 {offsets = [0, 0], sizes = [8, 128], strides = [1, 1]} : vector<8x384xf32> to vector<8x128xf32>
    %143 = arith.addf %141, %142 : vector<8x128xf32>
    %144 = arith.negf %143 : vector<8x128xf32>
    %145 = math.exp %144 : vector<8x128xf32>
    %cst_30 = arith.constant 1.000000e+00 : f32
    %146 = vector.broadcast %cst_30 : f32 to vector<8x128xf32>
    %147 = arith.addf %146, %145 : vector<8x128xf32>
    %148 = arith.divf %146, %147 : vector<8x128xf32>
    %149 = vector.extract_strided_slice %9 {offsets = [0, 4, 128], sizes = [8, 1, 128], strides = [1, 1, 1]} : vector<8x8x384xf32> to vector<8x1x128xf32>
    %150 = vector.shape_cast %149 : vector<8x1x128xf32> to vector<8x128xf32>
    %151 = vector.extract_strided_slice %139 {offsets = [0, 128], sizes = [8, 128], strides = [1, 1]} : vector<8x384xf32> to vector<8x128xf32>
    %152 = arith.addf %150, %151 : vector<8x128xf32>
    %153 = arith.negf %152 : vector<8x128xf32>
    %154 = math.exp %153 : vector<8x128xf32>
    %cst_31 = arith.constant 1.000000e+00 : f32
    %155 = vector.broadcast %cst_31 : f32 to vector<8x128xf32>
    %156 = arith.addf %155, %154 : vector<8x128xf32>
    %157 = arith.divf %155, %156 : vector<8x128xf32>
    %158 = vector.extract_strided_slice %9 {offsets = [0, 4, 256], sizes = [8, 1, 128], strides = [1, 1, 1]} : vector<8x8x384xf32> to vector<8x1x128xf32>
    %159 = vector.shape_cast %158 : vector<8x1x128xf32> to vector<8x128xf32>
    %160 = vector.extract_strided_slice %139 {offsets = [0, 256], sizes = [8, 128], strides = [1, 1]} : vector<8x384xf32> to vector<8x128xf32>
    %161 = arith.addf %160, %13 : vector<8x128xf32>
    %162 = arith.mulf %148, %161 : vector<8x128xf32>
    %163 = arith.addf %159, %162 : vector<8x128xf32>
    %164 = math.tanh %163 : vector<8x128xf32>
    %cst_32 = arith.constant 1.000000e+00 : f32
    %165 = vector.broadcast %cst_32 : f32 to vector<8x128xf32>
    %166 = arith.subf %165, %157 : vector<8x128xf32>
    %167 = arith.mulf %166, %164 : vector<8x128xf32>
    %168 = arith.mulf %157, %138 : vector<8x128xf32>
    %169 = arith.addf %167, %168 : vector<8x128xf32>
    %cst_33 = arith.constant dense<0.000000e+00> : vector<8x384xf32>
    %170 = tpu.matmul %169, %10, %cst_33 {dimension_numbers = #tpu.dot_dimension_numbers<[1], [0], [0], [1], [0, 0, 1, 1], [], []>} : vector<8x128xf32>, vector<128x384xf32>, vector<8x384xf32> -> vector<8x384xf32>
    %171 = vector.extract_strided_slice %9 {offsets = [0, 5, 0], sizes = [8, 1, 128], strides = [1, 1, 1]} : vector<8x8x384xf32> to vector<8x1x128xf32>
    %172 = vector.shape_cast %171 : vector<8x1x128xf32> to vector<8x128xf32>
    %173 = vector.extract_strided_slice %170 {offsets = [0, 0], sizes = [8, 128], strides = [1, 1]} : vector<8x384xf32> to vector<8x128xf32>
    %174 = arith.addf %172, %173 : vector<8x128xf32>
    %175 = arith.negf %174 : vector<8x128xf32>
    %176 = math.exp %175 : vector<8x128xf32>
    %cst_34 = arith.constant 1.000000e+00 : f32
    %177 = vector.broadcast %cst_34 : f32 to vector<8x128xf32>
    %178 = arith.addf %177, %176 : vector<8x128xf32>
    %179 = arith.divf %177, %178 : vector<8x128xf32>
    %180 = vector.extract_strided_slice %9 {offsets = [0, 5, 128], sizes = [8, 1, 128], strides = [1, 1, 1]} : vector<8x8x384xf32> to vector<8x1x128xf32>
    %181 = vector.shape_cast %180 : vector<8x1x128xf32> to vector<8x128xf32>
    %182 = vector.extract_strided_slice %170 {offsets = [0, 128], sizes = [8, 128], strides = [1, 1]} : vector<8x384xf32> to vector<8x128xf32>
    %183 = arith.addf %181, %182 : vector<8x128xf32>
    %184 = arith.negf %183 : vector<8x128xf32>
    %185 = math.exp %184 : vector<8x128xf32>
    %cst_35 = arith.constant 1.000000e+00 : f32
    %186 = vector.broadcast %cst_35 : f32 to vector<8x128xf32>
    %187 = arith.addf %186, %185 : vector<8x128xf32>
    %188 = arith.divf %186, %187 : vector<8x128xf32>
    %189 = vector.extract_strided_slice %9 {offsets = [0, 5, 256], sizes = [8, 1, 128], strides = [1, 1, 1]} : vector<8x8x384xf32> to vector<8x1x128xf32>
    %190 = vector.shape_cast %189 : vector<8x1x128xf32> to vector<8x128xf32>
    %191 = vector.extract_strided_slice %170 {offsets = [0, 256], sizes = [8, 128], strides = [1, 1]} : vector<8x384xf32> to vector<8x128xf32>
    %192 = arith.addf %191, %13 : vector<8x128xf32>
    %193 = arith.mulf %179, %192 : vector<8x128xf32>
    %194 = arith.addf %190, %193 : vector<8x128xf32>
    %195 = math.tanh %194 : vector<8x128xf32>
    %cst_36 = arith.constant 1.000000e+00 : f32
    %196 = vector.broadcast %cst_36 : f32 to vector<8x128xf32>
    %197 = arith.subf %196, %188 : vector<8x128xf32>
    %198 = arith.mulf %197, %195 : vector<8x128xf32>
    %199 = arith.mulf %188, %169 : vector<8x128xf32>
    %200 = arith.addf %198, %199 : vector<8x128xf32>
    %cst_37 = arith.constant dense<0.000000e+00> : vector<8x384xf32>
    %201 = tpu.matmul %200, %10, %cst_37 {dimension_numbers = #tpu.dot_dimension_numbers<[1], [0], [0], [1], [0, 0, 1, 1], [], []>} : vector<8x128xf32>, vector<128x384xf32>, vector<8x384xf32> -> vector<8x384xf32>
    %202 = vector.extract_strided_slice %9 {offsets = [0, 6, 0], sizes = [8, 1, 128], strides = [1, 1, 1]} : vector<8x8x384xf32> to vector<8x1x128xf32>
    %203 = vector.shape_cast %202 : vector<8x1x128xf32> to vector<8x128xf32>
    %204 = vector.extract_strided_slice %201 {offsets = [0, 0], sizes = [8, 128], strides = [1, 1]} : vector<8x384xf32> to vector<8x128xf32>
    %205 = arith.addf %203, %204 : vector<8x128xf32>
    %206 = arith.negf %205 : vector<8x128xf32>
    %207 = math.exp %206 : vector<8x128xf32>
    %cst_38 = arith.constant 1.000000e+00 : f32
    %208 = vector.broadcast %cst_38 : f32 to vector<8x128xf32>
    %209 = arith.addf %208, %207 : vector<8x128xf32>
    %210 = arith.divf %208, %209 : vector<8x128xf32>
    %211 = vector.extract_strided_slice %9 {offsets = [0, 6, 128], sizes = [8, 1, 128], strides = [1, 1, 1]} : vector<8x8x384xf32> to vector<8x1x128xf32>
    %212 = vector.shape_cast %211 : vector<8x1x128xf32> to vector<8x128xf32>
    %213 = vector.extract_strided_slice %201 {offsets = [0, 128], sizes = [8, 128], strides = [1, 1]} : vector<8x384xf32> to vector<8x128xf32>
    %214 = arith.addf %212, %213 : vector<8x128xf32>
    %215 = arith.negf %214 : vector<8x128xf32>
    %216 = math.exp %215 : vector<8x128xf32>
    %cst_39 = arith.constant 1.000000e+00 : f32
    %217 = vector.broadcast %cst_39 : f32 to vector<8x128xf32>
    %218 = arith.addf %217, %216 : vector<8x128xf32>
    %219 = arith.divf %217, %218 : vector<8x128xf32>
    %220 = vector.extract_strided_slice %9 {offsets = [0, 6, 256], sizes = [8, 1, 128], strides = [1, 1, 1]} : vector<8x8x384xf32> to vector<8x1x128xf32>
    %221 = vector.shape_cast %220 : vector<8x1x128xf32> to vector<8x128xf32>
    %222 = vector.extract_strided_slice %201 {offsets = [0, 256], sizes = [8, 128], strides = [1, 1]} : vector<8x384xf32> to vector<8x128xf32>
    %223 = arith.addf %222, %13 : vector<8x128xf32>
    %224 = arith.mulf %210, %223 : vector<8x128xf32>
    %225 = arith.addf %221, %224 : vector<8x128xf32>
    %226 = math.tanh %225 : vector<8x128xf32>
    %cst_40 = arith.constant 1.000000e+00 : f32
    %227 = vector.broadcast %cst_40 : f32 to vector<8x128xf32>
    %228 = arith.subf %227, %219 : vector<8x128xf32>
    %229 = arith.mulf %228, %226 : vector<8x128xf32>
    %230 = arith.mulf %219, %200 : vector<8x128xf32>
    %231 = arith.addf %229, %230 : vector<8x128xf32>
    %cst_41 = arith.constant dense<0.000000e+00> : vector<8x384xf32>
    %232 = tpu.matmul %231, %10, %cst_41 {dimension_numbers = #tpu.dot_dimension_numbers<[1], [0], [0], [1], [0, 0, 1, 1], [], []>} : vector<8x128xf32>, vector<128x384xf32>, vector<8x384xf32> -> vector<8x384xf32>
    %233 = vector.extract_strided_slice %9 {offsets = [0, 7, 0], sizes = [8, 1, 128], strides = [1, 1, 1]} : vector<8x8x384xf32> to vector<8x1x128xf32>
    %234 = vector.shape_cast %233 : vector<8x1x128xf32> to vector<8x128xf32>
    %235 = vector.extract_strided_slice %232 {offsets = [0, 0], sizes = [8, 128], strides = [1, 1]} : vector<8x384xf32> to vector<8x128xf32>
    %236 = arith.addf %234, %235 : vector<8x128xf32>
    %237 = arith.negf %236 : vector<8x128xf32>
    %238 = math.exp %237 : vector<8x128xf32>
    %cst_42 = arith.constant 1.000000e+00 : f32
    %239 = vector.broadcast %cst_42 : f32 to vector<8x128xf32>
    %240 = arith.addf %239, %238 : vector<8x128xf32>
    %241 = arith.divf %239, %240 : vector<8x128xf32>
    %242 = vector.extract_strided_slice %9 {offsets = [0, 7, 128], sizes = [8, 1, 128], strides = [1, 1, 1]} : vector<8x8x384xf32> to vector<8x1x128xf32>
    %243 = vector.shape_cast %242 : vector<8x1x128xf32> to vector<8x128xf32>
    %244 = vector.extract_strided_slice %232 {offsets = [0, 128], sizes = [8, 128], strides = [1, 1]} : vector<8x384xf32> to vector<8x128xf32>
    %245 = arith.addf %243, %244 : vector<8x128xf32>
    %246 = arith.negf %245 : vector<8x128xf32>
    %247 = math.exp %246 : vector<8x128xf32>
    %cst_43 = arith.constant 1.000000e+00 : f32
    %248 = vector.broadcast %cst_43 : f32 to vector<8x128xf32>
    %249 = arith.addf %248, %247 : vector<8x128xf32>
    %250 = arith.divf %248, %249 : vector<8x128xf32>
    %251 = vector.extract_strided_slice %9 {offsets = [0, 7, 256], sizes = [8, 1, 128], strides = [1, 1, 1]} : vector<8x8x384xf32> to vector<8x1x128xf32>
    %252 = vector.shape_cast %251 : vector<8x1x128xf32> to vector<8x128xf32>
    %253 = vector.extract_strided_slice %232 {offsets = [0, 256], sizes = [8, 128], strides = [1, 1]} : vector<8x384xf32> to vector<8x128xf32>
    %254 = arith.addf %253, %13 : vector<8x128xf32>
    %255 = arith.mulf %241, %254 : vector<8x128xf32>
    %256 = arith.addf %252, %255 : vector<8x128xf32>
    %257 = math.tanh %256 : vector<8x128xf32>
    %cst_44 = arith.constant 1.000000e+00 : f32
    %258 = vector.broadcast %cst_44 : f32 to vector<8x128xf32>
    %259 = arith.subf %258, %250 : vector<8x128xf32>
    %260 = arith.mulf %259, %257 : vector<8x128xf32>
    %261 = arith.mulf %250, %231 : vector<8x128xf32>
    %262 = arith.addf %260, %261 : vector<8x128xf32>
    %c0_45 = arith.constant 0 : index
    %c0_46 = arith.constant 0 : index
    %263 = vector.load %arg12[%c0_45, %c0_46] : memref<8x128xf32, #tpu.memory_space<vmem>>, vector<8x128xf32>
    tpu.vector_store %arg12[%c0_45, %c0_46], %262 {strides = array<i32>} : memref<8x128xf32, #tpu.memory_space<vmem>>, vector<8x128xf32>,
    %264 = vector.shape_cast %45 : vector<8x128xf32> to vector<8x1x128xf32>
    %265 = vector.shape_cast %76 : vector<8x128xf32> to vector<8x1x128xf32>
    %266 = vector.shape_cast %107 : vector<8x128xf32> to vector<8x1x128xf32>
    %267 = vector.shape_cast %138 : vector<8x128xf32> to vector<8x1x128xf32>
    %268 = vector.shape_cast %169 : vector<8x128xf32> to vector<8x1x128xf32>
    %269 = vector.shape_cast %200 : vector<8x128xf32> to vector<8x1x128xf32>
    %270 = vector.shape_cast %231 : vector<8x128xf32> to vector<8x1x128xf32>
    %271 = vector.shape_cast %262 : vector<8x128xf32> to vector<8x1x128xf32>
    %272 = tpu.concatenate %264, %265, %266, %267, %268, %269, %270, %271 in 1 : vector<8x1x128xf32>, vector<8x1x128xf32>, vector<8x1x128xf32>, vector<8x1x128xf32>, vector<8x1x128xf32>, vector<8x1x128xf32>, vector<8x1x128xf32>, vector<8x1x128xf32> -> vector<8x8x128xf32>
    %c0_47 = arith.constant 0 : index
    %c0_48 = arith.constant 0 : index
    %c0_49 = arith.constant 0 : index
    %273 = vector.load %arg11[%c0_47, %c0_48, %c0_49] : memref<8x8x128xf32, #tpu.memory_space<vmem>>, vector<8x8x128xf32>
    tpu.vector_store %arg11[%c0_47, %c0_48, %c0_49], %272 {strides = array<i32>} : memref<8x8x128xf32, #tpu.memory_space<vmem>>, vector<8x8x128xf32>,
    %c0_50 = arith.constant 0 : index
    %c0_51 = arith.constant 0 : index
    %274 = vector.load %arg8[%c0_50, %c0_51] : memref<128x128xf32, #tpu.memory_space<vmem>>, vector<128x128xf32>
    %cst_52 = arith.constant dense<0.000000e+00> : vector<8x8x128xf32>
    %275 = tpu.matmul %272, %274, %cst_52 {dimension_numbers = #tpu.dot_dimension_numbers<[2], [0], [0, 1], [1], [0, 0, 0, 1, 1, 1], [], []>} : vector<8x8x128xf32>, vector<128x128xf32>, vector<8x8x128xf32> -> vector<8x8x128xf32>
    %c0_53 = arith.constant 0 : index
    %c0_54 = arith.constant 0 : index
    %276 = vector.load %arg9[%c0_53, %c0_54] : memref<1x128xf32, #tpu.memory_space<vmem>>, vector<1x128xf32>
    %277 = vector.shape_cast %276 : vector<1x128xf32> to vector<1x1x128xf32>
    %278 = vector.broadcast %277 : vector<1x1x128xf32> to vector<8x8x128xf32>
    %279 = arith.addf %275, %278 : vector<8x8x128xf32>
    %c0_55 = arith.constant 0 : index
    %c0_56 = arith.constant 0 : index
    %c0_57 = arith.constant 0 : index
    %280 = vector.load %arg10[%c0_55, %c0_56, %c0_57] : memref<8x8x128xf32, #tpu.memory_space<vmem>>, vector<8x8x128xf32>
    tpu.vector_store %arg10[%c0_55, %c0_56, %c0_57], %279 {strides = array<i32>} : memref<8x8x128xf32, #tpu.memory_space<vmem>>, vector<8x8x128xf32>,
    return
  }
  func.func @transform_0(%arg0: i32, %arg1: i32) -> (i32, i32, i32) {
    %c0_i32 = arith.constant 0 : i32
    %c0_i32_0 = arith.constant 0 : i32
    return %arg0, %arg1, %c0_i32 : i32, i32, i32
  }
  func.func @transform_1(%arg0: i32, %arg1: i32) -> (i32, i32) {
    %c0_i32 = arith.constant 0 : i32
    %c0_i32_0 = arith.constant 0 : i32
    return %arg0, %c0_i32 : i32, i32
  }
  func.func @transform_2(%arg0: i32, %arg1: i32) -> (i32, i32) {
    %c0_i32 = arith.constant 0 : i32
    %c0_i32_0 = arith.constant 0 : i32
    %c0_i32_1 = arith.constant 0 : i32
    return %c0_i32, %c0_i32_0 : i32, i32
  }
  func.func @transform_3(%arg0: i32, %arg1: i32) -> (i32, i32) {
    %c0_i32 = arith.constant 0 : i32
    %c0_i32_0 = arith.constant 0 : i32
    %c0_i32_1 = arith.constant 0 : i32
    return %c0_i32, %c0_i32_0 : i32, i32
  }
  func.func @transform_4(%arg0: i32, %arg1: i32) -> (i32, i32) {
    %c0_i32 = arith.constant 0 : i32
    %c0_i32_0 = arith.constant 0 : i32
    %c0_i32_1 = arith.constant 0 : i32
    return %c0_i32, %c0_i32_0 : i32, i32
  }
  func.func @transform_5(%arg0: i32, %arg1: i32) -> (i32, i32) {
    %c0_i32 = arith.constant 0 : i32
    %c0_i32_0 = arith.constant 0 : i32
    %c0_i32_1 = arith.constant 0 : i32
    return %c0_i32, %c0_i32_0 : i32, i32
  }
  func.func @transform_6(%arg0: i32, %arg1: i32) -> (i32, i32) {
    %c0_i32 = arith.constant 0 : i32
    %c0_i32_0 = arith.constant 0 : i32
    %c0_i32_1 = arith.constant 0 : i32
    return %c0_i32, %c0_i32_0 : i32, i32
  }
  func.func @transform_7(%arg0: i32, %arg1: i32) -> (i32, i32) {
    %c0_i32 = arith.constant 0 : i32
    %c0_i32_0 = arith.constant 0 : i32
    %c0_i32_1 = arith.constant 0 : i32
    return %c0_i32, %c0_i32_0 : i32, i32
  }
  func.func @transform_8(%arg0: i32, %arg1: i32) -> (i32, i32, i32) {
    %c0_i32 = arith.constant 0 : i32
    %c0_i32_0 = arith.constant 0 : i32
    return %arg0, %arg1, %c0_i32 : i32, i32, i32
  }
  func.func @transform_9(%arg0: i32, %arg1: i32) -> (i32, i32, i32) {
    %c0_i32 = arith.constant 0 : i32
    %c0_i32_0 = arith.constant 0 : i32
    return %arg0, %arg1, %c0_i32 : i32, i32, i32
  }
}

</mosaic_0001>

<bundles_post_ra>
// kernel: tpu_custom_call.1
= control target key start
LH: loop header
LB: loop body
LE: loop exit
PB: predicated region body
PF: predicated region fallthrough
CT: control target
= control target key end

     0   :  { %15 = vsyncpa [#allocation4], 0  ;;  %s11291_s0 = inlined_call_operand.hbm [shape: f32[8,8,16], index: 0, kind: input, shape index: {}]   ;;  %s11292_s1 = inlined_call_operand.hbm [shape: f32[8,128], index: 1, kind: input, shape index: {}]   ;;  %s11293_s2 = inlined_call_operand.hbm [shape: f32[16,384], index: 2, kind: input, shape index: {}]   ;;  %s11294_s3 = inlined_call_operand.hbm [shape: f32[128,384], index: 3, kind: input, shape index: {}]   ;;  %s11295_s4 = inlined_call_operand.vmem [shape: f32[1,384], index: 4, kind: input, shape index: {}]   ;;  %s11296_s5 = inlined_call_operand.vmem [shape: f32[1,128], index: 5, kind: input, shape index: {}]   ;;  %s11297_s6 = inlined_call_operand.hbm [shape: f32[128,128], index: 6, kind: input, shape index: {}]   ;;  %s11298_s7 = inlined_call_operand.vmem [shape: f32[1,128], index: 7, kind: input, shape index: {}]   ;;  %s11299_s8 = inlined_call_operand.hbm [shape: f32[8,8,128], index: 8, kind: output, shape index: {0}]   ;;  %s11300_s9 = inlined_call_operand.hbm [shape: f32[8,8,128], index: 9, kind: output, shape index: {1}]  }
   0x1   :  { %16 = vsyncpa [#allocation7], 0 }
   0x2   :  { %17 = vsyncpa [#allocation10], 0 }
   0x3   :  { %18 = vsyncpa [#allocation5], 0  ;;  %s38_s11 = sshll.u32 %s11292_s1, 4  ;;  %s39_s11 = int_to_ptr.hbm [resolvable:$true] %s38_s11 }
   0x4   :  { %19 = vsyncpa [#allocation14], 0  ;;  %s5813_s12 = smov [#allocation6]   ;;  %s61_s16 = sshll.u32 %s11294_s3, 4  ;;  %s62_s16 = int_to_ptr.hbm [resolvable:$true] %s61_s16 }
   0x5   :  { %s40_s13 = sshll.u32 %s5813_s12, 4  ;;  %s5814_s17 = smov [#allocation9]   ;;  %s41_s13 = int_to_ptr.vmem [resolvable:$true] %s40_s13 }
   0x6   :  { %43 = dma.hbm_to_vmem [thread:$0]  %s39_s11, 128, %s41_s13, [#allocation7]  }
   0x7   :  { %s63_s18 = sshll.u32 %s5814_s17, 4  ;;  %s24_s21 = sshll.u32 %s11291_s0, 4  ;;  %s64_s18 = int_to_ptr.vmem [resolvable:$true] %s63_s18  ;;  %s25_s21 = int_to_ptr.hbm [resolvable:$true] %s24_s21 }
   0x8   :  { %s5815_s1 = smov 384   ;;  %s5816_s22 = smov 24  }
   0x9   :  { %69 = dma.hbm_to_vmem [thread:$0]  %s62_s16, 6144, %s64_s18, [#allocation10], %s5815_s1, %s5815_s1, %s5816_s22  }
   0xa   :  { %s5817_s23 = smov [#allocation3]   ;;  %s48_s27 = sshll.u32 %s11293_s2, 4  ;;  %s49_s27 = int_to_ptr.hbm [resolvable:$true] %s48_s27 }
   0xb   :  { %s26_s24 = sshll.u32 %s5817_s23, 4  ;;  %s5818_s3 = smov 128   ;;  %s27_s24 = int_to_ptr.vmem [resolvable:$true] %s26_s24 }
   0xc   :  { %s5819_s28 = smov 8   ;;  %s5820_s0 = smov [#allocation8]  }
   0xd   :  { %32 = dma.hbm_to_vmem [thread:$0]  %s25_s21, 1024, %s27_s24, [#allocation4], %s5818_s3, %s5818_s3, %s5819_s28  }
   0xe   :  { %s50_s29 = sshll.u32 %s5820_s0, 4  ;;  %s78_s11 = sshll.u32 %s11297_s6, 4  ;;  %s51_s29 = int_to_ptr.vmem [resolvable:$true] %s50_s29  ;;  %s79_s11 = int_to_ptr.hbm [resolvable:$true] %s78_s11 }
   0xf   :  { %56 = dma.hbm_to_vmem [thread:$0]  %s49_s27, 768, %s51_s29, [#allocation7], %s5815_s1, %s5815_s1, %s5816_s22  }
  0x10   :  { %s5821_s12 = smov [#allocation11]  }
  0x11   :  { %s80_s13 = sshll.u32 %s5821_s12, 4  ;;  %s81_s13 = int_to_ptr.vmem [resolvable:$true] %s80_s13 }
  0x12   :  { %86 = dma.hbm_to_vmem [thread:$0]  %s79_s11, 2048, %s81_s13, [#allocation10], %s5818_s3, %s5818_s3, %s5819_s28  }
  0x13   :  { %5803 = dma.done.wait [#allocation4], 1024  }
  0x14   :  { %5804 = vsyncadd [#allocation4], 4294966272 }
  0x15   :  { %5805 = dma.done.wait [#allocation7], 896  }
  0x16   :  { %5806 = vsyncadd [#allocation7], 4294966400 }
  0x17   :  { %5807 = dma.done.wait [#allocation10], 8192  }
  0x18   :  { %5808 = vsyncadd [#allocation10], 4294959104  ;;  %v126_v0 = vld [vmem:[#allocation8 + $0x18] sm:$0xff]  ;;  %v128_v1 = vld [vmem:[#allocation8 + $0x28] sm:$0xff]  ;;  %vm137_vm0 = vcmask 130048   ;;  %s4691_s25 = sshll.u32 %s11300_s9, 4  ;;  %s4692_s25 = int_to_ptr.hbm [resolvable:$true] %s4691_s25 }
  0x19   :  { %v123_v2 = vld [vmem:[#allocation8] sm:$0xff]  ;;  %176 = vmatpush.msra.mxu0 %v126_v0  ;;  %4863 = vmatpush.msra.mxu3 %v128_v1  ;;  %v125_v3 = vld [vmem:[#allocation8 + $0x10] sm:$0xff]  ;;  %v115_v4 = vld [vmem:[#allocation3] sm:$0xff]  ;;  %s4678_s30 = sshll.u32 %s11299_s8, 4  ;;  %s4679_s30 = int_to_ptr.hbm [resolvable:$true] %s4678_s30 }
  0x1a   :  { %v5895_v5 = vld [vmem:[#allocation3 + $0x20] sm:$0xff]  ;;  %258 = vmatpush.msra.mxu2 %v128_v1  ;;  %v5902_v7 = vld [vmem:[#allocation9 + $0x150] sm:$0xff]  ;;  %v124_v9 = vld [vmem:[#allocation8 + $0x8] sm:$0xff] }
  0x1b   :  { %v5897_v6 = vld [vmem:[#allocation9 + $0x168] sm:$0xff]  ;;  %177 = vmatpush.msra.mxu0 %v123_v2  ;;  %4864 = vmatpush.msra.mxu3 %v125_v3  ;;  %v127_v8 = vld [vmem:[#allocation8 + $0x20] sm:$0xff]  ;;  %v5905_v10 = vld [vmem:[#allocation9 + $0x138] sm:$0xff] }
  0x1c   :  { %4711 = vmatmul.msk.f32.vlgmr.msra.gmra.mxu0 %vm137_vm0, %v115_v4  ;;  %4731 = vmatmul.msk.f32.vlgmr.msra.gmra.mxu3 %vm137_vm0, %v5895_v5  ;;  %v5908_v11 = vld [vmem:[#allocation9 + $0x120] sm:$0xff]  ;;  %v5911_v12 = vld [vmem:[#allocation9 + $0x178] sm:$0xff]  ;;  %v116_v13 = vld [vmem:[#allocation3 + $0x8] sm:$0xff] }
  0x1d   :  { %338 = vmatpush.msrb.mxu3 %v5897_v6  ;;  %217 = vmatpush.msra.mxu1 %v127_v8  ;;  %v5915_v14 = vld [vmem:[#allocation3 + $0x28] sm:$0xff]  ;;  %v5918_v15 = vld [vmem:[#allocation9 + $0x160] sm:$0xff]  ;;  %v5920_v16 = vld [vmem:[#allocation9 + $0x108] sm:$0xff] }
  0x1e   :  { %259 = vmatpush.msra.mxu2 %v125_v3  ;;  %378 = vmatpush.msrb.mxu0 %v5911_v12  ;;  %v5925_v17 = vld [vmem:[#allocation9 + $0x148] sm:$0xff]  ;;  %v5932_v19 = vld [vmem:[#allocation9 + $0xf0] sm:$0xff]  ;;  %v5938_v21 = vld [vmem:[#allocation9 + $0xd8] sm:$0xff] }
  0x1f   :  { %339 = vmatpush.msrb.mxu3 %v5902_v7  ;;  %218 = vmatpush.msra.mxu1 %v124_v9  ;;  %v5927_v18 = vld [vmem:[#allocation6] sm:$0xff]  ;;  %v5935_v20 = vld [vmem:[#allocation9 + $0x130] sm:$0xff]  ;;  %v5943_v23 = vld [vmem:[#allocation9 + $0x118] sm:$0xff] }
  0x20   :  { %4719 = vmatmul.msk.f32.vlgmr.msra.gmra.mxu1 %vm137_vm0, %v115_v4  ;;  %4727 = vmatmul.msk.f32.vlgmr.msra.gmra.mxu2 %vm137_vm0, %v115_v4  ;;  %114 = vst [vmem:[#allocation2] sm:$0xff] %v5927_v18  ;;  %v5940_v22 = vld [vmem:[#allocation9 + $0x170] sm:$0xff]  ;;  %v5949_v24 = vld [vmem:[#allocation9 + $0xc0] sm:$0xff]  ;;  %v117_v26 = vld [vmem:[#allocation3 + $0x10] sm:$0xff] }
  0x21   :  { %340 = vmatpush.msrb.mxu3 %v5905_v10  ;;  %869 = vmatpush.msrb.mxu1 %v5897_v6  ;;  %v5952_v25 = vld [vmem:[#allocation9 + $0x100] sm:$0xff]  ;;  %v5956_v27 = vld [vmem:[#allocation3 + $0x30] sm:$0xff]  ;;  %v5961_v29 = vld [vmem:[#allocation9 + $0xa8] sm:$0xff] }
  0x22   :  { %379 = vmatpush.msrb.mxu0 %v5918_v15  ;;  %889 = vmatpush.msrb.mxu2 %v5940_v22  ;;  %v5958_v28 = vld [vmem:[#allocation9 + $0x158] sm:$0xff]  ;;  %v5967_v30 = vld [vmem:[#allocation9 + $0xe8] sm:$0xff]  ;;  %v5972_v31 = vld [vmem:[#allocation9 + $0x90] sm:$0xff] }
  0x23   :  { %341 = vmatpush.msrb.mxu3 %v5908_v11  ;;  %870 = vmatpush.msrb.mxu1 %v5902_v7  ;;  %v5975_v32 = vld [vmem:[#allocation9 + $0x140] sm:$0xff]  ;;  %v5978_v33 = vld [vmem:[#allocation9 + $0xd0] sm:$0xff]  ;;  %v5980_v34 = vld [vmem:[#allocation9 + $0x78] sm:$0xff] }
  0x24   :  { %4712 = vmatmul.msk.f32.gmra.mxu0 %vm137_vm0, %v116_v13  ;;  %4732 = vmatmul.msk.f32.gmra.mxu3 %vm137_vm0, %v5915_v14  ;;  %v5986_v35 = vld [vmem:[#allocation9 + $0xb8] sm:$0xff]  ;;  %v5988_v36 = vld [vmem:[#allocation9 + $0x60] sm:$0xff]  ;;  %v5995_v39 = vld [vmem:[#allocation9 + $0x128] sm:$0xff] }
  0x25   :  { %342 = vmatpush.msrb.mxu3 %v5920_v16  ;;  %380 = vmatpush.msrb.mxu0 %v5925_v17  ;;  %v118_v37 = vld [vmem:[#allocation3 + $0x18] sm:$0xff]  ;;  %v6000_v41 = vld [vmem:[#allocation9 + $0x48] sm:$0xff]  ;;  %v6011_v43 = vld [vmem:[#allocation9 + $0x30] sm:$0xff] }
  0x26   :  { %871 = vmatpush.msrb.mxu1 %v5905_v10  ;;  %890 = vmatpush.msrb.mxu2 %v5958_v28  ;;  %v5993_v38 = vld [vmem:[#allocation3 + $0x38] sm:$0xff]  ;;  %v6006_v42 = vld [vmem:[#allocation9 + $0x88] sm:$0xff]  ;;  %v6014_v44 = vld [vmem:[#allocation9 + $0x110] sm:$0xff] }
  0x27   :  { %343 = vmatpush.msrb.mxu3 %v5932_v19  ;;  %381 = vmatpush.msrb.mxu0 %v5935_v20  ;;  %v5998_v40 = vld [vmem:[#allocation9 + $0xa0] sm:$0xff]  ;;  %v6017_v45 = vld [vmem:[#allocation9 + $0x70] sm:$0xff]  ;;  %v6019_v46 = vld [vmem:[#allocation9 + $0x18] sm:$0xff] }
  0x28   :  { %4720 = vmatmul.msk.f32.gmra.mxu1 %vm137_vm0, %v116_v13  ;;  %4728 = vmatmul.msk.f32.gmra.mxu2 %vm137_vm0, %v116_v13  ;;  %v6025_v47 = vld [vmem:[#allocation9 + $0x58] sm:$0xff]  ;;  %v6027_v48 = vld [vmem:[#allocation9] sm:$0xff]  ;;  %v6041_v51 = vld [vmem:[#allocation9 + $0x28] sm:$0xff] }
  0x29   :  { %344 = vmatpush.msrb.mxu3 %v5938_v21  ;;  %382 = vmatpush.msrb.mxu0 %v5943_v23  ;;  %v6032_v49 = vld [vmem:[#allocation9 + $0xf8] sm:$0xff]  ;;  %v6035_v50 = vld [vmem:[#allocation9 + $0x40] sm:$0xff]  ;;  %v6046_v52 = vld [vmem:[#allocation9 + $0x10] sm:$0xff] }
  0x2a   :  { %872 = vmatpush.msrb.mxu1 %v5908_v11  ;;  %891 = vmatpush.msrb.mxu2 %v5975_v32  ;;  %v6051_v53 = vld [vmem:[#allocation9 + $0xe0] sm:$0xff]  ;;  %v6059_v54 = vld [vmem:[#allocation9 + $0xc8] sm:$0xff]  ;;  %v6064_v55 = vld [vmem:[#allocation9 + $0xb0] sm:$0xff] }
  0x2b   :  { %345 = vmatpush.msrb.mxu3 %v5949_v24  ;;  %383 = vmatpush.msrb.mxu0 %v5952_v25  ;;  %v6072_v56 = vld [vmem:[#allocation9 + $0x98] sm:$0xff]  ;;  %v6077_v57 = vld [vmem:[#allocation9 + $0x80] sm:$0xff]  ;;  %v6085_v58 = vld [vmem:[#allocation9 + $0x68] sm:$0xff] }
  0x2c   :  { %4713 = vmatmul.msk.f32.gmra.mxu0 %vm137_vm0, %v117_v26  ;;  %4733 = vmatmul.msk.f32.gmra.mxu3 %vm137_vm0, %v5956_v27  ;;  %v6090_v59 = vld [vmem:[#allocation9 + $0x50] sm:$0xff]  ;;  %v6098_v60 = vld [vmem:[#allocation9 + $0x38] sm:$0xff]  ;;  %v6103_v61 = vld [vmem:[#allocation9 + $0x20] sm:$0xff] }
  0x2d   :  { %346 = vmatpush.msrb.mxu3 %v5961_v29  ;;  %384 = vmatpush.msrb.mxu0 %v5967_v30  ;;  %v6111_v62 = vld [vmem:[#allocation9 + $0x8] sm:$0xff] }
  0x2e   :  { %873 = vmatpush.msrb.mxu1 %v5920_v16  ;;  %892 = vmatpush.msrb.mxu2 %v5995_v39 }
  0x2f   :  { %347 = vmatpush.msrb.mxu3 %v5972_v31  ;;  %385 = vmatpush.msrb.mxu0 %v5978_v33 }
  0x30   :  { %4721 = vmatmul.msk.f32.gmra.mxu1 %vm137_vm0, %v117_v26  ;;  %4729 = vmatmul.msk.f32.gmra.mxu2 %vm137_vm0, %v117_v26 }
  0x31   :  { %348 = vmatpush.msrb.mxu3 %v5980_v34  ;;  %386 = vmatpush.msrb.mxu0 %v5986_v35 }
  0x32   :  { %874 = vmatpush.msrb.mxu1 %v5932_v19  ;;  %893 = vmatpush.msrb.mxu2 %v6014_v44 }
  0x33   :  { %349 = vmatpush.msrb.mxu3 %v5988_v36  ;;  %387 = vmatpush.msrb.mxu0 %v5998_v40 }
  0x34   :  { %4714 = vmatmul.msk.f32.gmra.mxu0 %vm137_vm0, %v118_v37  ;;  %4734 = vmatmul.msk.f32.gmra.mxu3 %vm137_vm0, %v5993_v38 }
  0x35   :  { %350 = vmatpush.msrb.mxu3 %v6000_v41  ;;  %388 = vmatpush.msrb.mxu0 %v6006_v42 }
  0x36   :  { %875 = vmatpush.msrb.mxu1 %v5938_v21  ;;  %894 = vmatpush.msrb.mxu2 %v6032_v49 }
  0x37   :  { %351 = vmatpush.msrb.mxu3 %v6011_v43  ;;  %389 = vmatpush.msrb.mxu0 %v6017_v45 }
  0x38   :  { %4722 = vmatmul.msk.f32.gmra.mxu1 %vm137_vm0, %v118_v37  ;;  %4730 = vmatmul.msk.f32.gmra.mxu2 %vm137_vm0, %v118_v37 }
  0x39   :  { %352 = vmatpush.msrb.mxu3 %v6019_v46  ;;  %390 = vmatpush.msrb.mxu0 %v6025_v47 }
  0x3a   :  { %876 = vmatpush.msrb.mxu1 %v5949_v24  ;;  %895 = vmatpush.msrb.mxu2 %v6051_v53 }
  0x3b   :  { %353 = vmatpush.msrb.mxu3 %v6027_v48  ;;  %391 = vmatpush.msrb.mxu0 %v6035_v50 }
  0x3c   :  { %4715 = vmatmul.msk.f32.gmra.mxu0 %vm137_vm0, %v5895_v5  ;;  %354 = vmatmul.f32.vlgmr.msrb.gmra.mxu3 %v5927_v18 }
  0x3d   :  { %358 = vmatpush.msra.mxu3 %v5940_v22  ;;  %392 = vmatpush.msrb.mxu0 %v6041_v51 }
  0x3e   :  { %877 = vmatpush.msrb.mxu1 %v5961_v29  ;;  %896 = vmatpush.msrb.mxu2 %v6059_v54 }
  0x3f   :  { %359 = vmatpush.msra.mxu3 %v5958_v28  ;;  %393 = vmatpush.msrb.mxu0 %v6046_v52 }
  0x40   :  { %4723 = vmatmul.msk.f32.gmra.mxu1 %vm137_vm0, %v5895_v5  ;;  %897 = vmatpush.msrb.mxu2 %v6064_v55 }
  0x41   :  { %360 = vmatpush.msra.mxu3 %v5975_v32  ;;  %1392 = vmatpush.msra.mxu0 %v5897_v6 }
  0x42   :  { %878 = vmatpush.msrb.mxu1 %v5972_v31  ;;  %898 = vmatpush.msrb.mxu2 %v6072_v56 }
  0x43   :  { %361 = vmatpush.msra.mxu3 %v5995_v39  ;;  %1393 = vmatpush.msra.mxu0 %v5902_v7 }
  0x44   :  { %4716 = vmatmul.msk.f32.gmra.mxu0 %vm137_vm0, %v5915_v14  ;;  %879 = vmatpush.msrb.mxu1 %v5980_v34 }
  0x45   :  { %362 = vmatpush.msra.mxu3 %v6014_v44  ;;  %899 = vmatpush.msrb.mxu2 %v6077_v57 }
  0x46   :  { %880 = vmatpush.msrb.mxu1 %v5988_v36  ;;  %1394 = vmatpush.msra.mxu0 %v5905_v10 }
  0x47   :  { %363 = vmatpush.msra.mxu3 %v6032_v49  ;;  %900 = vmatpush.msrb.mxu2 %v6085_v58 }
  0x48   :  { %4724 = vmatmul.msk.f32.gmra.mxu1 %vm137_vm0, %v5915_v14  ;;  %1395 = vmatpush.msra.mxu0 %v5908_v11 }
  0x49   :  { %364 = vmatpush.msra.mxu3 %v6051_v53  ;;  %881 = vmatpush.msrb.mxu1 %v6000_v41 }
  0x4a   :  { %901 = vmatpush.msrb.mxu2 %v6090_v59  ;;  %1396 = vmatpush.msra.mxu0 %v5920_v16 }
  0x4b   :  { %365 = vmatpush.msra.mxu3 %v6059_v54  ;;  %882 = vmatpush.msrb.mxu1 %v6011_v43 }
  0x4c   :  { %4717 = vmatmul.msk.f32.gmra.mxu0 %vm137_vm0, %v5956_v27  ;;  %902 = vmatpush.msrb.mxu2 %v6098_v60 }
  0x4d   :  { %366 = vmatpush.msra.mxu3 %v6064_v55  ;;  %883 = vmatpush.msrb.mxu1 %v6019_v46 }
  0x4e   :  { %903 = vmatpush.msrb.mxu2 %v6103_v61  ;;  %1397 = vmatpush.msra.mxu0 %v5932_v19 }
  0x4f   :  { %367 = vmatpush.msra.mxu3 %v6072_v56  ;;  %884 = vmatpush.msrb.mxu1 %v6027_v48 }
  0x50   :  { %4725 = vmatmul.msk.f32.gmra.mxu1 %vm137_vm0, %v5956_v27  ;;  %904 = vmatpush.msrb.mxu2 %v6111_v62 }
  0x51   :  { %368 = vmatpush.msra.mxu3 %v6077_v57  ;;  %1412 = vmatpush.msra.mxu1 %v5940_v22 }
  0x52   :  { %1432 = vmatpush.msra.mxu2 %v5911_v12  ;;  %1398 = vmatpush.msra.mxu0 %v5938_v21 }
  0x53   :  { %369 = vmatpush.msra.mxu3 %v6085_v58  ;;  %1413 = vmatpush.msra.mxu1 %v5958_v28 }
  0x54   :  { %4718 = vmatmul.msk.f32.gmra.mxu0 %vm137_vm0, %v5993_v38  ;;  %1433 = vmatpush.msra.mxu2 %v5918_v15 }
  0x55   :  { %370 = vmatpush.msra.mxu3 %v6090_v59  ;;  %1414 = vmatpush.msra.mxu1 %v5975_v32 }
  0x56   :  { %1434 = vmatpush.msra.mxu2 %v5925_v17  ;;  %1399 = vmatpush.msra.mxu0 %v5949_v24 }
  0x57   :  { %371 = vmatpush.msra.mxu3 %v6098_v60  ;;  %1415 = vmatpush.msra.mxu1 %v5995_v39 }
  0x58   :  { %4726 = vmatmul.msk.f32.gmra.mxu1 %vm137_vm0, %v5993_v38  ;;  %1435 = vmatpush.msra.mxu2 %v5935_v20 }
  0x59   :  { %372 = vmatpush.msra.mxu3 %v6103_v61  ;;  %1416 = vmatpush.msra.mxu1 %v6014_v44 }
  0x5a   :  { %1436 = vmatpush.msra.mxu2 %v5943_v23  ;;  %1400 = vmatpush.msra.mxu0 %v5961_v29 }
  0x5b   :  { %373 = vmatpush.msra.mxu3 %v6111_v62  ;;  %1417 = vmatpush.msra.mxu1 %v6032_v49 }
  0x5c   :  { %374 = vmatmul.f32.vlgmr.msra.gmra.mxu3 %v5927_v18  ;;  %394 = vmatmul.f32.vlgmr.msrb.gmra.mxu0 %v5927_v18 }
  0x5d   :  { %909 = vmatpush.msrb.mxu3 %v5911_v12  ;;  %1437 = vmatpush.msra.mxu2 %v5952_v25  ;;  %v129_v12 = vld [vmem:[%s11295_s4] sm:$0x7] }
  0x5e   :  { %1418 = vmatpush.msra.mxu1 %v6051_v53  ;;  %1401 = vmatpush.msra.mxu0 %v5972_v31  ;;  %v6224_v14 = vperm.slane %v129_v12, 0 }
  0x5f   :  { %910 = vmatpush.msrb.mxu3 %v5918_v15  ;;  %1438 = vmatpush.msra.mxu2 %v5967_v30 }
  0x60   :  { %1419 = vmatpush.msra.mxu1 %v6059_v54  ;;  %1402 = vmatpush.msra.mxu0 %v5980_v34 }
  0x61   :  { %911 = vmatpush.msrb.mxu3 %v5925_v17  ;;  %1439 = vmatpush.msra.mxu2 %v5978_v33 }
  0x62   :  { %1420 = vmatpush.msra.mxu1 %v6064_v55  ;;  %1403 = vmatpush.msra.mxu0 %v5988_v36 }
  0x63   :  { %912 = vmatpush.msrb.mxu3 %v5935_v20  ;;  %1440 = vmatpush.msra.mxu2 %v5986_v35 }
  0x64   :  { %1421 = vmatpush.msra.mxu1 %v6072_v56  ;;  %1404 = vmatpush.msra.mxu0 %v6000_v41 }
  0x65   :  { %913 = vmatpush.msrb.mxu3 %v5943_v23  ;;  %1441 = vmatpush.msra.mxu2 %v5998_v40 }
  0x66   :  { %1422 = vmatpush.msra.mxu1 %v6077_v57  ;;  %1405 = vmatpush.msra.mxu0 %v6011_v43 }
  0x67   :  { %914 = vmatpush.msrb.mxu3 %v5952_v25  ;;  %1442 = vmatpush.msra.mxu2 %v6006_v42 }
  0x68   :  { %1423 = vmatpush.msra.mxu1 %v6085_v58  ;;  %1406 = vmatpush.msra.mxu0 %v6019_v46 }
  0x69   :  { %915 = vmatpush.msrb.mxu3 %v5967_v30  ;;  %1443 = vmatpush.msra.mxu2 %v6017_v45 }
  0x6a   :  { %1424 = vmatpush.msra.mxu1 %v6090_v59  ;;  %1407 = vmatpush.msra.mxu0 %v6027_v48 }
  0x6b   :  { %916 = vmatpush.msrb.mxu3 %v5978_v33  ;;  %1444 = vmatpush.msra.mxu2 %v6025_v47 }
  0x6c   :  { %1425 = vmatpush.msra.mxu1 %v6098_v60  ;;  %1935 = vmatpush.msrb.mxu0 %v5940_v22 }
  0x6d   :  { %917 = vmatpush.msrb.mxu3 %v5986_v35  ;;  %1445 = vmatpush.msra.mxu2 %v6035_v50 }
  0x6e   :  { %1426 = vmatpush.msra.mxu1 %v6103_v61  ;;  %1936 = vmatpush.msrb.mxu0 %v5958_v28 }
  0x6f   :  { %918 = vmatpush.msrb.mxu3 %v5998_v40  ;;  %1446 = vmatpush.msra.mxu2 %v6041_v51 }
  0x70   :  { %1427 = vmatpush.msra.mxu1 %v6111_v62  ;;  %1937 = vmatpush.msrb.mxu0 %v5975_v32 }
  0x71   :  { %919 = vmatpush.msrb.mxu3 %v6006_v42  ;;  %1447 = vmatpush.msra.mxu2 %v6046_v52 }
  0x72   :  { %1938 = vmatpush.msrb.mxu0 %v5995_v39 }
  0x73   :  { %920 = vmatpush.msrb.mxu3 %v6017_v45  ;;  %v6263_v45 = vperm.slane %v129_v12, 1 }
  0x74   :  { %1939 = vmatpush.msrb.mxu0 %v6014_v44 }
  0x75   :  { %921 = vmatpush.msrb.mxu3 %v6025_v47  ;;  %v133_v47 = vperm.slane %v129_v12, 2 }
  0x76   :  { %1940 = vmatpush.msrb.mxu0 %v6032_v49 }
  0x77   :  { %922 = vmatpush.msrb.mxu3 %v6035_v50 }
  0x78   :  { %1941 = vmatpush.msrb.mxu0 %v6051_v53 }
  0x79   :  { %923 = vmatpush.msrb.mxu3 %v6041_v51 }
  0x7a   :  { %1942 = vmatpush.msrb.mxu0 %v6059_v54 }
  0x7b   :  { %924 = vmatpush.msrb.mxu3 %v6046_v52 }
  0x7c   :  { %1943 = vmatpush.msrb.mxu0 %v6064_v55 }
  0x7d   :  { %1915 = vmatpush.msra.mxu3 %v5897_v6 }
  0x7e   :  { %1944 = vmatpush.msrb.mxu0 %v6072_v56 }
  0x7f   :  { %1916 = vmatpush.msra.mxu3 %v5902_v7 }
  0x80   :  { %1945 = vmatpush.msrb.mxu0 %v6077_v57 }
  0x81   :  { %1917 = vmatpush.msra.mxu3 %v5905_v10 }
  0x82   :  { %1946 = vmatpush.msrb.mxu0 %v6085_v58 }
  0x83   :  { %1918 = vmatpush.msra.mxu3 %v5908_v11 }
  0x84   :  { %1947 = vmatpush.msrb.mxu0 %v6090_v59 }
  0x85   :  { %1919 = vmatpush.msra.mxu3 %v5920_v16 }
  0x86   :  { %1948 = vmatpush.msrb.mxu0 %v6098_v60 }
  0x87   :  { %1920 = vmatpush.msra.mxu3 %v5932_v19 }
  0x88   :  { %1949 = vmatpush.msrb.mxu0 %v6103_v61 }
  0x89   :  { %1921 = vmatpush.msra.mxu3 %v5938_v21 }
  0x8a   :  { %1950 = vmatpush.msrb.mxu0 %v6111_v62 }
  0x8b   :  { %1922 = vmatpush.msra.mxu3 %v5949_v24 }
  0x8d   :  { %1923 = vmatpush.msra.mxu3 %v5961_v29 }
  0x8f   :  { %1924 = vmatpush.msra.mxu3 %v5972_v31 }
  0x91   :  { %1925 = vmatpush.msra.mxu3 %v5980_v34 }
  0x93   :  { %1926 = vmatpush.msra.mxu3 %v5988_v36 }
  0x95   :  { %1927 = vmatpush.msra.mxu3 %v6000_v41 }
  0x97   :  { %1928 = vmatpush.msra.mxu3 %v6011_v43 }
  0x99   :  { %1929 = vmatpush.msra.mxu3 %v6019_v46  ;;  %v179_v63 = vpop.f32.mrf.mxu0 }
  0x9a   :  { %v6234_v18 = vadd.f32 %v179_v63, %v6224_v14 }
  0x9b   :  { %1930 = vmatpush.msra.mxu3 %v6027_v48 }
  0x9c   :  { %11538 = vst [vmem:[#allocation21_spill] sm:$0xff] %v6234_v18 }
  0x9d   :  { %v220_v0 = vpop.f32.mrf.mxu1 }
  0x9e   :  { %v6270_v52 = vadd.f32 %v220_v0, %v6263_v45 }
  0x9f   :  { %v273_v1 = vpop.f32.mrf.mxu3 }
  0xa0   :  { %11544 = vst [vmem:[#allocation27_spill] sm:$0xff] %v6270_v52  ;;  %v6274_v55 = vadd.f32 %v273_v1, %v133_v47 }
  0xa1   :  { %v182_v2 = vpop.f32.mrf.mxu0 }
  0xa2   :  { %v6237_v19 = vadd.f32 %v182_v2, %v6224_v14  ;;  %11545 = vst [vmem:[#allocation28_spill] sm:$0xff] %v6274_v55 }
  0xa3   :  { %v6217_v9 = vpop.f32.mrf.mxu2 }
  0xa4   :  { %11539 = vst [vmem:[#allocation22_spill] sm:$0xff] %v6237_v19 }
  0xa5   :  { %v223_v3 = vpop.f32.mrf.mxu1 }
  0xa6   :  { %v6279_v57 = vadd.f32 %v223_v3, %v6263_v45 }
  0xa7   :  { %v276_v4 = vpop.f32.mrf.mxu3 }
  0xa8   :  { %v6276_v56 = vadd.f32 %v276_v4, %v133_v47  ;;  %11547 = vst [vmem:[#allocation30_spill] sm:$0xff] %v6279_v57 }
  0xa9   :  { %v185_v5 = vpop.f32.mrf.mxu0 }
  0xaa   :  { %v6240_v20 = vadd.f32 %v185_v5, %v6224_v14  ;;  %11546 = vst [vmem:[#allocation29_spill] sm:$0xff] %v6276_v56 }
  0xab   :  { %v6228_v16 = vpop.f32.mrf.mxu2 }
  0xac   :  { %11540 = vst [vmem:[#allocation23_spill] sm:$0xff] %v6240_v20 }
  0xad   :  { %v226_v6 = vpop.f32.mrf.mxu1 }
  0xae   :  { %v6286_v61 = vadd.f32 %v226_v6, %v6263_v45 }
  0xaf   :  { %v279_v7 = vpop.f32.mrf.mxu3 }
  0xb0   :  { %v6283_v60 = vadd.f32 %v279_v7, %v133_v47  ;;  %11549 = vst [vmem:[#allocation32_spill] sm:$0xff] %v6286_v61 }
  0xb1   :  { %v188_v8 = vpop.f32.mrf.mxu0 }
  0xb2   :  { %v6243_v21 = vadd.f32 %v188_v8, %v6224_v14  ;;  %11548 = vst [vmem:[#allocation31_spill] sm:$0xff] %v6283_v60 }
  0xb3   :  { %v267_v44 = vpop.f32.mrf.mxu2 }
  0xb4   :  { %11541 = vst [vmem:[#allocation24_spill] sm:$0xff] %v6243_v21 }
  0xb5   :  { %v229_v10 = vpop.f32.mrf.mxu1 }
  0xb6   :  { %v6292_v1 = vadd.f32 %v229_v10, %v6263_v45 }
  0xb7   :  { %v6219_v11 = vpop.f32.mrf.mxu3 }
  0xb8   :  { %11550 = vst [vmem:[#allocation33_spill] sm:$0xff] %v6292_v1  ;;  %v6298_v5 = vadd.f32 %v6219_v11, %v133_v47 }
  0xb9   :  { %v191_v13 = vpop.f32.mrf.mxu0 }
  0xba   :  { %v6231_v17 = vadd.f32 %v191_v13, %v6224_v14  ;;  %11551 = vst [vmem:[#allocation34_spill] sm:$0xff] %v6298_v5  ;;  %v6308_v13 = vadd.f32 %v6217_v9, %v133_v47  ;;  %v6324_v9 = vadd.f32 %v267_v44, %v133_v47 }
  0xbc   :  { %11537 = vst [vmem:[#allocation20_spill] sm:$0xff] %v6231_v17 }
  0xbd   :  { %v6226_v15 = vpop.f32.mrf.mxu1  ;;  %11552 = vst [vmem:[#allocation35_spill] sm:$0xff] %v6308_v13 }
  0xbe   :  { %11556 = vst [vmem:[#allocation39_spill] sm:$0xff] %v6324_v9 }
  0xbf   :  { %v6245_v22 = vpop.f32.mrf.mxu3 }
  0xc0   :  { %v399_v23 = vrot.slane %v6245_v22, 1  ;;  %v400_v24 = vrot.slane %v6245_v22, 2  ;;  %v401_v25 = vrot.slane %v6245_v22, 3  ;;  %v402_v26 = vrot.slane %v6245_v22, 4 }
  0xc1   :  { %v194_v27 = vpop.f32.mrf.mxu0  ;;  %v403_v28 = vrot.slane %v6245_v22, 5  ;;  %v414_v29 = vadd.f32 %v6245_v22, %v6234_v18  ;;  %v404_v42 = vrot.slane %v6245_v22, 6  ;;  %v405_v12 = vrot.slane %v6245_v22, 7 }
  0xc2   :  { %v415_v30 = vadd.f32 %v399_v23, %v6237_v19  ;;  %v416_v31 = vadd.f32 %v400_v24, %v6240_v20  ;;  %v417_v32 = vadd.f32 %v401_v25, %v6243_v21  ;;  %v418_v33 = vadd.f32 %v402_v26, %v6231_v17  ;;  %v270_v23 = vpop.f32.mrf.mxu2 }
  0xc3   :  { %v4735_v34 = vmul.f32 -1.442695, %v414_v29  ;;  %v6259_v35 = vadd.f32 %v194_v27, %v6224_v14  ;;  %v6314_v24 = vadd.f32 %v6226_v15, %v6263_v45  ;;  %v6317_v25 = vadd.f32 %v6228_v16, %v133_v47 }
  0xc4   :  { %v4736_v36 = vmul.f32 -1.442695, %v415_v30  ;;  %v4737_v37 = vmul.f32 -1.442695, %v416_v31  ;;  %v4738_v38 = vmul.f32 -1.442695, %v417_v32  ;;  %v6336_v16 = vadd.f32 %v270_v23, %v133_v47 }
  0xc5   :  { %11542 = vst [vmem:[#allocation25_spill] sm:$0xff] %v6259_v35  ;;  %v235_v39 = vpop.f32.mrf.mxu1  ;;  %4878 = vpow2.f32 %v4735_v34  ;;  %v4739_v40 = vmul.f32 -1.442695, %v418_v33  ;;  %v419_v41 = vadd.f32 %v403_v28, %v6259_v35 }
  0xc6   :  { %4880 = vpow2.f32 %v4736_v36  ;;  %11553 = vst [vmem:[#allocation36_spill] sm:$0xff] %v6314_v24  ;;  %v6331_v29 = vadd.f32 %v235_v39, %v6263_v45  ;;  %v4876_v39 = vld [vmem:[%s11296_s5] ss:$0 sm:$0xff] }
  0xc7   :  { %4882 = vpow2.f32 %v4737_v37  ;;  %v4740_v43 = vmul.f32 -1.442695, %v419_v41  ;;  %11554 = vst [vmem:[#allocation37_spill] sm:$0xff] %v6317_v25 }
  0xc8   :  { %4884 = vpow2.f32 %v4738_v38  ;;  %11557 = vst [vmem:[#allocation40_spill] sm:$0xff] %v6331_v29 }
  0xc9   :  { %v197_v46 = vpop.f32.mrf.mxu0  ;;  %4886 = vpow2.f32 %v4739_v40  ;;  %11559 = vst [vmem:[#allocation42_spill] sm:$0xff] %v6336_v16 }
  0xca   :  { %v6266_v48 = vadd.f32 %v197_v46, %v6224_v14  ;;  %4888 = vpow2.f32 %v4740_v43 }
  0xcb   :  { %v4879_v49 = vpop.eup %4878 }
  0xcc   :  { %11543 = vst [vmem:[#allocation26_spill] sm:$0xff] %v6266_v48  ;;  %v420_v50 = vadd.f32 %v404_v42, %v6266_v48  ;;  %v4881_v51 = vpop.eup %4880  ;;  %v6272_v53 = vadd.f32 1.0, %v4879_v49 }
  0xcd   :  { %v4883_v54 = vpop.eup %4882  ;;  %v6281_v58 = vadd.f32 1.0, %v4881_v51  ;;  %v238_v63 = vpop.f32.mrf.mxu1 }
  0xce   :  { %v4885_v59 = vpop.eup %4884  ;;  %v6288_v62 = vadd.f32 1.0, %v4883_v54  ;;  %4890 = vrcp.f32 %v6272_v53  ;;  %v4741_v3 = vmul.f32 -1.442695, %v420_v50  ;;  %v465_v7 = vand.u32 2147483648, %v6272_v53 }
  0xcf   :  { %v4887_v0 = vpop.eup %4886  ;;  %v6294_v2 = vadd.f32 1.0, %v4885_v59  ;;  %4892 = vrcp.f32 %v6281_v58  ;;  %v480_v10 = vand.u32 2147483648, %v6281_v58  ;;  %v6334_v15 = vadd.f32 %v238_v63, %v6263_v45 }
  0xd0   :  { %v4889_v4 = vpop.eup %4888  ;;  %v6300_v6 = vadd.f32 1.0, %v4887_v0  ;;  %4894 = vrcp.f32 %v6288_v62  ;;  %v495_v11 = vand.u32 2147483648, %v6288_v62  ;;  %v6328_v28 = vor.u32 1.1754944e-38, %v465_v7 }
  0xd1   :  { %v200_v8 = vpop.f32.mrf.mxu0  ;;  %4896 = vrcp.f32 %v6294_v2  ;;  %v6319_v22 = vadd.f32 1.0, %v4889_v4  ;;  %11558 = vst [vmem:[#allocation41_spill] sm:$0xff] %v6334_v15  ;;  %v6342_v31 = vor.u32 1.1754944e-38, %v480_v10  ;;  %v510_v38 = vand.u32 2147483648, %v6294_v2 }
  0xd2   :  { %4898 = vrcp.f32 %v6300_v6  ;;  %v6322_v26 = vadd.f32 %v200_v8, %v6224_v14  ;;  %v6350_v37 = vor.u32 1.1754944e-38, %v495_v11  ;;  %v463_v40 = vand.u32 2147483647, %v6272_v53 }
  0xd3   :  { %4900 = vpow2.f32 %v4741_v3  ;;  %v478_v54 = vand.u32 2147483647, %v6281_v58  ;;  %v508_v59 = vand.u32 2147483647, %v6294_v2  ;;  %vm459_vm1 = vweird.f32 %v6272_v53 }
  0xd4   :  { %11555 = vst [vmem:[#allocation38_spill] sm:$0xff] %v6322_v26  ;;  %v6326_v27 = vpop.eup %4890  ;;  %v421_v33 = vadd.f32 %v405_v12, %v6322_v26  ;;  %4902 = vrcp.f32 %v6319_v22  ;;  %vm474_vm3 = vweird.f32 %v6281_v58  ;;  %vm489_vm7 = vweird.f32 %v6288_v62 }
  0xd5   :  { %v6338_v30 = vpop.eup %4892  ;;  %v455_v14 = vmul.f32 %v6326_v27, %v6272_v53  ;;  %v241_v51 = vpop.f32.mrf.mxu1  ;;  %vm460_vm2 = vweird.f32 %v6326_v27  ;;  %vm504_vm8 = vweird.f32 %v6294_v2  ;;  %vm6407_vm9 = vcmp.eq.f32.partialorder %v463_v40, 8.507059e+37 }
  0xd6   :  { %v6346_v34 = vpop.eup %4894  ;;  %v470_v36 = vmul.f32 %v6338_v30, %v6281_v58  ;;  %v4742_v44 = vmul.f32 -1.442695, %v421_v33  ;;  %vm475_vm4 = vweird.f32 %v6338_v30  ;;  %v6383_v10 = vadd.f32 %v241_v51, %v6263_v45  ;;  %vm6436_vm13 = vmor %vm459_vm1, %vm460_vm2 }
  0xd7   :  { %v6357_v41 = vpop.eup %4896  ;;  %v456_v42 = vsub.f32 1.0, %v455_v14  ;;  %v485_v43 = vmul.f32 %v6346_v34, %v6288_v62  ;;  %vm490_vm5 = vweird.f32 %v6346_v34  ;;  %vm6411_vm10 = vcmp.eq.f32.partialorder %v478_v54, 8.507059e+37  ;;  %vm6447_vm14 = vmor %vm474_vm3, %vm475_vm4 }
  0xd8   :  { %v6362_v46 = vpop.eup %4898  ;;  %v471_v47 = vsub.f32 1.0, %v470_v36  ;;  %v500_v49 = vmul.f32 %v6357_v41, %v6294_v2  ;;  %4904 = vpow2.f32 %v4742_v44  ;;  %11560 = vst [vmem:[#allocation43_spill] sm:$0xff] %v6383_v10  ;;  %vm505_vm6 = vweird.f32 %v6357_v41  ;;  %vm6460_vm15 = vmor %vm489_vm7, %vm490_vm5 }
  0xd9   :  { %v395_v50 = vpop.f32.mrf.mxu0  ;;  %v4901_v63 = vpop.eup %4900  ;;  %v457_v0 = vmul.f32 %v6326_v27, %v456_v42  ;;  %v486_v3 = vsub.f32 1.0, %v485_v43  ;;  %v6371_v4 = vmul.f32 %v6362_v46, %v6300_v6  ;;  %v6399_v43 = vor.u32 1.1754944e-38, %v510_v38  ;;  %vm6472_vm0 = vmor %vm504_vm8, %vm505_vm6 }
  0xda   :  { %v501_v7 = vsub.f32 1.0, %v500_v49  ;;  %v6375_v8 = vadd.f32 1.0, %v4901_v63  ;;  %v6377_v12 = vadd.f32 %v4876_v39, %v395_v50  ;;  %v472_v23 = vmul.f32 %v6338_v30, %v471_v47  ;;  %v6393_v36 = vpop.eup %4902 }
  0xdb   :  { %v487_v11 = vmul.f32 %v6346_v34, %v486_v3  ;;  %v516_v14 = vsub.f32 1.0, %v6371_v4  ;;  %v6391_v33 = vadd.f32 %v6326_v27, %v457_v0  ;;  %vm6425_vm12 = vcmp.eq.f32.partialorder %v508_v59, 8.507059e+37 }
  0xdc   :  { %v502_v39 = vmul.f32 %v6357_v41, %v501_v7  ;;  %4906 = vrcp.f32 %v6375_v8  ;;  %v753_v59 = vrot.slane %v6377_v12, 2  ;;  %v754_v53 = vrot.slane %v6377_v12, 3 }
  0xdd   :  { %vm520_vm1 = vweird.f32 %v6362_v46  ;;  %vm519_vm2 = vweird.f32 %v6300_v6  ;;  %vm534_vm5 = vweird.f32 %v6319_v22  ;;  %vm535_vm6 = vweird.f32 %v6393_v36 }
  0xde   :  { %v4905_v51 = vpop.eup %4904  ;;  %vm6518_vm3 = vmor %vm519_vm2, %vm520_vm1  ;;  %vm549_vm8 = vweird.f32 %v6375_v8 }
  0xdf   :  { %v375_v42 = vpop.f32.mrf.mxu3  ;;  %v6402_v7 = vadd.f32 1.0, %v4905_v51  ;;  %vm6554_vm7 = vmor %vm534_vm5, %vm535_vm6 }
  0xe0   :  { %v575_v44 = vrot.slane %v375_v42, 1  ;;  %v576_v47 = vrot.slane %v375_v42, 2  ;;  %v577_v49 = vrot.slane %v375_v42, 3  ;;  %v578_v50 = vrot.slane %v375_v42, 4 }
  0xe1   :  { %v579_v63 = vrot.slane %v375_v42, 5  ;;  %v580_v0 = vrot.slane %v375_v42, 6  ;;  %v581_v3 = vrot.slane %v375_v42, 7  ;;  %v590_v4 = vadd.f32 %v375_v42, %v6270_v52 }
  0xe2   :  { %v591_v32 = vadd.f32 %v575_v44, %v6279_v57  ;;  %v592_v26 = vadd.f32 %v576_v47, %v6286_v61  ;;  %v593_v45 = vadd.f32 %v577_v49, %v6292_v1  ;;  %v594_v35 = vadd.f32 %v578_v50, %v6314_v24 }
  0xe3   :  { %v595_v42 = vadd.f32 %v579_v63, %v6331_v29  ;;  %v596_v51 = vadd.f32 %v580_v0, %v6334_v15  ;;  %v473_v44 = vadd.f32 %v6338_v30, %v472_v23  ;;  %v11565_v47 = vand.u32 2147483647, %v6288_v62  ;;  %v6430_v63 = vpop.eup %4906 }
  0xe4   :  { %v597_v54 = vadd.f32 %v581_v3, %v6383_v10  ;;  %v4743_v1 = vmul.f32 -1.442695, %v590_v4  ;;  %v4744_v50 = vmul.f32 -1.442695, %v591_v32  ;;  %v4745_v24 = vmul.f32 -1.442695, %v592_v26 }
  0xe5   :  { %vm6421_vm11 = vcmp.eq.f32.partialorder %v11565_v47, 8.507059e+37  ;;  %4908 = vrcp.f32 %v6402_v7  ;;  %v4746_v0 = vmul.f32 -1.442695, %v593_v45  ;;  %v488_v3 = vadd.f32 %v6346_v34, %v487_v11 }
  0xe6   :  { %4910 = vpow2.f32 %v4743_v1  ;;  %v4747_v32 = vmul.f32 -1.442695, %v594_v35  ;;  %v462_v4 = vsel %vm6436_vm13, %v6326_v27, %v6391_v33  ;;  %v4748_v58 = vmul.f32 -1.442695, %v595_v42 }
  0xe7   :  { %4912 = vpow2.f32 %v4744_v50  ;;  %v4749_v45 = vmul.f32 -1.442695, %v596_v51  ;;  %v503_v47 = vadd.f32 %v6357_v41, %v502_v39  ;;  %v4750_v35 = vmul.f32 -1.442695, %v597_v54 }
  0xe8   :  { %4914 = vpow2.f32 %v4745_v24  ;;  %v477_v1 = vsel %vm6447_vm14, %v6338_v30, %v473_v44  ;;  %v517_v27 = vmul.f32 %v6362_v46, %v516_v14  ;;  %v492_v24 = vsel %vm6460_vm15, %v6346_v34, %v488_v3 }
  0xe9   :  { %4916 = vpow2.f32 %v4746_v0  ;;  %v507_v33 = vsel %vm6472_vm0, %v6357_v41, %v503_v47  ;;  %v523_v30 = vand.u32 2147483647, %v6300_v6  ;;  %v525_v39 = vand.u32 2147483648, %v6300_v6 }
  0xea   :  { %4918 = vpow2.f32 %v4747_v32  ;;  %v6485_v2 = vadd.f32 %v6362_v46, %v517_v27  ;;  %v6494_v34 = vsel %vm6407_vm9, %v6328_v28, %v462_v4  ;;  %v6499_v41 = vsel %vm6411_vm10, %v6342_v31, %v477_v1 }
  0xeb   :  { %v6489_v14 = vpop.eup %4908  ;;  %4920 = vpow2.f32 %v4748_v58  ;;  %v530_v42 = vmul.f32 %v6393_v36, %v6319_v22  ;;  %v6506_v44 = vsel %vm6421_vm11, %v6350_v37, %v492_v24  ;;  %v6511_v28 = vsel %vm6425_vm12, %v6399_v43, %v507_v33 }
  0xec   :  { %v4911_v51 = vpop.eup %4910  ;;  %4922 = vpow2.f32 %v4749_v45  ;;  %vm6522_vm4 = vcmp.eq.f32.partialorder %v523_v30, 8.507059e+37  ;;  %v522_v6 = vsel %vm6518_vm3, %v6362_v46, %v6485_v2  ;;  %v526_v54 = vor.u32 1.1754944e-38, %v525_v39 }
  0xed   :  { %v4913_v48 = vpop.eup %4912  ;;  %4924 = vpow2.f32 %v4750_v35  ;;  %v6514_v31 = vadd.f32 1.0, %v4911_v51  ;;  %v531_v49 = vsub.f32 1.0, %v530_v42  ;;  %v545_v50 = vmul.f32 %v6430_v63, %v6375_v8 }
  0xee   :  { %v4915_v43 = vpop.eup %4914  ;;  %v6527_v40 = vadd.f32 1.0, %v4913_v48  ;;  %v540_v46 = vand.u32 2147483648, %v6319_v22  ;;  %v538_v47 = vand.u32 2147483647, %v6319_v22  ;;  %vm550_vm9 = vweird.f32 %v6430_v63 }
  0xef   :  { %v4917_v23 = vpop.eup %4916  ;;  %v6535_v0 = vadd.f32 1.0, %v4915_v43  ;;  %4926 = vrcp.f32 %v6514_v31  ;;  %v532_v3 = vmul.f32 %v6393_v36, %v531_v49  ;;  %v546_v4 = vsub.f32 1.0, %v545_v50  ;;  %vm6590_vm11 = vmor %vm549_vm8, %vm550_vm9 }
  0xf0   :  { %v4919_v26 = vpop.eup %4918  ;;  %v6540_v32 = vadd.f32 1.0, %v4917_v23  ;;  %4928 = vrcp.f32 %v6527_v40  ;;  %v553_v2 = vand.u32 2147483647, %v6375_v8  ;;  %v541_v39 = vor.u32 1.1754944e-38, %v540_v46 }
  0xf1   :  { %v4921_v11 = vpop.eup %4920  ;;  %v6544_v58 = vadd.f32 1.0, %v4919_v26  ;;  %4930 = vrcp.f32 %v6535_v0  ;;  %v533_v45 = vadd.f32 %v6393_v36, %v532_v3  ;;  %v547_v27 = vmul.f32 %v6430_v63, %v546_v4 }
  0xf2   :  { %v4923_v35 = vpop.eup %4922  ;;  %v6549_v1 = vadd.f32 1.0, %v4921_v11  ;;  %4932 = vrcp.f32 %v6540_v32  ;;  %vm539_vm10 = vcmp.eq.f32.partialorder %v538_v47, 8.507059e+37  ;;  %v555_v48 = vand.u32 2147483648, %v6375_v8 }
  0xf3   :  { %v4925_v24 = vpop.eup %4924  ;;  %v6560_v33 = vadd.f32 1.0, %v4923_v35  ;;  %v537_v30 = vsel %vm6554_vm7, %v6393_v36, %v533_v45  ;;  %4934 = vrcp.f32 %v6544_v58  ;;  %v548_v42 = vadd.f32 %v6430_v63, %v547_v27 }
  0xf4   :  { %v6567_v22 = vadd.f32 1.0, %v4925_v24  ;;  %4936 = vrcp.f32 %v6549_v1  ;;  %v560_v36 = vmul.f32 %v6489_v14, %v6402_v7  ;;  %v6582_v49 = vsel %vm6522_vm4, %v526_v54, %v522_v6 }
  0xf5   :  { %v6571_v51 = vpop.eup %4926  ;;  %4938 = vrcp.f32 %v6560_v33  ;;  %v6584_v43 = vsel %vm539_vm10, %v541_v39, %v537_v30  ;;  %vm6594_vm12 = vcmp.eq.f32.partialorder %v553_v2, 8.507059e+37  ;;  %v552_v37 = vsel %vm6590_vm11, %v6430_v63, %v548_v42 }
  0xf6   :  { %v6577_v38 = vpop.eup %4928  ;;  %4940 = vrcp.f32 %v6567_v22  ;;  %v561_v6 = vsub.f32 1.0, %v560_v36  ;;  %v568_v54 = vand.u32 2147483647, %v6402_v7  ;;  %vm564_vm13 = vweird.f32 %v6402_v7 }
  0xf7   :  { %v6598_v3 = vpop.eup %4930  ;;  %v570_v26 = vand.u32 2147483648, %v6402_v7  ;;  %v631_v46 = vmul.f32 %v6571_v51, %v6514_v31  ;;  %v639_v4 = vand.u32 2147483647, %v6514_v31  ;;  %v556_v11 = vor.u32 1.1754944e-38, %v555_v48 }
  0xf8   :  { %v6605_v8 = vpop.eup %4932  ;;  %v562_v45 = vmul.f32 %v6489_v14, %v561_v6  ;;  %vm565_vm14 = vweird.f32 %v6489_v14  ;;  %vm635_vm15 = vweird.f32 %v6514_v31  ;;  %vm636_vm0 = vweird.f32 %v6571_v51 }
  0xf9   :  { %v6615_v63 = vpop.eup %4934  ;;  %v632_v47 = vsub.f32 1.0, %v631_v46  ;;  %v641_v35 = vand.u32 2147483648, %v6514_v31  ;;  %v646_v62 = vmul.f32 %v6577_v38, %v6527_v40  ;;  %v6625_v24 = vsel %vm6594_vm12, %v556_v11, %v552_v37  ;;  %vm6646_vm3 = vmor %vm564_vm13, %vm565_vm14 }
  0xfa   :  { %v6621_v27 = vpop.eup %4936  ;;  %v563_v30 = vadd.f32 %v6489_v14, %v562_v45  ;;  %vm6628_vm1 = vcmp.eq.f32.partialorder %v568_v54, 8.507059e+37  ;;  %v654_v39 = vand.u32 2147483647, %v6527_v40  ;;  %v571_v48 = vor.u32 1.1754944e-38, %v570_v26  ;;  %vm6664_vm6 = vmor %vm635_vm15, %vm636_vm0 }
  0xfb   :  { %v6633_v42 = vpop.eup %4938  ;;  %v633_v36 = vmul.f32 %v6571_v51, %v632_v47  ;;  %vm6636_vm2 = vcmp.eq.f32.partialorder %v639_v4, 8.507059e+37  ;;  %v647_v23 = vsub.f32 1.0, %v646_v62  ;;  %vm650_vm4 = vweird.f32 %v6527_v40 }
  0xfc   :  { %v6640_v37 = vpop.eup %4940  ;;  %vm651_vm5 = vweird.f32 %v6577_v38  ;;  %v656_v54 = vand.u32 2147483648, %v6527_v40  ;;  %v661_v26 = vmul.f32 %v6598_v3, %v6535_v0  ;;  %v567_v46 = vsel %vm6646_vm3, %v6489_v14, %v563_v30 }
  0xfd   :  { %v634_v4 = vadd.f32 %v6571_v51, %v633_v36  ;;  %v642_v7 = vor.u32 1.1754944e-38, %v641_v35  ;;  %v648_v11 = vmul.f32 %v6577_v38, %v647_v23  ;;  %vm6668_vm7 = vcmp.eq.f32.partialorder %v654_v39, 8.507059e+37  ;;  %vm6689_vm9 = vmor %vm650_vm4, %vm651_vm5 }
  0xfe   :  { %v662_v62 = vsub.f32 1.0, %v661_v26  ;;  %vm665_vm8 = vweird.f32 %v6535_v0  ;;  %v669_v14 = vand.u32 2147483647, %v6535_v0  ;;  %v671_v31 = vand.u32 2147483648, %v6535_v0 }
  0xff   :  { %v638_v35 = vsel %vm6664_vm6, %v6571_v51, %v634_v4  ;;  %v649_v30 = vadd.f32 %v6577_v38, %v648_v11  ;;  %v676_v36 = vmul.f32 %v6605_v8, %v6540_v32  ;;  %v6683_v39 = vsel %vm6628_vm1, %v571_v48, %v567_v46 }
 0x100   :  { %v657_v51 = vor.u32 1.1754944e-38, %v656_v54  ;;  %v663_v6 = vmul.f32 %v6598_v3, %v662_v62  ;;  %vm666_vm10 = vweird.f32 %v6598_v3  ;;  %vm680_vm11 = vweird.f32 %v6540_v32 }
 0x101   :  { %v653_v26 = vsel %vm6689_vm9, %v6577_v38, %v649_v30  ;;  %v677_v2 = vsub.f32 1.0, %v676_v36  ;;  %v684_v48 = vand.u32 2147483647, %v6540_v32  ;;  %v6702_v40 = vsel %vm6636_vm2, %v642_v7, %v638_v35  ;;  %vm6710_vm12 = vmor %vm665_vm8, %vm666_vm10 }
 0x102   :  { %v664_v46 = vadd.f32 %v6598_v3, %v663_v6  ;;  %v686_v54 = vand.u32 2147483648, %v6540_v32  ;;  %v691_v4 = vmul.f32 %v6615_v63, %v6544_v58  ;;  %vm6714_vm13 = vcmp.eq.f32.partialorder %v669_v14, 8.507059e+37 }
 0x103   :  { %v672_v50 = vor.u32 1.1754944e-38, %v671_v31  ;;  %v678_v7 = vmul.f32 %v6605_v8, %v677_v2  ;;  %vm681_vm14 = vweird.f32 %v6605_v8  ;;  %v6722_v45 = vsel %vm6668_vm7, %v657_v51, %v653_v26 }
 0x104   :  { %v668_v0 = vsel %vm6710_vm12, %v6598_v3, %v664_v46  ;;  %v692_v62 = vsub.f32 1.0, %v691_v4  ;;  %v699_v35 = vand.u32 2147483647, %v6544_v58  ;;  %vm6729_vm15 = vcmp.eq.f32.partialorder %v684_v48, 8.507059e+37  ;;  %vm6738_vm0 = vmor %vm680_vm11, %vm681_vm14 }
 0x105   :  { %v679_v14 = vadd.f32 %v6605_v8, %v678_v7  ;;  %v701_v31 = vand.u32 2147483648, %v6544_v58  ;;  %v706_v47 = vmul.f32 %v6621_v27, %v6549_v1  ;;  %v687_v3 = vor.u32 1.1754944e-38, %v686_v54 }
 0x106   :  { %v693_v23 = vmul.f32 %v6615_v63, %v692_v62  ;;  %vm695_vm1 = vweird.f32 %v6544_v58  ;;  %vm696_vm2 = vweird.f32 %v6615_v63  ;;  %v6747_v51 = vsel %vm6714_vm13, %v672_v50, %v668_v0 }
 0x107   :  { %v683_v6 = vsel %vm6738_vm0, %v6605_v8, %v679_v14  ;;  %v707_v32 = vsub.f32 1.0, %v706_v47  ;;  %v714_v26 = vand.u32 2147483647, %v6549_v1  ;;  %vm6754_vm3 = vcmp.eq.f32.partialorder %v699_v35, 8.507059e+37  ;;  %vm6761_vm4 = vmor %vm695_vm1, %vm696_vm2 }
 0x108   :  { %v694_v2 = vadd.f32 %v6615_v63, %v693_v23  ;;  %v716_v58 = vand.u32 2147483648, %v6549_v1  ;;  %v721_v46 = vmul.f32 %v6633_v42, %v6560_v33  ;;  %v702_v4 = vor.u32 1.1754944e-38, %v701_v31 }
 0x109   :  { %v708_v8 = vmul.f32 %v6621_v27, %v707_v32  ;;  %vm710_vm5 = vweird.f32 %v6549_v1  ;;  %vm711_vm6 = vweird.f32 %v6621_v27  ;;  %v6770_v38 = vsel %vm6729_vm15, %v687_v3, %v683_v6 }
 0x10a   :  { %v698_v11 = vsel %vm6761_vm4, %v6615_v63, %v694_v2  ;;  %v722_v50 = vsub.f32 1.0, %v721_v46  ;;  %v729_v7 = vand.u32 2147483647, %v6560_v33  ;;  %vm6777_vm7 = vcmp.eq.f32.partialorder %v714_v26, 8.507059e+37  ;;  %vm6793_vm10 = vmor %vm710_vm5, %vm711_vm6 }
 0x10b   :  { %v709_v0 = vadd.f32 %v6621_v27, %v708_v8  ;;  %v731_v35 = vand.u32 2147483648, %v6560_v33  ;;  %v736_v14 = vmul.f32 %v6640_v37, %v6567_v22  ;;  %v717_v30 = vor.u32 1.1754944e-38, %v716_v58 }
 0x10c   :  { %v723_v31 = vmul.f32 %v6633_v42, %v722_v50  ;;  %vm725_vm8 = vweird.f32 %v6560_v33  ;;  %vm726_vm9 = vweird.f32 %v6633_v42  ;;  %v6789_v63 = vsel %vm6754_vm3, %v702_v4, %v698_v11 }
 0x10d   :  { %vm6797_vm11 = vcmp.eq.f32.partialorder %v729_v7, 8.507059e+37  ;;  %v737_v3 = vsub.f32 1.0, %v736_v14  ;;  %vm740_vm12 = vweird.f32 %v6567_v22  ;;  %v713_v23 = vsel %vm6793_vm10, %v6621_v27, %v709_v0  ;;  %vm6813_vm14 = vmor %vm725_vm8, %vm726_vm9 }
 0x10e   :  { %v724_v6 = vadd.f32 %v6633_v42, %v723_v31  ;;  %vm741_vm13 = vweird.f32 %v6640_v37  ;;  %v755_v1 = vrot.slane %v6377_v12, 4  ;;  %v732_v32 = vor.u32 1.1754944e-38, %v731_v35 }
 0x10f   :  { %v738_v26 = vmul.f32 %v6640_v37, %v737_v3  ;;  %v756_v2 = vrot.slane %v6377_v12, 5  ;;  %v757_v48 = vrot.slane %v6377_v12, 6  ;;  %v744_v27 = vand.u32 2147483647, %v6567_v22  ;;  %vm6836_vm15 = vmor %vm740_vm12, %vm741_vm13 }
 0x110   :  { %v746_v46 = vand.u32 2147483648, %v6567_v22  ;;  %v758_v54 = vrot.slane %v6377_v12, 7  ;;  %v767_v4 = vmul.f32 %v6377_v12, %v6494_v34  ;;  %v728_v8 = vsel %vm6813_vm14, %v6633_v42, %v724_v6  ;;  %v5518_v6 = vld [vmem:[#allocation2] sm:$0xff] }
 0x111   :  { %v739_v11 = vadd.f32 %v6640_v37, %v738_v26  ;;  %v11620_v33 = vrot.slane %v6377_v12, 1  ;;  %v769_v7 = vmul.f32 %v753_v59, %v6506_v44  ;;  %v770_v42 = vmul.f32 %v754_v53, %v6511_v28 }
 0x112   :  { %v771_v0 = vmul.f32 %v755_v1, %v6582_v49  ;;  %v773_v35 = vmul.f32 %v757_v48, %v6625_v24  ;;  %v774_v44 = vmul.f32 %v758_v54, %v6683_v39  ;;  %v775_v22 = vadd.f32 %v767_v4, %v6308_v13 }
 0x113   :  { %v768_v50 = vmul.f32 %v11620_v33, %v6499_v41  ;;  %v772_v41 = vmul.f32 %v756_v2, %v6584_v43  ;;  %v743_v59 = vsel %vm6836_vm15, %v6640_v37, %v739_v11  ;;  %v718_v12 = vsel %vm6777_vm7, %v717_v30, %v713_v23 }
 0x114   :  { %v747_v53 = vor.u32 1.1754944e-38, %v746_v46  ;;  %v777_v28 = vadd.f32 %v769_v7, %v6324_v9  ;;  %v778_v49 = vadd.f32 %v770_v42, %v6336_v16  ;;  %v733_v43 = vsel %vm6797_vm11, %v732_v32, %v728_v8 }
 0x115   :  { %v776_v14 = vadd.f32 %v768_v50, %v6317_v25  ;;  %vm745_vm0 = vcmp.eq.f32.partialorder %v744_v27, 8.507059e+37  ;;  %v779_v24 = vadd.f32 %v771_v0, %v6274_v55  ;;  %4942 = vtanh.f32 %v775_v22 }
 0x116   :  { %v748_v37 = vsel %vm745_vm0, %v747_v53, %v743_v59  ;;  %v780_v39 = vadd.f32 %v772_v41, %v6276_v56  ;;  %v781_v31 = vadd.f32 %v773_v35, %v6283_v60  ;;  %v782_v62 = vadd.f32 %v774_v44, %v6298_v5 }
 0x117   :  { %4944 = vtanh.f32 %v776_v14  ;;  %v791_v30 = vsub.f32 1.0, %v6702_v40  ;;  %v792_v47 = vsub.f32 1.0, %v6722_v45  ;;  %v793_v36 = vsub.f32 1.0, %v6747_v51 }
 0x118   :  { %4946 = vtanh.f32 %v777_v28  ;;  %v794_v3 = vsub.f32 1.0, %v6770_v38  ;;  %v795_v23 = vsub.f32 1.0, %v6789_v63  ;;  %v808_v1 = vrot.slane %v5518_v6, 1 }
 0x119   :  { %4948 = vtanh.f32 %v778_v49  ;;  %v809_v32 = vrot.slane %v5518_v6, 2  ;;  %v810_v26 = vrot.slane %v5518_v6, 3  ;;  %v811_v2 = vrot.slane %v5518_v6, 4 }
 0x11a   :  { %4950 = vtanh.f32 %v779_v24  ;;  %v812_v48 = vrot.slane %v5518_v6, 5  ;;  %v813_v58 = vrot.slane %v5518_v6, 6  ;;  %v796_v46 = vsub.f32 1.0, %v718_v12 }
 0x11b   :  { %4952 = vtanh.f32 %v780_v39  ;;  %v4943_v27 = vpop.eup %4942  ;;  %v797_v54 = vsub.f32 1.0, %v733_v43  ;;  %v814_v4 = vrot.slane %v5518_v6, 7  ;;  %v798_v11 = vsub.f32 1.0, %v748_v37 }
 0x11c   :  { %4954 = vtanh.f32 %v781_v31  ;;  %v799_v33 = vmul.f32 %v4943_v27, %v791_v30  ;;  %v823_v50 = vmul.f32 %v5518_v6, %v6702_v40  ;;  %v824_v42 = vmul.f32 %v808_v1, %v6722_v45 }
 0x11d   :  { %v4945_v8 = vpop.eup %4944  ;;  %4956 = vtanh.f32 %v782_v62  ;;  %v825_v0 = vmul.f32 %v809_v32, %v6747_v51  ;;  %v826_v41 = vmul.f32 %v810_v26, %v6770_v38  ;;  %v827_v44 = vmul.f32 %v811_v2, %v6789_v63 }
 0x11e   :  { %v4947_v7 = vpop.eup %4946  ;;  %v800_v34 = vmul.f32 %v4945_v8, %v792_v47  ;;  %v828_v22 = vmul.f32 %v812_v48, %v718_v12  ;;  %v829_v14 = vmul.f32 %v813_v58, %v733_v43  ;;  %v830_v49 = vmul.f32 %v814_v4, %v748_v37 }
 0x11f   :  { %v4949_v35 = vpop.eup %4948  ;;  %v801_v59 = vmul.f32 %v4947_v7, %v793_v36  ;;  %v6872_v24 = vadd.f32 %v823_v50, %v799_v33  ;;  %vm11489_vm1 = vcmask 1041409   ;;  %vm11488_vm2 = vcmask 1042434   ;;  %v6908_v33 = vld [vmem:[#allocation9 + $0x168] sm:$0xff]  ;;  %v6911_v50 = vld [vmem:[#allocation9 + $0x170] sm:$0xff]  ;;  %v6914_v7 = vld [vmem:[#allocation9 + $0x160] sm:$0xff] }
 0x120   :  { %v4951_v53 = vpop.eup %4950  ;;  %v802_v28 = vmul.f32 %v4949_v35, %v794_v3  ;;  %v6874_v40 = vadd.f32 %v824_v42, %v800_v34  ;;  %vm11487_vm3 = vcmask 1043459   ;;  %vm11486_vm4 = vcmask 1044484   ;;  %v6917_v34 = vld [vmem:[#allocation9 + $0x150] sm:$0xff]  ;;  %v6920_v42 = vld [vmem:[#allocation9 + $0x158] sm:$0xff]  ;;  %v6929_v35 = vld [vmem:[#allocation9 + $0x140] sm:$0xff] }
 0x121   :  { %11623 = vst [vmem:[#allocation44_spill] sm:$0xff] %v6872_v24  ;;  %v4953_v39 = vpop.eup %4952  ;;  %v803_v31 = vmul.f32 %v4951_v53, %v795_v23  ;;  %v6876_v45 = vadd.f32 %v825_v0, %v801_v59  ;;  %vm11485_vm5 = vcmask 1045509   ;;  %vm11482_vm6 = vcmask 1046534   ;;  %v6923_v0 = vld [vmem:[#allocation9 + $0x148] sm:$0xff]  ;;  %v6932_v59 = vld [vmem:[#allocation9 + $0x130] sm:$0xff] }
 0x122   :  { %11624 = vst [vmem:[#allocation45_spill] sm:$0xff] %v6874_v40  ;;  %v4955_v51 = vpop.eup %4954  ;;  %v804_v38 = vmul.f32 %v4953_v39, %v796_v46  ;;  %v6878_v62 = vadd.f32 %v826_v41, %v802_v28  ;;  %v11311_v63 = vrot.slane %v6874_v40, 7  ;;  %vm11375_vm7 = vcmask 1047559   ;;  %v6926_v41 = vld [vmem:[#allocation9 + $0x138] sm:$0xff]  ;;  %v6944_v53 = vld [vmem:[#allocation9 + $0x108] sm:$0xff]  ;;  %v6947_v28 = vld [vmem:[#allocation9 + $0x110] sm:$0xff] }
 0x123   :  { %11625 = vst [vmem:[#allocation46_spill] sm:$0xff] %v6876_v45  ;;  %v4957_v12 = vpop.eup %4956  ;;  %v805_v43 = vmul.f32 %v4955_v51, %v797_v54  ;;  %v6881_v37 = vadd.f32 %v827_v44, %v803_v31  ;;  %v850_v30 = vrot.slane %v6876_v45, 6  ;;  %v6935_v44 = vld [vmem:[#allocation9 + $0x120] sm:$0xff]  ;;  %v6953_v39 = vld [vmem:[#allocation9 + $0xf0] sm:$0xff]  ;;  %v6956_v31 = vld [vmem:[#allocation9 + $0xf8] sm:$0xff] }
 0x124   :  { %11626 = vst [vmem:[#allocation47_spill] sm:$0xff] %v6878_v62  ;;  %v806_v47 = vmul.f32 %v4957_v12, %v798_v11  ;;  %v6884_v36 = vadd.f32 %v828_v22, %v804_v38  ;;  %v849_v3 = vsel %vm11489_vm1, %v11311_v63, %v6872_v24  ;;  %v853_v23 = vrot.slane %v6878_v62, 5  ;;  %v6905_v11 = vld [vmem:[#allocation9 + $0x178] sm:$0xff]  ;;  %v6938_v22 = vld [vmem:[#allocation9 + $0x128] sm:$0xff]  ;;  %v6965_v12 = vld [vmem:[#allocation9 + $0xe0] sm:$0xff] }
 0x125   :  { %11627 = vst [vmem:[#allocation48_spill] sm:$0xff] %v6881_v37  ;;  %v6891_v6 = vadd.f32 %v829_v14, %v805_v43  ;;  %v852_v1 = vsel %vm11488_vm2, %v850_v30, %v849_v3  ;;  %v856_v32 = vrot.slane %v6881_v37, 4  ;;  %v6941_v14 = vld [vmem:[#allocation9 + $0x118] sm:$0xff]  ;;  %v6959_v51 = vld [vmem:[#allocation9 + $0xe8] sm:$0xff]  ;;  %v6968_v43 = vld [vmem:[#allocation9 + $0xd0] sm:$0xff] }
 0x126   :  { %11628 = vst [vmem:[#allocation49_spill] sm:$0xff] %v6884_v36  ;;  %v6895_v26 = vadd.f32 %v830_v49, %v806_v47  ;;  %v855_v2 = vsel %vm11487_vm3, %v853_v23, %v852_v1  ;;  %v859_v48 = vrot.slane %v6884_v36, 3  ;;  %v6950_v49 = vld [vmem:[#allocation9 + $0x100] sm:$0xff]  ;;  %v6962_v38 = vld [vmem:[#allocation9 + $0xd8] sm:$0xff]  ;;  %v6974_v47 = vld [vmem:[#allocation9 + $0xc8] sm:$0xff] }
 0x127   :  { %11629 = vst [vmem:[#allocation50_spill] sm:$0xff] %v6891_v6  ;;  %v858_v58 = vsel %vm11486_vm4, %v856_v32, %v855_v2  ;;  %v862_v27 = vrot.slane %v6891_v6, 2  ;;  %v6971_v30 = vld [vmem:[#allocation9 + $0xc0] sm:$0xff]  ;;  %v6977_v3 = vld [vmem:[#allocation9 + $0xb8] sm:$0xff]  ;;  %v6980_v23 = vld [vmem:[#allocation9 + $0xa8] sm:$0xff] }
 0x128   :  { %11630 = vst [vmem:[#allocation51_spill] sm:$0xff] %v6895_v26  ;;  %v861_v46 = vsel %vm11485_vm5, %v859_v48, %v858_v58  ;;  %v865_v54 = vrot.slane %v6895_v26, 1  ;;  %v6983_v1 = vld [vmem:[#allocation9 + $0xb0] sm:$0xff]  ;;  %v6986_v32 = vld [vmem:[#allocation9 + $0xa0] sm:$0xff]  ;;  %v6992_v48 = vld [vmem:[#allocation9 + $0x98] sm:$0xff] }
 0x129   :  { %v864_v4 = vsel %vm11482_vm6, %v862_v27, %v861_v46  ;;  %11631 = vst [vmem:[#allocation52_spill] sm:$0xff] %v6920_v42  ;;  %v6989_v2 = vld [vmem:[#allocation9 + $0x90] sm:$0xff]  ;;  %v6995_v58 = vld [vmem:[#allocation9 + $0x88] sm:$0xff]  ;;  %v6998_v27 = vld [vmem:[#allocation9 + $0x78] sm:$0xff] }
 0x12a   :  { %v867_v8 = vsel %vm11375_vm7, %v865_v54, %v864_v4  ;;  %11632 = vst [vmem:[#allocation53_spill] sm:$0xff] %v6923_v0  ;;  %v7001_v46 = vld [vmem:[#allocation9 + $0x80] sm:$0xff]  ;;  %v7004_v54 = vld [vmem:[#allocation9 + $0x70] sm:$0xff]  ;;  %v7013_v63 = vld [vmem:[#allocation9 + $0x58] sm:$0xff] }
 0x12b   :  { %885 = vmatmul.f32.vlgmr.msrb.gmra.mxu1 %v867_v8  ;;  %905 = vmatmul.f32.vlgmr.msrb.gmra.mxu2 %v867_v8  ;;  %11633 = vst [vmem:[#allocation54_spill] sm:$0xff] %v6926_v41  ;;  %v7007_v4 = vld [vmem:[#allocation9 + $0x60] sm:$0xff] }
 0x12c   :  { %925 = vmatmul.f32.vlgmr.msrb.gmra.mxu3 %v867_v8  ;;  %1955 = vmatpush.msrb.mxu1 %v6905_v11  ;;  %11634 = vst [vmem:[#allocation55_spill] sm:$0xff] %v6929_v35  ;;  %v7010_v8 = vld [vmem:[#allocation9 + $0x68] sm:$0xff] }
 0x12d   :  { %2438 = vmatpush.msrb.mxu2 %v6908_v33  ;;  %2458 = vmatpush.msrb.mxu3 %v6911_v50  ;;  %11635 = vst [vmem:[#allocation56_spill] sm:$0xff] %v6932_v59 }
 0x12e   :  { %1956 = vmatpush.msrb.mxu1 %v6914_v7  ;;  %11636 = vst [vmem:[#allocation57_spill] sm:$0xff] %v6935_v44 }
 0x12f   :  { %2439 = vmatpush.msrb.mxu2 %v6917_v34  ;;  %2459 = vmatpush.msrb.mxu3 %v6920_v42  ;;  %11637 = vst [vmem:[#allocation58_spill] sm:$0xff] %v6938_v22 }
 0x130   :  { %1957 = vmatpush.msrb.mxu1 %v6923_v0  ;;  %11638 = vst [vmem:[#allocation59_spill] sm:$0xff] %v6941_v14 }
 0x131   :  { %2440 = vmatpush.msrb.mxu2 %v6926_v41  ;;  %2460 = vmatpush.msrb.mxu3 %v6929_v35  ;;  %11639 = vst [vmem:[#allocation60_spill] sm:$0xff] %v6944_v53 }
 0x132   :  { %1958 = vmatpush.msrb.mxu1 %v6932_v59  ;;  %11640 = vst [vmem:[#allocation61_spill] sm:$0xff] %v6947_v28 }
 0x133   :  { %2441 = vmatpush.msrb.mxu2 %v6935_v44  ;;  %2461 = vmatpush.msrb.mxu3 %v6938_v22  ;;  %11641 = vst [vmem:[#allocation62_spill] sm:$0xff] %v6950_v49 }
 0x134   :  { %1959 = vmatpush.msrb.mxu1 %v6941_v14  ;;  %11642 = vst [vmem:[#allocation63_spill] sm:$0xff] %v6953_v39 }
 0x135   :  { %2442 = vmatpush.msrb.mxu2 %v6944_v53  ;;  %2462 = vmatpush.msrb.mxu3 %v6947_v28  ;;  %11643 = vst [vmem:[#allocation64_spill] sm:$0xff] %v6956_v31 }
 0x136   :  { %1960 = vmatpush.msrb.mxu1 %v6950_v49  ;;  %11644 = vst [vmem:[#allocation65_spill] sm:$0xff] %v6959_v51  ;;  %v11676_v49 = vld [vmem:[#allocation38_spill] sm:$0xff] }
 0x137   :  { %2443 = vmatpush.msrb.mxu2 %v6953_v39  ;;  %2463 = vmatpush.msrb.mxu3 %v6956_v31  ;;  %11645 = vst [vmem:[#allocation66_spill] sm:$0xff] %v6962_v38 }
 0x138   :  { %1961 = vmatpush.msrb.mxu1 %v6959_v51  ;;  %11646 = vst [vmem:[#allocation67_spill] sm:$0xff] %v6965_v12 }
 0x139   :  { %2444 = vmatpush.msrb.mxu2 %v6962_v38  ;;  %2464 = vmatpush.msrb.mxu3 %v6965_v12  ;;  %11647 = vst [vmem:[#allocation68_spill] sm:$0xff] %v6968_v43 }
 0x13a   :  { %1962 = vmatpush.msrb.mxu1 %v6968_v43  ;;  %11648 = vst [vmem:[#allocation69_spill] sm:$0xff] %v6971_v30  ;;  %v11675_v43 = vld [vmem:[#allocation26_spill] sm:$0xff] }
 0x13b   :  { %2445 = vmatpush.msrb.mxu2 %v6971_v30  ;;  %11649 = vst [vmem:[#allocation70_spill] sm:$0xff] %v6974_v47  ;;  %2465 = vmatpush.msrb.mxu3 %v6974_v47  ;;  %v11674_v30 = vld [vmem:[#allocation25_spill] sm:$0xff] }
 0x13c   :  { %11650 = vst [vmem:[#allocation71_spill] sm:$0xff] %v6977_v3  ;;  %1963 = vmatpush.msrb.mxu1 %v6977_v3 }
 0x13d   :  { %11651 = vst [vmem:[#allocation72_spill] sm:$0xff] %v6980_v23  ;;  %2446 = vmatpush.msrb.mxu2 %v6980_v23  ;;  %2466 = vmatpush.msrb.mxu3 %v6983_v1 }
 0x13e   :  { %11652 = vst [vmem:[#allocation73_spill] sm:$0xff] %v6983_v1  ;;  %1964 = vmatpush.msrb.mxu1 %v6986_v32 }
 0x13f   :  { %11653 = vst [vmem:[#allocation74_spill] sm:$0xff] %v6986_v32  ;;  %2447 = vmatpush.msrb.mxu2 %v6989_v2  ;;  %2467 = vmatpush.msrb.mxu3 %v6992_v48 }
 0x140   :  { %11654 = vst [vmem:[#allocation75_spill] sm:$0xff] %v6989_v2  ;;  %1965 = vmatpush.msrb.mxu1 %v6995_v58 }
 0x141   :  { %11655 = vst [vmem:[#allocation76_spill] sm:$0xff] %v6992_v48  ;;  %2448 = vmatpush.msrb.mxu2 %v6998_v27  ;;  %2468 = vmatpush.msrb.mxu3 %v7001_v46 }
 0x142   :  { %11656 = vst [vmem:[#allocation77_spill] sm:$0xff] %v6995_v58  ;;  %1966 = vmatpush.msrb.mxu1 %v7004_v54 }
 0x143   :  { %11657 = vst [vmem:[#allocation78_spill] sm:$0xff] %v6998_v27  ;;  %2449 = vmatpush.msrb.mxu2 %v7007_v4  ;;  %2469 = vmatpush.msrb.mxu3 %v7010_v8  ;;  %v7016_v27 = vld [vmem:[#allocation9 + $0x48] sm:$0xff] }
 0x144   :  { %11658 = vst [vmem:[#allocation79_spill] sm:$0xff] %v7001_v46  ;;  %1967 = vmatpush.msrb.mxu1 %v7013_v63  ;;  %v7019_v46 = vld [vmem:[#allocation9 + $0x50] sm:$0xff] }
 0x145   :  { %11659 = vst [vmem:[#allocation80_spill] sm:$0xff] %v7004_v54  ;;  %2450 = vmatpush.msrb.mxu2 %v7016_v27  ;;  %2470 = vmatpush.msrb.mxu3 %v7019_v46  ;;  %v7022_v54 = vld [vmem:[#allocation9 + $0x40] sm:$0xff] }
 0x146   :  { %11660 = vst [vmem:[#allocation81_spill] sm:$0xff] %v7007_v4  ;;  %1968 = vmatpush.msrb.mxu1 %v7022_v54  ;;  %v7025_v4 = vld [vmem:[#allocation9 + $0x30] sm:$0xff] }
 0x147   :  { %11661 = vst [vmem:[#allocation82_spill] sm:$0xff] %v7010_v8  ;;  %2451 = vmatpush.msrb.mxu2 %v7025_v4  ;;  %v7028_v8 = vld [vmem:[#allocation9 + $0x38] sm:$0xff] }
 0x148   :  { %11662 = vst [vmem:[#allocation83_spill] sm:$0xff] %v7013_v63  ;;  %2471 = vmatpush.msrb.mxu3 %v7028_v8  ;;  %v7031_v63 = vld [vmem:[#allocation9 + $0x28] sm:$0xff] }
 0x149   :  { %11663 = vst [vmem:[#allocation84_spill] sm:$0xff] %v7016_v27  ;;  %1969 = vmatpush.msrb.mxu1 %v7031_v63  ;;  %v7034_v27 = vld [vmem:[#allocation9 + $0x18] sm:$0xff] }
 0x14a   :  { %11664 = vst [vmem:[#allocation85_spill] sm:$0xff] %v7019_v46  ;;  %2452 = vmatpush.msrb.mxu2 %v7034_v27  ;;  %v7037_v46 = vld [vmem:[#allocation9 + $0x20] sm:$0xff] }
 0x14b   :  { %11665 = vst [vmem:[#allocation86_spill] sm:$0xff] %v7022_v54  ;;  %2472 = vmatpush.msrb.mxu3 %v7037_v46  ;;  %v7040_v54 = vld [vmem:[#allocation9 + $0x10] sm:$0xff] }
 0x14c   :  { %11666 = vst [vmem:[#allocation87_spill] sm:$0xff] %v7025_v4  ;;  %1970 = vmatpush.msrb.mxu1 %v7040_v54  ;;  %v7043_v4 = vld [vmem:[#allocation9] sm:$0xff] }
 0x14d   :  { %11667 = vst [vmem:[#allocation88_spill] sm:$0xff] %v7028_v8  ;;  %2453 = vmatpush.msrb.mxu2 %v7043_v4  ;;  %v7046_v8 = vld [vmem:[#allocation9 + $0x8] sm:$0xff] }
 0x14e   :  { %11668 = vst [vmem:[#allocation89_spill] sm:$0xff] %v7031_v63  ;;  %2473 = vmatpush.msrb.mxu3 %v7046_v8 }
 0x14f   :  { %11669 = vst [vmem:[#allocation90_spill] sm:$0xff] %v7034_v27 }
 0x150   :  { %11670 = vst [vmem:[#allocation91_spill] sm:$0xff] %v7037_v46 }
 0x151   :  { %11671 = vst [vmem:[#allocation92_spill] sm:$0xff] %v7040_v54 }
 0x152   :  { %11672 = vst [vmem:[#allocation93_spill] sm:$0xff] %v7043_v4 }
 0x153   :  { %11673 = vst [vmem:[#allocation94_spill] sm:$0xff] %v7046_v8 }
 0x1a8   :  { %v886_v63 = vpop.f32.mrf.mxu1 }
 0x1a9   :  { %v930_v58 = vrot.slane %v886_v63, 7  ;;  %v931_v48 = vrot.slane %v886_v63, 1  ;;  %v932_v27 = vrot.slane %v886_v63, 2  ;;  %v933_v2 = vrot.slane %v886_v63, 3 }
 0x1aa   :  { %v934_v32 = vrot.slane %v886_v63, 4  ;;  %v935_v1 = vrot.slane %v886_v63, 5  ;;  %v936_v46 = vrot.slane %v886_v63, 6  ;;  %v946_v23 = vadd.f32 %v886_v63, %v6237_v19 }
 0x1ab   :  { %v945_v54 = vadd.f32 %v930_v58, %v6234_v18  ;;  %v947_v3 = vadd.f32 %v931_v48, %v6240_v20  ;;  %v948_v4 = vadd.f32 %v932_v27, %v6243_v21  ;;  %v949_v47 = vadd.f32 %v933_v2, %v6231_v17 }
 0x1ac   :  { %v950_v8 = vadd.f32 %v934_v32, %v11674_v30  ;;  %v951_v12 = vadd.f32 %v935_v1, %v11675_v43  ;;  %v4752_v38 = vmul.f32 -1.442695, %v946_v23  ;;  %v952_v28 = vadd.f32 %v936_v46, %v11676_v49  ;;  %v11678_v43 = vld [vmem:[#allocation36_spill] sm:$0xff] }
 0x1ad   :  { %v4751_v51 = vmul.f32 -1.442695, %v945_v54  ;;  %v4753_v31 = vmul.f32 -1.442695, %v947_v3  ;;  %v4754_v39 = vmul.f32 -1.442695, %v948_v4 }
 0x1ae   :  { %4958 = vpow2.f32 %v4752_v38  ;;  %v4755_v63 = vmul.f32 -1.442695, %v949_v47  ;;  %v906_v19 = vpop.f32.mrf.mxu2  ;;  %v4756_v58 = vmul.f32 -1.442695, %v950_v8  ;;  %v4757_v27 = vmul.f32 -1.442695, %v951_v12 }
 0x1af   :  { %4960 = vpow2.f32 %v4751_v51  ;;  %v1106_v48 = vrot.slane %v906_v19, 7  ;;  %v4758_v2 = vmul.f32 -1.442695, %v952_v28  ;;  %v1107_v51 = vrot.slane %v906_v19, 1  ;;  %v926_v14 = vpop.f32.mrf.mxu3 }
 0x1b0   :  { %4962 = vpow2.f32 %v4753_v31  ;;  %v1109_v12 = vrot.slane %v906_v19, 3  ;;  %v1110_v4 = vrot.slane %v906_v19, 4  ;;  %v1112_v38 = vrot.slane %v906_v19, 6 }
 0x1b1   :  { %4964 = vpow2.f32 %v4754_v39  ;;  %v1121_v1 = vadd.f32 %v1106_v48, %v6270_v52  ;;  %v1108_v39 = vrot.slane %v906_v19, 2 }
 0x1b2   :  { %4966 = vpow2.f32 %v4755_v63  ;;  %v1125_v30 = vadd.f32 %v1109_v12, %v11678_v43 }
 0x1b3   :  { %4968 = vpow2.f32 %v4756_v58  ;;  %v4759_v8 = vmul.f32 -1.442695, %v1121_v1  ;;  %v1123_v1 = vadd.f32 %v1107_v51, %v6286_v61 }
 0x1b4   :  { %v4959_v23 = vpop.eup %4958  ;;  %4970 = vpow2.f32 %v4757_v27  ;;  %v1111_v27 = vrot.slane %v906_v19, 5 }
 0x1b5   :  { %v4961_v3 = vpop.eup %4960  ;;  %v7060_v47 = vadd.f32 1.0, %v4959_v23  ;;  %4972 = vpow2.f32 %v4758_v2  ;;  %v1126_v23 = vadd.f32 %v1110_v4, %v6331_v29  ;;  %v4761_v52 = vmul.f32 -1.442695, %v1123_v1 }
 0x1b6   :  { %v4963_v46 = vpop.eup %4962  ;;  %v7062_v31 = vadd.f32 1.0, %v4961_v3 }
 0x1b7   :  { %v4965_v28 = vpop.eup %4964  ;;  %v7064_v54 = vadd.f32 1.0, %v4963_v46  ;;  %4974 = vrcp.f32 %v7060_v47  ;;  %v1122_v46 = vadd.f32 %v906_v19, %v6279_v57  ;;  %v1127_v19 = vadd.f32 %v1111_v27, %v6334_v15 }
 0x1b8   :  { %v4967_v63 = vpop.eup %4966  ;;  %v7068_v48 = vadd.f32 1.0, %v4965_v28  ;;  %4976 = vrcp.f32 %v7062_v31  ;;  %v11677_v28 = vld [vmem:[#allocation33_spill] sm:$0xff]  ;;  %v4763_v15 = vmul.f32 -1.442695, %v1125_v30  ;;  %v4764_v29 = vmul.f32 -1.442695, %v1126_v23 }
 0x1b9   :  { %v4969_v2 = vpop.eup %4968  ;;  %v7072_v3 = vadd.f32 1.0, %v4967_v63  ;;  %4978 = vrcp.f32 %v7064_v54  ;;  %v1124_v58 = vadd.f32 %v1108_v39, %v11677_v28  ;;  %v1128_v39 = vadd.f32 %v1112_v38, %v6383_v10 }
 0x1ba   :  { %v4971_v32 = vpop.eup %4970  ;;  %4980 = vpow2.f32 %v4759_v8  ;;  %v7082_v17 = vadd.f32 1.0, %v4969_v2  ;;  %v4760_v12 = vmul.f32 -1.442695, %v1122_v46  ;;  %v996_v8 = vand.u32 2147483648, %v7062_v31 }
 0x1bb   :  { %v4973_v63 = vpop.eup %4972  ;;  %4982 = vrcp.f32 %v7068_v48  ;;  %v7089_v51 = vadd.f32 1.0, %v4971_v32  ;;  %v4762_v27 = vmul.f32 -1.442695, %v1124_v58  ;;  %v1009_v32 = vand.u32 2147483647, %v7060_v47 }
 0x1bc   :  { %4984 = vrcp.f32 %v7072_v3  ;;  %v994_v38 = vand.u32 2147483647, %v7062_v31  ;;  %v1011_v10 = vand.u32 2147483648, %v7060_v47  ;;  %v7106_v61 = vadd.f32 1.0, %v4973_v63 }
 0x1bd   :  { %v7087_v57 = vpop.eup %4974  ;;  %4986 = vrcp.f32 %v7082_v17  ;;  %vm990_vm8 = vweird.f32 %v7062_v31  ;;  %v997_v23 = vor.u32 1.1754944e-38, %v996_v8  ;;  %vm1005_vm9 = vweird.f32 %v7060_v47 }
 0x1be   :  { %v7093_v4 = vpop.eup %4976  ;;  %v1001_v2 = vmul.f32 %v7087_v57, %v7060_v47  ;;  %4988 = vrcp.f32 %v7089_v51  ;;  %vm7121_vm10 = vcmp.eq.f32.partialorder %v994_v38, 8.507059e+37  ;;  %v1012_v20 = vor.u32 1.1754944e-38, %v1011_v10 }
 0x1bf   :  { %v986_v49 = vmul.f32 %v7093_v4, %v7062_v31  ;;  %v7101_v43 = vpop.eup %4978  ;;  %4990 = vpow2.f32 %v4760_v12  ;;  %v1026_v8 = vand.u32 2147483648, %v7064_v54  ;;  %v1041_v53 = vand.u32 2147483648, %v7068_v48 }
 0x1c0   :  { %v1002_v46 = vsub.f32 1.0, %v1001_v2  ;;  %v4981_v28 = vpop.eup %4980  ;;  %v1016_v1 = vmul.f32 %v7101_v43, %v7064_v54  ;;  %4992 = vpow2.f32 %v4761_v52  ;;  %v4765_v12 = vmul.f32 -1.442695, %v1127_v19 }
 0x1c1   :  { %v987_v58 = vsub.f32 1.0, %v986_v49  ;;  %v7111_v30 = vpop.eup %4982  ;;  %vm7127_vm11 = vcmp.eq.f32.partialorder %v1009_v32, 8.507059e+37  ;;  %4994 = vrcp.f32 %v7106_v61  ;;  %vm991_vm12 = vweird.f32 %v7093_v4 }
 0x1c2   :  { %v7115_v2 = vpop.eup %4984  ;;  %v1003_v63 = vmul.f32 %v7087_v57, %v1002_v46  ;;  %v1031_v49 = vmul.f32 %v7111_v30, %v7068_v48  ;;  %v1017_v46 = vsub.f32 1.0, %v1016_v1  ;;  %vm1020_vm13 = vweird.f32 %v7064_v54  ;;  %vm7162_vm0 = vmor %vm990_vm8, %vm991_vm12 }
 0x1c3   :  { %v988_v21 = vmul.f32 %v7093_v4, %v987_v58  ;;  %v1046_v52 = vmul.f32 %v7115_v2, %v7072_v3  ;;  %v7134_v38 = vpop.eup %4986  ;;  %4996 = vpow2.f32 %v4762_v27  ;;  %v7139_v19 = vadd.f32 1.0, %v4981_v28 }
 0x1c4   :  { %v1032_v58 = vsub.f32 1.0, %v1031_v49  ;;  %v7141_v32 = vpop.eup %4988  ;;  %v1004_v1 = vadd.f32 %v7087_v57, %v1003_v63  ;;  %vm1006_vm14 = vweird.f32 %v7087_v57  ;;  %vm1035_vm15 = vweird.f32 %v7068_v48 }
 0x1c5   :  { %v989_v10 = vadd.f32 %v7093_v4, %v988_v21  ;;  %4998 = vpow2.f32 %v4763_v15  ;;  %v7149_v21 = vld [vmem:[%s11296_s5] ss:$0 sm:$0xff]  ;;  %v4991_v27 = vpop.eup %4990  ;;  %v7154_v28 = vor.u32 1.1754944e-38, %v1026_v8  ;;  %v7156_v44 = vor.u32 1.1754944e-38, %v1041_v53  ;;  %vm7172_vm7 = vmor %vm1005_vm9, %vm1006_vm14 }
 0x1c6   :  { %11683 = vst [vmem:[#allocation95_spill] sm:$0xff] %v7149_v21  ;;  %v7152_v49 = vadd.f32 %v7149_v21, %v926_v14  ;;  %5000 = vpow2.f32 %v4764_v29  ;;  %v4766_v63 = vmul.f32 -1.442695, %v1128_v39  ;;  %v4993_v59 = vpop.eup %4992  ;;  %v1018_v35 = vmul.f32 %v7101_v43, %v1017_v46 }
 0x1c7   :  { %v1033_v14 = vmul.f32 %v7111_v30, %v1032_v58  ;;  %v1047_v21 = vsub.f32 1.0, %v1046_v52  ;;  %5002 = vpow2.f32 %v4765_v12  ;;  %v1061_v53 = vmul.f32 %v7134_v38, %v7082_v17  ;;  %v7184_v8 = vpop.eup %4994 }
 0x1c8   :  { %v1076_v31 = vmul.f32 %v7141_v32, %v7089_v51  ;;  %5004 = vrcp.f32 %v7139_v19  ;;  %v993_v39 = vsel %vm7162_vm0, %v7093_v4, %v989_v10  ;;  %vm1021_vm8 = vweird.f32 %v7101_v43 }
 0x1c9   :  { %v7187_v47 = vadd.f32 1.0, %v4991_v27  ;;  %v1008_v12 = vsel %vm7172_vm7, %v7087_v57, %v1004_v1  ;;  %v1283_v46 = vrot.slane %v7152_v49, 7  ;;  %v4997_v58 = vpop.eup %4996  ;;  %vm1036_vm9 = vweird.f32 %v7111_v30  ;;  %vm7210_vm7 = vmor %vm1020_vm13, %vm1021_vm8 }
 0x1ca   :  { %vm1050_vm12 = vweird.f32 %v7072_v3  ;;  %5006 = vpow2.f32 %v4766_v63  ;;  %v7195_v52 = vadd.f32 1.0, %v4993_v59  ;;  %v1048_v27 = vmul.f32 %v7115_v2, %v1047_v21 }
 0x1cb   :  { %v4999_v10 = vpop.eup %4998  ;;  %v998_v15 = vsel %vm7121_vm10, %v997_v23, %v993_v39  ;;  %v1019_v57 = vadd.f32 %v7101_v43, %v1018_v35  ;;  %v1034_v1 = vadd.f32 %v7111_v30, %v1033_v14  ;;  %v1062_v41 = vsub.f32 1.0, %v1061_v53  ;;  %vm7225_vm10 = vmor %vm1035_vm15, %vm1036_vm9 }
 0x1cc   :  { %v5001_v29 = vpop.eup %5000  ;;  %v1077_v0 = vsub.f32 1.0, %v1076_v31  ;;  %v1013_v63 = vsel %vm7127_vm11, %v1012_v20, %v1008_v12  ;;  %v7214_v35 = vadd.f32 1.0, %v4997_v58  ;;  %5008 = vrcp.f32 %v7187_v47 }
 0x1cd   :  { %v5003_v42 = vpop.eup %5002  ;;  %v1024_v23 = vand.u32 2147483647, %v7064_v54  ;;  %v1039_v22 = vand.u32 2147483647, %v7068_v48  ;;  %v7229_v14 = vadd.f32 1.0, %v4999_v10  ;;  %5010 = vrcp.f32 %v7195_v52 }
 0x1ce   :  { %v7219_v20 = vpop.eup %5004  ;;  %v7233_v31 = vmul.f32 %v1283_v46, %v998_v15  ;;  %v7235_v54 = vadd.f32 1.0, %v5001_v29  ;;  %v1023_v39 = vsel %vm7210_vm7, %v7101_v43, %v1019_v57  ;;  %v1038_v48 = vsel %vm7225_vm10, %v7111_v30, %v1034_v1 }
 0x1cf   :  { %v1049_v12 = vadd.f32 %v7115_v2, %v1048_v27  ;;  %v7244_v10 = vadd.f32 1.0, %v5003_v42  ;;  %v1162_v53 = vmul.f32 %v7219_v20, %v7139_v19  ;;  %vm1051_vm11 = vweird.f32 %v7115_v2 }
 0x1d0   :  { %v5007_v58 = vpop.eup %5006  ;;  %v1063_v46 = vmul.f32 %v7134_v38, %v1062_v41  ;;  %5012 = vrcp.f32 %v7214_v35  ;;  %v7252_v43 = vmul.f32 %v7152_v49, %v1013_v63  ;;  %vm1025_vm13 = vcmp.eq.f32.partialorder %v1024_v23, 8.507059e+37  ;;  %vm7269_vm15 = vmor %vm1050_vm12, %vm1051_vm11 }
 0x1d1   :  { %vm1040_vm14 = vcmp.eq.f32.partialorder %v1039_v22, 8.507059e+37  ;;  %5014 = vrcp.f32 %v7229_v14  ;;  %v7256_v30 = vsel %vm1025_vm13, %v7154_v28, %v1023_v39  ;;  %v1078_v27 = vmul.f32 %v7141_v32, %v1077_v0 }
 0x1d2   :  { %v7259_v42 = vsel %vm1040_vm14, %v7156_v44, %v1038_v48  ;;  %v7262_v15 = vpop.eup %5008  ;;  %v7264_v41 = vadd.f32 1.0, %v5007_v58  ;;  %5016 = vrcp.f32 %v7235_v54  ;;  %v1054_v28 = vand.u32 2147483647, %v7072_v3 }
 0x1d3   :  { %v1056_v1 = vand.u32 2147483648, %v7072_v3  ;;  %v7275_v44 = vpop.eup %5010  ;;  %v1163_v29 = vsub.f32 1.0, %v1162_v53  ;;  %5018 = vrcp.f32 %v7244_v10  ;;  %v1053_v0 = vsel %vm7269_vm15, %v7115_v2, %v1049_v12 }
 0x1d4   :  { %v1064_v63 = vadd.f32 %v7134_v38, %v1063_v46  ;;  %vm1066_vm0 = vweird.f32 %v7134_v38  ;;  %v1069_v18 = vand.u32 2147483647, %v7082_v17  ;;  %v1071_v23 = vand.u32 2147483648, %v7082_v17 }
 0x1d5   :  { %v1091_v3 = vmul.f32 %v7184_v8, %v7106_v61  ;;  %v1177_v22 = vmul.f32 %v7262_v15, %v7187_v47  ;;  %v1079_v21 = vadd.f32 %v7141_v32, %v1078_v27  ;;  %vm1081_vm8 = vweird.f32 %v7141_v32 }
 0x1d6   :  { %v1084_v2 = vand.u32 2147483647, %v7089_v51  ;;  %v7292_v53 = vpop.eup %5012  ;;  %v1057_v39 = vor.u32 1.1754944e-38, %v1056_v1  ;;  %vm1065_vm9 = vweird.f32 %v7082_v17  ;;  %v1086_v48 = vand.u32 2147483648, %v7089_v51 }
 0x1d7   :  { %v1092_v12 = vsub.f32 1.0, %v1091_v3  ;;  %v7296_v58 = vpop.eup %5014  ;;  %5020 = vrcp.f32 %v7264_v41  ;;  %vm1055_vm12 = vcmp.eq.f32.partialorder %v1054_v28, 8.507059e+37  ;;  %vm7301_vm7 = vmor %vm1065_vm9, %vm1066_vm0  ;;  %vm1080_vm10 = vweird.f32 %v7089_v51 }
 0x1d8   :  { %v1164_v27 = vmul.f32 %v7219_v20, %v1163_v29  ;;  %v7307_v57 = vpop.eup %5016  ;;  %v7309_v17 = vsel %vm1055_vm12, %v1057_v39, %v1053_v0  ;;  %v1068_v1 = vsel %vm7301_vm7, %v7134_v38, %v1064_v63  ;;  %vm7314_vm11 = vcmp.eq.f32.partialorder %v1069_v18, 8.507059e+37  ;;  %vm7320_vm13 = vmor %vm1080_vm10, %vm1081_vm8 }
 0x1d9   :  { %v1072_v3 = vor.u32 1.1754944e-38, %v1071_v23  ;;  %v7324_v51 = vpop.eup %5018  ;;  %v1083_v29 = vsel %vm7320_vm13, %v7141_v32, %v1079_v21  ;;  %vm7329_vm14 = vcmp.eq.f32.partialorder %v1084_v2, 8.507059e+37  ;;  %v1093_v38 = vmul.f32 %v7184_v8, %v1092_v12 }
 0x1da   :  { %v1178_v63 = vsub.f32 1.0, %v1177_v22  ;;  %v1087_v18 = vor.u32 1.1754944e-38, %v1086_v48  ;;  %v1099_v23 = vand.u32 2147483647, %v7106_v61  ;;  %v1101_v39 = vand.u32 2147483648, %v7106_v61 }
 0x1db   :  { %vm1167_vm15 = vweird.f32 %v7219_v20  ;;  %v1165_v46 = vadd.f32 %v7219_v20, %v1164_v27  ;;  %v1170_v4 = vand.u32 2147483647, %v7139_v19  ;;  %v1192_v59 = vmul.f32 %v7275_v44, %v7195_v52 }
 0x1dc   :  { %v1179_v32 = vmul.f32 %v7262_v15, %v1178_v63  ;;  %v7344_v21 = vsel %vm7314_vm11, %v1072_v3, %v1068_v1  ;;  %vm1095_vm0 = vweird.f32 %v7106_v61  ;;  %vm1096_vm8 = vweird.f32 %v7184_v8 }
 0x1dd   :  { %v1172_v22 = vand.u32 2147483648, %v7139_v19  ;;  %v7349_v2 = vpop.eup %5020  ;;  %v7353_v48 = vsel %vm7329_vm14, %v1087_v18, %v1083_v29  ;;  %v1094_v12 = vadd.f32 %v7184_v8, %v1093_v38  ;;  %vm1166_vm9 = vweird.f32 %v7139_v19  ;;  %vm7379_vm13 = vmor %vm1095_vm0, %vm1096_vm8 }
 0x1de   :  { %v1193_v27 = vsub.f32 1.0, %v1192_v59  ;;  %vm7357_vm12 = vcmp.eq.f32.partialorder %v1099_v23, 8.507059e+37  ;;  %v1102_v28 = vor.u32 1.1754944e-38, %v1101_v39  ;;  %vm7363_vm7 = vmor %vm1166_vm9, %vm1167_vm15  ;;  %v1185_v0 = vand.u32 2147483647, %v7187_v47 }
 0x1df   :  { %v1207_v29 = vmul.f32 %v7292_v53, %v7214_v35  ;;  %v1169_v19 = vsel %vm7363_vm7, %v7219_v20, %v1165_v46  ;;  %vm1171_vm10 = vcmp.eq.f32.partialorder %v1170_v4, 8.507059e+37  ;;  %v1180_v38 = vadd.f32 %v7262_v15, %v1179_v32 }
 0x1e0   :  { %vm1182_vm11 = vweird.f32 %v7262_v15  ;;  %v1173_v18 = vor.u32 1.1754944e-38, %v1172_v22  ;;  %v1187_v23 = vand.u32 2147483648, %v7187_v47  ;;  %v1194_v39 = vmul.f32 %v7275_v44, %v1193_v27 }
 0x1e1   :  { %v1208_v59 = vsub.f32 1.0, %v1207_v29  ;;  %v1098_v4 = vsel %vm7379_vm13, %v7184_v8, %v1094_v12  ;;  %vm1181_vm14 = vweird.f32 %v7187_v47  ;;  %vm1196_vm15 = vweird.f32 %v7195_v52 }
 0x1e2   :  { %v1222_v61 = vmul.f32 %v7296_v58, %v7229_v14  ;;  %v7392_v20 = vsel %vm1171_vm10, %v1173_v18, %v1169_v19  ;;  %vm7394_vm0 = vmor %vm1181_vm14, %vm1182_vm11  ;;  %vm1186_vm8 = vcmp.eq.f32.partialorder %v1185_v0, 8.507059e+37  ;;  %v1200_v32 = vand.u32 2147483647, %v7195_v52 }
 0x1e3   :  { %v1209_v22 = vmul.f32 %v7292_v53, %v1208_v59  ;;  %v1184_v8 = vsel %vm7394_vm0, %v7262_v15, %v1180_v38  ;;  %v1202_v47 = vand.u32 2147483648, %v7195_v52  ;;  %v1215_v12 = vand.u32 2147483647, %v7214_v35 }
 0x1e4   :  { %v1223_v27 = vsub.f32 1.0, %v1222_v61  ;;  %v1188_v3 = vor.u32 1.1754944e-38, %v1187_v23  ;;  %v1195_v29 = vadd.f32 %v7275_v44, %v1194_v39  ;;  %vm1197_vm9 = vweird.f32 %v7275_v44 }
 0x1e5   :  { %v1237_v0 = vmul.f32 %v7307_v57, %v7235_v54  ;;  %v1103_v19 = vsel %vm7357_vm12, %v1102_v28, %v1098_v4  ;;  %v1210_v63 = vadd.f32 %v7292_v53, %v1209_v22  ;;  %vm1212_vm7 = vweird.f32 %v7292_v53  ;;  %vm7424_vm13 = vmor %vm1196_vm15, %vm1197_vm9 }
 0x1e6   :  { %v1224_v15 = vmul.f32 %v7296_v58, %v1223_v27  ;;  %v7414_v38 = vsel %vm1186_vm8, %v1188_v3, %v1184_v8  ;;  %vm7416_vm10 = vcmp.eq.f32.partialorder %v1200_v32, 8.507059e+37  ;;  %vm1211_vm11 = vweird.f32 %v7214_v35 }
 0x1e7   :  { %v1217_v23 = vand.u32 2147483648, %v7214_v35  ;;  %v1203_v28 = vor.u32 1.1754944e-38, %v1202_v47  ;;  %vm7428_vm12 = vcmp.eq.f32.partialorder %v1215_v12, 8.507059e+37  ;;  %v1232_v59 = vand.u32 2147483648, %v7229_v14  ;;  %vm7438_vm14 = vmor %vm1211_vm11, %vm1212_vm7 }
 0x1e8   :  { %v1252_v4 = vmul.f32 %v7324_v51, %v7244_v10  ;;  %v1199_v35 = vsel %vm7424_vm13, %v7275_v44, %v1195_v29  ;;  %vm1227_vm15 = vweird.f32 %v7296_v58  ;;  %v1230_v61 = vand.u32 2147483647, %v7229_v14 }
 0x1e9   :  { %v1238_v46 = vsub.f32 1.0, %v1237_v0  ;;  %v1214_v32 = vsel %vm7438_vm14, %v7292_v53, %v1210_v63  ;;  %v1225_v22 = vadd.f32 %v7296_v58, %v1224_v15  ;;  %v1247_v8 = vand.u32 2147483648, %v7235_v54 }
 0x1ea   :  { %v1253_v47 = vsub.f32 1.0, %v1252_v4  ;;  %v1218_v12 = vor.u32 1.1754944e-38, %v1217_v23  ;;  %vm1226_vm0 = vweird.f32 %v7229_v14  ;;  %v1245_v44 = vand.u32 2147483647, %v7235_v54 }
 0x1eb   :  { %v1267_v27 = vmul.f32 %v7349_v2, %v7264_v41  ;;  %v7455_v3 = vsel %vm7416_vm10, %v1203_v28, %v1199_v35  ;;  %v1233_v29 = vor.u32 1.1754944e-38, %v1232_v59  ;;  %vm1241_vm8 = vweird.f32 %v7235_v54  ;;  %vm7465_vm7 = vmor %vm1226_vm0, %vm1227_vm15 }
 0x1ec   :  { %vm1242_vm9 = vweird.f32 %v7307_v57  ;;  %v7461_v53 = vsel %vm7428_vm12, %v1218_v12, %v1214_v32  ;;  %vm7469_vm11 = vcmp.eq.f32.partialorder %v1230_v61, 8.507059e+37  ;;  %v1239_v63 = vmul.f32 %v7307_v57, %v1238_v46 }
 0x1ed   :  { %v1254_v15 = vmul.f32 %v7324_v51, %v1253_v47  ;;  %v1268_v18 = vsub.f32 1.0, %v1267_v27  ;;  %v1229_v23 = vsel %vm7465_vm7, %v7296_v58, %v1225_v22  ;;  %v1248_v1 = vor.u32 1.1754944e-38, %v1247_v8  ;;  %vm7515_vm15 = vmor %vm1241_vm8, %vm1242_vm9 }
 0x1ee   :  { %vm1256_vm10 = vweird.f32 %v7244_v10  ;;  %vm1257_vm13 = vweird.f32 %v7324_v51  ;;  %vm7480_vm12 = vcmp.eq.f32.partialorder %v1245_v44, 8.507059e+37  ;;  %v1260_v39 = vand.u32 2147483647, %v7244_v10 }
 0x1ef   :  { %v1262_v59 = vand.u32 2147483648, %v7244_v10  ;;  %v1269_v4 = vmul.f32 %v7349_v2, %v1268_v18  ;;  %v1287_v35 = vrot.slane %v7152_v49, 4  ;;  %v1288_v52 = vrot.slane %v7152_v49, 5  ;;  %vm7529_vm7 = vmor %vm1256_vm10, %vm1257_vm13 }
 0x1f0   :  { %v11724_v58 = vrot.slane %v7152_v49, 1  ;;  %v11725_v46 = vrot.slane %v7152_v49, 2  ;;  %v11726_v22 = vrot.slane %v7152_v49, 3  ;;  %v1240_v47 = vadd.f32 %v7307_v57, %v1239_v63 }
 0x1f1   :  { %v1255_v12 = vadd.f32 %v7324_v51, %v1254_v15  ;;  %v1289_v44 = vrot.slane %v7152_v49, 6  ;;  %v1303_v27 = vmul.f32 %v1287_v35, %v7344_v21  ;;  %v1304_v14 = vmul.f32 %v1288_v52, %v7353_v48 }
 0x1f2   :  { %v1300_v61 = vmul.f32 %v11724_v58, %v7256_v30  ;;  %v1301_v32 = vmul.f32 %v11725_v46, %v7259_v42  ;;  %v1302_v8 = vmul.f32 %v11726_v22, %v7309_v17  ;;  %v1306_v30 = vadd.f32 %v7233_v31, %v6308_v13 }
 0x1f3   :  { %v1307_v42 = vadd.f32 %v7252_v43, %v6317_v25  ;;  %v1270_v17 = vadd.f32 %v7349_v2, %v1269_v4  ;;  %vm1272_vm14 = vweird.f32 %v7349_v2  ;;  %v1305_v63 = vmul.f32 %v1289_v44, %v1103_v19 }
 0x1f4   :  { %v1308_v18 = vadd.f32 %v1300_v61, %v6324_v9  ;;  %v1309_v15 = vadd.f32 %v1301_v32, %v6336_v16  ;;  %vm1271_vm0 = vweird.f32 %v7264_v41  ;;  %v1277_v31 = vand.u32 2147483648, %v7264_v41 }
 0x1f5   :  { %v1310_v43 = vadd.f32 %v1302_v8, %v6274_v55  ;;  %5022 = vtanh.f32 %v1306_v30  ;;  %v1244_v21 = vsel %vm7515_vm15, %v7307_v57, %v1240_v47  ;;  %v1275_v48 = vand.u32 2147483647, %v7264_v41  ;;  %vm7542_vm8 = vmor %vm1271_vm0, %vm1272_vm14 }
 0x1f6   :  { %v1311_v19 = vadd.f32 %v1303_v27, %v6276_v56  ;;  %5024 = vtanh.f32 %v1307_v42  ;;  %v1234_v4 = vsel %vm7469_vm11, %v1233_v29, %v1229_v23  ;;  %v1259_v57 = vsel %vm7529_vm7, %v7324_v51, %v1255_v12 }
 0x1f7   :  { %v1312_v35 = vadd.f32 %v1304_v14, %v6283_v60  ;;  %5026 = vtanh.f32 %v1308_v18  ;;  %v1263_v41 = vor.u32 1.1754944e-38, %v1262_v59  ;;  %v1274_v52 = vsel %vm7542_vm8, %v7349_v2, %v1270_v17 }
 0x1f8   :  { %v1313_v29 = vadd.f32 %v1305_v63, %v6298_v5  ;;  %5028 = vtanh.f32 %v1309_v15  ;;  %v1249_v51 = vsel %vm7480_vm12, %v1248_v1, %v1244_v21  ;;  %vm1261_vm9 = vcmp.eq.f32.partialorder %v1260_v39, 8.507059e+37 }
 0x1f9   :  { %v1278_v0 = vor.u32 1.1754944e-38, %v1277_v31  ;;  %5030 = vtanh.f32 %v1310_v43  ;;  %v1264_v23 = vsel %vm1261_vm9, %v1263_v41, %v1259_v57  ;;  %vm1276_vm11 = vcmp.eq.f32.partialorder %v1275_v48, 8.507059e+37 }
 0x1fa   :  { %5032 = vtanh.f32 %v1311_v19  ;;  %v1322_v58 = vsub.f32 1.0, %v7392_v20  ;;  %v1323_v46 = vsub.f32 1.0, %v7414_v38  ;;  %v1324_v2 = vsub.f32 1.0, %v7455_v3 }
 0x1fb   :  { %v5023_v61 = vpop.eup %5022  ;;  %v1279_v59 = vsel %vm1276_vm11, %v1278_v0, %v1274_v52  ;;  %5034 = vtanh.f32 %v1312_v35  ;;  %v1325_v28 = vsub.f32 1.0, %v7461_v53  ;;  %v11733_v39 = vrot.slane %v6872_v24, 7 }
 0x1fc   :  { %v5025_v32 = vpop.eup %5024  ;;  %5036 = vtanh.f32 %v1313_v29  ;;  %v1330_v1 = vmul.f32 %v5023_v61, %v1322_v58  ;;  %v1326_v47 = vsub.f32 1.0, %v1234_v4  ;;  %v1327_v12 = vsub.f32 1.0, %v1249_v51 }
 0x1fd   :  { %v1353_v22 = vmul.f32 %v11733_v39, %v7392_v20  ;;  %v5027_v8 = vpop.eup %5026  ;;  %v1328_v44 = vsub.f32 1.0, %v1264_v23  ;;  %v1331_v27 = vmul.f32 %v5025_v32, %v1323_v46  ;;  %v11734_v42 = vrot.slane %v6874_v40, 7 }
 0x1fe   :  { %v5029_v14 = vpop.eup %5028  ;;  %v1332_v30 = vmul.f32 %v5027_v8, %v1324_v2  ;;  %v11735_v17 = vrot.slane %v6876_v45, 7  ;;  %v1329_v31 = vsub.f32 1.0, %v1279_v59  ;;  %v11737_v43 = vrot.slane %v6878_v62, 7 }
 0x1ff   :  { %v1354_v18 = vmul.f32 %v7414_v38, %v11734_v42  ;;  %v7566_v15 = vadd.f32 %v1353_v22, %v1330_v1  ;;  %v5031_v49 = vpop.eup %5030  ;;  %v1333_v20 = vmul.f32 %v5029_v14, %v1325_v28  ;;  %v11738_v54 = vrot.slane %v6881_v37, 7 }
 0x200   :  { %v1355_v63 = vmul.f32 %v11735_v17, %v7455_v3  ;;  %v1356_v21 = vmul.f32 %v11737_v43, %v7461_v53  ;;  %v5033_v19 = vpop.eup %5032  ;;  %v1334_v57 = vmul.f32 %v5031_v49, %v1326_v47  ;;  %v11741_v52 = vrot.slane %v6884_v36, 7  ;;  %v11751_v49 = vld [vmem:[#allocation53_spill] sm:$0xff]  ;;  %v11754_v43 = vld [vmem:[#allocation56_spill] sm:$0xff] }
 0x201   :  { %11736 = vst [vmem:[#allocation96_spill] sm:$0xff] %v7566_v15  ;;  %v1357_v48 = vmul.f32 %v11738_v54, %v1234_v4  ;;  %v7573_v10 = vadd.f32 %v1354_v18, %v1331_v27  ;;  %v1377_v3 = vrot.slane %v7566_v15, 1  ;;  %v5035_v35 = vpop.eup %5034  ;;  %v1335_v41 = vmul.f32 %v5033_v19, %v1327_v12  ;;  %v11761_v54 = vld [vmem:[#allocation63_spill] sm:$0xff]  ;;  %v11763_v19 = vld [vmem:[#allocation65_spill] sm:$0xff] }
 0x202   :  { %v7575_v38 = vadd.f32 %v1355_v63, %v1332_v30  ;;  %v1358_v29 = vmul.f32 %v11741_v52, %v1249_v51  ;;  %v11742_v0 = vrot.slane %v6891_v6, 7  ;;  %v7582_v53 = vadd.f32 %v1356_v21, %v1333_v20  ;;  %v5037_v61 = vpop.eup %5036  ;;  %v11750_v63 = vld [vmem:[#allocation52_spill] sm:$0xff]  ;;  %v11753_v20 = vld [vmem:[#allocation55_spill] sm:$0xff]  ;;  %v11755_v21 = vld [vmem:[#allocation57_spill] sm:$0xff] }
 0x203   :  { %11739 = vst [vmem:[#allocation97_spill] sm:$0xff] %v7573_v10  ;;  %v1336_v4 = vmul.f32 %v5035_v35, %v1328_v44  ;;  %v7584_v46 = vadd.f32 %v1357_v48, %v1334_v57  ;;  %v1378_v2 = vsel %vm11489_vm1, %v7573_v10, %v1377_v3  ;;  %v1337_v28 = vmul.f32 %v5037_v61, %v1329_v31  ;;  %v11752_v31 = vld [vmem:[#allocation54_spill] sm:$0xff]  ;;  %v11762_v48 = vld [vmem:[#allocation64_spill] sm:$0xff]  ;;  %v11765_v3 = vld [vmem:[#allocation67_spill] sm:$0xff] }
 0x204   :  { %11740 = vst [vmem:[#allocation98_spill] sm:$0xff] %v7575_v38  ;;  %v1359_v58 = vmul.f32 %v11742_v0, %v1264_v23  ;;  %v11379_v32 = vrot.slane %v7575_v38, 7  ;;  %v11745_v1 = vrot.slane %v6895_v26, 7  ;;  %v7591_v22 = vadd.f32 %v1358_v29, %v1335_v41  ;;  %v11764_v57 = vld [vmem:[#allocation66_spill] sm:$0xff]  ;;  %v11766_v35 = vld [vmem:[#allocation68_spill] sm:$0xff]  ;;  %v11767_v41 = vld [vmem:[#allocation69_spill] sm:$0xff] }
 0x205   :  { %11743 = vst [vmem:[#allocation99_spill] sm:$0xff] %v7582_v53  ;;  %v1381_v51 = vrot.slane %v7582_v53, 6  ;;  %v1383_v47 = vrot.slane %v7584_v46, 5  ;;  %vm11749_vm10 = vcmask 1047559   ;;  %v11768_v52 = vld [vmem:[#allocation70_spill] sm:$0xff]  ;;  %v11769_v29 = vld [vmem:[#allocation71_spill] sm:$0xff] }
 0x206   :  { %11744 = vst [vmem:[#allocation100_spill] sm:$0xff] %v7584_v46  ;;  %v1360_v39 = vmul.f32 %v11745_v1, %v1279_v59  ;;  %v7594_v23 = vadd.f32 %v1359_v58, %v1336_v4  ;;  %v1380_v8 = vsel %vm11488_vm2, %v11379_v32, %v1378_v2  ;;  %v1385_v27 = vrot.slane %v7591_v22, 4  ;;  %v11770_v0 = vld [vmem:[#allocation72_spill] sm:$0xff]  ;;  %v11771_v58 = vld [vmem:[#allocation73_spill] sm:$0xff]  ;;  %v11772_v61 = vld [vmem:[#allocation74_spill] sm:$0xff] }
 0x207   :  { %11746 = vst [vmem:[#allocation101_spill] sm:$0xff] %v7591_v22  ;;  %v1382_v44 = vsel %vm11487_vm3, %v1381_v51, %v1380_v8  ;;  %v11773_v4 = vld [vmem:[#allocation75_spill] sm:$0xff]  ;;  %v11774_v2 = vld [vmem:[#allocation76_spill] sm:$0xff]  ;;  %v11776_v1 = vld [vmem:[#allocation78_spill] sm:$0xff] }
 0x208   :  { %11747 = vst [vmem:[#allocation102_spill] sm:$0xff] %v7594_v23  ;;  %v7600_v12 = vadd.f32 %v1360_v39, %v1337_v28  ;;  %v1384_v59 = vsel %vm11486_vm4, %v1383_v47, %v1382_v44  ;;  %v1387_v14 = vrot.slane %v7594_v23, 3  ;;  %v11775_v28 = vld [vmem:[#allocation77_spill] sm:$0xff]  ;;  %v11777_v39 = vld [vmem:[#allocation79_spill] sm:$0xff]  ;;  %v11778_v51 = vld [vmem:[#allocation80_spill] sm:$0xff] }
 0x209   :  { %v1386_v30 = vsel %vm11485_vm5, %v1385_v27, %v1384_v59  ;;  %v11779_v8 = vld [vmem:[#allocation81_spill] sm:$0xff]  ;;  %v11780_v47 = vld [vmem:[#allocation82_spill] sm:$0xff]  ;;  %v11781_v44 = vld [vmem:[#allocation83_spill] sm:$0xff] }
 0x20a   :  { %11748 = vst [vmem:[#allocation103_spill] sm:$0xff] %v7600_v12  ;;  %v1389_v42 = vrot.slane %v7600_v12, 2  ;;  %v1388_v18 = vsel %vm11482_vm6, %v1387_v14, %v1386_v30  ;;  %v11782_v27 = vld [vmem:[#allocation84_spill] sm:$0xff]  ;;  %v11783_v59 = vld [vmem:[#allocation85_spill] sm:$0xff]  ;;  %v11784_v14 = vld [vmem:[#allocation86_spill] sm:$0xff] }
 0x20b   :  { %v11785_v30 = vld [vmem:[#allocation87_spill] sm:$0xff]  ;;  %v11807_v32 = vld [vmem:[#allocation41_spill] sm:$0xff] }
 0x20c   :  { %v1390_v17 = vsel %vm11749_vm10, %v1389_v42, %v1388_v18  ;;  %v11786_v42 = vld [vmem:[#allocation88_spill] sm:$0xff]  ;;  %v11787_v18 = vld [vmem:[#allocation89_spill] sm:$0xff] }
 0x20d   :  { %1408 = vmatmul.f32.vlgmr.msra.gmra.mxu0 %v1390_v17  ;;  %1428 = vmatmul.f32.vlgmr.msra.gmra.mxu1 %v1390_v17 }
 0x20e   :  { %1448 = vmatmul.f32.vlgmr.msra.gmra.mxu2 %v1390_v17  ;;  %2478 = vmatpush.msra.mxu0 %v6905_v11  ;;  %v11756_v11 = vld [vmem:[#allocation58_spill] sm:$0xff] }
 0x20f   :  { %2961 = vmatpush.msra.mxu1 %v6908_v33  ;;  %2981 = vmatpush.msra.mxu2 %v6911_v50  ;;  %v11757_v33 = vld [vmem:[#allocation59_spill] sm:$0xff]  ;;  %v11758_v50 = vld [vmem:[#allocation60_spill] sm:$0xff]  ;;  %v11788_v17 = vld [vmem:[#allocation90_spill] sm:$0xff] }
 0x210   :  { %2479 = vmatpush.msra.mxu0 %v6914_v7  ;;  %v11759_v7 = vld [vmem:[#allocation61_spill] sm:$0xff] }
 0x211   :  { %2962 = vmatpush.msra.mxu1 %v6917_v34  ;;  %2982 = vmatpush.msra.mxu2 %v11750_v63  ;;  %v11760_v34 = vld [vmem:[#allocation62_spill] sm:$0xff]  ;;  %v11789_v63 = vld [vmem:[#allocation91_spill] sm:$0xff] }
 0x212   :  { %2480 = vmatpush.msra.mxu0 %v11751_v49  ;;  %v11790_v49 = vld [vmem:[#allocation92_spill] sm:$0xff] }
 0x213   :  { %2963 = vmatpush.msra.mxu1 %v11752_v31  ;;  %2983 = vmatpush.msra.mxu2 %v11753_v20  ;;  %v11791_v31 = vld [vmem:[#allocation93_spill] sm:$0xff]  ;;  %v11792_v20 = vld [vmem:[#allocation94_spill] sm:$0xff] }
 0x214   :  { %2481 = vmatpush.msra.mxu0 %v11754_v43 }
 0x215   :  { %2964 = vmatpush.msra.mxu1 %v11755_v21  ;;  %2984 = vmatpush.msra.mxu2 %v11756_v11 }
 0x216   :  { %2482 = vmatpush.msra.mxu0 %v11757_v33 }
 0x217   :  { %2965 = vmatpush.msra.mxu1 %v11758_v50  ;;  %2985 = vmatpush.msra.mxu2 %v11759_v7 }
 0x218   :  { %2483 = vmatpush.msra.mxu0 %v11760_v34 }
 0x219   :  { %2966 = vmatpush.msra.mxu1 %v11761_v54  ;;  %2986 = vmatpush.msra.mxu2 %v11762_v48  ;;  %v11793_v54 = vld [vmem:[#allocation23_spill] sm:$0xff] }
 0x21a   :  { %2484 = vmatpush.msra.mxu0 %v11763_v19  ;;  %v11794_v19 = vld [vmem:[#allocation21_spill] sm:$0xff] }
 0x21b   :  { %2967 = vmatpush.msra.mxu1 %v11764_v57  ;;  %2987 = vmatpush.msra.mxu2 %v11765_v3  ;;  %v11795_v3 = vld [vmem:[#allocation22_spill] sm:$0xff] }
 0x21c   :  { %2485 = vmatpush.msra.mxu0 %v11766_v35 }
 0x21d   :  { %2968 = vmatpush.msra.mxu1 %v11767_v41  ;;  %2988 = vmatpush.msra.mxu2 %v11768_v52  ;;  %v11796_v41 = vld [vmem:[#allocation24_spill] sm:$0xff] }
 0x21e   :  { %2486 = vmatpush.msra.mxu0 %v11769_v29  ;;  %v11797_v29 = vld [vmem:[#allocation20_spill] sm:$0xff] }
 0x21f   :  { %2969 = vmatpush.msra.mxu1 %v11770_v0  ;;  %2989 = vmatpush.msra.mxu2 %v11771_v58  ;;  %v11798_v58 = vld [vmem:[#allocation25_spill] sm:$0xff] }
 0x220   :  { %2487 = vmatpush.msra.mxu0 %v11772_v61 }
 0x221   :  { %2970 = vmatpush.msra.mxu1 %v11773_v4  ;;  %2990 = vmatpush.msra.mxu2 %v11774_v2  ;;  %v11799_v4 = vld [vmem:[#allocation26_spill] sm:$0xff] }
 0x222   :  { %2488 = vmatpush.msra.mxu0 %v11775_v28 }
 0x223   :  { %2971 = vmatpush.msra.mxu1 %v11776_v1  ;;  %2991 = vmatpush.msra.mxu2 %v11777_v39 }
 0x224   :  { %2489 = vmatpush.msra.mxu0 %v11778_v51 }
 0x225   :  { %2972 = vmatpush.msra.mxu1 %v11779_v8  ;;  %2992 = vmatpush.msra.mxu2 %v11780_v47 }
 0x226   :  { %2490 = vmatpush.msra.mxu0 %v11781_v44 }
 0x227   :  { %2973 = vmatpush.msra.mxu1 %v11782_v27  ;;  %2993 = vmatpush.msra.mxu2 %v11783_v59 }
 0x228   :  { %2491 = vmatpush.msra.mxu0 %v11784_v14 }
 0x229   :  { %2974 = vmatpush.msra.mxu1 %v11785_v30  ;;  %2994 = vmatpush.msra.mxu2 %v11786_v42  ;;  %v11800_v30 = vld [vmem:[#allocation27_spill] sm:$0xff] }
 0x22a   :  { %2492 = vmatpush.msra.mxu0 %v11787_v18  ;;  %v11801_v18 = vld [vmem:[#allocation38_spill] sm:$0xff] }
 0x22b   :  { %2975 = vmatpush.msra.mxu1 %v11788_v17  ;;  %2995 = vmatpush.msra.mxu2 %v11789_v63 }
 0x22c   :  { %2493 = vmatpush.msra.mxu0 %v11790_v49 }
 0x22d   :  { %2976 = vmatpush.msra.mxu1 %v11791_v31  ;;  %2996 = vmatpush.msra.mxu2 %v11792_v20 }
 0x28a   :  { %v1409_v43 = vpop.f32.mrf.mxu0  ;;  %v7665_v1 = vpop.f32.mrf.mxu1 }
 0x28b   :  { %v1453_v21 = vrot.slane %v1409_v43, 6  ;;  %v1454_v11 = vrot.slane %v1409_v43, 7  ;;  %v1455_v33 = vrot.slane %v1409_v43, 1  ;;  %v1456_v50 = vrot.slane %v1409_v43, 2 }
 0x28c   :  { %v1457_v7 = vrot.slane %v1409_v43, 3  ;;  %v1458_v34 = vrot.slane %v1409_v43, 4  ;;  %v1470_v48 = vadd.f32 %v1409_v43, %v11793_v54  ;;  %v1459_v44 = vrot.slane %v1409_v43, 5 }
 0x28d   :  { %v1468_v57 = vadd.f32 %v1453_v21, %v11794_v19  ;;  %v1469_v35 = vadd.f32 %v1454_v11, %v11795_v3  ;;  %v1471_v52 = vadd.f32 %v1455_v33, %v11796_v41  ;;  %v1472_v0 = vadd.f32 %v1456_v50, %v11797_v29 }
 0x28e   :  { %v1473_v61 = vadd.f32 %v1457_v7, %v11798_v58  ;;  %v1474_v2 = vadd.f32 %v1458_v34, %v11799_v4  ;;  %v4769_v28 = vmul.f32 -1.442695, %v1470_v48  ;;  %v1629_v59 = vrot.slane %v7665_v1, 6 }
 0x28f   :  { %v4767_v39 = vmul.f32 -1.442695, %v1468_v57  ;;  %v4768_v51 = vmul.f32 -1.442695, %v1469_v35  ;;  %v4770_v8 = vmul.f32 -1.442695, %v1471_v52  ;;  %v1475_v17 = vadd.f32 %v1459_v44, %v11801_v18 }
 0x290   :  { %5038 = vpow2.f32 %v4769_v28  ;;  %v4771_v47 = vmul.f32 -1.442695, %v1472_v0  ;;  %v4772_v27 = vmul.f32 -1.442695, %v1473_v61  ;;  %v4773_v14 = vmul.f32 -1.442695, %v1474_v2 }
 0x291   :  { %5040 = vpow2.f32 %v4767_v39  ;;  %v1644_v42 = vadd.f32 %v1629_v59, %v11800_v30  ;;  %v1630_v49 = vrot.slane %v7665_v1, 7  ;;  %v1631_v7 = vrot.slane %v7665_v1, 1  ;;  %v11802_v39 = vld [vmem:[#allocation30_spill] sm:$0xff]  ;;  %v1449_v24 = vpop.f32.mrf.mxu2 }
 0x292   :  { %5042 = vpow2.f32 %v4768_v51  ;;  %v1632_v34 = vrot.slane %v7665_v1, 2  ;;  %v4774_v35 = vmul.f32 -1.442695, %v1475_v17  ;;  %v1633_v0 = vrot.slane %v7665_v1, 3  ;;  %v11804_v17 = vld [vmem:[#allocation33_spill] sm:$0xff] }
 0x293   :  { %5044 = vpow2.f32 %v4770_v8  ;;  %v4775_v48 = vmul.f32 -1.442695, %v1644_v42  ;;  %v1634_v28 = vrot.slane %v7665_v1, 4  ;;  %v1645_v51 = vadd.f32 %v1630_v49, %v11802_v39  ;;  %v11806_v49 = vld [vmem:[#allocation40_spill] sm:$0xff] }
 0x294   :  { %5046 = vpow2.f32 %v4771_v47  ;;  %v1635_v44 = vrot.slane %v7665_v1, 5 }
 0x295   :  { %5048 = vpow2.f32 %v4772_v27  ;;  %v11803_v27 = vld [vmem:[#allocation32_spill] sm:$0xff]  ;;  %v1650_v20 = vadd.f32 %v1634_v28, %v11807_v32 }
 0x296   :  { %v5039_v63 = vpop.eup %5038  ;;  %5050 = vpow2.f32 %v4773_v14  ;;  %v1646_v59 = vadd.f32 %v7665_v1, %v11803_v27  ;;  %v4776_v1 = vmul.f32 -1.442695, %v1645_v51 }
 0x297   :  { %v5041_v31 = vpop.eup %5040  ;;  %v7672_v43 = vadd.f32 1.0, %v5039_v63  ;;  %v1647_v63 = vadd.f32 %v1631_v7, %v11804_v17 }
 0x298   :  { %v5043_v33 = vpop.eup %5042  ;;  %v7676_v50 = vadd.f32 1.0, %v5041_v31  ;;  %v11805_v31 = vld [vmem:[#allocation36_spill] sm:$0xff]  ;;  %v4777_v7 = vmul.f32 -1.442695, %v1646_v59 }
 0x299   :  { %v5045_v57 = vpop.eup %5044  ;;  %v7680_v52 = vadd.f32 1.0, %v5043_v33  ;;  %5052 = vrcp.f32 %v7672_v43  ;;  %v1648_v33 = vadd.f32 %v1632_v34, %v11805_v31  ;;  %v4778_v11 = vmul.f32 -1.442695, %v1647_v63 }
 0x29a   :  { %v5047_v61 = vpop.eup %5046  ;;  %v7684_v2 = vadd.f32 1.0, %v5045_v57  ;;  %5054 = vrcp.f32 %v7676_v50  ;;  %v1549_v6 = vand.u32 2147483648, %v7672_v43  ;;  %vm1513_vm13 = vweird.f32 %v7676_v50 }
 0x29b   :  { %v5049_v8 = vpop.eup %5048  ;;  %v7689_v47 = vadd.f32 1.0, %v5047_v61  ;;  %5056 = vrcp.f32 %v7680_v52  ;;  %v1649_v61 = vadd.f32 %v1633_v0, %v11806_v49  ;;  %v11808_v0 = vld [vmem:[#allocation43_spill] sm:$0xff]  ;;  %v4779_v28 = vmul.f32 -1.442695, %v1648_v33 }
 0x29c   :  { %v5051_v14 = vpop.eup %5050  ;;  %v7695_v42 = vadd.f32 1.0, %v5049_v8  ;;  %5058 = vpow2.f32 %v4775_v48  ;;  %v1517_v36 = vand.u32 2147483647, %v7676_v50  ;;  %v1519_v37 = vand.u32 2147483648, %v7676_v50 }
 0x29d   :  { %v7699_v57 = vadd.f32 1.0, %v5051_v14  ;;  %5060 = vrcp.f32 %v7684_v2  ;;  %v4780_v34 = vmul.f32 -1.442695, %v1649_v61  ;;  %vm1528_vm12 = vweird.f32 %v7680_v52 }
 0x29e   :  { %5062 = vpow2.f32 %v4774_v35  ;;  %v1651_v35 = vadd.f32 %v1635_v44, %v11808_v0  ;;  %v4781_v44 = vmul.f32 -1.442695, %v1650_v20  ;;  %v1532_v45 = vand.u32 2147483647, %v7680_v52 }
 0x29f   :  { %v7706_v21 = vpop.eup %5052  ;;  %5064 = vrcp.f32 %v7689_v47  ;;  %vm7746_vm14 = vcmp.eq.f32.partialorder %v1517_v36, 8.507059e+37  ;;  %vm1543_vm15 = vweird.f32 %v7672_v43  ;;  %v11813_v36 = vld [vmem:[#allocation95_spill] sm:$0xff] }
 0x2a0   :  { %v7711_v14 = vpop.eup %5054  ;;  %5066 = vrcp.f32 %v7695_v42  ;;  %v1539_v59 = vmul.f32 %v7706_v21, %v7672_v43  ;;  %vm7755_vm7 = vcmp.eq.f32.partialorder %v1532_v45, 8.507059e+37  ;;  %vm1544_vm9 = vweird.f32 %v7706_v21 }
 0x2a1   :  { %v7715_v51 = vpop.eup %5056  ;;  %v1509_v8 = vmul.f32 %v7711_v14, %v7676_v50  ;;  %5068 = vrcp.f32 %v7699_v57  ;;  %vm1514_vm0 = vweird.f32 %v7711_v14 }
 0x2a2   :  { %v5059_v48 = vpop.eup %5058  ;;  %v1524_v26 = vmul.f32 %v7715_v51, %v7680_v52  ;;  %5070 = vpow2.f32 %v4776_v1  ;;  %v1540_v1 = vsub.f32 1.0, %v1539_v59  ;;  %v7752_v59 = vor.u32 1.1754944e-38, %v1549_v6  ;;  %vm7779_vm11 = vmor %vm1513_vm13, %vm1514_vm0 }
 0x2a3   :  { %v7725_v63 = vpop.eup %5060  ;;  %v1510_v33 = vsub.f32 1.0, %v1509_v8  ;;  %5072 = vpow2.f32 %v4777_v7  ;;  %v4782_v8 = vmul.f32 -1.442695, %v1651_v35  ;;  %v7740_v7 = vadd.f32 1.0, %v5059_v48 }
 0x2a4   :  { %v5063_v62 = vpop.eup %5062  ;;  %v1525_v61 = vsub.f32 1.0, %v1524_v26  ;;  %5074 = vpow2.f32 %v4778_v11  ;;  %v1554_v26 = vmul.f32 %v7725_v63, %v7684_v2  ;;  %v1520_v35 = vor.u32 1.1754944e-38, %v1519_v37 }
 0x2a5   :  { %v7732_v40 = vpop.eup %5064  ;;  %v1511_v20 = vmul.f32 %v7711_v14, %v1510_v33  ;;  %5076 = vpow2.f32 %v4779_v28  ;;  %v7744_v11 = vadd.f32 1.0, %v5063_v62  ;;  %v1534_v28 = vand.u32 2147483648, %v7680_v52 }
 0x2a6   :  { %v7735_v18 = vpop.eup %5066  ;;  %v1526_v4 = vmul.f32 %v7715_v51, %v1525_v61  ;;  %5078 = vpow2.f32 %v4780_v34  ;;  %v1569_v62 = vmul.f32 %v7732_v40, %v7689_v47  ;;  %v7762_v48 = vadd.f32 %v11813_v36, %v1449_v24 }
 0x2a7   :  { %v7742_v58 = vpop.eup %5068  ;;  %5080 = vpow2.f32 %v4781_v44  ;;  %v1512_v29 = vadd.f32 %v7711_v14, %v1511_v20  ;;  %v1541_v6 = vmul.f32 %v7706_v21, %v1540_v1  ;;  %vm1529_vm8 = vweird.f32 %v7715_v51 }
 0x2a8   :  { %v5071_v61 = vpop.eup %5070  ;;  %5082 = vpow2.f32 %v4782_v8  ;;  %v1527_v45 = vadd.f32 %v7715_v51, %v1526_v4  ;;  %v1555_v3 = vsub.f32 1.0, %v1554_v26  ;;  %v1535_v19 = vor.u32 1.1754944e-38, %v1534_v28  ;;  %vm7792_vm10 = vmor %vm1528_vm12, %vm1529_vm8 }
 0x2a9   :  { %v5073_v37 = vpop.eup %5072  ;;  %v7766_v41 = vadd.f32 1.0, %v5071_v61  ;;  %5084 = vrcp.f32 %v7740_v7  ;;  %v1584_v24 = vmul.f32 %v7735_v18, %v7695_v42  ;;  %v1570_v1 = vsub.f32 1.0, %v1569_v62  ;;  %vm7821_vm12 = vmor %vm1543_vm15, %vm1544_vm9 }
 0x2aa   :  { %v5075_v54 = vpop.eup %5074  ;;  %v7785_v8 = vmul.f32 %v7742_v58, %v7699_v57  ;;  %v7788_v26 = vadd.f32 1.0, %v5073_v37  ;;  %v1516_v61 = vsel %vm7779_vm11, %v7711_v14, %v1512_v29  ;;  %v1542_v62 = vadd.f32 %v7706_v21, %v1541_v6 }
 0x2ab   :  { %v5077_v44 = vpop.eup %5076  ;;  %5086 = vrcp.f32 %v7766_v41  ;;  %v7796_v50 = vadd.f32 1.0, %v5075_v54  ;;  %v1547_v36 = vand.u32 2147483647, %v7672_v43  ;;  %v1556_v37 = vmul.f32 %v7725_v63, %v1555_v3 }
 0x2ac   :  { %v5079_v20 = vpop.eup %5078  ;;  %5088 = vrcp.f32 %v7744_v11  ;;  %vm1573_vm13 = vweird.f32 %v7689_v47  ;;  %v7805_v52 = vadd.f32 1.0, %v5077_v44  ;;  %v1531_v54 = vsel %vm7792_vm10, %v7715_v51, %v1527_v45 }
 0x2ad   :  { %v5081_v0 = vpop.eup %5080  ;;  %v1806_v32 = vrot.slane %v7762_v48, 6  ;;  %v1585_v4 = vsub.f32 1.0, %v1584_v24  ;;  %v7811_v29 = vadd.f32 1.0, %v5079_v20  ;;  %v1807_v14 = vrot.slane %v7762_v48, 7 }
 0x2ae   :  { %v5083_v49 = vpop.eup %5082  ;;  %v1571_v51 = vmul.f32 %v7732_v40, %v1570_v1  ;;  %v1600_v45 = vsub.f32 1.0, %v7785_v8  ;;  %5090 = vrcp.f32 %v7788_v26  ;;  %v1521_v44 = vsel %vm7746_vm14, %v1520_v35, %v1516_v61 }
 0x2af   :  { %v7815_v31 = vpop.eup %5084  ;;  %v7832_v20 = vadd.f32 1.0, %v5081_v0  ;;  %5092 = vrcp.f32 %v7796_v50  ;;  %v1536_v43 = vsel %vm7755_vm7, %v1535_v19, %v1531_v54  ;;  %v1546_v1 = vsel %vm7821_vm12, %v7706_v21, %v1542_v62 }
 0x2b0   :  { %v7842_v8 = vadd.f32 1.0, %v5083_v49  ;;  %5094 = vrcp.f32 %v7805_v52  ;;  %vm7845_vm14 = vcmp.eq.f32.partialorder %v1547_v36, 8.507059e+37  ;;  %v1557_v0 = vadd.f32 %v7725_v63, %v1556_v37 }
 0x2b1   :  { %v7830_v24 = vpop.eup %5086  ;;  %v1685_v35 = vmul.f32 %v7815_v31, %v7740_v7  ;;  %5096 = vrcp.f32 %v7811_v29  ;;  %vm1559_vm15 = vweird.f32 %v7725_v63  ;;  %v1562_v19 = vand.u32 2147483647, %v7684_v2 }
 0x2b2   :  { %v7840_v28 = vpop.eup %5088  ;;  %v1700_v21 = vmul.f32 %v7830_v24, %v7766_v41  ;;  %v1564_v49 = vand.u32 2147483648, %v7684_v2  ;;  %v1572_v34 = vadd.f32 %v7732_v40, %v1571_v51  ;;  %vm1574_vm0 = vweird.f32 %v7732_v40 }
 0x2b3   :  { %5098 = vrcp.f32 %v7832_v20  ;;  %vm1558_vm7 = vweird.f32 %v7684_v2  ;;  %v1579_v61 = vand.u32 2147483648, %v7689_v47  ;;  %v1586_v62 = vmul.f32 %v7735_v18, %v1585_v4  ;;  %vm7895_vm11 = vmor %vm1573_vm13, %vm1574_vm0 }
 0x2b4   :  { %v7864_v36 = vpop.eup %5090  ;;  %5100 = vrcp.f32 %v7842_v8  ;;  %v7867_v37 = vmul.f32 %v1806_v32, %v1521_v44  ;;  %v7869_v54 = vmul.f32 %v1807_v14, %v1536_v43  ;;  %v7874_v3 = vsel %vm7845_vm14, %v7752_v59, %v1546_v1  ;;  %vm7878_vm8 = vmor %vm1558_vm7, %vm1559_vm15 }
 0x2b5   :  { %v7882_v4 = vpop.eup %5092  ;;  %v1686_v51 = vsub.f32 1.0, %v1685_v35  ;;  %v1561_v32 = vsel %vm7878_vm8, %v7725_v63, %v1557_v0  ;;  %vm7887_vm9 = vcmp.eq.f32.partialorder %v1562_v19, 8.507059e+37  ;;  %v1577_v44 = vand.u32 2147483647, %v7689_v47 }
 0x2b6   :  { %v7900_v43 = vpop.eup %5094  ;;  %v1701_v1 = vsub.f32 1.0, %v1700_v21  ;;  %v1565_v33 = vor.u32 1.1754944e-38, %v1564_v49  ;;  %v1576_v63 = vsel %vm7895_vm11, %v7732_v40, %v1572_v34  ;;  %v1614_v0 = vmul.f32 %v7840_v28, %v7744_v11 }
 0x2b7   :  { %v7907_v35 = vpop.eup %5096  ;;  %v1580_v19 = vor.u32 1.1754944e-38, %v1579_v61  ;;  %v1587_v2 = vadd.f32 %v7735_v18, %v1586_v62  ;;  %vm1589_vm10 = vweird.f32 %v7735_v18  ;;  %v1601_v47 = vmul.f32 %v7742_v58, %v1600_v45 }
 0x2b8   :  { %v1592_v6 = vand.u32 2147483647, %v7695_v42  ;;  %v1594_v21 = vand.u32 2147483648, %v7695_v42  ;;  %v1607_v49 = vand.u32 2147483647, %v7699_v57  ;;  %v1615_v59 = vsub.f32 1.0, %v1614_v0 }
 0x2b9   :  { %v7915_v40 = vpop.eup %5098  ;;  %v7919_v34 = vsel %vm7887_vm9, %v1565_v33, %v1561_v32  ;;  %vm1578_vm13 = vcmp.eq.f32.partialorder %v1577_v44, 8.507059e+37  ;;  %vm1588_vm12 = vweird.f32 %v7695_v42  ;;  %vm1603_vm14 = vweird.f32 %v7699_v57 }
 0x2ba   :  { %v7923_v61 = vpop.eup %5100  ;;  %v7925_v45 = vsel %vm1578_vm13, %v1580_v19, %v1576_v63  ;;  %vm7927_vm15 = vmor %vm1588_vm12, %vm1589_vm10  ;;  %vm1604_vm0 = vweird.f32 %v7742_v58  ;;  %v1616_v0 = vmul.f32 %v7840_v28, %v1615_v59  ;;  %v1687_v32 = vmul.f32 %v7815_v31, %v1686_v51 }
 0x2bb   :  { %v1591_v42 = vsel %vm7927_vm15, %v7735_v18, %v1587_v2  ;;  %v1602_v14 = vadd.f32 %v7742_v58, %v1601_v47  ;;  %v1609_v44 = vand.u32 2147483648, %v7699_v57  ;;  %v1622_v33 = vand.u32 2147483647, %v7744_v11  ;;  %vm7953_vm10 = vmor %vm1603_vm14, %vm1604_vm0 }
 0x2bc   :  { %vm1593_vm7 = vcmp.eq.f32.partialorder %v1592_v6, 8.507059e+37  ;;  %v1595_v63 = vor.u32 1.1754944e-38, %v1594_v21  ;;  %vm7940_vm8 = vcmp.eq.f32.partialorder %v1607_v49, 8.507059e+37  ;;  %v1624_v59 = vand.u32 2147483648, %v7744_v11 }
 0x2bd   :  { %v1617_v51 = vadd.f32 %v7840_v28, %v1616_v0  ;;  %vm1618_vm9 = vweird.f32 %v7744_v11  ;;  %vm1619_vm11 = vweird.f32 %v7840_v28  ;;  %v1702_v18 = vmul.f32 %v7830_v24, %v1701_v1 }
 0x2be   :  { %v1688_v2 = vadd.f32 %v7815_v31, %v1687_v32  ;;  %vm1690_vm13 = vweird.f32 %v7815_v31  ;;  %v1695_v47 = vand.u32 2147483648, %v7740_v7  ;;  %v1715_v11 = vmul.f32 %v7864_v36, %v7788_v26  ;;  %vm7971_vm14 = vmor %vm1618_vm9, %vm1619_vm11 }
 0x2bf   :  { %v7962_v21 = vsel %vm1593_vm7, %v1595_v63, %v1591_v42  ;;  %v1606_v1 = vsel %vm7953_vm10, %v7742_v58, %v1602_v14  ;;  %v1610_v57 = vor.u32 1.1754944e-38, %v1609_v44  ;;  %vm7967_vm12 = vcmp.eq.f32.partialorder %v1622_v33, 8.507059e+37 }
 0x2c0   :  { %v1625_v0 = vor.u32 1.1754944e-38, %v1624_v59  ;;  %vm1689_vm15 = vweird.f32 %v7740_v7  ;;  %v1693_v32 = vand.u32 2147483647, %v7740_v7  ;;  %v1716_v42 = vsub.f32 1.0, %v1715_v11 }
 0x2c1   :  { %v1621_v63 = vsel %vm7971_vm14, %v7840_v28, %v1617_v51  ;;  %vm7980_vm0 = vmor %vm1689_vm15, %vm1690_vm13  ;;  %v1703_v14 = vadd.f32 %v7830_v24, %v1702_v18  ;;  %vm1705_vm7 = vweird.f32 %v7830_v24  ;;  %v1730_v44 = vmul.f32 %v7882_v4, %v7796_v50 }
 0x2c2   :  { %v1692_v7 = vsel %vm7980_vm0, %v7815_v31, %v1688_v2  ;;  %v1696_v33 = vor.u32 1.1754944e-38, %v1695_v47  ;;  %vm1704_vm9 = vweird.f32 %v7766_v41  ;;  %v1708_v28 = vand.u32 2147483647, %v7766_v41 }
 0x2c3   :  { %v1710_v59 = vand.u32 2147483648, %v7766_v41  ;;  %v1717_v51 = vmul.f32 %v7864_v36, %v1716_v42  ;;  %v1731_v6 = vsub.f32 1.0, %v1730_v44  ;;  %v1745_v18 = vmul.f32 %v7900_v43, %v7805_v52  ;;  %vm8005_vm10 = vmor %vm1704_vm9, %vm1705_vm7 }
 0x2c4   :  { %v7999_v11 = vsel %vm7940_vm8, %v1610_v57, %v1606_v1  ;;  %v8003_v31 = vsel %vm7967_vm12, %v1625_v0, %v1621_v63  ;;  %vm1694_vm11 = vcmp.eq.f32.partialorder %v1693_v32, 8.507059e+37  ;;  %vm1719_vm13 = vweird.f32 %v7788_v26 }
 0x2c5   :  { %v8010_v41 = vsel %vm1694_vm11, %v1696_v33, %v1692_v7  ;;  %v1707_v47 = vsel %vm8005_vm10, %v7830_v24, %v1703_v14  ;;  %v1732_v19 = vmul.f32 %v7882_v4, %v1731_v6  ;;  %v1746_v1 = vsub.f32 1.0, %v1745_v18 }
 0x2c6   :  { %v1723_v57 = vand.u32 2147483647, %v7788_v26  ;;  %v1725_v49 = vand.u32 2147483648, %v7788_v26  ;;  %v1738_v62 = vand.u32 2147483647, %v7796_v50  ;;  %v1760_v0 = vmul.f32 %v7907_v35, %v7811_v29 }
 0x2c7   :  { %vm1709_vm8 = vcmp.eq.f32.partialorder %v1708_v28, 8.507059e+37  ;;  %v1711_v32 = vor.u32 1.1754944e-38, %v1710_v59  ;;  %v1718_v42 = vadd.f32 %v7864_v36, %v1717_v51  ;;  %vm1720_vm12 = vweird.f32 %v7864_v36 }
 0x2c8   :  { %v1733_v24 = vadd.f32 %v7882_v4, %v1732_v19  ;;  %vm1734_vm14 = vweird.f32 %v7796_v50  ;;  %vm1735_vm15 = vweird.f32 %v7882_v4  ;;  %v1747_v63 = vmul.f32 %v7900_v43, %v1746_v1  ;;  %vm8034_vm0 = vmor %vm1719_vm13, %vm1720_vm12 }
 0x2c9   :  { %v8027_v58 = vsel %vm1709_vm8, %v1711_v32, %v1707_v47  ;;  %v1740_v14 = vand.u32 2147483648, %v7796_v50  ;;  %v1761_v44 = vsub.f32 1.0, %v1760_v0  ;;  %v1775_v7 = vmul.f32 %v7915_v40, %v7832_v20  ;;  %vm8050_vm11 = vmor %vm1734_vm14, %vm1735_vm15 }
 0x2ca   :  { %vm8038_vm7 = vcmp.eq.f32.partialorder %v1723_v57, 8.507059e+37  ;;  %v1726_v59 = vor.u32 1.1754944e-38, %v1725_v49  ;;  %vm8042_vm9 = vcmp.eq.f32.partialorder %v1738_v62, 8.507059e+37  ;;  %v1755_v50 = vand.u32 2147483648, %v7805_v52 }
 0x2cb   :  { %v1722_v6 = vsel %vm8034_vm0, %v7864_v36, %v1718_v42  ;;  %vm1749_vm10 = vweird.f32 %v7805_v52  ;;  %v1753_v18 = vand.u32 2147483647, %v7805_v52  ;;  %v1776_v2 = vsub.f32 1.0, %v1775_v7 }
 0x2cc   :  { %v1737_v47 = vsel %vm8050_vm11, %v7882_v4, %v1733_v24  ;;  %v1748_v19 = vadd.f32 %v7900_v43, %v1747_v63  ;;  %vm1750_vm13 = vweird.f32 %v7900_v43  ;;  %v1770_v1 = vand.u32 2147483648, %v7811_v29 }
 0x2cd   :  { %v1741_v36 = vor.u32 1.1754944e-38, %v1740_v14  ;;  %v1762_v57 = vmul.f32 %v7907_v35, %v1761_v44  ;;  %v1768_v49 = vand.u32 2147483647, %v7811_v29  ;;  %v1790_v62 = vmul.f32 %v7923_v61, %v7842_v8  ;;  %vm8078_vm14 = vmor %vm1749_vm10, %vm1750_vm13 }
 0x2ce   :  { %v8068_v0 = vsel %vm8038_vm7, %v1726_v59, %v1722_v6  ;;  %v1756_v32 = vor.u32 1.1754944e-38, %v1755_v50  ;;  %vm1764_vm8 = vweird.f32 %v7811_v29  ;;  %vm1765_vm12 = vweird.f32 %v7907_v35 }
 0x2cf   :  { %v8074_v4 = vsel %vm8042_vm9, %v1741_v36, %v1737_v47  ;;  %vm8082_vm15 = vcmp.eq.f32.partialorder %v1753_v18, 8.507059e+37  ;;  %v1777_v63 = vmul.f32 %v7915_v40, %v1776_v2  ;;  %vm1779_vm0 = vweird.f32 %v7832_v20  ;;  %vm8126_vm10 = vmor %vm1764_vm8, %vm1765_vm12 }
 0x2d0   :  { %v1791_v14 = vsub.f32 1.0, %v1790_v62  ;;  %v1752_v44 = vsel %vm8078_vm14, %v7900_v43, %v1748_v19  ;;  %v1771_v7 = vor.u32 1.1754944e-38, %v1770_v1  ;;  %vm1780_vm7 = vweird.f32 %v7915_v40 }
 0x2d1   :  { %v1808_v52 = vrot.slane %v7762_v48, 1  ;;  %v1763_v33 = vadd.f32 %v7907_v35, %v1762_v57  ;;  %vm8094_vm9 = vcmp.eq.f32.partialorder %v1768_v49, 8.507059e+37  ;;  %v1783_v59 = vand.u32 2147483647, %v7832_v20  ;;  %vm8140_vm14 = vmor %vm1779_vm0, %vm1780_vm7 }
 0x2d2   :  { %v1792_v51 = vmul.f32 %v7923_v61, %v1791_v14  ;;  %v1810_v50 = vrot.slane %v7762_v48, 3  ;;  %v1811_v6 = vrot.slane %v7762_v48, 4  ;;  %v1823_v43 = vmul.f32 %v7762_v48, %v7874_v3 }
 0x2d3   :  { %v1824_v26 = vmul.f32 %v1808_v52, %v7919_v34  ;;  %v11856_v18 = vrot.slane %v7762_v48, 2  ;;  %v1778_v47 = vadd.f32 %v7915_v40, %v1777_v63  ;;  %v1785_v19 = vand.u32 2147483648, %v7832_v20 }
 0x2d4   :  { %v1812_v1 = vrot.slane %v7762_v48, 5  ;;  %v1826_v36 = vmul.f32 %v1810_v50, %v7962_v21  ;;  %v1827_v57 = vmul.f32 %v1811_v6, %v7999_v11  ;;  %v1829_v49 = vadd.f32 %v7867_v37, %v6308_v13 }
 0x2d5   :  { %v1825_v2 = vmul.f32 %v11856_v18, %v7925_v45  ;;  %v1830_v3 = vadd.f32 %v7869_v54, %v6317_v25  ;;  %v1831_v34 = vadd.f32 %v1823_v43, %v6324_v9  ;;  %v1793_v45 = vadd.f32 %v7923_v61, %v1792_v51 }
 0x2d6   :  { %vm1795_vm11 = vweird.f32 %v7923_v61  ;;  %v1828_v62 = vmul.f32 %v1812_v1, %v8003_v31  ;;  %v1832_v48 = vadd.f32 %v1824_v26, %v6336_v16  ;;  %vm1794_vm13 = vweird.f32 %v7842_v8 }
 0x2d7   :  { %v1800_v37 = vand.u32 2147483648, %v7842_v8  ;;  %v1833_v54 = vadd.f32 %v1825_v2, %v6274_v55  ;;  %5102 = vtanh.f32 %v1829_v49  ;;  %v1767_v11 = vsel %vm8126_vm10, %v7907_v35, %v1763_v33  ;;  %vm8153_vm8 = vmor %vm1794_vm13, %vm1795_vm11 }
 0x2d8   :  { %v1798_v31 = vand.u32 2147483647, %v7842_v8  ;;  %v1834_v42 = vadd.f32 %v1826_v36, %v6276_v56  ;;  %5104 = vtanh.f32 %v1830_v3  ;;  %v1757_v63 = vsel %vm8082_vm15, %v1756_v32, %v1752_v44 }
 0x2d9   :  { %v1782_v35 = vsel %vm8140_vm14, %v7915_v40, %v1778_v47  ;;  %v1835_v14 = vadd.f32 %v1827_v57, %v6283_v60  ;;  %5106 = vtanh.f32 %v1831_v34  ;;  %v1786_v8 = vor.u32 1.1754944e-38, %v1785_v19 }
 0x2da   :  { %v1797_v52 = vsel %vm8153_vm8, %v7923_v61, %v1793_v45  ;;  %v1836_v32 = vadd.f32 %v1828_v62, %v6298_v5  ;;  %5108 = vtanh.f32 %v1832_v48  ;;  %v1772_v40 = vsel %vm8094_vm9, %v1771_v7, %v1767_v11 }
 0x2db   :  { %vm1784_vm12 = vcmp.eq.f32.partialorder %v1783_v59, 8.507059e+37  ;;  %v1801_v24 = vor.u32 1.1754944e-38, %v1800_v37  ;;  %5110 = vtanh.f32 %v1833_v54  ;;  %vm1799_vm15 = vcmp.eq.f32.partialorder %v1798_v31, 8.507059e+37 }
 0x2dc   :  { %v1787_v44 = vsel %vm1784_vm12, %v1786_v8, %v1782_v35  ;;  %5112 = vtanh.f32 %v1834_v42  ;;  %v1845_v33 = vsub.f32 1.0, %v8010_v41  ;;  %v1846_v6 = vsub.f32 1.0, %v8027_v58 }
 0x2dd   :  { %v5103_v51 = vpop.eup %5102  ;;  %v1802_v50 = vsel %vm1799_vm15, %v1801_v24, %v1797_v52  ;;  %5114 = vtanh.f32 %v1835_v14  ;;  %v1847_v61 = vsub.f32 1.0, %v8068_v0  ;;  %v1848_v28 = vsub.f32 1.0, %v8074_v4 }
 0x2de   :  { %v5105_v43 = vpop.eup %5104  ;;  %5116 = vtanh.f32 %v1836_v32  ;;  %v1853_v7 = vmul.f32 %v5103_v51, %v1845_v33  ;;  %v11863_v59 = vrot.slane %v7566_v15, 7  ;;  %v1849_v2 = vsub.f32 1.0, %v1757_v63  ;;  %v8350_v15 = vld [vmem:[#allocation9 + $0x18] sm:$0xff] }
 0x2df   :  { %v5107_v18 = vpop.eup %5106  ;;  %v1850_v47 = vsub.f32 1.0, %v1772_v40  ;;  %v1854_v19 = vmul.f32 %v5105_v43, %v1846_v6  ;;  %v11864_v1 = vrot.slane %v7573_v10, 7  ;;  %v1851_v49 = vsub.f32 1.0, %v1787_v44  ;;  %v8347_v10 = vld [vmem:[#allocation9 + $0x28] sm:$0xff]  ;;  %11923 = vst [vmem:[#allocation111_spill] sm:$0xff] %v8350_v15 }
 0x2e0   :  { %v1876_v26 = vmul.f32 %v11863_v59, %v8010_v41  ;;  %v5109_v57 = vpop.eup %5108  ;;  %v1852_v3 = vsub.f32 1.0, %v1802_v50  ;;  %v1855_v34 = vmul.f32 %v5107_v18, %v1847_v61  ;;  %v11866_v21 = vrot.slane %v7575_v38, 7  ;;  %v8344_v38 = vld [vmem:[#allocation9 + $0x38] sm:$0xff]  ;;  %11922 = vst [vmem:[#allocation110_spill] sm:$0xff] %v8347_v10 }
 0x2e1   :  { %v1877_v36 = vmul.f32 %v11864_v1, %v8027_v58  ;;  %v5111_v62 = vpop.eup %5110  ;;  %v1856_v48 = vmul.f32 %v5109_v57, %v1848_v28  ;;  %v11867_v37 = vrot.slane %v7582_v53, 7  ;;  %v11869_v31 = vrot.slane %v7584_v46, 7  ;;  %v8338_v46 = vld [vmem:[#allocation9 + $0x40] sm:$0xff]  ;;  %v8341_v53 = vld [vmem:[#allocation9 + $0x30] sm:$0xff]  ;;  %11921 = vst [vmem:[#allocation109_spill] sm:$0xff] %v8344_v38 }
 0x2e2   :  { %v8174_v45 = vadd.f32 %v1876_v26, %v1853_v7  ;;  %v1878_v41 = vmul.f32 %v8068_v0, %v11866_v21  ;;  %v5113_v29 = vpop.eup %5112  ;;  %v1857_v58 = vmul.f32 %v5111_v62, %v1849_v2  ;;  %v11870_v35 = vrot.slane %v7591_v22, 7  ;;  %v8224_v62 = vld [vmem:[#allocation9 + $0x168] sm:$0xff]  ;;  %v8230_v21 = vld [vmem:[#allocation9 + $0x160] sm:$0xff]  ;;  %v8335_v22 = vld [vmem:[#allocation9 + $0x50] sm:$0xff]  ;;  %11919 = vst [vmem:[#allocation107_spill] sm:$0xff] %v8338_v46 }
 0x2e3   :  { %v1879_v54 = vmul.f32 %v11867_v37, %v8074_v4  ;;  %v8182_v11 = vadd.f32 %v1877_v36, %v1854_v19  ;;  %v1880_v42 = vmul.f32 %v11869_v31, %v1757_v63  ;;  %v5115_v8 = vpop.eup %5114  ;;  %v1858_v52 = vmul.f32 %v5113_v29, %v1850_v47  ;;  %11881 = vst [vmem:[#allocation61_spill] sm:$0xff] %v8224_v62  ;;  %v8236_v37 = vld [vmem:[#allocation9 + $0x158] sm:$0xff]  ;;  %v8248_v31 = vld [vmem:[#allocation9 + $0x130] sm:$0xff] }
 0x2e4   :  { %11865 = vst [vmem:[#allocation52_spill] sm:$0xff] %v8174_v45  ;;  %v1881_v20 = vmul.f32 %v11870_v35, %v1772_v40  ;;  %v1900_v14 = vrot.slane %v8174_v45, 2  ;;  %v11871_v0 = vrot.slane %v7594_v23, 7  ;;  %v5117_v33 = vpop.eup %5116  ;;  %v1859_v51 = vmul.f32 %v5115_v8, %v1851_v49  ;;  %v8242_v29 = vld [vmem:[#allocation9 + $0x138] sm:$0xff]  ;;  %v8254_v35 = vld [vmem:[#allocation9 + $0x128] sm:$0xff]  ;;  %v8263_v8 = vld [vmem:[#allocation9 + $0x110] sm:$0xff] }
 0x2e5   :  { %11868 = vst [vmem:[#allocation53_spill] sm:$0xff] %v8182_v11  ;;  %v8191_v24 = vadd.f32 %v1879_v54, %v1856_v48  ;;  %v1901_v4 = vrot.slane %v8182_v11, 1  ;;  %v11873_v6 = vrot.slane %v7600_v12, 7  ;;  %v8196_v63 = vadd.f32 %v1878_v41, %v1855_v34  ;;  %v8221_v34 = vld [vmem:[#allocation9 + $0x178] sm:$0xff]  ;;  %v8227_v48 = vld [vmem:[#allocation9 + $0x170] sm:$0xff]  ;;  %v8239_v54 = vld [vmem:[#allocation9 + $0x148] sm:$0xff] }
 0x2e6   :  { %v1882_v32 = vmul.f32 %v11871_v0, %v1787_v44  ;;  %v8198_v43 = vadd.f32 %v1880_v42, %v1857_v58  ;;  %v1860_v40 = vmul.f32 %v5117_v33, %v1852_v3  ;;  %v8200_v28 = vadd.f32 %v1881_v20, %v1858_v52  ;;  %11880 = vst [vmem:[#allocation60_spill] sm:$0xff] %v8221_v34  ;;  %v8233_v41 = vld [vmem:[#allocation9 + $0x150] sm:$0xff]  ;;  %v8245_v58 = vld [vmem:[#allocation9 + $0x140] sm:$0xff]  ;;  %v8257_v20 = vld [vmem:[#allocation9 + $0x118] sm:$0xff] }
 0x2e7   :  { %11872 = vst [vmem:[#allocation54_spill] sm:$0xff] %v8191_v24  ;;  %v1883_v61 = vmul.f32 %v11873_v6, %v1802_v50  ;;  %v1902_v7 = vsel %vm11489_vm1, %v1901_v4, %v1900_v14  ;;  %v11388_v44 = vrot.slane %v8191_v24, 7  ;;  %vm11879_vm0 = vcmask 1047559   ;;  %v8251_v42 = vld [vmem:[#allocation9 + $0x120] sm:$0xff]  ;;  %v8260_v14 = vld [vmem:[#allocation9 + $0x108] sm:$0xff]  ;;  %v8269_v0 = vld [vmem:[#allocation9 + $0xf0] sm:$0xff] }
 0x2e8   :  { %11874 = vst [vmem:[#allocation55_spill] sm:$0xff] %v8196_v63  ;;  %v8204_v59 = vadd.f32 %v1882_v32, %v1859_v51  ;;  %v1903_v26 = vsel %vm11488_vm2, %v8196_v63, %v1902_v7  ;;  %v1906_v18 = vrot.slane %v8198_v43, 6  ;;  %v1908_v47 = vrot.slane %v8200_v28, 5  ;;  %v8266_v52 = vld [vmem:[#allocation9 + $0x100] sm:$0xff]  ;;  %v8272_v32 = vld [vmem:[#allocation9 + $0xf8] sm:$0xff]  ;;  %v8275_v4 = vld [vmem:[#allocation9 + $0xe8] sm:$0xff] }
 0x2e9   :  { %11875 = vst [vmem:[#allocation56_spill] sm:$0xff] %v8198_v43  ;;  %v8209_v2 = vadd.f32 %v1883_v61, %v1860_v40  ;;  %v1905_v50 = vsel %vm11487_vm3, %v11388_v44, %v1903_v26  ;;  %v8278_v33 = vld [vmem:[#allocation9 + $0xd8] sm:$0xff]  ;;  %v8281_v51 = vld [vmem:[#allocation9 + $0xe0] sm:$0xff]  ;;  %v8284_v6 = vld [vmem:[#allocation9 + $0xd0] sm:$0xff] }
 0x2ea   :  { %11876 = vst [vmem:[#allocation57_spill] sm:$0xff] %v8200_v28  ;;  %v1907_v19 = vsel %vm11486_vm4, %v1906_v18, %v1905_v50  ;;  %v1910_v1 = vrot.slane %v8204_v59, 4  ;;  %v8287_v61 = vld [vmem:[#allocation9 + $0xc0] sm:$0xff]  ;;  %v8290_v40 = vld [vmem:[#allocation9 + $0xc8] sm:$0xff]  ;;  %v8293_v7 = vld [vmem:[#allocation9 + $0xb8] sm:$0xff] }
 0x2eb   :  { %11877 = vst [vmem:[#allocation58_spill] sm:$0xff] %v8204_v59  ;;  %v1909_v36 = vsel %vm11485_vm5, %v1908_v47, %v1907_v19  ;;  %v1912_v57 = vrot.slane %v8209_v2, 3  ;;  %v8296_v26 = vld [vmem:[#allocation9 + $0xa8] sm:$0xff]  ;;  %v8299_v18 = vld [vmem:[#allocation9 + $0xb0] sm:$0xff]  ;;  %v8302_v50 = vld [vmem:[#allocation9 + $0xa0] sm:$0xff] }
 0x2ec   :  { %11878 = vst [vmem:[#allocation59_spill] sm:$0xff] %v8209_v2  ;;  %v1911_v49 = vsel %vm11482_vm6, %v1910_v1, %v1909_v36  ;;  %v8305_v47 = vld [vmem:[#allocation9 + $0x90] sm:$0xff]  ;;  %v8308_v19 = vld [vmem:[#allocation9 + $0x98] sm:$0xff]  ;;  %v8311_v1 = vld [vmem:[#allocation9 + $0x88] sm:$0xff] }
 0x2ed   :  { %v1913_v3 = vsel %vm11879_vm0, %v1912_v57, %v1911_v49  ;;  %11882 = vst [vmem:[#allocation62_spill] sm:$0xff] %v8227_v48  ;;  %v8314_v36 = vld [vmem:[#allocation9 + $0x78] sm:$0xff]  ;;  %v8317_v57 = vld [vmem:[#allocation9 + $0x80] sm:$0xff]  ;;  %v8320_v49 = vld [vmem:[#allocation9 + $0x70] sm:$0xff] }
 0x2ee   :  { %1931 = vmatmul.f32.vlgmr.msra.gmra.mxu3 %v1913_v3  ;;  %1951 = vmatmul.f32.vlgmr.msrb.gmra.mxu0 %v1913_v3  ;;  %11883 = vst [vmem:[#allocation63_spill] sm:$0xff] %v8230_v21  ;;  %v8326_v44 = vld [vmem:[#allocation9 + $0x68] sm:$0xff]  ;;  %v8329_v12 = vld [vmem:[#allocation9 + $0x58] sm:$0xff] }
 0x2ef   :  { %1971 = vmatmul.f32.vlgmr.msrb.gmra.mxu1 %v1913_v3  ;;  %3001 = vmatpush.msra.mxu3 %v8221_v34  ;;  %11884 = vst [vmem:[#allocation64_spill] sm:$0xff] %v8233_v41  ;;  %v8323_v3 = vld [vmem:[#allocation9 + $0x60] sm:$0xff]  ;;  %v8332_v23 = vld [vmem:[#allocation9 + $0x48] sm:$0xff] }
 0x2f0   :  { %3484 = vmatpush.msrb.mxu0 %v8224_v62  ;;  %3504 = vmatpush.msrb.mxu1 %v8227_v48  ;;  %11885 = vst [vmem:[#allocation65_spill] sm:$0xff] %v8236_v37 }
 0x2f1   :  { %3002 = vmatpush.msra.mxu3 %v8230_v21  ;;  %11886 = vst [vmem:[#allocation66_spill] sm:$0xff] %v8239_v54 }
 0x2f2   :  { %3485 = vmatpush.msrb.mxu0 %v8233_v41  ;;  %3505 = vmatpush.msrb.mxu1 %v8236_v37  ;;  %11887 = vst [vmem:[#allocation67_spill] sm:$0xff] %v8242_v29 }
 0x2f3   :  { %3003 = vmatpush.msra.mxu3 %v8239_v54  ;;  %11888 = vst [vmem:[#allocation68_spill] sm:$0xff] %v8245_v58 }
 0x2f4   :  { %3486 = vmatpush.msrb.mxu0 %v8242_v29  ;;  %3506 = vmatpush.msrb.mxu1 %v8245_v58  ;;  %11889 = vst [vmem:[#allocation69_spill] sm:$0xff] %v8248_v31 }
 0x2f5   :  { %3004 = vmatpush.msra.mxu3 %v8248_v31  ;;  %11890 = vst [vmem:[#allocation70_spill] sm:$0xff] %v8251_v42 }
 0x2f6   :  { %3487 = vmatpush.msrb.mxu0 %v8251_v42  ;;  %11891 = vst [vmem:[#allocation71_spill] sm:$0xff] %v8254_v35  ;;  %3507 = vmatpush.msrb.mxu1 %v8254_v35 }
 0x2f7   :  { %11892 = vst [vmem:[#allocation72_spill] sm:$0xff] %v8257_v20  ;;  %3005 = vmatpush.msra.mxu3 %v8257_v20 }
 0x2f8   :  { %11893 = vst [vmem:[#allocation73_spill] sm:$0xff] %v8260_v14  ;;  %3488 = vmatpush.msrb.mxu0 %v8260_v14  ;;  %3508 = vmatpush.msrb.mxu1 %v8263_v8 }
 0x2f9   :  { %11894 = vst [vmem:[#allocation74_spill] sm:$0xff] %v8263_v8  ;;  %3006 = vmatpush.msra.mxu3 %v8266_v52 }
 0x2fa   :  { %11895 = vst [vmem:[#allocation75_spill] sm:$0xff] %v8266_v52  ;;  %3489 = vmatpush.msrb.mxu0 %v8269_v0  ;;  %3509 = vmatpush.msrb.mxu1 %v8272_v32 }
 0x2fb   :  { %11896 = vst [vmem:[#allocation76_spill] sm:$0xff] %v8269_v0  ;;  %3007 = vmatpush.msra.mxu3 %v8275_v4 }
 0x2fc   :  { %11897 = vst [vmem:[#allocation77_spill] sm:$0xff] %v8272_v32  ;;  %3490 = vmatpush.msrb.mxu0 %v8278_v33  ;;  %3510 = vmatpush.msrb.mxu1 %v8281_v51 }
 0x2fd   :  { %11898 = vst [vmem:[#allocation78_spill] sm:$0xff] %v8275_v4  ;;  %3008 = vmatpush.msra.mxu3 %v8284_v6 }
 0x2fe   :  { %11899 = vst [vmem:[#allocation79_spill] sm:$0xff] %v8278_v33  ;;  %3491 = vmatpush.msrb.mxu0 %v8287_v61  ;;  %3511 = vmatpush.msrb.mxu1 %v8290_v40 }
 0x2ff   :  { %11900 = vst [vmem:[#allocation80_spill] sm:$0xff] %v8281_v51  ;;  %3009 = vmatpush.msra.mxu3 %v8293_v7 }
 0x300   :  { %11901 = vst [vmem:[#allocation81_spill] sm:$0xff] %v8284_v6  ;;  %3492 = vmatpush.msrb.mxu0 %v8296_v26  ;;  %3512 = vmatpush.msrb.mxu1 %v8299_v18 }
 0x301   :  { %11902 = vst [vmem:[#allocation82_spill] sm:$0xff] %v8287_v61  ;;  %3010 = vmatpush.msra.mxu3 %v8302_v50  ;;  %v11930_v61 = vld [vmem:[#allocation41_spill] sm:$0xff] }
 0x302   :  { %11903 = vst [vmem:[#allocation83_spill] sm:$0xff] %v8290_v40  ;;  %3493 = vmatpush.msrb.mxu0 %v8305_v47  ;;  %3513 = vmatpush.msrb.mxu1 %v8308_v19 }
 0x303   :  { %11904 = vst [vmem:[#allocation84_spill] sm:$0xff] %v8293_v7  ;;  %3011 = vmatpush.msra.mxu3 %v8311_v1 }
 0x304   :  { %11905 = vst [vmem:[#allocation85_spill] sm:$0xff] %v8296_v26  ;;  %3494 = vmatpush.msrb.mxu0 %v8314_v36  ;;  %3514 = vmatpush.msrb.mxu1 %v8317_v57 }
 0x305   :  { %11906 = vst [vmem:[#allocation86_spill] sm:$0xff] %v8299_v18  ;;  %3012 = vmatpush.msra.mxu3 %v8320_v49 }
 0x306   :  { %11907 = vst [vmem:[#allocation87_spill] sm:$0xff] %v8302_v50  ;;  %3495 = vmatpush.msrb.mxu0 %v8323_v3  ;;  %3515 = vmatpush.msrb.mxu1 %v8326_v44 }
 0x307   :  { %11908 = vst [vmem:[#allocation88_spill] sm:$0xff] %v8305_v47  ;;  %3013 = vmatpush.msra.mxu3 %v8329_v12  ;;  %v11929_v47 = vld [vmem:[#allocation40_spill] sm:$0xff] }
 0x308   :  { %11909 = vst [vmem:[#allocation89_spill] sm:$0xff] %v8308_v19  ;;  %3496 = vmatpush.msrb.mxu0 %v8332_v23  ;;  %3516 = vmatpush.msrb.mxu1 %v8335_v22 }
 0x309   :  { %11910 = vst [vmem:[#allocation90_spill] sm:$0xff] %v8311_v1  ;;  %3014 = vmatpush.msra.mxu3 %v8338_v46  ;;  %v8356_v46 = vld [vmem:[#allocation9 + $0x10] sm:$0xff] }
 0x30a   :  { %11911 = vst [vmem:[#allocation91_spill] sm:$0xff] %v8314_v36  ;;  %3497 = vmatpush.msrb.mxu0 %v8341_v53  ;;  %3517 = vmatpush.msrb.mxu1 %v8344_v38  ;;  %v8362_v38 = vld [vmem:[#allocation9 + $0x8] sm:$0xff] }
 0x30b   :  { %11912 = vst [vmem:[#allocation92_spill] sm:$0xff] %v8317_v57  ;;  %3015 = vmatpush.msra.mxu3 %v8347_v10 }
 0x30c   :  { %11913 = vst [vmem:[#allocation93_spill] sm:$0xff] %v8320_v49  ;;  %3498 = vmatpush.msrb.mxu0 %v8350_v15 }
 0x30d   :  { %11914 = vst [vmem:[#allocation94_spill] sm:$0xff] %v8323_v3  ;;  %3016 = vmatpush.msra.mxu3 %v8356_v46 }
 0x30e   :  { %11915 = vst [vmem:[#allocation95_spill] sm:$0xff] %v8326_v44 }
 0x30f   :  { %11916 = vst [vmem:[#allocation104_spill] sm:$0xff] %v8329_v12 }
 0x310   :  { %11917 = vst [vmem:[#allocation105_spill] sm:$0xff] %v8332_v23 }
 0x311   :  { %11918 = vst [vmem:[#allocation106_spill] sm:$0xff] %v8335_v22  ;;  %v8353_v22 = vld [vmem:[#allocation9 + $0x20] sm:$0xff] }
 0x312   :  { %11920 = vst [vmem:[#allocation108_spill] sm:$0xff] %v8341_v53  ;;  %3518 = vmatpush.msrb.mxu1 %v8353_v22  ;;  %v8359_v53 = vld [vmem:[#allocation9] sm:$0xff] }
 0x313   :  { %11924 = vst [vmem:[#allocation112_spill] sm:$0xff] %v8353_v22  ;;  %3499 = vmatpush.msrb.mxu0 %v8359_v53 }
 0x314   :  { %11925 = vst [vmem:[#allocation113_spill] sm:$0xff] %v8356_v46  ;;  %3519 = vmatpush.msrb.mxu1 %v8362_v38 }
 0x315   :  { %11926 = vst [vmem:[#allocation114_spill] sm:$0xff] %v8359_v53  ;;  %v11928_v53 = vld [vmem:[#allocation36_spill] sm:$0xff] }
 0x316   :  { %11927 = vst [vmem:[#allocation115_spill] sm:$0xff] %v8362_v38 }
 0x36b   :  { %v1952_v10 = vpop.f32.mrf.mxu0 }
 0x36c   :  { %v2152_v23 = vrot.slane %v1952_v10, 5  ;;  %v2153_v12 = vrot.slane %v1952_v10, 6  ;;  %v2154_v15 = vrot.slane %v1952_v10, 7  ;;  %v2155_v44 = vrot.slane %v1952_v10, 1 }
 0x36d   :  { %v2156_v3 = vrot.slane %v1952_v10, 2  ;;  %v2157_v49 = vrot.slane %v1952_v10, 3  ;;  %v2170_v22 = vadd.f32 %v1952_v10, %v11804_v17  ;;  %v2158_v19 = vrot.slane %v1952_v10, 4 }
 0x36e   :  { %v2167_v57 = vadd.f32 %v2152_v23, %v11800_v30  ;;  %v2168_v46 = vadd.f32 %v2153_v12, %v11802_v39  ;;  %v2169_v36 = vadd.f32 %v2154_v15, %v11803_v27  ;;  %v2171_v1 = vadd.f32 %v2155_v44, %v11928_v53  ;;  %v11931_v23 = vld [vmem:[#allocation43_spill] sm:$0xff]  ;;  %v11937_v27 = vld [vmem:[#allocation25_spill] sm:$0xff] }
 0x36f   :  { %v2172_v38 = vadd.f32 %v2156_v3, %v11929_v47  ;;  %v4794_v50 = vmul.f32 -1.442695, %v2170_v22  ;;  %v2173_v6 = vadd.f32 %v2157_v49, %v11930_v61  ;;  %v2174_v30 = vadd.f32 %v2158_v19, %v11931_v23  ;;  %v11933_v19 = vld [vmem:[#allocation22_spill] sm:$0xff]  ;;  %v11934_v61 = vld [vmem:[#allocation23_spill] sm:$0xff] }
 0x370   :  { %v4791_v18 = vmul.f32 -1.442695, %v2167_v57  ;;  %v4792_v26 = vmul.f32 -1.442695, %v2168_v46  ;;  %v4793_v7 = vmul.f32 -1.442695, %v2169_v36 }
 0x371   :  { %5118 = vpow2.f32 %v4794_v50  ;;  %v4795_v40 = vmul.f32 -1.442695, %v2171_v1  ;;  %v4796_v17 = vmul.f32 -1.442695, %v2172_v38  ;;  %v1932_v12 = vpop.f32.mrf.mxu3  ;;  %v4797_v15 = vmul.f32 -1.442695, %v2173_v6 }
 0x372   :  { %5120 = vpow2.f32 %v4791_v18  ;;  %v1976_v10 = vrot.slane %v1932_v12, 5  ;;  %v4798_v22 = vmul.f32 -1.442695, %v2174_v30  ;;  %v1977_v57 = vrot.slane %v1932_v12, 6 }
 0x373   :  { %5122 = vpow2.f32 %v4792_v26  ;;  %v1978_v50 = vrot.slane %v1932_v12, 7  ;;  %v1979_v26 = vrot.slane %v1932_v12, 1  ;;  %v1980_v30 = vrot.slane %v1932_v12, 2 }
 0x374   :  { %5124 = vpow2.f32 %v4793_v7  ;;  %v11932_v7 = vld [vmem:[#allocation21_spill] sm:$0xff]  ;;  %v1992_v3 = vadd.f32 %v1977_v57, %v11933_v19 }
 0x375   :  { %5126 = vpow2.f32 %v4795_v40  ;;  %v1991_v40 = vadd.f32 %v1976_v10, %v11932_v7  ;;  %v11935_v10 = vld [vmem:[#allocation24_spill] sm:$0xff]  ;;  %v1996_v39 = vadd.f32 %v1980_v30, %v11937_v27 }
 0x376   :  { %5128 = vpow2.f32 %v4796_v17  ;;  %v1994_v47 = vadd.f32 %v1932_v12, %v11935_v10  ;;  %v4784_v19 = vmul.f32 -1.442695, %v1992_v3  ;;  %v11941_v3 = vld [vmem:[#allocation38_spill] sm:$0xff] }
 0x377   :  { %v5119_v44 = vpop.eup %5118  ;;  %5130 = vpow2.f32 %v4797_v15  ;;  %v1993_v15 = vadd.f32 %v1978_v50, %v11934_v61  ;;  %v4783_v57 = vmul.f32 -1.442695, %v1991_v40  ;;  %v11938_v50 = vld [vmem:[#allocation26_spill] sm:$0xff]  ;;  %v8404_v40 = vld [vmem:[%s11296_s5] ss:$0 sm:$0xff] }
 0x378   :  { %v5121_v46 = vpop.eup %5120  ;;  %v8373_v36 = vadd.f32 1.0, %v5119_v44  ;;  %5132 = vpow2.f32 %v4798_v22  ;;  %v1982_v22 = vrot.slane %v1932_v12, 4  ;;  %11939 = vst [vmem:[#allocation116_spill] sm:$0xff] %v8404_v40  ;;  %v4788_v10 = vmul.f32 -1.442695, %v1996_v39 }
 0x379   :  { %v5123_v1 = vpop.eup %5122  ;;  %v8375_v49 = vadd.f32 1.0, %v5121_v46  ;;  %v1981_v46 = vrot.slane %v1932_v12, 3  ;;  %v4785_v61 = vmul.f32 -1.442695, %v1993_v15  ;;  %v4786_v12 = vmul.f32 -1.442695, %v1994_v47 }
 0x37a   :  { %v5125_v38 = vpop.eup %5124  ;;  %v8377_v18 = vadd.f32 1.0, %v5123_v1  ;;  %5134 = vrcp.f32 %v8373_v36  ;;  %v1998_v27 = vadd.f32 %v1982_v22, %v11941_v3  ;;  %v2263_v47 = vand.u32 2147483648, %v8373_v36 }
 0x37b   :  { %v5127_v17 = vpop.eup %5126  ;;  %v8380_v6 = vadd.f32 1.0, %v5125_v38  ;;  %5136 = vrcp.f32 %v8375_v49  ;;  %v11936_v38 = vld [vmem:[#allocation20_spill] sm:$0xff] }
 0x37c   :  { %v5129_v44 = vpop.eup %5128  ;;  %v8383_v23 = vadd.f32 1.0, %v5127_v17  ;;  %5138 = vrcp.f32 %v8377_v18  ;;  %v1995_v53 = vadd.f32 %v1979_v26, %v11936_v38  ;;  %v1972_v17 = vpop.f32.mrf.mxu1  ;;  %v2233_v52 = vand.u32 2147483648, %v8377_v18 }
 0x37d   :  { %v8387_v1 = vadd.f32 1.0, %v5129_v44  ;;  %5140 = vrcp.f32 %v8380_v6  ;;  %v5131_v7 = vpop.eup %5130  ;;  %v1997_v44 = vadd.f32 %v1981_v46, %v11938_v50  ;;  %v8407_v30 = vadd.f32 %v8404_v40, %v1972_v17 }
 0x37e   :  { %5142 = vrcp.f32 %v8383_v23  ;;  %v5133_v51 = vpop.eup %5132  ;;  %v4787_v46 = vmul.f32 -1.442695, %v1995_v53  ;;  %v8420_v22 = vadd.f32 1.0, %v5131_v7 }
 0x37f   :  { %5144 = vrcp.f32 %v8387_v1  ;;  %11940 = vst [vmem:[#allocation117_spill] sm:$0xff] %v8407_v30  ;;  %v4789_v33 = vmul.f32 -1.442695, %v1997_v44  ;;  %v4790_v44 = vmul.f32 -1.442695, %v1998_v27  ;;  %v8434_v39 = vadd.f32 1.0, %v5133_v51 }
 0x380   :  { %v8399_v26 = vpop.eup %5134  ;;  %5146 = vpow2.f32 %v4783_v57  ;;  %v2218_v57 = vand.u32 2147483648, %v8375_v49 }
 0x381   :  { %v8410_v15 = vpop.eup %5136  ;;  %5148 = vpow2.f32 %v4784_v19  ;;  %v2253_v7 = vmul.f32 %v8399_v26, %v8373_v36  ;;  %vm2258_vm2 = vweird.f32 %v8399_v26 }
 0x382   :  { %v8414_v38 = vpop.eup %5138  ;;  %5150 = vpow2.f32 %v4785_v61  ;;  %v2208_v27 = vmul.f32 %v8410_v15, %v8375_v49  ;;  %vm2213_vm4 = vweird.f32 %v8410_v15 }
 0x383   :  { %v8418_v40 = vpop.eup %5140  ;;  %5152 = vpow2.f32 %v4786_v12  ;;  %v2254_v32 = vsub.f32 1.0, %v2253_v7  ;;  %v8465_v7 = vor.u32 1.1754944e-38, %v2218_v57 }
 0x384   :  { %v8424_v19 = vpop.eup %5142  ;;  %5154 = vpow2.f32 %v4787_v46  ;;  %v2238_v51 = vmul.f32 %v8418_v40, %v8380_v6  ;;  %v2209_v8 = vsub.f32 1.0, %v2208_v27 }
 0x385   :  { %v8428_v4 = vpop.eup %5144  ;;  %5156 = vpow2.f32 %v4788_v10  ;;  %v2223_v10 = vmul.f32 %v8414_v38, %v8377_v18  ;;  %v2255_v27 = vmul.f32 %v8399_v26, %v2254_v32 }
 0x386   :  { %v5147_v53 = vpop.eup %5146  ;;  %5158 = vpow2.f32 %v4789_v33  ;;  %v8489_v32 = vmul.f32 %v8410_v15, %v2209_v8 }
 0x387   :  { %v5149_v46 = vpop.eup %5148  ;;  %5160 = vrcp.f32 %v8420_v22  ;;  %v8443_v17 = vadd.f32 1.0, %v5147_v53  ;;  %v2224_v14 = vsub.f32 1.0, %v2223_v10 }
 0x388   :  { %v5151_v61 = vpop.eup %5150  ;;  %5162 = vpow2.f32 %v4790_v44  ;;  %v8447_v33 = vadd.f32 1.0, %v5149_v46  ;;  %v2248_v44 = vand.u32 2147483648, %v8380_v6 }
 0x389   :  { %v5153_v12 = vpop.eup %5152  ;;  %v8450_v50 = vadd.f32 1.0, %v5151_v61  ;;  %5164 = vrcp.f32 %v8443_v17  ;;  %v8492_v31 = vmul.f32 %v8414_v38, %v2224_v14  ;;  %v8509_v14 = vadd.f32 %v8399_v26, %v2255_v27 }
 0x38a   :  { %v5155_v0 = vpop.eup %5154  ;;  %v8454_v53 = vadd.f32 1.0, %v5153_v12  ;;  %5166 = vrcp.f32 %v8447_v33  ;;  %v2239_v12 = vsub.f32 1.0, %v2238_v51  ;;  %v8480_v57 = vor.u32 1.1754944e-38, %v2248_v44 }
 0x38b   :  { %v5157_v46 = vpop.eup %5156  ;;  %5168 = vrcp.f32 %v8434_v39  ;;  %v8460_v61 = vadd.f32 1.0, %v5155_v0  ;;  %v8475_v0 = vmul.f32 %v8424_v19, %v8383_v23  ;;  %v8482_v51 = vor.u32 1.1754944e-38, %v2263_v47 }
 0x38c   :  { %v5159_v20 = vpop.eup %5158  ;;  %v8462_v35 = vadd.f32 1.0, %v5157_v46  ;;  %5170 = vrcp.f32 %v8450_v50  ;;  %v8478_v46 = vor.u32 1.1754944e-38, %v2233_v52  ;;  %v2057_v47 = vand.u32 2147483648, %v8447_v33 }
 0x38d   :  { %v8467_v3 = vpop.eup %5160  ;;  %v8469_v42 = vadd.f32 1.0, %v5159_v20  ;;  %5172 = vrcp.f32 %v8454_v53  ;;  %v2042_v20 = vand.u32 2147483648, %v8443_v17  ;;  %v8501_v44 = vmul.f32 %v8418_v40, %v2239_v12 }
 0x38e   :  { %v5163_v10 = vpop.eup %5162  ;;  %5174 = vrcp.f32 %v8460_v61  ;;  %vm2036_vm7 = vweird.f32 %v8443_v17  ;;  %v2040_v12 = vand.u32 2147483647, %v8443_v17  ;;  %v2055_v48 = vand.u32 2147483647, %v8447_v33 }
 0x38f   :  { %v8484_v58 = vpop.eup %5164  ;;  %5176 = vrcp.f32 %v8462_v35  ;;  %v8517_v62 = vadd.f32 1.0, %v5163_v10  ;;  %v8519_v34 = vor.u32 1.1754944e-38, %v2042_v20  ;;  %vm2051_vm9 = vweird.f32 %v8447_v33 }
 0x390   :  { %v8494_v29 = vpop.eup %5166  ;;  %v2032_v52 = vmul.f32 %v8484_v58, %v8443_v17  ;;  %5178 = vrcp.f32 %v8469_v42  ;;  %v8526_v59 = vor.u32 1.1754944e-38, %v2057_v47  ;;  %vm2066_vm11 = vweird.f32 %v8450_v50 }
 0x391   :  { %v8503_v54 = vpop.eup %5168  ;;  %v2047_v8 = vmul.f32 %v8494_v29, %v8447_v33  ;;  %v2072_v28 = vand.u32 2147483648, %v8450_v50  ;;  %vm2081_vm10 = vweird.f32 %v8454_v53  ;;  %v2085_v11 = vand.u32 2147483647, %v8454_v53 }
 0x392   :  { %v8512_v41 = vpop.eup %5170  ;;  %v2033_v21 = vsub.f32 1.0, %v2032_v52  ;;  %v2070_v52 = vand.u32 2147483647, %v8450_v50  ;;  %v2087_v45 = vand.u32 2147483648, %v8454_v53  ;;  %vm8546_vm13 = vcmp.eq.f32.partialorder %v2040_v12, 8.507059e+37 }
 0x393   :  { %v2048_v2 = vsub.f32 1.0, %v2047_v8  ;;  %v2062_v27 = vmul.f32 %v8512_v41, %v8450_v50  ;;  %v8524_v37 = vpop.eup %5172  ;;  %5180 = vrcp.f32 %v8517_v62  ;;  %vm2037_vm14 = vweird.f32 %v8484_v58 }
 0x394   :  { %v8531_v10 = vpop.eup %5174  ;;  %v2034_v20 = vmul.f32 %v8484_v58, %v2033_v21  ;;  %v2077_v24 = vmul.f32 %v8524_v37, %v8454_v53  ;;  %vm2052_vm8 = vweird.f32 %v8494_v29  ;;  %vm8556_vm12 = vcmp.eq.f32.partialorder %v2055_v48, 8.507059e+37  ;;  %vm8574_vm6 = vmor %vm2036_vm7, %vm2037_vm14  ;;  %v12001_v53 = vld [vmem:[#allocation37_spill] sm:$0xff] }
 0x395   :  { %v2049_v8 = vmul.f32 %v8494_v29, %v2048_v2  ;;  %v2063_v43 = vsub.f32 1.0, %v2062_v27  ;;  %v8537_v63 = vpop.eup %5176  ;;  %v2092_v47 = vmul.f32 %v8531_v10, %v8460_v61  ;;  %vm8560_vm15 = vcmp.eq.f32.partialorder %v2070_v52, 8.507059e+37  ;;  %vm8588_vm3 = vmor %vm2051_vm9, %vm2052_vm8 }
 0x396   :  { %v8544_v5 = vpop.eup %5178  ;;  %v2078_v27 = vsub.f32 1.0, %v2077_v24  ;;  %v2107_v60 = vmul.f32 %v8537_v63, %v8462_v35  ;;  %vm2067_vm0 = vweird.f32 %v8512_v41  ;;  %v2073_v30 = vor.u32 1.1754944e-38, %v2072_v28 }
 0x397   :  { %v2064_v2 = vmul.f32 %v8512_v41, %v2063_v43  ;;  %v2093_v55 = vsub.f32 1.0, %v2092_v47  ;;  %v2122_v24 = vmul.f32 %v8544_v5, %v8469_v42  ;;  %v2035_v43 = vadd.f32 %v8484_v58, %v2034_v20  ;;  %vm8609_vm9 = vmor %vm2066_vm11, %vm2067_vm0 }
 0x398   :  { %v2050_v16 = vadd.f32 %v8494_v29, %v2049_v8  ;;  %v2079_v9 = vmul.f32 %v8524_v37, %v2078_v27  ;;  %v2108_v25 = vsub.f32 1.0, %v2107_v60  ;;  %vm8578_vm5 = vcmp.eq.f32.partialorder %v2085_v11, 8.507059e+37 }
 0x399   :  { %v2065_v48 = vadd.f32 %v8512_v41, %v2064_v2  ;;  %v2123_v13 = vsub.f32 1.0, %v2122_v24  ;;  %v2094_v52 = vmul.f32 %v8531_v10, %v2093_v55  ;;  %v2088_v8 = vor.u32 1.1754944e-38, %v2087_v45 }
 0x39a   :  { %v2109_v60 = vmul.f32 %v8537_v63, %v2108_v25  ;;  %vm2082_vm7 = vweird.f32 %v8524_v37  ;;  %vm2097_vm14 = vweird.f32 %v8531_v10  ;;  %v2100_v11 = vand.u32 2147483647, %v8460_v61  ;;  %v8597_v25 = vpop.eup %5180 }
 0x39b   :  { %v2102_v45 = vand.u32 2147483648, %v8460_v61  ;;  %v2039_v28 = vsel %vm8574_vm6, %v8484_v58, %v2035_v43  ;;  %v2054_v17 = vsel %vm8588_vm3, %v8494_v29, %v2050_v16  ;;  %v2080_v2 = vadd.f32 %v8524_v37, %v2079_v9  ;;  %vm8629_vm1 = vmor %vm2081_vm10, %vm2082_vm7 }
 0x39c   :  { %v2095_v27 = vadd.f32 %v8531_v10, %v2094_v52  ;;  %vm2212_vm8 = vweird.f32 %v8375_v49  ;;  %v2069_v16 = vsel %vm8609_vm9, %v8512_v41, %v2065_v48  ;;  %v2110_v29 = vadd.f32 %v8537_v63, %v2109_v60 }
 0x39d   :  { %vm2112_vm3 = vweird.f32 %v8537_v63  ;;  %v2124_v58 = vmul.f32 %v8544_v5, %v2123_v13  ;;  %vm2257_vm0 = vweird.f32 %v8373_v36  ;;  %vm2096_vm9 = vweird.f32 %v8460_v61 }
 0x39e   :  { %vm2111_vm6 = vweird.f32 %v8462_v35  ;;  %v2115_v41 = vand.u32 2147483647, %v8462_v35  ;;  %v2117_v13 = vand.u32 2147483648, %v8462_v35  ;;  %v8641_v50 = vsel %vm8546_vm13, %v8519_v34, %v2039_v28  ;;  %vm8645_vm10 = vmor %vm2096_vm9, %vm2097_vm14 }
 0x39f   :  { %vm8649_vm7 = vcmp.eq.f32.partialorder %v2100_v11, 8.507059e+37  ;;  %v2103_v24 = vor.u32 1.1754944e-38, %v2102_v45  ;;  %v2137_v35 = vmul.f32 %v8597_v25, %v8517_v62  ;;  %vm2242_vm11 = vweird.f32 %v8380_v6  ;;  %vm8673_vm13 = vmor %vm2111_vm6, %vm2112_vm3 }
 0x3a0   :  { %v8659_v34 = vsel %vm8556_vm12, %v8526_v59, %v2054_v17  ;;  %v8663_v21 = vsel %vm8560_vm15, %v2073_v30, %v2069_v16  ;;  %v2084_v43 = vsel %vm8629_vm1, %v8524_v37, %v2080_v2  ;;  %v2099_v48 = vsel %vm8645_vm10, %v8531_v10, %v2095_v27 }
 0x3a1   :  { %v2114_v56 = vsel %vm8673_vm13, %v8537_v63, %v2110_v29  ;;  %v2125_v59 = vadd.f32 %v8544_v5, %v2124_v58  ;;  %vm2127_vm12 = vweird.f32 %v8544_v5  ;;  %v2138_v30 = vsub.f32 1.0, %v2137_v35 }
 0x3a2   :  { %vm2116_vm1 = vcmp.eq.f32.partialorder %v2115_v41, 8.507059e+37  ;;  %v2118_v37 = vor.u32 1.1754944e-38, %v2117_v13  ;;  %v2130_v12 = vand.u32 2147483647, %v8469_v42  ;;  %v2132_v10 = vand.u32 2147483648, %v8469_v42 }
 0x3a3   :  { %v11964_v47 = vand.u32 2147483647, %v8375_v49  ;;  %v11967_v55 = vand.u32 2147483647, %v8377_v18  ;;  %v11970_v11 = vand.u32 2147483647, %v8373_v36  ;;  %v8704_v28 = vsel %vm8578_vm5, %v2088_v8, %v2084_v43 }
 0x3a4   :  { %vm2126_vm3 = vweird.f32 %v8469_v42  ;;  %v2139_v17 = vmul.f32 %v8597_v25, %v2138_v30  ;;  %v2145_v33 = vand.u32 2147483647, %v8517_v62  ;;  %v11973_v2 = vand.u32 2147483647, %v8380_v6 }
 0x3a5   :  { %vm8686_vm15 = vcmp.eq.f32.partialorder %v11964_v47, 8.507059e+37  ;;  %vm8692_vm14 = vcmp.eq.f32.partialorder %v11967_v55, 8.507059e+37  ;;  %vm8698_vm6 = vcmp.eq.f32.partialorder %v11970_v11, 8.507059e+37  ;;  %v8717_v16 = vsel %vm8649_vm7, %v2103_v24, %v2099_v48  ;;  %vm8723_vm5 = vmor %vm2126_vm3, %vm2127_vm12  ;;  %v11994_v11 = vld [vmem:[#allocation117_spill] sm:$0xff] }
 0x3a6   :  { %vm8711_vm9 = vcmp.eq.f32.partialorder %v11973_v2, 8.507059e+37  ;;  %v8719_v29 = vsel %vm2116_vm1, %v2118_v37, %v2114_v56  ;;  %v2211_v20 = vadd.f32 %v8410_v15, %v8489_v32  ;;  %v2226_v8 = vadd.f32 %v8414_v38, %v8492_v31  ;;  %vm8739_vm7 = vmor %vm2212_vm8, %vm2213_vm4 }
 0x3a7   :  { %v2129_v58 = vsel %vm8723_vm5, %v8544_v5, %v2125_v59  ;;  %vm2141_vm10 = vweird.f32 %v8517_v62  ;;  %v2241_v32 = vadd.f32 %v8418_v40, %v8501_v44  ;;  %v11980_v41 = vsub.f32 1.0, %v8475_v0  ;;  %vm8754_vm4 = vmor %vm2257_vm0, %vm2258_vm2  ;;  %v12000_v44 = vld [vmem:[#allocation35_spill] sm:$0xff] }
 0x3a8   :  { %vm2131_vm13 = vcmp.eq.f32.partialorder %v2130_v12, 8.507059e+37  ;;  %v2133_v13 = vor.u32 1.1754944e-38, %v2132_v10  ;;  %v2140_v5 = vadd.f32 %v8597_v25, %v2139_v17  ;;  %vm2142_vm12 = vweird.f32 %v8597_v25 }
 0x3a9   :  { %v2270_v31 = vmul.f32 %v8424_v19, %v11980_v41  ;;  %vm8758_vm8 = vcmp.eq.f32.partialorder %v2145_v33, 8.507059e+37  ;;  %v2147_v0 = vand.u32 2147483648, %v8517_v62  ;;  %vm11985_vm1 = vweird.f32 %v8414_v38 }
 0x3aa   :  { %vm11986_vm3 = vweird.f32 %v8377_v18  ;;  %v2260_v36 = vsel %vm8754_vm4, %v8399_v26, %v8509_v14  ;;  %v2283_v61 = vmul.f32 %v8428_v4, %v8387_v1  ;;  %v2215_v24 = vsel %vm8739_vm7, %v8410_v15, %v2211_v20  ;;  %vm8795_vm7 = vmor %vm2141_vm10, %vm2142_vm12 }
 0x3ab   :  { %vm8767_vm5 = vmor %vm11986_vm3, %vm11985_vm1  ;;  %vm11989_vm2 = vweird.f32 %v8418_v40  ;;  %v2271_v26 = vadd.f32 %v8424_v19, %v2270_v31  ;;  %vm2273_vm4 = vweird.f32 %v8424_v19  ;;  %v2134_v14 = vsel %vm2131_vm13, %v2133_v13, %v2129_v58 }
 0x3ac   :  { %v2230_v18 = vsel %vm8767_vm5, %v8414_v38, %v2226_v8  ;;  %vm8787_vm0 = vmor %vm2242_vm11, %vm11989_vm2  ;;  %v2276_v6 = vand.u32 2147483647, %v8383_v23  ;;  %v2278_v43 = vand.u32 2147483648, %v8383_v23  ;;  %v2144_v48 = vsel %vm8795_vm7, %v8597_v25, %v2140_v5 }
 0x3ad   :  { %v2245_v38 = vsel %vm8787_vm0, %v8418_v40, %v2241_v32  ;;  %vm2272_vm11 = vweird.f32 %v8383_v23  ;;  %v2284_v52 = vsub.f32 1.0, %v2283_v61  ;;  %v2298_v62 = vmul.f32 %v8467_v3, %v8420_v22 }
 0x3ae   :  { %v2148_v56 = vor.u32 1.1754944e-38, %v2147_v0  ;;  %v8813_v59 = vsel %vm8686_vm15, %v8465_v7, %v2215_v24  ;;  %v8818_v40 = vsel %vm8692_vm14, %v8478_v46, %v2230_v18  ;;  %v8823_v25 = vsel %vm8698_vm6, %v8482_v51, %v2260_v36  ;;  %vm2274_vm10 = vmor %vm2272_vm11, %vm2273_vm4  ;;  %v12002_v24 = vld [vmem:[#allocation39_spill] sm:$0xff]  ;;  %v12003_v18 = vld [vmem:[#allocation42_spill] sm:$0xff] }
 0x3af   :  { %v8828_v23 = vsel %vm8711_vm9, %v8480_v57, %v2245_v38  ;;  %v2275_v30 = vsel %vm2274_vm10, %v8424_v19, %v2271_v26  ;;  %v2299_v7 = vsub.f32 1.0, %v2298_v62  ;;  %v2313_v37 = vmul.f32 %v8503_v54, %v8434_v39  ;;  %v12012_v62 = vld [vmem:[#allocation31_spill] sm:$0xff] }
 0x3b0   :  { %v2149_v46 = vsel %vm8758_vm8, %v2148_v56, %v2144_v48  ;;  %vm2277_vm15 = vcmp.eq.f32.partialorder %v2276_v6, 8.507059e+37  ;;  %v2279_v12 = vor.u32 1.1754944e-38, %v2278_v43  ;;  %vm2287_vm14 = vweird.f32 %v8387_v1 }
 0x3b1   :  { %v2285_v51 = vmul.f32 %v8428_v4, %v2284_v52  ;;  %vm2288_vm6 = vweird.f32 %v8428_v4  ;;  %v2291_v57 = vand.u32 2147483647, %v8387_v1  ;;  %v2314_v10 = vsub.f32 1.0, %v2313_v37 }
 0x3b2   :  { %v8839_v47 = vsel %vm2277_vm15, %v2279_v12, %v2275_v30  ;;  %v2293_v19 = vand.u32 2147483648, %v8387_v1  ;;  %vm2302_vm9 = vweird.f32 %v8420_v22  ;;  %vm2303_vm13 = vweird.f32 %v8467_v3  ;;  %vm8881_vm1 = vmor %vm2287_vm14, %vm2288_vm6  ;;  %v12009_v1 = vld [vmem:[#allocation29_spill] sm:$0xff] }
 0x3b3   :  { %v2300_v60 = vmul.f32 %v8467_v3, %v2299_v7  ;;  %v2306_v55 = vand.u32 2147483647, %v8420_v22  ;;  %v2308_v63 = vand.u32 2147483648, %v8420_v22  ;;  %v2332_v45 = vrot.slane %v11994_v11, 1  ;;  %vm8892_vm3 = vmor %vm2302_vm9, %vm2303_vm13  ;;  %v12013_v7 = vld [vmem:[#allocation34_spill] sm:$0xff] }
 0x3b4   :  { %v2315_v17 = vmul.f32 %v8503_v54, %v2314_v10  ;;  %v2333_v33 = vrot.slane %v11994_v11, 2  ;;  %v11995_v2 = vrot.slane %v11994_v11, 5  ;;  %v11996_v42 = vrot.slane %v11994_v11, 6 }
 0x3b5   :  { %v2286_v8 = vadd.f32 %v8428_v4, %v2285_v51  ;;  %vm8857_vm12 = vcmp.eq.f32.partialorder %v2291_v57, 8.507059e+37  ;;  %v2334_v9 = vrot.slane %v11994_v11, 3  ;;  %v11999_v32 = vrot.slane %v11994_v11, 7 }
 0x3b6   :  { %v2344_v27 = vmul.f32 %v11995_v2, %v8641_v50  ;;  %v2345_v20 = vmul.f32 %v11996_v42, %v8659_v34  ;;  %v2347_v31 = vmul.f32 %v11994_v11, %v8704_v28  ;;  %vm2318_vm8 = vweird.f32 %v8503_v54  ;;  %v12016_v42 = vld [vmem:[#allocation53_spill] sm:$0xff] }
 0x3b7   :  { %v2346_v41 = vmul.f32 %v11999_v32, %v8663_v21  ;;  %v2335_v50 = vrot.slane %v11994_v11, 4  ;;  %v2348_v34 = vmul.f32 %v2332_v45, %v8717_v16  ;;  %v2349_v13 = vmul.f32 %v2333_v33, %v8719_v29 }
 0x3b8   :  { %v2301_v5 = vadd.f32 %v8467_v3, %v2300_v60  ;;  %v2350_v49 = vmul.f32 %v2334_v9, %v2134_v14  ;;  %v2352_v0 = vadd.f32 %v2344_v27, %v12000_v44  ;;  %v2353_v36 = vadd.f32 %v2345_v20, %v12001_v53  ;;  %v12006_v14 = vld [vmem:[#allocation28_spill] sm:$0xff] }
 0x3b9   :  { %v2316_v21 = vadd.f32 %v8503_v54, %v2315_v17  ;;  %v2351_v61 = vmul.f32 %v2335_v50, %v2149_v46  ;;  %v2354_v28 = vadd.f32 %v2346_v41, %v12002_v24  ;;  %v2355_v35 = vadd.f32 %v2347_v31, %v12003_v18  ;;  %v12018_v41 = vld [vmem:[#allocation55_spill] sm:$0xff] }
 0x3ba   :  { %v2321_v29 = vand.u32 2147483647, %v8434_v39  ;;  %v2323_v26 = vand.u32 2147483648, %v8434_v39  ;;  %v2356_v15 = vadd.f32 %v2348_v34, %v12006_v14  ;;  %5182 = vtanh.f32 %v2352_v0 }
 0x3bb   :  { %v2294_v38 = vor.u32 1.1754944e-38, %v2293_v19  ;;  %vm2317_vm5 = vweird.f32 %v8434_v39  ;;  %v2357_v43 = vadd.f32 %v2349_v13, %v12009_v1  ;;  %5184 = vtanh.f32 %v2353_v36 }
 0x3bc   :  { %v2290_v48 = vsel %vm8881_vm1, %v8428_v4, %v2286_v8  ;;  %v2305_v52 = vsel %vm8892_vm3, %v8467_v3, %v2301_v5  ;;  %vm8906_vm2 = vmor %vm2317_vm5, %vm2318_vm8  ;;  %v2358_v56 = vadd.f32 %v2350_v49, %v12012_v62  ;;  %5186 = vtanh.f32 %v2354_v28  ;;  %v12021_v49 = vld [vmem:[#allocation54_spill] sm:$0xff]  ;;  %v12024_v28 = vld [vmem:[#allocation56_spill] sm:$0xff] }
 0x3bd   :  { %v2309_v39 = vor.u32 1.1754944e-38, %v2308_v63  ;;  %v2320_v30 = vsel %vm8906_vm2, %v8503_v54, %v2316_v21  ;;  %v2359_v4 = vadd.f32 %v2351_v61, %v12013_v7  ;;  %5188 = vtanh.f32 %v2355_v35  ;;  %v12014_v63 = vld [vmem:[#allocation52_spill] sm:$0xff] }
 0x3be   :  { %vm2307_vm0 = vcmp.eq.f32.partialorder %v2306_v55, 8.507059e+37  ;;  %vm2322_vm4 = vcmp.eq.f32.partialorder %v2321_v29, 8.507059e+37  ;;  %v2324_v3 = vor.u32 1.1754944e-38, %v2323_v26  ;;  %5190 = vtanh.f32 %v2356_v15 }
 0x3bf   :  { %v2295_v37 = vsel %vm8857_vm12, %v2294_v38, %v2290_v48  ;;  %v2310_v46 = vsel %vm2307_vm0, %v2309_v39, %v2305_v52  ;;  %5192 = vtanh.f32 %v2357_v43  ;;  %v2368_v12 = vsub.f32 1.0, %v8813_v59  ;;  %v12027_v38 = vld [vmem:[#allocation57_spill] sm:$0xff]  ;;  %v12029_v48 = vld [vmem:[#allocation58_spill] sm:$0xff] }
 0x3c0   :  { %v5183_v51 = vpop.eup %5182  ;;  %v2325_v57 = vsel %vm2322_vm4, %v2324_v3, %v2320_v30  ;;  %5194 = vtanh.f32 %v2358_v56  ;;  %v2369_v10 = vsub.f32 1.0, %v8818_v40  ;;  %v2370_v54 = vsub.f32 1.0, %v8828_v23  ;;  %v12031_v30 = vld [vmem:[#allocation59_spill] sm:$0xff] }
 0x3c1   :  { %v5185_v19 = vpop.eup %5184  ;;  %5196 = vtanh.f32 %v2359_v4  ;;  %v2371_v60 = vsub.f32 1.0, %v8823_v25  ;;  %v2376_v55 = vmul.f32 %v5183_v51, %v2368_v12  ;;  %v12015_v11 = vrot.slane %v12014_v63, 7 }
 0x3c2   :  { %v5187_v17 = vpop.eup %5186  ;;  %v2372_v33 = vsub.f32 1.0, %v8839_v47  ;;  %v2373_v2 = vsub.f32 1.0, %v2295_v37  ;;  %v2377_v27 = vmul.f32 %v5185_v19, %v2369_v10  ;;  %v12017_v20 = vrot.slane %v12016_v42, 7 }
 0x3c3   :  { %v2399_v45 = vmul.f32 %v12015_v11, %v8813_v59  ;;  %v5189_v58 = vpop.eup %5188  ;;  %v2374_v9 = vsub.f32 1.0, %v2310_v46  ;;  %v2378_v32 = vmul.f32 %v5187_v17, %v2370_v54  ;;  %v12019_v31 = vrot.slane %v12018_v41, 7 }
 0x3c4   :  { %v2400_v8 = vmul.f32 %v12017_v20, %v8818_v40  ;;  %v5191_v13 = vpop.eup %5190  ;;  %v2375_v59 = vsub.f32 1.0, %v2325_v57  ;;  %v2379_v5 = vmul.f32 %v5189_v58, %v2371_v60  ;;  %v12022_v0 = vrot.slane %v12021_v49, 7  ;;  %v12046_v58 = vld [vmem:[#allocation61_spill] sm:$0xff] }
 0x3c5   :  { %v2401_v50 = vmul.f32 %v12019_v31, %v8828_v23  ;;  %v8931_v34 = vadd.f32 %v2399_v45, %v2376_v55  ;;  %v5193_v61 = vpop.eup %5192  ;;  %v2380_v40 = vmul.f32 %v5191_v13, %v2372_v33  ;;  %v12025_v35 = vrot.slane %v12024_v28, 7  ;;  %v12049_v31 = vld [vmem:[#allocation64_spill] sm:$0xff]  ;;  %v12051_v13 = vld [vmem:[#allocation66_spill] sm:$0xff] }
 0x3c6   :  { %v2402_v36 = vmul.f32 %v8823_v25, %v12022_v0  ;;  %v8936_v21 = vadd.f32 %v2400_v8, %v2377_v27  ;;  %v5195_v26 = vpop.eup %5194  ;;  %v2381_v15 = vmul.f32 %v5193_v61, %v2373_v2  ;;  %v12028_v6 = vrot.slane %v12027_v38, 7  ;;  %v12045_v8 = vld [vmem:[#allocation60_spill] sm:$0xff]  ;;  %v12054_v0 = vld [vmem:[#allocation69_spill] sm:$0xff]  ;;  %v12056_v61 = vld [vmem:[#allocation71_spill] sm:$0xff] }
 0x3c7   :  { %12020 = vst [vmem:[#allocation117_spill] sm:$0xff] %v8931_v34  ;;  %v2403_v16 = vmul.f32 %v12025_v35, %v8839_v47  ;;  %v8941_v29 = vadd.f32 %v2401_v50, %v2378_v32  ;;  %v2423_v23 = vrot.slane %v8931_v34, 3  ;;  %v12030_v52 = vrot.slane %v12029_v48, 7  ;;  %v5197_v56 = vpop.eup %5196  ;;  %v12048_v32 = vld [vmem:[#allocation63_spill] sm:$0xff]  ;;  %v12050_v50 = vld [vmem:[#allocation65_spill] sm:$0xff] }
 0x3c8   :  { %12023 = vst [vmem:[#allocation35_spill] sm:$0xff] %v8936_v21  ;;  %v2404_v43 = vmul.f32 %v12028_v6, %v2295_v37  ;;  %v2424_v22 = vrot.slane %v8936_v21, 2  ;;  %v2382_v39 = vmul.f32 %v5195_v26, %v2374_v9  ;;  %v12032_v4 = vrot.slane %v12031_v30, 7  ;;  %v12047_v9 = vld [vmem:[#allocation62_spill] sm:$0xff]  ;;  %v12058_v35 = vld [vmem:[#allocation73_spill] sm:$0xff]  ;;  %v12061_v26 = vld [vmem:[#allocation76_spill] sm:$0xff] }
 0x3c9   :  { %12026 = vst [vmem:[#allocation37_spill] sm:$0xff] %v8941_v29  ;;  %v2405_v25 = vmul.f32 %v12030_v52, %v2310_v46  ;;  %v8951_v47 = vadd.f32 %v2403_v16, %v2380_v40  ;;  %v2426_v12 = vrot.slane %v8941_v29, 1  ;;  %v2383_v51 = vmul.f32 %v5197_v56, %v2375_v59  ;;  %v12052_v59 = vld [vmem:[#allocation67_spill] sm:$0xff]  ;;  %v12057_v40 = vld [vmem:[#allocation72_spill] sm:$0xff]  ;;  %v12059_v16 = vld [vmem:[#allocation74_spill] sm:$0xff] }
 0x3ca   :  { %v2406_v3 = vmul.f32 %v12032_v4, %v2325_v57  ;;  %v8954_v10 = vadd.f32 %v2402_v36, %v2379_v5  ;;  %v8956_v54 = vadd.f32 %v2404_v43, %v2381_v15  ;;  %vm12036_vm7 = vcmask 1041409   ;;  %v12053_v5 = vld [vmem:[#allocation68_spill] sm:$0xff]  ;;  %v12055_v36 = vld [vmem:[#allocation70_spill] sm:$0xff]  ;;  %v12062_v15 = vld [vmem:[#allocation77_spill] sm:$0xff] }
 0x3cb   :  { %12033 = vst [vmem:[#allocation39_spill] sm:$0xff] %v8951_v47  ;;  %v2425_v37 = vsel %vm12036_vm7, %v2424_v22, %v2423_v23  ;;  %v8959_v19 = vadd.f32 %v2405_v25, %v2382_v39  ;;  %vm12038_vm11 = vcmask 1042434   ;;  %v11490_v60 = vrot.slane %v8951_v47, 7  ;;  %v12060_v23 = vld [vmem:[#allocation75_spill] sm:$0xff]  ;;  %v12063_v6 = vld [vmem:[#allocation78_spill] sm:$0xff]  ;;  %v12065_v52 = vld [vmem:[#allocation80_spill] sm:$0xff] }
 0x3cc   :  { %12034 = vst [vmem:[#allocation42_spill] sm:$0xff] %v8954_v10  ;;  %v2427_v46 = vsel %vm12038_vm11, %v2426_v12, %v2425_v37  ;;  %v8963_v55 = vadd.f32 %v2406_v3, %v2383_v51  ;;  %vm12040_vm10 = vcmask 1043459   ;;  %v2431_v11 = vrot.slane %v8956_v54, 6  ;;  %v12064_v43 = vld [vmem:[#allocation79_spill] sm:$0xff]  ;;  %v12066_v25 = vld [vmem:[#allocation81_spill] sm:$0xff]  ;;  %v12067_v22 = vld [vmem:[#allocation82_spill] sm:$0xff] }
 0x3cd   :  { %12035 = vst [vmem:[#allocation28_spill] sm:$0xff] %v8956_v54  ;;  %v2428_v57 = vsel %vm12040_vm10, %v8954_v10, %v2427_v46  ;;  %vm12041_vm15 = vcmask 1044484   ;;  %v2433_v17 = vrot.slane %v8959_v19, 5  ;;  %vm12042_vm14 = vcmask 1045509   ;;  %v12068_v56 = vld [vmem:[#allocation83_spill] sm:$0xff]  ;;  %v12069_v39 = vld [vmem:[#allocation84_spill] sm:$0xff] }
 0x3ce   :  { %12037 = vst [vmem:[#allocation118_spill] sm:$0xff] %v8959_v19  ;;  %v2430_v45 = vsel %vm12041_vm15, %v11490_v60, %v2428_v57  ;;  %v2435_v2 = vrot.slane %v8963_v55, 4  ;;  %vm12043_vm6 = vcmask 1046534   ;;  %vm12044_vm9 = vcmask 1047559   ;;  %v12070_v4 = vld [vmem:[#allocation85_spill] sm:$0xff]  ;;  %v12071_v3 = vld [vmem:[#allocation86_spill] sm:$0xff] }
 0x3cf   :  { %12039 = vst [vmem:[#allocation119_spill] sm:$0xff] %v8963_v55  ;;  %v2432_v33 = vsel %vm12042_vm14, %v2431_v11, %v2430_v45  ;;  %v12072_v12 = vld [vmem:[#allocation87_spill] sm:$0xff]  ;;  %v12073_v51 = vld [vmem:[#allocation88_spill] sm:$0xff]  ;;  %v12074_v37 = vld [vmem:[#allocation89_spill] sm:$0xff] }
 0x3d0   :  { %v2434_v27 = vsel %vm12043_vm6, %v2433_v17, %v2432_v33  ;;  %v12075_v46 = vld [vmem:[#allocation90_spill] sm:$0xff]  ;;  %v12076_v57 = vld [vmem:[#allocation91_spill] sm:$0xff]  ;;  %v12077_v11 = vld [vmem:[#allocation92_spill] sm:$0xff] }
 0x3d1   :  { %v2436_v20 = vsel %vm12044_vm9, %v2435_v2, %v2434_v27  ;;  %v12078_v45 = vld [vmem:[#allocation93_spill] sm:$0xff]  ;;  %v12079_v17 = vld [vmem:[#allocation94_spill] sm:$0xff]  ;;  %v12080_v33 = vld [vmem:[#allocation95_spill] sm:$0xff] }
 0x3d2   :  { %2454 = vmatmul.f32.vlgmr.msrb.gmra.mxu2 %v2436_v20  ;;  %2474 = vmatmul.f32.vlgmr.msrb.gmra.mxu3 %v2436_v20  ;;  %v12081_v2 = vld [vmem:[#allocation104_spill] sm:$0xff]  ;;  %v12082_v27 = vld [vmem:[#allocation105_spill] sm:$0xff] }
 0x3d3   :  { %2494 = vmatmul.f32.vlgmr.msra.gmra.mxu0 %v2436_v20  ;;  %3524 = vmatpush.msrb.mxu2 %v12045_v8  ;;  %v12083_v20 = vld [vmem:[#allocation106_spill] sm:$0xff]  ;;  %v12084_v8 = vld [vmem:[#allocation107_spill] sm:$0xff]  ;;  %v12106_v60 = vld [vmem:[#allocation36_spill] sm:$0xff] }
 0x3d4   :  { %4007 = vmatpush.msrb.mxu3 %v12046_v58  ;;  %4027 = vmatpush.msra.mxu0 %v12047_v9  ;;  %v12085_v58 = vld [vmem:[#allocation108_spill] sm:$0xff]  ;;  %v12086_v9 = vld [vmem:[#allocation109_spill] sm:$0xff] }
 0x3d5   :  { %3525 = vmatpush.msrb.mxu2 %v12048_v32  ;;  %v12087_v32 = vld [vmem:[#allocation110_spill] sm:$0xff] }
 0x3d6   :  { %4008 = vmatpush.msrb.mxu3 %v12049_v31  ;;  %4028 = vmatpush.msra.mxu0 %v12050_v50  ;;  %v12088_v31 = vld [vmem:[#allocation111_spill] sm:$0xff]  ;;  %v12089_v50 = vld [vmem:[#allocation112_spill] sm:$0xff] }
 0x3d7   :  { %3526 = vmatpush.msrb.mxu2 %v12051_v13  ;;  %v12090_v13 = vld [vmem:[#allocation113_spill] sm:$0xff] }
 0x3d8   :  { %4009 = vmatpush.msrb.mxu3 %v12052_v59  ;;  %4029 = vmatpush.msra.mxu0 %v12053_v5  ;;  %v12091_v59 = vld [vmem:[#allocation114_spill] sm:$0xff]  ;;  %v12092_v5 = vld [vmem:[#allocation115_spill] sm:$0xff] }
 0x3d9   :  { %3527 = vmatpush.msrb.mxu2 %v12054_v0 }
 0x3da   :  { %4010 = vmatpush.msrb.mxu3 %v12055_v36  ;;  %4030 = vmatpush.msra.mxu0 %v12056_v61 }
 0x3db   :  { %3528 = vmatpush.msrb.mxu2 %v12057_v40 }
 0x3dc   :  { %4011 = vmatpush.msrb.mxu3 %v12058_v35  ;;  %4031 = vmatpush.msra.mxu0 %v12059_v16 }
 0x3dd   :  { %3529 = vmatpush.msrb.mxu2 %v12060_v23 }
 0x3de   :  { %4012 = vmatpush.msrb.mxu3 %v12061_v26  ;;  %4032 = vmatpush.msra.mxu0 %v12062_v15  ;;  %v12093_v15 = vld [vmem:[#allocation20_spill] sm:$0xff] }
 0x3df   :  { %3530 = vmatpush.msrb.mxu2 %v12063_v6 }
 0x3e0   :  { %4013 = vmatpush.msrb.mxu3 %v12064_v43  ;;  %4033 = vmatpush.msra.mxu0 %v12065_v52  ;;  %v12094_v43 = vld [vmem:[#allocation21_spill] sm:$0xff] }
 0x3e1   :  { %3531 = vmatpush.msrb.mxu2 %v12066_v25  ;;  %v12095_v25 = vld [vmem:[#allocation22_spill] sm:$0xff] }
 0x3e2   :  { %4014 = vmatpush.msrb.mxu3 %v12067_v22  ;;  %4034 = vmatpush.msra.mxu0 %v12068_v56  ;;  %v12096_v56 = vld [vmem:[#allocation23_spill] sm:$0xff] }
 0x3e3   :  { %3532 = vmatpush.msrb.mxu2 %v12069_v39 }
 0x3e4   :  { %4015 = vmatpush.msrb.mxu3 %v12070_v4  ;;  %4035 = vmatpush.msra.mxu0 %v12071_v3  ;;  %v12097_v4 = vld [vmem:[#allocation24_spill] sm:$0xff] }
 0x3e5   :  { %3533 = vmatpush.msrb.mxu2 %v12072_v12  ;;  %v12098_v12 = vld [vmem:[#allocation25_spill] sm:$0xff] }
 0x3e6   :  { %4016 = vmatpush.msrb.mxu3 %v12073_v51  ;;  %4036 = vmatpush.msra.mxu0 %v12074_v37  ;;  %v12099_v37 = vld [vmem:[#allocation26_spill] sm:$0xff] }
 0x3e7   :  { %3534 = vmatpush.msrb.mxu2 %v12075_v46 }
 0x3e8   :  { %4017 = vmatpush.msrb.mxu3 %v12076_v57  ;;  %4037 = vmatpush.msra.mxu0 %v12077_v11 }
 0x3e9   :  { %3535 = vmatpush.msrb.mxu2 %v12078_v45 }
 0x3ea   :  { %4018 = vmatpush.msrb.mxu3 %v12079_v17  ;;  %4038 = vmatpush.msra.mxu0 %v12080_v33 }
 0x3eb   :  { %3536 = vmatpush.msrb.mxu2 %v12081_v2  ;;  %v12100_v2 = vld [vmem:[#allocation38_spill] sm:$0xff] }
 0x3ec   :  { %4019 = vmatpush.msrb.mxu3 %v12082_v27  ;;  %4039 = vmatpush.msra.mxu0 %v12083_v20 }
 0x3ed   :  { %3537 = vmatpush.msrb.mxu2 %v12084_v8 }
 0x3ee   :  { %4020 = vmatpush.msrb.mxu3 %v12085_v58  ;;  %4040 = vmatpush.msra.mxu0 %v12086_v9 }
 0x3ef   :  { %3538 = vmatpush.msrb.mxu2 %v12087_v32 }
 0x3f0   :  { %4021 = vmatpush.msrb.mxu3 %v12088_v31  ;;  %4041 = vmatpush.msra.mxu0 %v12089_v50 }
 0x3f1   :  { %3539 = vmatpush.msrb.mxu2 %v12090_v13  ;;  %v12108_v13 = vld [vmem:[#allocation41_spill] sm:$0xff] }
 0x3f2   :  { %4022 = vmatpush.msrb.mxu3 %v12091_v59  ;;  %4042 = vmatpush.msra.mxu0 %v12092_v5 }
 0x450   :  { %v2495_v32 = vpop.f32.mrf.mxu0 }
 0x455   :  { %v2455_v0 = vpop.f32.mrf.mxu2  ;;  %v2475_v33 = vpop.f32.mrf.mxu3 }
 0x456   :  { %v2499_v36 = vrot.slane %v2455_v0, 4  ;;  %v2500_v61 = vrot.slane %v2455_v0, 5  ;;  %v2501_v40 = vrot.slane %v2455_v0, 6  ;;  %v2502_v35 = vrot.slane %v2455_v0, 7 }
 0x457   :  { %v2503_v16 = vrot.slane %v2455_v0, 1  ;;  %v2504_v23 = vrot.slane %v2455_v0, 2  ;;  %v2505_v26 = vrot.slane %v2455_v0, 3  ;;  %v2518_v6 = vadd.f32 %v2455_v0, %v12093_v15  ;;  %v12101_v0 = vld [vmem:[#allocation27_spill] sm:$0xff] }
 0x458   :  { %v2514_v52 = vadd.f32 %v2499_v36, %v12094_v43  ;;  %v2515_v22 = vadd.f32 %v2500_v61, %v12095_v25  ;;  %v2516_v39 = vadd.f32 %v2501_v40, %v12096_v56  ;;  %v2517_v3 = vadd.f32 %v2502_v35, %v12097_v4 }
 0x459   :  { %v2519_v51 = vadd.f32 %v2503_v16, %v12098_v12  ;;  %v2520_v46 = vadd.f32 %v2504_v23, %v12099_v37  ;;  %v4803_v57 = vmul.f32 -1.442695, %v2518_v6  ;;  %v2521_v27 = vadd.f32 %v2505_v26, %v12100_v2  ;;  %v12102_v16 = vld [vmem:[#allocation116_spill] sm:$0xff] }
 0x45a   :  { %v4799_v11 = vmul.f32 -1.442695, %v2514_v52  ;;  %v4800_v45 = vmul.f32 -1.442695, %v2515_v22  ;;  %v4801_v17 = vmul.f32 -1.442695, %v2516_v39  ;;  %v9039_v23 = vadd.f32 %v12102_v16, %v2495_v32 }
 0x45b   :  { %v4802_v20 = vmul.f32 -1.442695, %v2517_v3  ;;  %5198 = vpow2.f32 %v4803_v57  ;;  %v4804_v8 = vmul.f32 -1.442695, %v2519_v51  ;;  %v4805_v58 = vmul.f32 -1.442695, %v2520_v46 }
 0x45c   :  { %5200 = vpow2.f32 %v4799_v11  ;;  %v2675_v9 = vrot.slane %v2475_v33, 4  ;;  %v4806_v31 = vmul.f32 -1.442695, %v2521_v27  ;;  %v2676_v6 = vrot.slane %v2475_v33, 5  ;;  %v12103_v32 = vld [vmem:[#allocation30_spill] sm:$0xff]  ;;  %v12109_v16 = vld [vmem:[#allocation43_spill] sm:$0xff] }
 0x45d   :  { %5202 = vpow2.f32 %v4800_v45  ;;  %v2677_v3 = vrot.slane %v2475_v33, 6  ;;  %v2678_v51 = vrot.slane %v2475_v33, 7  ;;  %v2679_v11 = vrot.slane %v2475_v33, 1 }
 0x45e   :  { %5204 = vpow2.f32 %v4801_v17  ;;  %v2690_v36 = vadd.f32 %v2675_v9, %v12101_v0  ;;  %v2680_v45 = vrot.slane %v2475_v33, 2  ;;  %v2694_v50 = vadd.f32 %v2475_v33, %v12106_v60 }
 0x45f   :  { %5206 = vpow2.f32 %v4802_v20  ;;  %v2681_v20 = vrot.slane %v2475_v33, 3 }
 0x460   :  { %5208 = vpow2.f32 %v4804_v8  ;;  %v4807_v8 = vmul.f32 -1.442695, %v2690_v36  ;;  %v2696_v30 = vadd.f32 %v2680_v45, %v12108_v13  ;;  %v4811_v28 = vmul.f32 -1.442695, %v2694_v50 }
 0x461   :  { %v5199_v5 = vpop.eup %5198  ;;  %5210 = vpow2.f32 %v4805_v58  ;;  %v2697_v48 = vadd.f32 %v2681_v20, %v12109_v16 }
 0x462   :  { %v5201_v35 = vpop.eup %5200  ;;  %v9041_v26 = vadd.f32 1.0, %v5199_v5  ;;  %5212 = vpow2.f32 %v4806_v31  ;;  %v2691_v31 = vadd.f32 %v2676_v6, %v12103_v32  ;;  %v4813_v33 = vmul.f32 -1.442695, %v2696_v30 }
 0x463   :  { %v5203_v22 = vpop.eup %5202  ;;  %v9044_v39 = vadd.f32 1.0, %v5201_v35  ;;  %v9086_v49 = vmul.f32 -1.442695, %v2697_v48 }
 0x464   :  { %v5205_v46 = vpop.eup %5204  ;;  %v9046_v57 = vadd.f32 1.0, %v5203_v22  ;;  %5214 = vrcp.f32 %v9041_v26  ;;  %v12104_v22 = vld [vmem:[#allocation32_spill] sm:$0xff]  ;;  %vm2619_vm4 = vweird.f32 %v9041_v26  ;;  %v2625_v4 = vand.u32 2147483648, %v9041_v26 }
 0x465   :  { %v5207_v17 = vpop.eup %5206  ;;  %v9049_v27 = vadd.f32 1.0, %v5205_v46  ;;  %5216 = vrcp.f32 %v9044_v39  ;;  %v2692_v52 = vadd.f32 %v2677_v3, %v12104_v22  ;;  %v12105_v46 = vld [vmem:[#allocation33_spill] sm:$0xff]  ;;  %v2565_v20 = vand.u32 2147483648, %v9044_v39 }
 0x466   :  { %v5209_v58 = vpop.eup %5208  ;;  %v9052_v9 = vadd.f32 1.0, %v5207_v17  ;;  %5218 = vrcp.f32 %v9046_v57  ;;  %v2693_v40 = vadd.f32 %v2678_v51, %v12105_v46  ;;  %v12107_v17 = vld [vmem:[#allocation40_spill] sm:$0xff]  ;;  %vm2559_vm13 = vweird.f32 %v9044_v39 }
 0x467   :  { %v5211_v35 = vpop.eup %5210  ;;  %v9062_v61 = vadd.f32 1.0, %v5209_v58  ;;  %5220 = vrcp.f32 %v9049_v27  ;;  %v2695_v59 = vadd.f32 %v2679_v11, %v12107_v17  ;;  %v4808_v58 = vmul.f32 -1.442695, %v2691_v31 }
 0x468   :  { %v5213_v6 = vpop.eup %5212  ;;  %5222 = vpow2.f32 %v4807_v8  ;;  %v9072_v51 = vadd.f32 1.0, %v5211_v35  ;;  %v4809_v11 = vmul.f32 -1.442695, %v2692_v52  ;;  %v4810_v38 = vmul.f32 -1.442695, %v2693_v40 }
 0x469   :  { %5224 = vrcp.f32 %v9052_v9  ;;  %v4812_v8 = vmul.f32 -1.442695, %v2695_v59  ;;  %v2580_v31 = vand.u32 2147483648, %v9046_v57  ;;  %v9090_v50 = vadd.f32 1.0, %v5213_v6 }
 0x46a   :  { %v9069_v3 = vpop.eup %5214  ;;  %5226 = vrcp.f32 %v9062_v61  ;;  %v2563_v59 = vand.u32 2147483647, %v9044_v39  ;;  %v9101_v6 = vor.u32 1.1754944e-38, %v2565_v20  ;;  %vm2574_vm12 = vweird.f32 %v9046_v57 }
 0x46b   :  { %v9075_v36 = vpop.eup %5216  ;;  %v2615_v42 = vmul.f32 %v9069_v3, %v9041_v26  ;;  %5228 = vrcp.f32 %v9072_v51  ;;  %v9105_v16 = vor.u32 1.1754944e-38, %v2580_v31  ;;  %vm2589_vm8 = vweird.f32 %v9049_v27 }
 0x46c   :  { %v9077_v5 = vpop.eup %5218  ;;  %v2555_v45 = vmul.f32 %v9075_v36, %v9044_v39  ;;  %5230 = vpow2.f32 %v4808_v58  ;;  %vm2560_vm1 = vweird.f32 %v9075_v36  ;;  %vm9122_vm3 = vcmp.eq.f32.partialorder %v2563_v59, 8.507059e+37 }
 0x46d   :  { %v2570_v35 = vmul.f32 %v9077_v5, %v9046_v57  ;;  %v9088_v40 = vpop.eup %5220  ;;  %5232 = vpow2.f32 %v4809_v11  ;;  %v2616_v60 = vsub.f32 1.0, %v2615_v42  ;;  %v2595_v42 = vand.u32 2147483648, %v9049_v27  ;;  %vm9151_vm11 = vmor %vm2559_vm13, %vm2560_vm1 }
 0x46e   :  { %v2556_v52 = vsub.f32 1.0, %v2555_v45  ;;  %v5223_v41 = vpop.eup %5222  ;;  %v2585_v48 = vmul.f32 %v9088_v40, %v9049_v27  ;;  %v2578_v45 = vand.u32 2147483647, %v9046_v57  ;;  %5234 = vrcp.f32 %v9090_v50 }
 0x46f   :  { %v2571_v63 = vsub.f32 1.0, %v2570_v35  ;;  %v9099_v30 = vpop.eup %5224  ;;  %v2593_v35 = vand.u32 2147483647, %v9049_v27  ;;  %v9115_v46 = vadd.f32 1.0, %v5223_v41  ;;  %5236 = vpow2.f32 %v4810_v38 }
 0x470   :  { %v2586_v13 = vsub.f32 1.0, %v2585_v48  ;;  %v2600_v17 = vmul.f32 %v9099_v30, %v9052_v9  ;;  %v9111_v58 = vpop.eup %5226  ;;  %v2557_v20 = vmul.f32 %v9075_v36, %v2556_v52  ;;  %vm2604_vm5 = vweird.f32 %v9052_v9 }
 0x471   :  { %v2572_v11 = vmul.f32 %v9077_v5, %v2571_v63  ;;  %v9119_v22 = vpop.eup %5228  ;;  %5238 = vpow2.f32 %v4811_v28  ;;  %vm2575_vm2 = vweird.f32 %v9077_v5  ;;  %vm9129_vm0 = vcmp.eq.f32.partialorder %v2578_v45, 8.507059e+37 }
 0x472   :  { %v2587_v31 = vmul.f32 %v9088_v40, %v2586_v13  ;;  %v2601_v48 = vsub.f32 1.0, %v2600_v17  ;;  %v5231_v41 = vpop.eup %5230  ;;  %v2630_v13 = vmul.f32 %v9111_v58, %v9062_v61  ;;  %5240 = vpow2.f32 %v4812_v8  ;;  %vm9164_vm10 = vmor %vm2574_vm12, %vm2575_vm2 }
 0x473   :  { %v5233_v17 = vpop.eup %5232  ;;  %v2558_v52 = vadd.f32 %v9075_v36, %v2557_v20  ;;  %vm2590_vm7 = vweird.f32 %v9088_v40  ;;  %5242 = vpow2.f32 %v4813_v33  ;;  %v9139_v28 = vadd.f32 1.0, %v5231_v41 }
 0x474   :  { %v2602_v38 = vmul.f32 %v9099_v30, %v2601_v48  ;;  %v2573_v59 = vadd.f32 %v9077_v5, %v2572_v11  ;;  %v2588_v45 = vadd.f32 %v9088_v40, %v2587_v31  ;;  %5244 = vrcp.f32 %v9115_v46  ;;  %v9145_v0 = vpop.eup %5234  ;;  %vm9179_vm14 = vmor %vm2589_vm8, %vm2590_vm7 }
 0x475   :  { %v2617_v48 = vmul.f32 %v9069_v3, %v2616_v60  ;;  %v2610_v33 = vand.u32 2147483648, %v9052_v9  ;;  %v2645_v20 = vmul.f32 %v9119_v22, %v9072_v51  ;;  %5246 = vrcp.f32 %v9139_v28  ;;  %v5237_v60 = vpop.eup %5236 }
 0x476   :  { %v2608_v11 = vand.u32 2147483647, %v9052_v9  ;;  %vm2605_vm15 = vweird.f32 %v9099_v30  ;;  %v2631_v31 = vsub.f32 1.0, %v2630_v13  ;;  %v9169_v41 = vadd.f32 1.0, %v5233_v17 }
 0x477   :  { %v2603_v2 = vadd.f32 %v9099_v30, %v2602_v38  ;;  %v5239_v37 = vpop.eup %5238  ;;  %v2562_v15 = vsel %vm9151_vm11, %v9075_v36, %v2558_v52  ;;  %vm9183_vm6 = vcmp.eq.f32.partialorder %v2593_v35, 8.507059e+37  ;;  %v2596_v13 = vor.u32 1.1754944e-38, %v2595_v42  ;;  %vm9200_vm13 = vmor %vm2604_vm5, %vm2605_vm15 }
 0x478   :  { %5248 = vpow2.f32 %v9086_v49  ;;  %v5241_v38 = vpop.eup %5240  ;;  %v2577_v36 = vsel %vm9164_vm10, %v9077_v5, %v2573_v59  ;;  %v2592_v27 = vsel %vm9179_vm14, %v9088_v40, %v2588_v45  ;;  %v2618_v17 = vadd.f32 %v9069_v3, %v2617_v48 }
 0x479   :  { %vm2620_vm9 = vweird.f32 %v9069_v3  ;;  %v5243_v35 = vpop.eup %5242  ;;  %v2611_v42 = vor.u32 1.1754944e-38, %v2610_v33  ;;  %v2646_v52 = vsub.f32 1.0, %v2645_v20  ;;  %v9204_v5 = vadd.f32 1.0, %v5237_v60 }
 0x47a   :  { %vm9206_vm12 = vcmp.eq.f32.partialorder %v2608_v11, 8.507059e+37  ;;  %v9210_v40 = vpop.eup %5244  ;;  %5250 = vrcp.f32 %v9169_v41  ;;  %v9216_v9 = vsel %vm9122_vm3, %v9101_v6, %v2562_v15  ;;  %v2607_v45 = vsel %vm9200_vm13, %v9099_v30, %v2603_v2  ;;  %vm9239_vm8 = vmor %vm2619_vm4, %vm2620_vm9 }
 0x47b   :  { %v2632_v48 = vmul.f32 %v9111_v58, %v2631_v31  ;;  %v9222_v8 = vpop.eup %5246  ;;  %v9224_v33 = vadd.f32 1.0, %v5239_v37  ;;  %v9229_v20 = vsel %vm9129_vm0, %v9105_v16, %v2577_v36  ;;  %v9233_v32 = vsel %vm9183_vm6, %v2596_v13, %v2592_v27 }
 0x47c   :  { %v2623_v37 = vand.u32 2147483647, %v9041_v26  ;;  %v2731_v2 = vmul.f32 %v9210_v40, %v9115_v46  ;;  %v2622_v16 = vsel %vm9239_vm8, %v9069_v3, %v2618_v17  ;;  %vm2634_vm1 = vweird.f32 %v9062_v61 }
 0x47d   :  { %v9251_v6 = vadd.f32 1.0, %v5241_v38  ;;  %v2746_v63 = vmul.f32 %v9222_v8, %v9139_v28  ;;  %5252 = vrcp.f32 %v9204_v5  ;;  %v9258_v11 = vsel %vm9206_vm12, %v2611_v42, %v2607_v45 }
 0x47e   :  { %v5249_v30 = vpop.eup %5248  ;;  %v9260_v60 = vadd.f32 1.0, %v5243_v35  ;;  %v2633_v3 = vadd.f32 %v9111_v58, %v2632_v48  ;;  %vm2635_vm3 = vweird.f32 %v9111_v58  ;;  %v2647_v26 = vmul.f32 %v9119_v22, %v2646_v52 }
 0x47f   :  { %5254 = vrcp.f32 %v9224_v33  ;;  %vm9266_vm5 = vcmp.eq.f32.partialorder %v2623_v37, 8.507059e+37  ;;  %v2640_v31 = vand.u32 2147483648, %v9062_v61  ;;  %v2660_v57 = vmul.f32 %v9145_v0, %v9090_v50  ;;  %vm9281_vm2 = vmor %vm2634_vm1, %vm2635_vm3 }
 0x480   :  { %v9273_v13 = vpop.eup %5250  ;;  %v9275_v38 = vadd.f32 1.0, %v5249_v30  ;;  %v2732_v36 = vsub.f32 1.0, %v2731_v2  ;;  %v2626_v27 = vor.u32 1.1754944e-38, %v2625_v4  ;;  %v2638_v17 = vand.u32 2147483647, %v9062_v61 }
 0x481   :  { %v2747_v35 = vsub.f32 1.0, %v2746_v63  ;;  %5256 = vrcp.f32 %v9251_v6  ;;  %v2653_v42 = vand.u32 2147483647, %v9072_v51  ;;  %v2661_v52 = vsub.f32 1.0, %v2660_v57 }
 0x482   :  { %5258 = vrcp.f32 %v9260_v60  ;;  %v2637_v59 = vsel %vm9281_vm2, %v9111_v58, %v2633_v3  ;;  %v2648_v45 = vadd.f32 %v9119_v22, %v2647_v26  ;;  %vm2650_vm0 = vweird.f32 %v9119_v22 }
 0x483   :  { %v9292_v48 = vpop.eup %5252  ;;  %v2761_v61 = vmul.f32 %v9273_v13, %v9169_v41  ;;  %v9298_v15 = vsel %vm9266_vm5, %v2626_v27, %v2622_v16  ;;  %v2641_v37 = vor.u32 1.1754944e-38, %v2640_v31  ;;  %v2655_v2 = vand.u32 2147483648, %v9072_v51 }
 0x484   :  { %vm2639_vm4 = vcmp.eq.f32.partialorder %v2638_v17, 8.507059e+37  ;;  %vm2649_vm7 = vweird.f32 %v9072_v51  ;;  %v2662_v58 = vmul.f32 %v9145_v0, %v2661_v52  ;;  %v2733_v4 = vmul.f32 %v9210_v40, %v2732_v36 }
 0x485   :  { %v9304_v30 = vpop.eup %5254  ;;  %5260 = vrcp.f32 %v9275_v38  ;;  %v9307_v63 = vsel %vm2639_vm4, %v2641_v37, %v2637_v59  ;;  %vm9309_vm11 = vmor %vm2649_vm7, %vm2650_vm0  ;;  %vm9313_vm10 = vcmp.eq.f32.partialorder %v2653_v42, 8.507059e+37  ;;  %v2748_v51 = vmul.f32 %v9222_v8, %v2747_v35 }
 0x486   :  { %v2652_v26 = vsel %vm9309_vm11, %v9119_v22, %v2648_v45  ;;  %vm2664_vm15 = vweird.f32 %v9090_v50  ;;  %vm2665_vm14 = vweird.f32 %v9145_v0  ;;  %v2668_v39 = vand.u32 2147483647, %v9090_v50 }
 0x487   :  { %v9324_v31 = vpop.eup %5256  ;;  %v2656_v57 = vor.u32 1.1754944e-38, %v2655_v2  ;;  %v2670_v36 = vand.u32 2147483648, %v9090_v50  ;;  %v2739_v27 = vand.u32 2147483647, %v9115_v46  ;;  %v2762_v17 = vsub.f32 1.0, %v2761_v61  ;;  %vm9346_vm13 = vmor %vm2664_vm15, %vm2665_vm14 }
 0x488   :  { %v9328_v49 = vpop.eup %5258  ;;  %v2663_v35 = vadd.f32 %v9145_v0, %v2662_v58  ;;  %v2734_v22 = vadd.f32 %v9210_v40, %v2733_v4  ;;  %vm2736_vm6 = vweird.f32 %v9210_v40  ;;  %v2741_v42 = vand.u32 2147483648, %v9115_v46 }
 0x489   :  { %v2749_v52 = vadd.f32 %v9222_v8, %v2748_v51  ;;  %vm2751_vm9 = vweird.f32 %v9222_v8  ;;  %v2754_v59 = vand.u32 2147483647, %v9139_v28  ;;  %v2756_v45 = vand.u32 2147483648, %v9139_v28 }
 0x48a   :  { %v9340_v61 = vsel %vm9313_vm10, %v2656_v57, %v2652_v26  ;;  %vm9350_vm12 = vcmp.eq.f32.partialorder %v2668_v39, 8.507059e+37  ;;  %vm2735_vm8 = vweird.f32 %v9115_v46  ;;  %v2776_v58 = vmul.f32 %v9292_v48, %v9204_v5 }
 0x48b   :  { %v9357_v4 = vpop.eup %5260  ;;  %v2671_v3 = vor.u32 1.1754944e-38, %v2670_v36  ;;  %vm9359_vm1 = vmor %vm2735_vm8, %vm2736_vm6  ;;  %vm9363_vm3 = vcmp.eq.f32.partialorder %v2739_v27, 8.507059e+37  ;;  %vm2750_vm5 = vweird.f32 %v9139_v28  ;;  %v2763_v51 = vmul.f32 %v9273_v13, %v2762_v17 }
 0x48c   :  { %v2667_v46 = vsel %vm9346_vm13, %v9145_v0, %v2663_v35  ;;  %v2738_v26 = vsel %vm9359_vm1, %v9210_v40, %v2734_v22  ;;  %vm9377_vm2 = vmor %vm2750_vm5, %vm2751_vm9  ;;  %v2777_v57 = vsub.f32 1.0, %v2776_v58  ;;  %v2791_v28 = vmul.f32 %v9304_v30, %v9224_v33 }
 0x48d   :  { %v2742_v36 = vor.u32 1.1754944e-38, %v2741_v42  ;;  %v2753_v27 = vsel %vm9377_vm2, %v9222_v8, %v2749_v52  ;;  %vm2755_vm0 = vcmp.eq.f32.partialorder %v2754_v59, 8.507059e+37  ;;  %v2757_v0 = vor.u32 1.1754944e-38, %v2756_v45 }
 0x48e   :  { %v2769_v17 = vand.u32 2147483647, %v9169_v41  ;;  %v2771_v40 = vand.u32 2147483648, %v9169_v41  ;;  %v2778_v35 = vmul.f32 %v9292_v48, %v2777_v57  ;;  %v2792_v22 = vsub.f32 1.0, %v2791_v28 }
 0x48f   :  { %v9391_v37 = vsel %vm9350_vm12, %v2671_v3, %v2667_v46  ;;  %v2764_v58 = vadd.f32 %v9273_v13, %v2763_v51  ;;  %vm2765_vm4 = vweird.f32 %v9169_v41  ;;  %vm2766_vm7 = vweird.f32 %v9273_v13 }
 0x490   :  { %v9398_v8 = vsel %vm9363_vm3, %v2742_v36, %v2738_v26  ;;  %v9400_v42 = vsel %vm2755_vm0, %v2757_v0, %v2753_v27  ;;  %v2793_v52 = vmul.f32 %v9304_v30, %v2792_v22  ;;  %v2806_v59 = vmul.f32 %v9324_v31, %v9251_v6  ;;  %vm9410_vm10 = vmor %vm2765_vm4, %vm2766_vm7 }
 0x491   :  { %v2779_v45 = vadd.f32 %v9292_v48, %v2778_v35  ;;  %vm2781_vm11 = vweird.f32 %v9292_v48  ;;  %v2784_v2 = vand.u32 2147483647, %v9204_v5  ;;  %v2821_v41 = vmul.f32 %v9328_v49, %v9260_v60 }
 0x492   :  { %vm9414_vm15 = vcmp.eq.f32.partialorder %v2769_v17, 8.507059e+37  ;;  %v2772_v50 = vor.u32 1.1754944e-38, %v2771_v40  ;;  %vm2780_vm14 = vweird.f32 %v9204_v5  ;;  %v2786_v51 = vand.u32 2147483648, %v9204_v5 }
 0x493   :  { %v2768_v46 = vsel %vm9410_vm10, %v9273_v13, %v2764_v58  ;;  %vm2795_vm6 = vweird.f32 %v9224_v33  ;;  %vm2796_vm9 = vweird.f32 %v9304_v30  ;;  %v2801_v26 = vand.u32 2147483648, %v9224_v33  ;;  %vm9426_vm13 = vmor %vm2780_vm14, %vm2781_vm11 }
 0x494   :  { %v2794_v57 = vadd.f32 %v9304_v30, %v2793_v52  ;;  %v2799_v28 = vand.u32 2147483647, %v9224_v33  ;;  %v2807_v36 = vsub.f32 1.0, %v2806_v59  ;;  %v2816_v5 = vand.u32 2147483648, %v9251_v6  ;;  %vm9448_vm1 = vmor %vm2795_vm6, %vm2796_vm9 }
 0x495   :  { %v2783_v13 = vsel %vm9426_vm13, %v9292_v48, %v2779_v45  ;;  %vm2785_vm12 = vcmp.eq.f32.partialorder %v2784_v2, 8.507059e+37  ;;  %v2822_v27 = vsub.f32 1.0, %v2821_v41  ;;  %v2836_v0 = vmul.f32 %v9357_v4, %v9275_v38 }
 0x496   :  { %v9440_v17 = vsel %vm9414_vm15, %v2772_v50, %v2768_v46  ;;  %v2787_v40 = vor.u32 1.1754944e-38, %v2786_v51  ;;  %vm2810_vm8 = vweird.f32 %v9251_v6  ;;  %v2814_v35 = vand.u32 2147483647, %v9251_v6 }
 0x497   :  { %v2802_v22 = vor.u32 1.1754944e-38, %v2801_v26  ;;  %vm2811_vm3 = vweird.f32 %v9324_v31  ;;  %vm2825_vm5 = vweird.f32 %v9260_v60  ;;  %v2837_v58 = vsub.f32 1.0, %v2836_v0 }
 0x498   :  { %v9454_v52 = vsel %vm2785_vm12, %v2787_v40, %v2783_v13  ;;  %v2798_v59 = vsel %vm9448_vm1, %v9304_v30, %v2794_v57  ;;  %vm9459_vm2 = vcmp.eq.f32.partialorder %v2799_v28, 8.507059e+37  ;;  %v2808_v33 = vmul.f32 %v9324_v31, %v2807_v36  ;;  %vm9505_vm11 = vmor %vm2810_vm8, %vm2811_vm3 }
 0x499   :  { %v2817_v2 = vor.u32 1.1754944e-38, %v2816_v5  ;;  %v2823_v41 = vmul.f32 %v9328_v49, %v2822_v27  ;;  %vm2826_vm0 = vweird.f32 %v9328_v49  ;;  %v2829_v3 = vand.u32 2147483647, %v9260_v60 }
 0x49a   :  { %v2831_v16 = vand.u32 2147483648, %v9260_v60  ;;  %vm9468_vm4 = vcmp.eq.f32.partialorder %v2814_v35, 8.507059e+37  ;;  %v2838_v30 = vmul.f32 %v9357_v4, %v2837_v58  ;;  %v2856_v51 = vrot.slane %v9039_v23, 1  ;;  %vm9519_vm15 = vmor %vm2825_vm5, %vm2826_vm0 }
 0x49b   :  { %v12158_v46 = vrot.slane %v9039_v23, 4  ;;  %v12159_v39 = vrot.slane %v9039_v23, 5  ;;  %v2857_v28 = vrot.slane %v9039_v23, 2  ;;  %v12160_v36 = vrot.slane %v9039_v23, 6 }
 0x49c   :  { %v12161_v13 = vrot.slane %v9039_v23, 7  ;;  %v2871_v0 = vmul.f32 %v9039_v23, %v9298_v15  ;;  %v2809_v40 = vadd.f32 %v9324_v31, %v2808_v33  ;;  %v2872_v35 = vmul.f32 %v2856_v51, %v9307_v63 }
 0x49d   :  { %v2867_v26 = vmul.f32 %v12158_v46, %v9216_v9  ;;  %v2868_v57 = vmul.f32 %v12159_v39, %v9229_v20  ;;  %v2869_v5 = vmul.f32 %v12160_v36, %v9233_v32  ;;  %v2858_v9 = vrot.slane %v9039_v23, 3 }
 0x49e   :  { %v2870_v27 = vmul.f32 %v12161_v13, %v9258_v11  ;;  %v2824_v48 = vadd.f32 %v9328_v49, %v2823_v41  ;;  %v2873_v58 = vmul.f32 %v2857_v28, %v9340_v61  ;;  %v2839_v11 = vadd.f32 %v9357_v4, %v2838_v30 }
 0x49f   :  { %v2875_v20 = vadd.f32 %v2867_v26, %v12000_v44  ;;  %v2876_v32 = vadd.f32 %v2868_v57, %v12001_v53  ;;  %v2877_v46 = vadd.f32 %v2869_v5, %v12002_v24  ;;  %vm2841_vm7 = vweird.f32 %v9357_v4 }
 0x4a0   :  { %v2874_v15 = vmul.f32 %v2858_v9, %v9391_v37  ;;  %v2878_v23 = vadd.f32 %v2870_v27, %v12003_v18  ;;  %vm2840_vm10 = vweird.f32 %v9275_v38  ;;  %v2846_v61 = vand.u32 2147483648, %v9275_v38 }
 0x4a1   :  { %v2879_v33 = vadd.f32 %v2871_v0, %v12006_v14  ;;  %5262 = vtanh.f32 %v2875_v20  ;;  %v2813_v37 = vsel %vm9505_vm11, %v9324_v31, %v2809_v40  ;;  %v2844_v41 = vand.u32 2147483647, %v9275_v38  ;;  %vm9532_vm14 = vmor %vm2840_vm10, %vm2841_vm7 }
 0x4a2   :  { %v2880_v30 = vadd.f32 %v2872_v35, %v12009_v1  ;;  %5264 = vtanh.f32 %v2876_v32  ;;  %v2803_v51 = vsel %vm9459_vm2, %v2802_v22, %v2798_v59  ;;  %v2828_v31 = vsel %vm9519_vm15, %v9328_v49, %v2824_v48 }
 0x4a3   :  { %v2881_v26 = vadd.f32 %v2873_v58, %v12012_v62  ;;  %5266 = vtanh.f32 %v2877_v46  ;;  %v2832_v38 = vor.u32 1.1754944e-38, %v2831_v16  ;;  %v2843_v39 = vsel %vm9532_vm14, %v9357_v4, %v2839_v11 }
 0x4a4   :  { %v2882_v22 = vadd.f32 %v2874_v15, %v12013_v7  ;;  %5268 = vtanh.f32 %v2878_v23  ;;  %v2818_v49 = vsel %vm9468_vm4, %v2817_v2, %v2813_v37  ;;  %vm2830_vm6 = vcmp.eq.f32.partialorder %v2829_v3, 8.507059e+37 }
 0x4a5   :  { %v2847_v59 = vor.u32 1.1754944e-38, %v2846_v61  ;;  %5270 = vtanh.f32 %v2879_v33  ;;  %v2833_v45 = vsel %vm2830_vm6, %v2832_v38, %v2828_v31  ;;  %vm2845_vm9 = vcmp.eq.f32.partialorder %v2844_v41, 8.507059e+37 }
 0x4a6   :  { %5272 = vtanh.f32 %v2880_v30  ;;  %v2891_v57 = vsub.f32 1.0, %v9398_v8  ;;  %v2892_v36 = vsub.f32 1.0, %v9400_v42  ;;  %v2893_v4 = vsub.f32 1.0, %v9440_v17 }
 0x4a7   :  { %v5263_v28 = vpop.eup %5262  ;;  %v2848_v16 = vsel %vm2845_vm9, %v2847_v59, %v2843_v39  ;;  %5274 = vtanh.f32 %v2881_v26  ;;  %v2894_v50 = vsub.f32 1.0, %v9454_v52  ;;  %v12168_v3 = vrot.slane %v8931_v34, 7 }
 0x4a8   :  { %v5265_v5 = vpop.eup %5264  ;;  %5276 = vtanh.f32 %v2882_v22  ;;  %v2899_v2 = vmul.f32 %v5263_v28, %v2891_v57  ;;  %v2895_v0 = vsub.f32 1.0, %v2803_v51  ;;  %v2896_v40 = vsub.f32 1.0, %v2818_v49 }
 0x4a9   :  { %v2922_v13 = vmul.f32 %v12168_v3, %v9398_v8  ;;  %v5267_v27 = vpop.eup %5266  ;;  %v2900_v9 = vmul.f32 %v5265_v5, %v2892_v36  ;;  %v12169_v35 = vrot.slane %v8936_v21, 7  ;;  %v2897_v58 = vsub.f32 1.0, %v2833_v45 }
 0x4aa   :  { %v5269_v48 = vpop.eup %5268  ;;  %v2901_v32 = vmul.f32 %v5267_v27, %v2893_v4  ;;  %v12170_v46 = vrot.slane %v8941_v29, 7  ;;  %v2898_v63 = vsub.f32 1.0, %v2848_v16  ;;  %v12172_v61 = vrot.slane %v8954_v10, 7 }
 0x4ab   :  { %v2923_v20 = vmul.f32 %v12169_v35, %v9400_v42  ;;  %v9556_v15 = vadd.f32 %v2922_v13, %v2899_v2  ;;  %v5271_v23 = vpop.eup %5270  ;;  %v2902_v8 = vmul.f32 %v5269_v48, %v2894_v50  ;;  %v12174_v41 = vrot.slane %v8951_v47, 7 }
 0x4ac   :  { %v2924_v11 = vmul.f32 %v12170_v46, %v9440_v17  ;;  %v2925_v33 = vmul.f32 %v12172_v61, %v9454_v52  ;;  %v5273_v6 = vpop.eup %5272  ;;  %v2903_v42 = vmul.f32 %v5271_v23, %v2895_v0  ;;  %v12176_v38 = vrot.slane %v8956_v54, 7  ;;  %v5617_v46 = vld [vmem:[#allocation9 + $0x178] sm:$0xff]  ;;  %v5619_v23 = vld [vmem:[#allocation9 + $0x148] sm:$0xff]  ;;  %v5622_v61 = vld [vmem:[#allocation9 + $0x100] sm:$0xff] }
 0x4ad   :  { %12171 = vst [vmem:[#allocation60_spill] sm:$0xff] %v9556_v15  ;;  %v9561_v37 = vadd.f32 %v2923_v20, %v2900_v9  ;;  %v2926_v30 = vmul.f32 %v2803_v51, %v12174_v41  ;;  %v2946_v17 = vrot.slane %v9556_v15, 4  ;;  %v5275_v60 = vpop.eup %5274  ;;  %v2904_v26 = vmul.f32 %v5273_v6, %v2896_v40  ;;  %v5624_v6 = vld [vmem:[#allocation9 + $0xd0] sm:$0xff]  ;;  %v5626_v41 = vld [vmem:[#allocation9 + $0xa0] sm:$0xff] }
 0x4ae   :  { %v9565_v31 = vadd.f32 %v2924_v11, %v2901_v32  ;;  %v2927_v39 = vmul.f32 %v12176_v38, %v2818_v49  ;;  %v9570_v22 = vadd.f32 %v2925_v33, %v2902_v8  ;;  %v5277_v59 = vpop.eup %5276  ;;  %v2905_v57 = vmul.f32 %v5275_v60, %v2897_v58  ;;  %v5618_v11 = vld [vmem:[#allocation9 + $0x160] sm:$0xff]  ;;  %v5621_v8 = vld [vmem:[#allocation9 + $0x118] sm:$0xff]  ;;  %v5623_v33 = vld [vmem:[#allocation9 + $0xe8] sm:$0xff] }
 0x4af   :  { %12173 = vst [vmem:[#allocation61_spill] sm:$0xff] %v9561_v37  ;;  %v2947_v52 = vrot.slane %v9561_v37, 3  ;;  %v12178_v28 = vrot.slane %v8959_v19, 7  ;;  %v12179_v51 = vrot.slane %v8963_v55, 7  ;;  %v2906_v50 = vmul.f32 %v5277_v59, %v2898_v63  ;;  %v5620_v63 = vld [vmem:[#allocation9 + $0x130] sm:$0xff]  ;;  %v5629_v60 = vld [vmem:[#allocation9 + $0x58] sm:$0xff] }
 0x4b0   :  { %12175 = vst [vmem:[#allocation62_spill] sm:$0xff] %v9565_v31  ;;  %v2949_v5 = vrot.slane %v9565_v31, 2  ;;  %v9578_v2 = vadd.f32 %v2927_v39, %v2904_v26  ;;  %vm12181_vm13 = vcmask 1041409   ;;  %v2951_v49 = vrot.slane %v9570_v22, 1  ;;  %v5630_v26 = vld [vmem:[#allocation9 + $0x40] sm:$0xff]  ;;  %v5631_v38 = vld [vmem:[#allocation9 + $0x28] sm:$0xff] }
 0x4b1   :  { %12177 = vst [vmem:[#allocation63_spill] sm:$0xff] %v9570_v22  ;;  %v2928_v36 = vmul.f32 %v12178_v28, %v2833_v45  ;;  %v2929_v4 = vmul.f32 %v12179_v51, %v2848_v16  ;;  %v2948_v3 = vsel %vm12181_vm13, %v2947_v52, %v2946_v17  ;;  %v9582_v13 = vadd.f32 %v2926_v30, %v2903_v42  ;;  %v5625_v42 = vld [vmem:[#allocation9 + $0xb8] sm:$0xff]  ;;  %v5627_v30 = vld [vmem:[#allocation9 + $0x88] sm:$0xff]  ;;  %v5628_v17 = vld [vmem:[#allocation9 + $0x70] sm:$0xff] }
 0x4b2   :  { %12180 = vst [vmem:[#allocation64_spill] sm:$0xff] %v9578_v2  ;;  %vm12184_vm12 = vcmask 1042434   ;;  %vm12186_vm8 = vcmask 1043459   ;;  %v11491_v16 = vrot.slane %v9578_v2, 7  ;;  %vm12187_vm1 = vcmask 1044484   ;;  %v5632_v39 = vld [vmem:[#allocation9 + $0x10] sm:$0xff] }
 0x4b3   :  { %12182 = vst [vmem:[#allocation65_spill] sm:$0xff] %v9582_v13  ;;  %v9584_v27 = vadd.f32 %v2928_v36, %v2905_v57  ;;  %v2950_v0 = vsel %vm12184_vm12, %v2949_v5, %v2948_v3  ;;  %v9587_v40 = vadd.f32 %v2929_v4, %v2906_v50  ;;  %vm12188_vm3 = vcmask 1045509  }
 0x4b4   :  { %v2952_v45 = vsel %vm12186_vm8, %v2951_v49, %v2950_v0  ;;  %vm12189_vm5 = vcmask 1046534   ;;  %vm12190_vm2 = vcmask 1047559  }
 0x4b5   :  { %12183 = vst [vmem:[#allocation66_spill] sm:$0xff] %v9584_v27  ;;  %v2953_v9 = vsel %vm12187_vm1, %v9582_v13, %v2952_v45  ;;  %v2956_v35 = vrot.slane %v9584_v27, 6  ;;  %v2958_v48 = vrot.slane %v9587_v40, 5  ;;  %v12191_v45 = vld [vmem:[#allocation24_spill] sm:$0xff] }
 0x4b6   :  { %12185 = vst [vmem:[#allocation67_spill] sm:$0xff] %v9587_v40  ;;  %v2955_v20 = vsel %vm12188_vm3, %v11491_v16, %v2953_v9 }
 0x4b7   :  { %v2957_v58 = vsel %vm12189_vm5, %v2956_v35, %v2955_v20  ;;  %v12192_v35 = vld [vmem:[#allocation20_spill] sm:$0xff] }
 0x4b8   :  { %v2959_v32 = vsel %vm12190_vm2, %v2958_v48, %v2957_v58 }
 0x4b9   :  { %2977 = vmatmul.f32.vlgmr.msra.gmra.mxu1 %v2959_v32  ;;  %2997 = vmatmul.f32.vlgmr.msra.gmra.mxu2 %v2959_v32 }
 0x4ba   :  { %3017 = vmatmul.f32.vlgmr.msra.gmra.mxu3 %v2959_v32  ;;  %4047 = vmatpush.msra.mxu1 %v5617_v46 }
 0x4bc   :  { %4048 = vmatpush.msra.mxu1 %v5618_v11  ;;  %v12193_v11 = vld [vmem:[#allocation26_spill] sm:$0xff] }
 0x4be   :  { %4049 = vmatpush.msra.mxu1 %v5619_v23 }
 0x4c0   :  { %4050 = vmatpush.msra.mxu1 %v5620_v63 }
 0x4c2   :  { %4051 = vmatpush.msra.mxu1 %v5621_v8 }
 0x4c4   :  { %4052 = vmatpush.msra.mxu1 %v5622_v61  ;;  %v12194_v61 = vld [vmem:[#allocation38_spill] sm:$0xff] }
 0x4c6   :  { %4053 = vmatpush.msra.mxu1 %v5623_v33 }
 0x4c8   :  { %4054 = vmatpush.msra.mxu1 %v5624_v6 }
 0x4ca   :  { %4055 = vmatpush.msra.mxu1 %v5625_v42 }
 0x4cc   :  { %4056 = vmatpush.msra.mxu1 %v5626_v41 }
 0x4ce   :  { %4057 = vmatpush.msra.mxu1 %v5627_v30 }
 0x4d0   :  { %4058 = vmatpush.msra.mxu1 %v5628_v17 }
 0x4d2   :  { %4059 = vmatpush.msra.mxu1 %v5629_v60 }
 0x4d4   :  { %4060 = vmatpush.msra.mxu1 %v5630_v26 }
 0x4d6   :  { %4061 = vmatpush.msra.mxu1 %v5631_v38  ;;  %v12195_v38 = vld [vmem:[#allocation27_spill] sm:$0xff] }
 0x4d8   :  { %4062 = vmatpush.msra.mxu1 %v5632_v39 }
 0x536   :  { %v2978_v52 = vpop.f32.mrf.mxu1 }
 0x537   :  { %v3022_v59 = vrot.slane %v2978_v52, 3  ;;  %v3023_v57 = vrot.slane %v2978_v52, 4  ;;  %v3024_v28 = vrot.slane %v2978_v52, 5  ;;  %v3025_v36 = vrot.slane %v2978_v52, 6 }
 0x538   :  { %v3026_v51 = vrot.slane %v2978_v52, 7  ;;  %v3027_v4 = vrot.slane %v2978_v52, 1  ;;  %v3028_v5 = vrot.slane %v2978_v52, 2  ;;  %v3042_v50 = vadd.f32 %v2978_v52, %v12098_v12 }
 0x539   :  { %v3037_v3 = vadd.f32 %v3022_v59, %v12094_v43  ;;  %v3038_v49 = vadd.f32 %v3023_v57, %v12095_v25  ;;  %v3039_v0 = vadd.f32 %v3024_v28, %v12096_v56  ;;  %v3040_v9 = vadd.f32 %v3025_v36, %v12191_v45 }
 0x53a   :  { %v3041_v20 = vadd.f32 %v3026_v51, %v12192_v35  ;;  %v4820_v48 = vmul.f32 -1.442695, %v3042_v50  ;;  %v3043_v23 = vadd.f32 %v3027_v4, %v12193_v11  ;;  %v3044_v33 = vadd.f32 %v3028_v5, %v12194_v61 }
 0x53b   :  { %v4815_v58 = vmul.f32 -1.442695, %v3037_v3  ;;  %v4816_v32 = vmul.f32 -1.442695, %v3038_v49  ;;  %v4817_v46 = vmul.f32 -1.442695, %v3039_v0 }
 0x53c   :  { %v4818_v63 = vmul.f32 -1.442695, %v3040_v9  ;;  %5278 = vpow2.f32 %v4820_v48  ;;  %v2998_v8 = vpop.f32.mrf.mxu2  ;;  %v4819_v6 = vmul.f32 -1.442695, %v3041_v20  ;;  %v4821_v41 = vmul.f32 -1.442695, %v3043_v23 }
 0x53d   :  { %5280 = vpow2.f32 %v4815_v58  ;;  %v3198_v42 = vrot.slane %v2998_v8, 3  ;;  %v4822_v30 = vmul.f32 -1.442695, %v3044_v33  ;;  %v3199_v26 = vrot.slane %v2998_v8, 4  ;;  %v12196_v58 = vld [vmem:[#allocation30_spill] sm:$0xff]  ;;  %v12197_v33 = vld [vmem:[#allocation32_spill] sm:$0xff] }
 0x53e   :  { %5282 = vpow2.f32 %v4816_v32  ;;  %v3200_v59 = vrot.slane %v2998_v8, 5  ;;  %v3201_v57 = vrot.slane %v2998_v8, 6  ;;  %v3202_v5 = vrot.slane %v2998_v8, 7 }
 0x53f   :  { %5284 = vpow2.f32 %v4817_v46  ;;  %v3213_v39 = vadd.f32 %v3198_v42, %v12195_v38  ;;  %v3203_v0 = vrot.slane %v2998_v8, 1  ;;  %v3204_v9 = vrot.slane %v2998_v8, 2  ;;  %v12198_v42 = vld [vmem:[#allocation33_spill] sm:$0xff] }
 0x540   :  { %5286 = vpow2.f32 %v4818_v63  ;;  %v3214_v32 = vadd.f32 %v3199_v26, %v12196_v58  ;;  %v12201_v26 = vld [vmem:[#allocation41_spill] sm:$0xff] }
 0x541   :  { %5288 = vpow2.f32 %v4819_v6  ;;  %v4823_v46 = vmul.f32 -1.442695, %v3213_v39  ;;  %v3215_v6 = vadd.f32 %v3200_v59, %v12197_v33  ;;  %v3219_v39 = vadd.f32 %v3203_v0, %v12201_v26  ;;  %v12202_v59 = vld [vmem:[#allocation43_spill] sm:$0xff] }
 0x542   :  { %v5279_v17 = vpop.eup %5278  ;;  %5290 = vpow2.f32 %v4821_v41  ;;  %v3216_v41 = vadd.f32 %v3201_v57, %v12198_v42  ;;  %v3220_v28 = vadd.f32 %v3204_v9, %v12202_v59  ;;  %v4824_v57 = vmul.f32 -1.442695, %v3214_v32  ;;  %v3018_v42 = vpop.f32.mrf.mxu3 }
 0x543   :  { %v5281_v52 = vpop.eup %5280  ;;  %5292 = vpow2.f32 %v4822_v30  ;;  %v9631_v50 = vadd.f32 1.0, %v5279_v17  ;;  %v4825_v17 = vmul.f32 -1.442695, %v3215_v6 }
 0x544   :  { %v5283_v51 = vpop.eup %5282  ;;  %v9612_v4 = vadd.f32 1.0, %v5281_v52  ;;  %v12199_v52 = vld [vmem:[#allocation36_spill] sm:$0xff]  ;;  %v4826_v60 = vmul.f32 -1.442695, %v3216_v41  ;;  %v9655_v54 = vmul.f32 -1.442695, %v3220_v28 }
 0x545   :  { %v5285_v3 = vpop.eup %5284  ;;  %v9615_v49 = vadd.f32 1.0, %v5283_v51  ;;  %v3217_v51 = vadd.f32 %v3202_v5, %v12199_v52 }
 0x546   :  { %v5287_v20 = vpop.eup %5286  ;;  %v9617_v48 = vadd.f32 1.0, %v5285_v3  ;;  %5294 = vrcp.f32 %v9612_v4  ;;  %v12200_v3 = vld [vmem:[#allocation40_spill] sm:$0xff]  ;;  %vm3082_vm0 = vweird.f32 %v9612_v4  ;;  %v3086_v6 = vand.u32 2147483647, %v9612_v4 }
 0x547   :  { %v5289_v23 = vpop.eup %5288  ;;  %v9621_v63 = vadd.f32 1.0, %v5287_v20  ;;  %5296 = vrcp.f32 %v9615_v49  ;;  %v3218_v16 = vadd.f32 %v2998_v8, %v12200_v3  ;;  %v3088_v8 = vand.u32 2147483648, %v9612_v4 }
 0x548   :  { %v9626_v30 = vadd.f32 1.0, %v5289_v23  ;;  %5298 = vrcp.f32 %v9617_v48  ;;  %v5291_v36 = vpop.eup %5290  ;;  %v3103_v0 = vand.u32 2147483648, %v9615_v49  ;;  %v4827_v20 = vmul.f32 -1.442695, %v3217_v51 }
 0x549   :  { %5300 = vpow2.f32 %v4823_v46  ;;  %v5293_v5 = vpop.eup %5292  ;;  %v4828_v19 = vmul.f32 -1.442695, %v3218_v16  ;;  %v9646_v32 = vadd.f32 1.0, %v5291_v36  ;;  %v4829_v23 = vmul.f32 -1.442695, %v3219_v39 }
 0x54a   :  { %5302 = vrcp.f32 %v9621_v63  ;;  %v9659_v51 = vadd.f32 1.0, %v5293_v5  ;;  %v9661_v47 = vor.u32 1.1754944e-38, %v3088_v8  ;;  %vm3097_vm4 = vweird.f32 %v9615_v49 }
 0x54b   :  { %5304 = vrcp.f32 %v9626_v30  ;;  %v3101_v39 = vand.u32 2147483647, %v9615_v49  ;;  %v9665_v10 = vor.u32 1.1754944e-38, %v3103_v0  ;;  %vm3112_vm7 = vweird.f32 %v9617_v48 }
 0x54c   :  { %v9640_v55 = vpop.eup %5294  ;;  %5306 = vrcp.f32 %v9631_v50  ;;  %v3116_v8 = vand.u32 2147483647, %v9617_v48  ;;  %vm9678_vm11 = vcmp.eq.f32.partialorder %v3086_v6, 8.507059e+37  ;;  %vm3127_vm12 = vweird.f32 %v9621_v63 }
 0x54d   :  { %v9644_v9 = vpop.eup %5296  ;;  %v3078_v46 = vmul.f32 %v9640_v55, %v9612_v4  ;;  %5308 = vpow2.f32 %v4824_v57  ;;  %vm3083_vm10 = vweird.f32 %v9640_v55  ;;  %vm9688_vm15 = vcmp.eq.f32.partialorder %v3101_v39, 8.507059e+37 }
 0x54e   :  { %v3093_v41 = vmul.f32 %v9644_v9, %v9615_v49  ;;  %v9657_v16 = vpop.eup %5298  ;;  %5310 = vrcp.f32 %v9646_v32  ;;  %vm3098_vm14 = vweird.f32 %v9644_v9  ;;  %v3133_v39 = vand.u32 2147483648, %v9621_v63  ;;  %vm9712_vm9 = vmor %vm3082_vm0, %vm3083_vm10 }
 0x54f   :  { %v3079_v36 = vsub.f32 1.0, %v3078_v46  ;;  %v5301_v29 = vpop.eup %5300  ;;  %v3108_v34 = vmul.f32 %v9657_v16, %v9617_v48  ;;  %v3118_v46 = vand.u32 2147483648, %v9617_v48  ;;  %5312 = vpow2.f32 %v4825_v17  ;;  %vm9730_vm13 = vmor %vm3097_vm4, %vm3098_vm14 }
 0x550   :  { %v3094_v21 = vsub.f32 1.0, %v3093_v41  ;;  %v9670_v28 = vpop.eup %5302  ;;  %5314 = vrcp.f32 %v9659_v51  ;;  %v9695_v52 = vadd.f32 1.0, %v5301_v29  ;;  %vm3113_vm6 = vweird.f32 %v9657_v16 }
 0x551   :  { %v3080_v5 = vmul.f32 %v9640_v55, %v3079_v36  ;;  %v9676_v59 = vpop.eup %5304  ;;  %v3109_v26 = vsub.f32 1.0, %v3108_v34  ;;  %v3123_v57 = vmul.f32 %v9670_v28, %v9621_v63  ;;  %5316 = vpow2.f32 %v4826_v60  ;;  %vm9746_vm8 = vmor %vm3112_vm7, %vm3113_vm6 }
 0x552   :  { %v3095_v41 = vmul.f32 %v9644_v9, %v3094_v21  ;;  %v9685_v36 = vpop.eup %5306  ;;  %v3138_v6 = vmul.f32 %v9676_v59, %v9626_v30  ;;  %5318 = vpow2.f32 %v4827_v20  ;;  %vm9750_vm1 = vcmp.eq.f32.partialorder %v3116_v8, 8.507059e+37 }
 0x553   :  { %v3081_v34 = vadd.f32 %v9640_v55, %v3080_v5  ;;  %v3110_v21 = vmul.f32 %v9657_v16, %v3109_v26  ;;  %v3124_v17 = vsub.f32 1.0, %v3123_v57  ;;  %v5309_v58 = vpop.eup %5308  ;;  %v3153_v29 = vmul.f32 %v9685_v36, %v9631_v50 }
 0x554   :  { %v3096_v33 = vadd.f32 %v9644_v9, %v3095_v41  ;;  %5320 = vpow2.f32 %v4828_v19  ;;  %v9706_v26 = vpop.eup %5310  ;;  %v3139_v20 = vsub.f32 1.0, %v3138_v6  ;;  %v9716_v5 = vadd.f32 1.0, %v5309_v58  ;;  %v9721_v41 = vld [vmem:[%s11296_s5] ss:$0 sm:$0xff] }
 0x555   :  { %v3111_v38 = vadd.f32 %v9657_v16, %v3110_v21  ;;  %5322 = vpow2.f32 %v4829_v23  ;;  %12209 = vst [vmem:[#allocation68_spill] sm:$0xff] %v9721_v41  ;;  %v9724_v19 = vadd.f32 %v9721_v41, %v3018_v42  ;;  %v5313_v57 = vpop.eup %5312  ;;  %v3125_v58 = vmul.f32 %v9670_v28, %v3124_v17 }
 0x556   :  { %5324 = vrcp.f32 %v9695_v52  ;;  %v3085_v42 = vsel %vm9712_vm9, %v9640_v55, %v3081_v34  ;;  %v9740_v23 = vpop.eup %5314  ;;  %v3119_v21 = vor.u32 1.1754944e-38, %v3118_v46  ;;  %v3100_v55 = vsel %vm9730_vm13, %v9644_v9, %v3096_v33 }
 0x557   :  { %5326 = vrcp.f32 %v9716_v5  ;;  %v5317_v34 = vpop.eup %5316  ;;  %v3134_v17 = vor.u32 1.1754944e-38, %v3133_v39  ;;  %vm3142_vm3 = vweird.f32 %v9626_v30  ;;  %v3154_v48 = vsub.f32 1.0, %v3153_v29 }
 0x558   :  { %5328 = vpow2.f32 %v9655_v54  ;;  %v3115_v8 = vsel %vm9746_vm8, %v9657_v16, %v3111_v38  ;;  %v5319_v60 = vpop.eup %5318  ;;  %v3140_v46 = vmul.f32 %v9676_v59, %v3139_v20  ;;  %v9764_v41 = vadd.f32 1.0, %v5313_v57 }
 0x559   :  { %v3090_v33 = vsel %vm9678_vm11, %v9661_v47, %v3085_v42  ;;  %v3375_v9 = vrot.slane %v9724_v19, 3  ;;  %vm3128_vm5 = vweird.f32 %v9670_v28  ;;  %v3105_v54 = vsel %vm9688_vm15, %v9665_v10, %v3100_v55 }
 0x55a   :  { %v5321_v39 = vpop.eup %5320  ;;  %v3376_v38 = vrot.slane %v9724_v19, 4  ;;  %v3126_v16 = vadd.f32 %v9670_v28, %v3125_v58  ;;  %v9776_v20 = vadd.f32 1.0, %v5317_v34  ;;  %v3120_v0 = vsel %vm9750_vm1, %v3119_v21, %v3115_v8  ;;  %vm9796_vm2 = vmor %vm3127_vm12, %vm3128_vm5 }
 0x55b   :  { %v5323_v29 = vpop.eup %5322  ;;  %v3377_v47 = vrot.slane %v9724_v19, 5  ;;  %v9784_v42 = vadd.f32 1.0, %v5319_v60  ;;  %v9787_v3 = vmul.f32 %v3375_v9, %v3090_v33  ;;  %v3131_v58 = vand.u32 2147483647, %v9621_v63 }
 0x55c   :  { %v9782_v4 = vpop.eup %5324  ;;  %v9800_v21 = vadd.f32 1.0, %v5321_v39  ;;  %5330 = vrcp.f32 %v9764_v41  ;;  %v9803_v55 = vmul.f32 %v3376_v38, %v3105_v54  ;;  %v3141_v34 = vadd.f32 %v9676_v59, %v3140_v46 }
 0x55d   :  { %v9790_v49 = vpop.eup %5326  ;;  %v9806_v60 = vadd.f32 1.0, %v5323_v29  ;;  %v3130_v33 = vsel %vm9796_vm2, %v9670_v28, %v3126_v16  ;;  %vm3143_vm0 = vweird.f32 %v9676_v59  ;;  %v3155_v63 = vmul.f32 %v9685_v36, %v3154_v48 }
 0x55e   :  { %v5329_v8 = vpop.eup %5328  ;;  %v3254_v9 = vmul.f32 %v9782_v4, %v9695_v52  ;;  %5332 = vrcp.f32 %v9776_v20  ;;  %v9816_v39 = vmul.f32 %v3377_v47, %v3120_v0  ;;  %v3146_v46 = vand.u32 2147483647, %v9626_v30  ;;  %vm9830_vm7 = vmor %vm3142_vm3, %vm3143_vm0 }
 0x55f   :  { %v3269_v54 = vmul.f32 %v9790_v49, %v9716_v5  ;;  %5334 = vrcp.f32 %v9784_v42  ;;  %vm3132_vm4 = vcmp.eq.f32.partialorder %v3131_v58, 8.507059e+37  ;;  %v3148_v28 = vand.u32 2147483648, %v9626_v30 }
 0x560   :  { %v9823_v38 = vadd.f32 1.0, %v5329_v8  ;;  %5336 = vrcp.f32 %v9800_v21  ;;  %v9826_v48 = vsel %vm3132_vm4, %v3134_v17, %v3130_v33  ;;  %v3168_v29 = vmul.f32 %v9706_v26, %v9646_v32 }
 0x561   :  { %5338 = vrcp.f32 %v9806_v60  ;;  %v3145_v0 = vsel %vm9830_vm7, %v9676_v59, %v3141_v34  ;;  %v3156_v47 = vadd.f32 %v9685_v36, %v3155_v63  ;;  %vm3158_vm11 = vweird.f32 %v9685_v36 }
 0x562   :  { %v9842_v17 = vpop.eup %5330  ;;  %v3255_v30 = vsub.f32 1.0, %v3254_v9  ;;  %v3163_v58 = vand.u32 2147483648, %v9631_v50  ;;  %v3169_v6 = vsub.f32 1.0, %v3168_v29  ;;  %v3183_v8 = vmul.f32 %v9740_v23, %v9659_v51 }
 0x563   :  { %v3270_v33 = vsub.f32 1.0, %v3269_v54  ;;  %v3149_v10 = vor.u32 1.1754944e-38, %v3148_v28  ;;  %vm3157_vm10 = vweird.f32 %v9631_v50  ;;  %v3161_v16 = vand.u32 2147483647, %v9631_v50 }
 0x564   :  { %v9849_v59 = vpop.eup %5332  ;;  %5340 = vrcp.f32 %v9823_v38  ;;  %vm3147_vm15 = vcmp.eq.f32.partialorder %v3146_v46, 8.507059e+37  ;;  %vm9852_vm14 = vmor %vm3157_vm10, %vm3158_vm11  ;;  %v3170_v63 = vmul.f32 %v9706_v26, %v3169_v6  ;;  %v3184_v9 = vsub.f32 1.0, %v3183_v8 }
 0x565   :  { %v9857_v29 = vpop.eup %5334  ;;  %v3284_v54 = vmul.f32 %v9842_v17, %v9764_v41  ;;  %v9861_v28 = vsel %vm3147_vm15, %v3149_v10, %v3145_v0  ;;  %v3160_v50 = vsel %vm9852_vm14, %v9685_v36, %v3156_v47  ;;  %v3176_v46 = vand.u32 2147483647, %v9646_v32 }
 0x566   :  { %v9867_v57 = vpop.eup %5336  ;;  %v3164_v61 = vor.u32 1.1754944e-38, %v3163_v58  ;;  %vm3172_vm6 = vweird.f32 %v9646_v32  ;;  %vm3173_vm9 = vweird.f32 %v9706_v26  ;;  %v3256_v6 = vmul.f32 %v9782_v4, %v3255_v30 }
 0x567   :  { %v9872_v8 = vpop.eup %5338  ;;  %vm3162_vm13 = vcmp.eq.f32.partialorder %v3161_v16, 8.507059e+37  ;;  %v3171_v10 = vadd.f32 %v9706_v26, %v3170_v63  ;;  %v3185_v0 = vmul.f32 %v9740_v23, %v3184_v9  ;;  %v3271_v36 = vmul.f32 %v9790_v49, %v3270_v33  ;;  %vm9895_vm5 = vmor %vm3172_vm6, %vm3173_vm9 }
 0x568   :  { %v9877_v47 = vsel %vm3162_vm13, %v3164_v61, %v3160_v50  ;;  %v3178_v34 = vand.u32 2147483648, %v9646_v32  ;;  %vm3187_vm12 = vweird.f32 %v9659_v51  ;;  %v3191_v58 = vand.u32 2147483647, %v9659_v51 }
 0x569   :  { %vm9882_vm8 = vcmp.eq.f32.partialorder %v3176_v46, 8.507059e+37  ;;  %vm3188_vm1 = vweird.f32 %v9740_v23  ;;  %v3193_v30 = vand.u32 2147483648, %v9659_v51  ;;  %vm3259_vm3 = vweird.f32 %v9782_v4 }
 0x56a   :  { %v9889_v16 = vpop.eup %5340  ;;  %v3257_v33 = vadd.f32 %v9782_v4, %v3256_v6  ;;  %v3262_v63 = vand.u32 2147483647, %v9695_v52  ;;  %v3264_v9 = vand.u32 2147483648, %v9695_v52  ;;  %v3285_v50 = vsub.f32 1.0, %v3284_v54  ;;  %vm9910_vm0 = vmor %vm3187_vm12, %vm3188_vm1 }
 0x56b   :  { %v3175_v46 = vsel %vm9895_vm5, %v9706_v26, %v3171_v10  ;;  %v3186_v35 = vadd.f32 %v9740_v23, %v3185_v0  ;;  %v3272_v45 = vadd.f32 %v9790_v49, %v3271_v36  ;;  %vm3274_vm2 = vweird.f32 %v9790_v49 }
 0x56c   :  { %v3179_v32 = vor.u32 1.1754944e-38, %v3178_v34  ;;  %vm9914_vm4 = vcmp.eq.f32.partialorder %v3191_v58, 8.507059e+37  ;;  %vm3258_vm7 = vweird.f32 %v9695_v52  ;;  %v3286_v26 = vmul.f32 %v9842_v17, %v3285_v50 }
 0x56d   :  { %vm9922_vm11 = vmor %vm3258_vm7, %vm3259_vm3  ;;  %vm3273_vm10 = vweird.f32 %v9716_v5  ;;  %v3277_v51 = vand.u32 2147483647, %v9716_v5  ;;  %v3279_v10 = vand.u32 2147483648, %v9716_v5  ;;  %v3299_v0 = vmul.f32 %v9849_v59, %v9776_v20 }
 0x56e   :  { %v9933_v52 = vsel %vm9882_vm8, %v3179_v32, %v3175_v46  ;;  %v3194_v36 = vor.u32 1.1754944e-38, %v3193_v30  ;;  %v3261_v34 = vsel %vm9922_vm11, %v9782_v4, %v3257_v33  ;;  %vm9938_vm15 = vcmp.eq.f32.partialorder %v3262_v63, 8.507059e+37  ;;  %vm9944_vm14 = vmor %vm3273_vm10, %vm3274_vm2 }
 0x56f   :  { %v3190_v12 = vsel %vm9910_vm0, %v9740_v23, %v3186_v35  ;;  %v3265_v61 = vor.u32 1.1754944e-38, %v3264_v9  ;;  %v3276_v30 = vsel %vm9944_vm14, %v9790_v49, %v3272_v45  ;;  %v3300_v4 = vsub.f32 1.0, %v3299_v0 }
 0x570   :  { %v3287_v33 = vadd.f32 %v9842_v17, %v3286_v26  ;;  %vm3288_vm6 = vweird.f32 %v9764_v41  ;;  %vm3289_vm9 = vweird.f32 %v9842_v17  ;;  %v3314_v63 = vmul.f32 %v9857_v29, %v9784_v42 }
 0x571   :  { %vm3278_vm13 = vcmp.eq.f32.partialorder %v3277_v51, 8.507059e+37  ;;  %v3280_v50 = vor.u32 1.1754944e-38, %v3279_v10  ;;  %v3294_v46 = vand.u32 2147483648, %v9764_v41  ;;  %v3301_v35 = vmul.f32 %v9849_v59, %v3300_v4  ;;  %vm3290_vm12 = vmor %vm3288_vm6, %vm3289_vm9 }
 0x572   :  { %v3292_v23 = vand.u32 2147483647, %v9764_v41  ;;  %v3307_v45 = vand.u32 2147483647, %v9776_v20  ;;  %v3315_v49 = vsub.f32 1.0, %v3314_v63  ;;  %v3329_v9 = vmul.f32 %v9867_v57, %v9800_v21 }
 0x573   :  { %v3195_v32 = vsel %vm9914_vm4, %v3194_v36, %v3190_v12  ;;  %v9969_v6 = vsel %vm9938_vm15, %v3265_v61, %v3261_v34  ;;  %v9971_v26 = vsel %vm3278_vm13, %v3280_v50, %v3276_v30  ;;  %vm3303_vm8 = vweird.f32 %v9776_v20 }
 0x574   :  { %v3291_v41 = vsel %vm3290_vm12, %v9842_v17, %v3287_v33  ;;  %v3302_v54 = vadd.f32 %v9849_v59, %v3301_v35  ;;  %vm3304_vm1 = vweird.f32 %v9849_v59  ;;  %v3309_v51 = vand.u32 2147483648, %v9776_v20 }
 0x575   :  { %v3295_v10 = vor.u32 1.1754944e-38, %v3294_v46  ;;  %v3316_v56 = vmul.f32 %v9857_v29, %v3315_v49  ;;  %v3330_v0 = vsub.f32 1.0, %v3329_v9  ;;  %v3344_v36 = vmul.f32 %v9872_v8, %v9806_v60  ;;  %vm9989_vm0 = vmor %vm3303_vm8, %vm3304_vm1 }
 0x576   :  { %vm3293_vm3 = vcmp.eq.f32.partialorder %v3292_v23, 8.507059e+37  ;;  %vm9981_vm5 = vcmp.eq.f32.partialorder %v3307_v45, 8.507059e+37  ;;  %vm3318_vm2 = vweird.f32 %v9784_v42  ;;  %v3322_v17 = vand.u32 2147483647, %v9784_v42 }
 0x577   :  { %v9987_v58 = vsel %vm3293_vm3, %v3295_v10, %v3291_v41  ;;  %v3324_v5 = vand.u32 2147483648, %v9784_v42  ;;  %v3339_v12 = vand.u32 2147483648, %v9800_v21  ;;  %v3345_v61 = vsub.f32 1.0, %v3344_v36 }
 0x578   :  { %v3306_v30 = vsel %vm9989_vm0, %v9849_v59, %v3302_v54  ;;  %v3310_v4 = vor.u32 1.1754944e-38, %v3309_v51  ;;  %v3337_v33 = vand.u32 2147483647, %v9800_v21  ;;  %v3359_v63 = vmul.f32 %v9889_v16, %v9823_v38 }
 0x579   :  { %v3317_v50 = vadd.f32 %v9857_v29, %v3316_v56  ;;  %vm3319_vm4 = vweird.f32 %v9857_v29  ;;  %v3331_v46 = vmul.f32 %v9867_v57, %v3330_v0  ;;  %vm3333_vm7 = vweird.f32 %v9800_v21 }
 0x57a   :  { %vm10005_vm11 = vcmp.eq.f32.partialorder %v3322_v17, 8.507059e+37  ;;  %vm3334_vm10 = vweird.f32 %v9867_v57  ;;  %v3346_v59 = vmul.f32 %v9872_v8, %v3345_v61  ;;  %v3360_v23 = vsub.f32 1.0, %v3359_v63  ;;  %vm10018_vm14 = vmor %vm3318_vm2, %vm3319_vm4 }
 0x57b   :  { %v10013_v45 = vsel %vm9981_vm5, %v3310_v4, %v3306_v30  ;;  %v3325_v49 = vor.u32 1.1754944e-38, %v3324_v5  ;;  %v3340_v9 = vor.u32 1.1754944e-38, %v3339_v12  ;;  %vm3348_vm15 = vweird.f32 %v9806_v60  ;;  %vm10059_vm12 = vmor %vm3333_vm7, %vm3334_vm10 }
 0x57c   :  { %vm10022_vm6 = vcmp.eq.f32.partialorder %v3337_v33, 8.507059e+37  ;;  %vm3349_vm9 = vweird.f32 %v9872_v8  ;;  %v3352_v51 = vand.u32 2147483647, %v9806_v60  ;;  %v3361_v10 = vmul.f32 %v9889_v16, %v3360_v23 }
 0x57d   :  { %v12246_v56 = vrot.slane %v9724_v19, 6  ;;  %v3321_v42 = vsel %vm10018_vm14, %v9857_v29, %v3317_v50  ;;  %v3332_v36 = vadd.f32 %v9867_v57, %v3331_v46  ;;  %v3380_v34 = vrot.slane %v9724_v19, 1  ;;  %vm10073_vm1 = vmor %vm3348_vm15, %vm3349_vm9 }
 0x57e   :  { %v12247_v17 = vrot.slane %v9724_v19, 7  ;;  %v3347_v5 = vadd.f32 %v9872_v8, %v3346_v59  ;;  %v3354_v12 = vand.u32 2147483648, %v9806_v60  ;;  %v3381_v61 = vrot.slane %v9724_v19, 2 }
 0x57f   :  { %v3393_v0 = vmul.f32 %v12246_v56, %v9826_v48  ;;  %v3395_v48 = vmul.f32 %v9724_v19, %v9877_v47  ;;  %v3396_v30 = vmul.f32 %v3380_v34, %v9933_v52  ;;  %v3398_v29 = vadd.f32 %v9787_v3, %v12000_v44 }
 0x580   :  { %v3394_v20 = vmul.f32 %v12247_v17, %v9861_v28  ;;  %v3399_v4 = vadd.f32 %v9803_v55, %v12001_v53  ;;  %v3400_v28 = vadd.f32 %v9816_v39, %v12002_v24  ;;  %v3362_v33 = vadd.f32 %v9889_v16, %v3361_v10 }
 0x581   :  { %vm3364_vm13 = vweird.f32 %v9889_v16  ;;  %v3397_v63 = vmul.f32 %v3381_v61, %v3195_v32  ;;  %v3401_v50 = vadd.f32 %v3393_v0, %v12003_v18  ;;  %vm3363_vm8 = vweird.f32 %v9823_v38 }
 0x582   :  { %v3369_v3 = vand.u32 2147483648, %v9823_v38  ;;  %v3402_v55 = vadd.f32 %v3394_v20, %v12006_v14  ;;  %5342 = vtanh.f32 %v3398_v29  ;;  %v3336_v39 = vsel %vm10059_vm12, %v9867_v57, %v3332_v36  ;;  %vm10086_vm3 = vmor %vm3363_vm8, %vm3364_vm13 }
 0x583   :  { %v3367_v47 = vand.u32 2147483647, %v9823_v38  ;;  %v3403_v52 = vadd.f32 %v3395_v48, %v12009_v1  ;;  %5344 = vtanh.f32 %v3399_v4  ;;  %v3326_v32 = vsel %vm10005_vm11, %v3325_v49, %v3321_v42 }
 0x584   :  { %v3351_v57 = vsel %vm10073_vm1, %v9872_v8, %v3347_v5  ;;  %v3404_v46 = vadd.f32 %v3396_v30, %v12012_v62  ;;  %5346 = vtanh.f32 %v3400_v28  ;;  %v3355_v38 = vor.u32 1.1754944e-38, %v3354_v12 }
 0x585   :  { %v3366_v59 = vsel %vm10086_vm3, %v9889_v16, %v3362_v33  ;;  %v3405_v35 = vadd.f32 %v3397_v63, %v12013_v7  ;;  %5348 = vtanh.f32 %v3401_v50  ;;  %v3341_v8 = vsel %vm10022_vm6, %v3340_v9, %v3336_v39 }
 0x586   :  { %vm3353_vm5 = vcmp.eq.f32.partialorder %v3352_v51, 8.507059e+37  ;;  %v3370_v23 = vor.u32 1.1754944e-38, %v3369_v3  ;;  %5350 = vtanh.f32 %v3402_v55  ;;  %vm3368_vm2 = vcmp.eq.f32.partialorder %v3367_v47, 8.507059e+37 }
 0x587   :  { %v3356_v49 = vsel %vm3353_vm5, %v3355_v38, %v3351_v57  ;;  %5352 = vtanh.f32 %v3403_v52  ;;  %v3414_v41 = vsub.f32 1.0, %v9969_v6  ;;  %v3415_v0 = vsub.f32 1.0, %v9971_v26 }
 0x588   :  { %v5343_v10 = vpop.eup %5342  ;;  %v3371_v56 = vsel %vm3368_vm2, %v3370_v23, %v3366_v59  ;;  %5354 = vtanh.f32 %v3404_v46  ;;  %v3416_v16 = vsub.f32 1.0, %v9987_v58  ;;  %v3417_v54 = vsub.f32 1.0, %v10013_v45 }
 0x589   :  { %v5345_v42 = vpop.eup %5344  ;;  %5356 = vtanh.f32 %v3405_v35  ;;  %v3422_v9 = vmul.f32 %v5343_v10, %v3414_v41  ;;  %v12254_v51 = vrot.slane %v9556_v15, 7  ;;  %v3418_v17 = vsub.f32 1.0, %v3326_v32 }
 0x58a   :  { %v5347_v34 = vpop.eup %5346  ;;  %v3419_v20 = vsub.f32 1.0, %v3341_v8  ;;  %v3423_v5 = vmul.f32 %v5345_v42, %v3415_v0  ;;  %v12255_v12 = vrot.slane %v9561_v37, 7  ;;  %v3420_v30 = vsub.f32 1.0, %v3356_v49 }
 0x58b   :  { %v3445_v36 = vmul.f32 %v12254_v51, %v9969_v6  ;;  %v5349_v48 = vpop.eup %5348  ;;  %v3424_v29 = vmul.f32 %v5347_v34, %v3416_v16  ;;  %v12256_v4 = vrot.slane %v9565_v31, 7  ;;  %v3421_v50 = vsub.f32 1.0, %v3371_v56 }
 0x58c   :  { %v3446_v61 = vmul.f32 %v12255_v12, %v9971_v26  ;;  %v5351_v63 = vpop.eup %5350  ;;  %v3425_v6 = vmul.f32 %v5349_v48, %v3417_v54  ;;  %v12257_v19 = vrot.slane %v9570_v22, 7  ;;  %v12258_v21 = vrot.slane %v9582_v13, 7 }
 0x58d   :  { %v3447_v28 = vmul.f32 %v12256_v4, %v9987_v58  ;;  %v10110_v33 = vadd.f32 %v3445_v36, %v3422_v9  ;;  %v5353_v39 = vpop.eup %5352  ;;  %v3426_v26 = vmul.f32 %v5351_v63, %v3418_v17  ;;  %v12259_v46 = vrot.slane %v9578_v2, 7 }
 0x58e   :  { %v3448_v3 = vmul.f32 %v12257_v19, %v10013_v45  ;;  %v10115_v55 = vadd.f32 %v3446_v61, %v3423_v5  ;;  %v3449_v47 = vmul.f32 %v12258_v21, %v3326_v32  ;;  %v5355_v57 = vpop.eup %5354  ;;  %v3427_v60 = vmul.f32 %v5353_v39, %v3419_v20 }
 0x58f   :  { %v10119_v52 = vadd.f32 %v3447_v28, %v3424_v29  ;;  %v3469_v58 = vrot.slane %v10110_v33, 5  ;;  %v3450_v38 = vmul.f32 %v3341_v8, %v12259_v46  ;;  %v5357_v35 = vpop.eup %5356  ;;  %v3428_v23 = vmul.f32 %v5355_v57, %v3420_v30  ;;  %v12273_v57 = vld [vmem:[#allocation24_spill] sm:$0xff] }
 0x590   :  { %v10124_v59 = vadd.f32 %v3448_v3, %v3425_v6  ;;  %v3470_v45 = vrot.slane %v10115_v55, 4  ;;  %v12260_v41 = vrot.slane %v9584_v27, 7  ;;  %v10129_v0 = vadd.f32 %v3449_v47, %v3426_v26  ;;  %v12272_v47 = vld [vmem:[#allocation23_spill] sm:$0xff]  ;;  %v12274_v46 = vld [vmem:[#allocation20_spill] sm:$0xff] }
 0x591   :  { %v3472_v32 = vrot.slane %v10119_v52, 3  ;;  %v3429_v16 = vmul.f32 %v5357_v35, %v3421_v50  ;;  %v12261_v42 = vrot.slane %v9587_v40, 7  ;;  %vm12262_vm0 = vcmask 1041409  }
 0x592   :  { %v3451_v10 = vmul.f32 %v12260_v41, %v3356_v49  ;;  %v3471_v9 = vsel %vm12262_vm0, %v3470_v45, %v3469_v58  ;;  %v3474_v8 = vrot.slane %v10124_v59, 2  ;;  %vm12264_vm4 = vcmask 1042434   ;;  %v12275_v45 = vld [vmem:[#allocation25_spill] sm:$0xff] }
 0x593   :  { %v3452_v54 = vmul.f32 %v12261_v42, %v3371_v56  ;;  %v3473_v36 = vsel %vm12264_vm4, %v3472_v32, %v3471_v9  ;;  %v3476_v34 = vrot.slane %v10129_v0, 1  ;;  %v10140_v17 = vadd.f32 %v3450_v38, %v3427_v60 }
 0x594   :  { %v10136_v51 = vadd.f32 %v3451_v10, %v3428_v23  ;;  %vm12267_vm7 = vcmask 1043459   ;;  %vm12268_vm11 = vcmask 1044484   ;;  %vm12269_vm10 = vcmask 1045509  }
 0x595   :  { %12265 = vst [vmem:[#allocation70_spill] sm:$0xff] %v10140_v17  ;;  %v10142_v49 = vadd.f32 %v3452_v54, %v3429_v16  ;;  %v3475_v20 = vsel %vm12267_vm7, %v3474_v8, %v3473_v36  ;;  %vm12270_vm15 = vcmask 1046534   ;;  %vm12271_vm14 = vcmask 1047559   ;;  %v12276_v54 = vld [vmem:[#allocation38_spill] sm:$0xff] }
 0x596   :  { %12263 = vst [vmem:[#allocation69_spill] sm:$0xff] %v10136_v51  ;;  %v3477_v5 = vsel %vm12268_vm11, %v3476_v34, %v3475_v20  ;;  %v11503_v56 = vrot.slane %v10136_v51, 7 }
 0x597   :  { %12266 = vst [vmem:[#allocation71_spill] sm:$0xff] %v10142_v49  ;;  %v3478_v12 = vsel %vm12269_vm10, %v10140_v17, %v3477_v5  ;;  %v3481_v61 = vrot.slane %v10142_v49, 6 }
 0x598   :  { %v3480_v48 = vsel %vm12270_vm15, %v11503_v56, %v3478_v12 }
 0x599   :  { %v3482_v30 = vsel %vm12271_vm14, %v3481_v61, %v3480_v48  ;;  %v12277_v48 = vld [vmem:[#allocation27_spill] sm:$0xff] }
 0x59a   :  { %3500 = vmatmul.f32.vlgmr.msrb.gmra.mxu0 %v3482_v30  ;;  %3520 = vmatmul.f32.vlgmr.msrb.gmra.mxu1 %v3482_v30 }
 0x59b   :  { %3540 = vmatmul.f32.vlgmr.msrb.gmra.mxu2 %v3482_v30 }
 0x617   :  { %v3501_v29 = vpop.f32.mrf.mxu0  ;;  %v3521_v16 = vpop.f32.mrf.mxu1 }
 0x618   :  { %v3545_v4 = vrot.slane %v3501_v29, 2  ;;  %v3546_v28 = vrot.slane %v3501_v29, 3  ;;  %v3547_v63 = vrot.slane %v3501_v29, 4  ;;  %v3548_v50 = vrot.slane %v3501_v29, 5 }
 0x619   :  { %v3549_v6 = vrot.slane %v3501_v29, 6  ;;  %v3550_v19 = vrot.slane %v3501_v29, 7  ;;  %v3551_v3 = vrot.slane %v3501_v29, 1  ;;  %v3566_v39 = vadd.f32 %v3501_v29, %v12193_v11 }
 0x61a   :  { %v3560_v26 = vadd.f32 %v3545_v4, %v12094_v43  ;;  %v3561_v21 = vadd.f32 %v3546_v28, %v12095_v25  ;;  %v3562_v58 = vadd.f32 %v3547_v63, %v12272_v47  ;;  %v3563_v60 = vadd.f32 %v3548_v50, %v12273_v57  ;;  %v12283_v4 = vld [vmem:[#allocation41_spill] sm:$0xff] }
 0x61b   :  { %v3564_v38 = vadd.f32 %v3549_v6, %v12274_v46  ;;  %v3565_v35 = vadd.f32 %v3550_v19, %v12275_v45  ;;  %v4837_v23 = vmul.f32 -1.442695, %v3566_v39  ;;  %v3567_v9 = vadd.f32 %v3551_v3, %v12276_v54 }
 0x61c   :  { %v4831_v41 = vmul.f32 -1.442695, %v3560_v26  ;;  %v4832_v10 = vmul.f32 -1.442695, %v3561_v21  ;;  %v4833_v32 = vmul.f32 -1.442695, %v3562_v58  ;;  %v3742_v26 = vadd.f32 %v3521_v16, %v12283_v4 }
 0x61d   :  { %v4834_v42 = vmul.f32 -1.442695, %v3563_v60  ;;  %5358 = vpow2.f32 %v4837_v23  ;;  %v4835_v8 = vmul.f32 -1.442695, %v3564_v38  ;;  %v4836_v36 = vmul.f32 -1.442695, %v3565_v35 }
 0x61e   :  { %5360 = vpow2.f32 %v4831_v41  ;;  %v3721_v34 = vrot.slane %v3521_v16, 2  ;;  %v4838_v20 = vmul.f32 -1.442695, %v3567_v9  ;;  %v3722_v5 = vrot.slane %v3521_v16, 3  ;;  %v12278_v38 = vld [vmem:[#allocation30_spill] sm:$0xff] }
 0x61f   :  { %5362 = vpow2.f32 %v4832_v10  ;;  %v3723_v61 = vrot.slane %v3521_v16, 4  ;;  %v3724_v28 = vrot.slane %v3521_v16, 5  ;;  %v3725_v63 = vrot.slane %v3521_v16, 6  ;;  %v12279_v10 = vld [vmem:[#allocation32_spill] sm:$0xff] }
 0x620   :  { %5364 = vpow2.f32 %v4833_v32  ;;  %v3736_v30 = vadd.f32 %v3721_v34, %v12277_v48  ;;  %v3726_v3 = vrot.slane %v3521_v16, 7  ;;  %v3727_v60 = vrot.slane %v3521_v16, 1 }
 0x621   :  { %5366 = vpow2.f32 %v4834_v42  ;;  %v3737_v35 = vadd.f32 %v3722_v5, %v12278_v38  ;;  %v3738_v32 = vadd.f32 %v3723_v61, %v12279_v10  ;;  %v12282_v5 = vld [vmem:[#allocation40_spill] sm:$0xff] }
 0x622   :  { %5368 = vpow2.f32 %v4835_v8  ;;  %v4839_v42 = vmul.f32 -1.442695, %v3736_v30  ;;  %v4845_v30 = vmul.f32 -1.442695, %v3742_v26 }
 0x623   :  { %v5359_v12 = vpop.eup %5358  ;;  %5370 = vpow2.f32 %v4836_v36  ;;  %v12280_v36 = vld [vmem:[#allocation33_spill] sm:$0xff] }
 0x624   :  { %v5361_v29 = vpop.eup %5360  ;;  %5372 = vpow2.f32 %v4838_v20  ;;  %v3739_v34 = vadd.f32 %v3724_v28, %v12280_v36  ;;  %v12281_v20 = vld [vmem:[#allocation36_spill] sm:$0xff]  ;;  %v10186_v61 = vadd.f32 1.0, %v5359_v12  ;;  %v12284_v28 = vld [vmem:[#allocation43_spill] sm:$0xff]  ;;  %v3541_v12 = vpop.f32.mrf.mxu2 }
 0x625   :  { %v5363_v6 = vpop.eup %5362  ;;  %v10165_v19 = vadd.f32 1.0, %v5361_v29  ;;  %v3740_v29 = vadd.f32 %v3725_v63, %v12281_v20  ;;  %v3743_v50 = vadd.f32 %v3727_v60, %v12284_v28  ;;  %v4840_v63 = vmul.f32 -1.442695, %v3737_v35 }
 0x626   :  { %v5365_v21 = vpop.eup %5364  ;;  %v10169_v58 = vadd.f32 1.0, %v5363_v6  ;;  %v4842_v16 = vmul.f32 -1.442695, %v3739_v34 }
 0x627   :  { %v5367_v23 = vpop.eup %5366  ;;  %v10172_v41 = vadd.f32 1.0, %v5365_v21  ;;  %5374 = vrcp.f32 %v10165_v19  ;;  %v3741_v21 = vadd.f32 %v3726_v3, %v12282_v5  ;;  %v4843_v3 = vmul.f32 -1.442695, %v3740_v29 }
 0x628   :  { %v5369_v9 = vpop.eup %5368  ;;  %v10176_v8 = vadd.f32 1.0, %v5367_v23  ;;  %5376 = vrcp.f32 %v10169_v58  ;;  %v3611_v54 = vand.u32 2147483648, %v10165_v19  ;;  %vm3605_vm6 = vweird.f32 %v10165_v19 }
 0x629   :  { %v5371_v6 = vpop.eup %5370  ;;  %v10181_v56 = vadd.f32 1.0, %v5369_v9  ;;  %5378 = vrcp.f32 %v10172_v41  ;;  %v4841_v9 = vmul.f32 -1.442695, %v3738_v32  ;;  %v4844_v23 = vmul.f32 -1.442695, %v3741_v21 }
 0x62a   :  { %5380 = vpow2.f32 %v4839_v42  ;;  %v5373_v40 = vpop.eup %5372  ;;  %v10192_v27 = vadd.f32 1.0, %v5371_v6  ;;  %v3609_v32 = vand.u32 2147483647, %v10165_v19  ;;  %v3626_v42 = vand.u32 2147483648, %v10169_v58  ;;  %v12285_v6 = vld [vmem:[#allocation68_spill] sm:$0xff] }
 0x62b   :  { %5382 = vrcp.f32 %v10176_v8  ;;  %v4846_v29 = vmul.f32 -1.442695, %v3743_v50  ;;  %v10210_v21 = vadd.f32 %v12285_v6, %v3541_v12  ;;  %v10214_v11 = vadd.f32 1.0, %v5373_v40 }
 0x62c   :  { %5384 = vrcp.f32 %v10181_v56  ;;  %v3624_v46 = vand.u32 2147483647, %v10169_v58  ;;  %v3612_v57 = vor.u32 1.1754944e-38, %v3611_v54  ;;  %vm3620_vm9 = vweird.f32 %v10169_v58 }
 0x62d   :  { %v10195_v39 = vpop.eup %5374  ;;  %5386 = vrcp.f32 %v10186_v61  ;;  %vm10224_vm13 = vcmp.eq.f32.partialorder %v3609_v32, 8.507059e+37  ;;  %vm3635_vm12 = vweird.f32 %v10172_v41  ;;  %v3639_v54 = vand.u32 2147483647, %v10172_v41 }
 0x62e   :  { %v10199_v60 = vpop.eup %5376  ;;  %v3601_v35 = vmul.f32 %v10195_v39, %v10165_v19  ;;  %5388 = vrcp.f32 %v10192_v27  ;;  %vm3606_vm8 = vweird.f32 %v10195_v39  ;;  %vm10250_vm3 = vcmp.eq.f32.partialorder %v3624_v46, 8.507059e+37 }
 0x62f   :  { %v3616_v34 = vmul.f32 %v10199_v60, %v10169_v58  ;;  %v10212_v26 = vpop.eup %5378  ;;  %5390 = vpow2.f32 %v4840_v63  ;;  %vm3621_vm1 = vweird.f32 %v10199_v60  ;;  %v3656_v13 = vand.u32 2147483648, %v10176_v8  ;;  %vm10258_vm5 = vmor %vm3605_vm6, %vm3606_vm8 }
 0x630   :  { %v3602_v45 = vsub.f32 1.0, %v3601_v35  ;;  %v5381_v2 = vpop.eup %5380  ;;  %v3631_v50 = vmul.f32 %v10212_v26, %v10172_v41  ;;  %v10228_v35 = vor.u32 1.1754944e-38, %v3626_v42  ;;  %5392 = vpow2.f32 %v4841_v9  ;;  %vm10283_vm7 = vmor %vm3620_vm9, %vm3621_vm1 }
 0x631   :  { %v3617_v47 = vsub.f32 1.0, %v3616_v34  ;;  %v10221_v12 = vpop.eup %5382  ;;  %5394 = vrcp.f32 %v10214_v11  ;;  %vm3636_vm2 = vweird.f32 %v10212_v26  ;;  %vm10270_vm0 = vcmp.eq.f32.partialorder %v3639_v54, 8.507059e+37 }
 0x632   :  { %v3603_v6 = vmul.f32 %v10195_v39, %v3602_v45  ;;  %v10232_v34 = vpop.eup %5384  ;;  %v3632_v22 = vsub.f32 1.0, %v3631_v50  ;;  %v3646_v63 = vmul.f32 %v10221_v12, %v10176_v8  ;;  %5396 = vpow2.f32 %v4842_v16  ;;  %vm10294_vm11 = vmor %vm3635_vm12, %vm3636_vm2 }
 0x633   :  { %v3618_v25 = vmul.f32 %v10199_v60, %v3617_v47  ;;  %v10237_v45 = vpop.eup %5386  ;;  %v3661_v42 = vmul.f32 %v10232_v34, %v10181_v56  ;;  %v10245_v47 = vadd.f32 1.0, %v5381_v2  ;;  %5398 = vpow2.f32 %v4843_v3 }
 0x634   :  { %v3604_v32 = vadd.f32 %v10195_v39, %v3603_v6  ;;  %v3633_v31 = vmul.f32 %v10212_v26, %v3632_v22  ;;  %v3647_v37 = vsub.f32 1.0, %v3646_v63  ;;  %v10247_v50 = vpop.eup %5388  ;;  %v3641_v6 = vand.u32 2147483648, %v10172_v41 }
 0x635   :  { %v5391_v15 = vpop.eup %5390  ;;  %v3619_v2 = vadd.f32 %v10199_v60, %v3618_v25  ;;  %v3662_v46 = vsub.f32 1.0, %v3661_v42  ;;  %5400 = vpow2.f32 %v4844_v23  ;;  %vm3650_vm4 = vweird.f32 %v10176_v8 }
 0x636   :  { %v3634_v16 = vadd.f32 %v10212_v26, %v3633_v31  ;;  %5402 = vpow2.f32 %v4845_v30  ;;  %v10265_v63 = vadd.f32 1.0, %v5391_v15  ;;  %v3608_v3 = vsel %vm10258_vm5, %v10195_v39, %v3604_v32  ;;  %v5393_v19 = vpop.eup %5392 }
 0x637   :  { %v3648_v25 = vmul.f32 %v10221_v12, %v3647_v37  ;;  %5404 = vrcp.f32 %v10245_v47  ;;  %v10277_v23 = vpop.eup %5394  ;;  %v3642_v31 = vor.u32 1.1754944e-38, %v3641_v6  ;;  %v3657_v39 = vor.u32 1.1754944e-38, %v3656_v13 }
 0x638   :  { %v3676_v30 = vmul.f32 %v10247_v50, %v10192_v27  ;;  %5406 = vrcp.f32 %v10265_v63  ;;  %v5397_v37 = vpop.eup %5396  ;;  %vm3665_vm10 = vweird.f32 %v10181_v56  ;;  %v3613_v13 = vsel %vm10224_vm13, %v3612_v57, %v3608_v3 }
 0x639   :  { %5408 = vpow2.f32 %v4846_v29  ;;  %v3898_v58 = vrot.slane %v10210_v21, 2  ;;  %v3899_v32 = vrot.slane %v10210_v21, 3  ;;  %v5399_v42 = vpop.eup %5398  ;;  %v3663_v6 = vmul.f32 %v10232_v34, %v3662_v46 }
 0x63a   :  { %v10304_v22 = vadd.f32 1.0, %v5393_v19  ;;  %v3623_v41 = vsel %vm10283_vm7, %v10199_v60, %v3619_v2  ;;  %v3638_v29 = vsel %vm10294_vm11, %v10212_v26, %v3634_v16  ;;  %vm3651_vm15 = vweird.f32 %v10221_v12 }
 0x63b   :  { %v5401_v4 = vpop.eup %5400  ;;  %v3900_v57 = vrot.slane %v10210_v21, 4  ;;  %v3649_v3 = vadd.f32 %v10221_v12, %v3648_v25  ;;  %v3677_v19 = vsub.f32 1.0, %v3676_v30  ;;  %v10316_v28 = vadd.f32 1.0, %v5397_v37  ;;  %vm10337_vm14 = vmor %vm3650_vm4, %vm3651_vm15 }
 0x63c   :  { %v5403_v46 = vpop.eup %5402  ;;  %v3654_v60 = vand.u32 2147483647, %v10176_v8  ;;  %v10322_v26 = vadd.f32 1.0, %v5399_v42  ;;  %v3628_v16 = vsel %vm10250_vm3, %v10228_v35, %v3623_v41  ;;  %v3643_v54 = vsel %vm10270_vm0, %v3642_v31, %v3638_v29 }
 0x63d   :  { %v10320_v2 = vpop.eup %5404  ;;  %v10329_v25 = vmul.f32 %v3898_v58, %v3613_v13  ;;  %v10341_v42 = vadd.f32 1.0, %v5401_v4  ;;  %5410 = vrcp.f32 %v10304_v22  ;;  %v3664_v35 = vadd.f32 %v10232_v34, %v3663_v6 }
 0x63e   :  { %v10331_v30 = vpop.eup %5406  ;;  %vm3666_vm6 = vweird.f32 %v10232_v34  ;;  %v10346_v9 = vadd.f32 1.0, %v5403_v46  ;;  %v3777_v31 = vmul.f32 %v10320_v2, %v10245_v47  ;;  %v3653_v8 = vsel %vm10337_vm14, %v10221_v12, %v3649_v3 }
 0x63f   :  { %v5409_v43 = vpop.eup %5408  ;;  %v3669_v13 = vand.u32 2147483647, %v10181_v56  ;;  %5412 = vrcp.f32 %v10316_v28  ;;  %v10355_v4 = vmul.f32 %v3899_v32, %v3628_v16  ;;  %v10357_v58 = vmul.f32 %v3900_v57, %v3643_v54  ;;  %vm10373_vm13 = vmor %vm3665_vm10, %vm3666_vm6 }
 0x640   :  { %v3678_v6 = vmul.f32 %v10247_v50, %v3677_v19  ;;  %v3792_v41 = vmul.f32 %v10331_v30, %v10265_v63  ;;  %5414 = vrcp.f32 %v10322_v26  ;;  %vm3655_vm9 = vcmp.eq.f32.partialorder %v3654_v60, 8.507059e+37 }
 0x641   :  { %v3671_v29 = vand.u32 2147483648, %v10181_v56  ;;  %v10364_v46 = vadd.f32 1.0, %v5409_v43  ;;  %5416 = vrcp.f32 %v10341_v42  ;;  %v10367_v12 = vsel %vm3655_vm9, %v3657_v39, %v3653_v8 }
 0x642   :  { %v3691_v57 = vmul.f32 %v10237_v45, %v10186_v61  ;;  %v3778_v3 = vsub.f32 1.0, %v3777_v31  ;;  %5418 = vrcp.f32 %v10346_v9  ;;  %v3668_v19 = vsel %vm10373_vm13, %v10232_v34, %v3664_v35 }
 0x643   :  { %vm10383_vm12 = vcmp.eq.f32.partialorder %v3669_v13, 8.507059e+37  ;;  %v10387_v60 = vpop.eup %5410  ;;  %v3679_v56 = vadd.f32 %v10247_v50, %v3678_v6  ;;  %vm3681_vm8 = vweird.f32 %v10247_v50  ;;  %v3706_v54 = vmul.f32 %v10277_v23, %v10214_v11 }
 0x644   :  { %v3692_v16 = vsub.f32 1.0, %v3691_v57  ;;  %v3793_v37 = vsub.f32 1.0, %v3792_v41  ;;  %v3672_v43 = vor.u32 1.1754944e-38, %v3671_v29  ;;  %vm3680_vm1 = vweird.f32 %v10192_v27 }
 0x645   :  { %v3684_v34 = vand.u32 2147483647, %v10192_v27  ;;  %v10395_v35 = vpop.eup %5412  ;;  %v3686_v31 = vand.u32 2147483648, %v10192_v27  ;;  %v3699_v13 = vand.u32 2147483647, %v10186_v61  ;;  %v3707_v6 = vsub.f32 1.0, %v3706_v54  ;;  %vm10411_vm3 = vmor %vm3680_vm1, %vm3681_vm8 }
 0x646   :  { %v3693_v8 = vmul.f32 %v10237_v45, %v3692_v16  ;;  %v10400_v32 = vpop.eup %5414  ;;  %v3807_v57 = vmul.f32 %v10387_v60, %v10304_v22  ;;  %5420 = vrcp.f32 %v10364_v46  ;;  %v10407_v41 = vsel %vm10383_vm12, %v3672_v43, %v3668_v19 }
 0x647   :  { %vm3695_vm5 = vweird.f32 %v10186_v61  ;;  %v10416_v29 = vpop.eup %5416  ;;  %v3683_v16 = vsel %vm10411_vm3, %v10247_v50, %v3679_v56  ;;  %vm3696_vm2 = vweird.f32 %v10237_v45  ;;  %v3708_v39 = vmul.f32 %v10277_v23, %v3707_v6 }
 0x648   :  { %v3779_v19 = vmul.f32 %v10320_v2, %v3778_v3  ;;  %v10424_v54 = vpop.eup %5418  ;;  %vm3685_vm0 = vcmp.eq.f32.partialorder %v3684_v34, 8.507059e+37  ;;  %v3694_v43 = vadd.f32 %v10237_v45, %v3693_v8  ;;  %v3701_v15 = vand.u32 2147483648, %v10186_v61  ;;  %vm10445_vm10 = vmor %vm3695_vm5, %vm3696_vm2 }
 0x649   :  { %v3714_v40 = vand.u32 2147483647, %v10214_v11  ;;  %v3687_v5 = vor.u32 1.1754944e-38, %v3686_v31  ;;  %vm10429_vm4 = vcmp.eq.f32.partialorder %v3699_v13, 8.507059e+37  ;;  %v3716_v50 = vand.u32 2147483648, %v10214_v11 }
 0x64a   :  { %v3794_v56 = vmul.f32 %v10331_v30, %v3793_v37  ;;  %v3709_v3 = vadd.f32 %v10277_v23, %v3708_v39  ;;  %vm3710_vm7 = vweird.f32 %v10214_v11  ;;  %vm3711_vm11 = vweird.f32 %v10277_v23 }
 0x64b   :  { %v3785_v34 = vand.u32 2147483647, %v10245_v47  ;;  %v10439_v8 = vsel %vm3685_vm0, %v3687_v5, %v3683_v16  ;;  %v3780_v37 = vadd.f32 %v10320_v2, %v3779_v19  ;;  %vm3782_vm15 = vweird.f32 %v10320_v2  ;;  %vm10461_vm6 = vmor %vm3710_vm7, %vm3711_vm11 }
 0x64c   :  { %v3808_v13 = vsub.f32 1.0, %v3807_v57  ;;  %v10451_v11 = vpop.eup %5420  ;;  %v3698_v5 = vsel %vm10445_vm10, %v10237_v45, %v3694_v43  ;;  %v3702_v6 = vor.u32 1.1754944e-38, %v3701_v15  ;;  %vm10456_vm14 = vcmp.eq.f32.partialorder %v3714_v40, 8.507059e+37 }
 0x64d   :  { %v3787_v61 = vand.u32 2147483648, %v10245_v47  ;;  %v3717_v39 = vor.u32 1.1754944e-38, %v3716_v50  ;;  %vm3781_vm9 = vweird.f32 %v10245_v47  ;;  %v3795_v57 = vadd.f32 %v10331_v30, %v3794_v56 }
 0x64e   :  { %vm3797_vm13 = vweird.f32 %v10331_v30  ;;  %v3713_v45 = vsel %vm10461_vm6, %v10277_v23, %v3709_v3  ;;  %vm10471_vm12 = vmor %vm3781_vm9, %vm3782_vm15  ;;  %vm10475_vm8 = vcmp.eq.f32.partialorder %v3785_v34, 8.507059e+37  ;;  %v3802_v19 = vand.u32 2147483648, %v10265_v63 }
 0x64f   :  { %v3822_v47 = vmul.f32 %v10395_v35, %v10316_v28  ;;  %v10484_v43 = vsel %vm10429_vm4, %v3702_v6, %v3698_v5  ;;  %v3784_v23 = vsel %vm10471_vm12, %v10320_v2, %v3780_v37  ;;  %vm3796_vm1 = vweird.f32 %v10265_v63 }
 0x650   :  { %v3809_v50 = vmul.f32 %v10387_v60, %v3808_v13  ;;  %v3788_v56 = vor.u32 1.1754944e-38, %v3787_v61  ;;  %vm10491_vm3 = vmor %vm3796_vm1, %vm3797_vm13  ;;  %v3800_v34 = vand.u32 2147483647, %v10265_v63  ;;  %v3837_v20 = vmul.f32 %v10400_v32, %v10322_v26 }
 0x651   :  { %v3823_v31 = vsub.f32 1.0, %v3822_v47  ;;  %v10500_v5 = vsel %vm10456_vm14, %v3717_v39, %v3713_v45  ;;  %v3799_v2 = vsel %vm10491_vm3, %v10331_v30, %v3795_v57  ;;  %vm3811_vm5 = vweird.f32 %v10304_v22 }
 0x652   :  { %v3815_v37 = vand.u32 2147483647, %v10304_v22  ;;  %v3803_v13 = vor.u32 1.1754944e-38, %v3802_v19  ;;  %v3817_v6 = vand.u32 2147483648, %v10304_v22  ;;  %v3838_v61 = vsub.f32 1.0, %v3837_v20 }
 0x653   :  { %v3824_v63 = vmul.f32 %v10395_v35, %v3823_v31  ;;  %v3810_v16 = vadd.f32 %v10387_v60, %v3809_v50  ;;  %vm3812_vm2 = vweird.f32 %v10387_v60  ;;  %v3830_v27 = vand.u32 2147483647, %v10316_v28 }
 0x654   :  { %v3852_v39 = vmul.f32 %v10416_v29, %v10341_v42  ;;  %v10516_v30 = vsel %vm10475_vm8, %v3788_v56, %v3784_v23  ;;  %vm3801_vm0 = vcmp.eq.f32.partialorder %v3800_v34, 8.507059e+37  ;;  %vm3826_vm4 = vweird.f32 %v10316_v28  ;;  %vm10530_vm10 = vmor %vm3811_vm5, %vm3812_vm2 }
 0x655   :  { %vm3827_vm7 = vweird.f32 %v10395_v35  ;;  %v10520_v57 = vsel %vm3801_vm0, %v3803_v13, %v3799_v2  ;;  %vm10522_vm11 = vcmp.eq.f32.partialorder %v3815_v37, 8.507059e+37  ;;  %v3825_v40 = vadd.f32 %v10395_v35, %v3824_v63 }
 0x656   :  { %v3839_v19 = vmul.f32 %v10400_v32, %v3838_v61  ;;  %v3818_v47 = vor.u32 1.1754944e-38, %v3817_v6  ;;  %v3832_v23 = vand.u32 2147483648, %v10316_v28  ;;  %v3853_v50 = vsub.f32 1.0, %v3852_v39  ;;  %vm10548_vm6 = vmor %vm3826_vm4, %vm3827_vm7 }
 0x657   :  { %v3867_v56 = vmul.f32 %v10424_v54, %v10346_v9  ;;  %v3814_v3 = vsel %vm10530_vm10, %v10387_v60, %v3810_v16  ;;  %vm10540_vm15 = vcmp.eq.f32.partialorder %v3830_v27, 8.507059e+37  ;;  %vm3841_vm14 = vweird.f32 %v10322_v26 }
 0x658   :  { %v3845_v22 = vand.u32 2147483647, %v10322_v26  ;;  %vm3842_vm9 = vweird.f32 %v10400_v32  ;;  %v3847_v20 = vand.u32 2147483648, %v10322_v26  ;;  %v3862_v60 = vand.u32 2147483648, %v10341_v42 }
 0x659   :  { %v3868_v2 = vsub.f32 1.0, %v3867_v56  ;;  %v3829_v37 = vsel %vm10548_vm6, %v10395_v35, %v3825_v40  ;;  %v3840_v13 = vadd.f32 %v10400_v32, %v3839_v19  ;;  %v3860_v6 = vand.u32 2147483647, %v10341_v42  ;;  %vm10582_vm1 = vmor %vm3841_vm14, %vm3842_vm9 }
 0x65a   :  { %v3882_v28 = vmul.f32 %v10451_v11, %v10364_v46  ;;  %v10564_v63 = vsel %vm10522_vm11, %v3818_v47, %v3814_v3  ;;  %v3833_v61 = vor.u32 1.1754944e-38, %v3832_v23  ;;  %v3854_v16 = vmul.f32 %v10416_v29, %v3853_v50 }
 0x65b   :  { %vm3856_vm13 = vweird.f32 %v10341_v42  ;;  %vm10568_vm12 = vcmp.eq.f32.partialorder %v3845_v22, 8.507059e+37  ;;  %vm3857_vm8 = vweird.f32 %v10416_v29  ;;  %v3869_v35 = vmul.f32 %v10424_v54, %v3868_v2 }
 0x65c   :  { %v3883_v39 = vsub.f32 1.0, %v3882_v28  ;;  %v10576_v40 = vsel %vm10540_vm15, %v3833_v61, %v3829_v37  ;;  %v3848_v19 = vor.u32 1.1754944e-38, %v3847_v20  ;;  %v3863_v15 = vor.u32 1.1754944e-38, %v3862_v60  ;;  %vm10625_vm4 = vmor %vm3856_vm13, %vm3857_vm8 }
 0x65d   :  { %vm3871_vm3 = vweird.f32 %v10346_v9  ;;  %v3844_v47 = vsel %vm10582_vm1, %v10400_v32, %v3840_v13  ;;  %vm10590_vm5 = vcmp.eq.f32.partialorder %v3860_v6, 8.507059e+37  ;;  %v3903_v26 = vrot.slane %v10210_v21, 7 }
 0x65e   :  { %v3884_v50 = vmul.f32 %v10451_v11, %v3883_v39  ;;  %v12334_v56 = vrot.slane %v10210_v21, 5  ;;  %v3855_v34 = vadd.f32 %v10416_v29, %v3854_v16  ;;  %vm3872_vm2 = vweird.f32 %v10424_v54 }
 0x65f   :  { %v3875_v22 = vand.u32 2147483647, %v10346_v9  ;;  %v12335_v32 = vrot.slane %v10210_v21, 6  ;;  %v3870_v20 = vadd.f32 %v10424_v54, %v3869_v35  ;;  %v3877_v60 = vand.u32 2147483648, %v10346_v9  ;;  %vm10639_vm11 = vmor %vm3871_vm3, %vm3872_vm2 }
 0x660   :  { %v3916_v3 = vmul.f32 %v12334_v56, %v10367_v12  ;;  %v3904_v2 = vrot.slane %v10210_v21, 1  ;;  %v3918_v37 = vmul.f32 %v3903_v26, %v10439_v8  ;;  %v3919_v12 = vmul.f32 %v10210_v21, %v10484_v43 }
 0x661   :  { %v3917_v31 = vmul.f32 %v12335_v32, %v10407_v41  ;;  %v3921_v13 = vadd.f32 %v10329_v25, %v12000_v44  ;;  %v3922_v6 = vadd.f32 %v10355_v4, %v12001_v53  ;;  %v3923_v41 = vadd.f32 %v10357_v58, %v12002_v24 }
 0x662   :  { %v3885_v28 = vadd.f32 %v10451_v11, %v3884_v50  ;;  %vm3887_vm0 = vweird.f32 %v10451_v11  ;;  %v3920_v61 = vmul.f32 %v3904_v2, %v10500_v5  ;;  %v3924_v8 = vadd.f32 %v3916_v3, %v12003_v18 }
 0x663   :  { %vm3886_vm7 = vweird.f32 %v10364_v46  ;;  %v3892_v25 = vand.u32 2147483648, %v10364_v46  ;;  %v3925_v4 = vadd.f32 %v3917_v31, %v12006_v14  ;;  %5422 = vtanh.f32 %v3921_v13 }
 0x664   :  { %v3859_v58 = vsel %vm10625_vm4, %v10416_v29, %v3855_v34  ;;  %v3890_v43 = vand.u32 2147483647, %v10364_v46  ;;  %v3926_v5 = vadd.f32 %v3918_v37, %v12009_v1  ;;  %5424 = vtanh.f32 %v3922_v6  ;;  %vm10652_vm10 = vmor %vm3886_vm7, %vm3887_vm0 }
 0x665   :  { %v3849_v16 = vsel %vm10568_vm12, %v3848_v19, %v3844_v47  ;;  %v3874_v29 = vsel %vm10639_vm11, %v10424_v54, %v3870_v20  ;;  %v3927_v35 = vadd.f32 %v3919_v12, %v12012_v62  ;;  %5426 = vtanh.f32 %v3923_v41 }
 0x666   :  { %v3878_v46 = vor.u32 1.1754944e-38, %v3877_v60  ;;  %v3889_v39 = vsel %vm10652_vm10, %v10451_v11, %v3885_v28  ;;  %v3928_v27 = vadd.f32 %v3920_v61, %v12013_v7  ;;  %5428 = vtanh.f32 %v3924_v8 }
 0x667   :  { %v3864_v54 = vsel %vm10590_vm5, %v3863_v15, %v3859_v58  ;;  %vm3876_vm15 = vcmp.eq.f32.partialorder %v3875_v22, 8.507059e+37  ;;  %v3893_v45 = vor.u32 1.1754944e-38, %v3892_v25  ;;  %5430 = vtanh.f32 %v3925_v4 }
 0x668   :  { %v3879_v19 = vsel %vm3876_vm15, %v3878_v46, %v3874_v29  ;;  %vm3891_vm14 = vcmp.eq.f32.partialorder %v3890_v43, 8.507059e+37  ;;  %5432 = vtanh.f32 %v3926_v5  ;;  %v3937_v47 = vsub.f32 1.0, %v10516_v30 }
 0x669   :  { %v5423_v50 = vpop.eup %5422  ;;  %v3894_v26 = vsel %vm3891_vm14, %v3893_v45, %v3889_v39  ;;  %5434 = vtanh.f32 %v3927_v35  ;;  %v3938_v56 = vsub.f32 1.0, %v10520_v57  ;;  %v3939_v11 = vsub.f32 1.0, %v10564_v63 }
 0x66a   :  { %v5425_v3 = vpop.eup %5424  ;;  %5436 = vtanh.f32 %v3928_v27  ;;  %v3940_v23 = vsub.f32 1.0, %v10576_v40  ;;  %v3945_v15 = vmul.f32 %v5423_v50, %v3937_v47  ;;  %v12342_v34 = vrot.slane %v10110_v33, 7 }
 0x66b   :  { %v5427_v32 = vpop.eup %5426  ;;  %v3941_v31 = vsub.f32 1.0, %v3849_v16  ;;  %v3942_v20 = vsub.f32 1.0, %v3864_v54  ;;  %v3946_v60 = vmul.f32 %v5425_v3, %v3938_v56  ;;  %v12343_v2 = vrot.slane %v10115_v55, 7 }
 0x66c   :  { %v3968_v22 = vmul.f32 %v12342_v34, %v10516_v30  ;;  %v5429_v12 = vpop.eup %5428  ;;  %v3943_v13 = vsub.f32 1.0, %v3879_v19  ;;  %v3947_v6 = vmul.f32 %v5427_v32, %v3939_v11  ;;  %v12344_v41 = vrot.slane %v10119_v52, 7 }
 0x66d   :  { %v3969_v37 = vmul.f32 %v12343_v2, %v10520_v57  ;;  %v5431_v8 = vpop.eup %5430  ;;  %v3944_v21 = vsub.f32 1.0, %v3894_v26  ;;  %v3948_v30 = vmul.f32 %v5429_v12, %v3940_v23  ;;  %v12345_v25 = vrot.slane %v10124_v59, 7 }
 0x66e   :  { %v3970_v28 = vmul.f32 %v12344_v41, %v10564_v63  ;;  %v10676_v61 = vadd.f32 %v3968_v22, %v3945_v15  ;;  %v5433_v42 = vpop.eup %5432  ;;  %v3949_v57 = vmul.f32 %v5431_v8, %v3941_v31  ;;  %v12346_v43 = vrot.slane %v10129_v0, 7  ;;  %v12360_v41 = vld [vmem:[#allocation96_spill] sm:$0xff] }
 0x66f   :  { %v3971_v4 = vmul.f32 %v12345_v25, %v10576_v40  ;;  %v10681_v58 = vadd.f32 %v3969_v37, %v3946_v60  ;;  %v5435_v9 = vpop.eup %5434  ;;  %v3950_v35 = vmul.f32 %v5433_v42, %v3942_v20  ;;  %v12347_v46 = vrot.slane %v10140_v17, 7  ;;  %v12365_v42 = vld [vmem:[#allocation46_spill] sm:$0xff] }
 0x670   :  { %v3972_v5 = vmul.f32 %v12346_v43, %v3849_v16  ;;  %v10685_v29 = vadd.f32 %v3970_v28, %v3947_v6  ;;  %v3992_v63 = vrot.slane %v10676_v61, 6  ;;  %v5437_v45 = vpop.eup %5436  ;;  %v3951_v47 = vmul.f32 %v5435_v9, %v3943_v13  ;;  %v12361_v28 = vld [vmem:[#allocation44_spill] sm:$0xff]  ;;  %v12367_v9 = vld [vmem:[#allocation99_spill] sm:$0xff] }
 0x671   :  { %v3973_v39 = vmul.f32 %v12347_v46, %v3864_v54  ;;  %v10690_v27 = vadd.f32 %v3971_v4, %v3948_v30  ;;  %v3993_v40 = vrot.slane %v10681_v58, 5  ;;  %v12348_v50 = vrot.slane %v10142_v49, 7  ;;  %v12363_v30 = vld [vmem:[#allocation45_spill] sm:$0xff]  ;;  %v12364_v4 = vld [vmem:[#allocation98_spill] sm:$0xff] }
 0x672   :  { %v10695_v11 = vadd.f32 %v3972_v5, %v3949_v57  ;;  %v3995_v16 = vrot.slane %v10685_v29, 4  ;;  %v3952_v3 = vmul.f32 %v5437_v45, %v3944_v21  ;;  %vm12350_vm6 = vcmask 1041409   ;;  %v12362_v21 = vld [vmem:[#allocation97_spill] sm:$0xff]  ;;  %v12366_v5 = vld [vmem:[#allocation52_spill] sm:$0xff] }
 0x673   :  { %v3975_v56 = vmul.f32 %v12348_v50, %v3894_v26  ;;  %v10698_v23 = vadd.f32 %v3973_v39, %v3950_v35  ;;  %v3994_v15 = vsel %vm12350_vm6, %v3993_v40, %v3992_v63  ;;  %v3997_v54 = vrot.slane %v10690_v27, 3  ;;  %v12368_v35 = vld [vmem:[#allocation47_spill] sm:$0xff]  ;;  %v12369_v39 = vld [vmem:[#allocation100_spill] sm:$0xff]  ;;  %v12372_v50 = vld [vmem:[#allocation49_spill] sm:$0xff] }
 0x674   :  { %v12351_v34 = vrot.slane %v10136_v51, 7  ;;  %vm12352_vm9 = vcmask 1042434   ;;  %v3999_v31 = vrot.slane %v10695_v11, 2  ;;  %vm12354_vm13 = vcmask 1043459   ;;  %v12370_v40 = vld [vmem:[#allocation48_spill] sm:$0xff] }
 0x675   :  { %12349 = vst [vmem:[#allocation72_spill] sm:$0xff] %v10698_v23  ;;  %v3996_v32 = vsel %vm12352_vm9, %v3995_v16, %v3994_v15  ;;  %v10706_v20 = vadd.f32 %v3975_v56, %v3952_v3  ;;  %v4001_v60 = vrot.slane %v10698_v23, 1  ;;  %vm12356_vm12 = vcmask 1044484  }
 0x676   :  { %v3974_v22 = vmul.f32 %v3879_v19, %v12351_v34  ;;  %v3998_v26 = vsel %vm12354_vm13, %v3997_v54, %v3996_v32  ;;  %vm12357_vm8 = vcmask 1045509   ;;  %vm12358_vm1 = vcmask 1046534  }
 0x677   :  { %12353 = vst [vmem:[#allocation73_spill] sm:$0xff] %v10706_v20  ;;  %v4000_v37 = vsel %vm12356_vm12, %v3999_v31, %v3998_v26  ;;  %v11515_v13 = vrot.slane %v10706_v20, 7  ;;  %vm12359_vm3 = vcmask 1047559   ;;  %vm11532_vm5 = vcmask 1040384   ;;  %v12373_v31 = vld [vmem:[#allocation55_spill] sm:$0xff] }
 0x678   :  { %v10710_v2 = vadd.f32 %v3974_v22, %v3951_v47  ;;  %v4002_v12 = vsel %vm12357_vm8, %v4001_v60, %v4000_v37  ;;  %v4533_v8 = vsel %vm11532_vm5, %v12361_v28, %v12360_v41  ;;  %vm11531_vm2 = vcmask 1041408   ;;  %v12371_v47 = vld [vmem:[#allocation101_spill] sm:$0xff]  ;;  %v12375_v28 = vld [vmem:[#allocation40_spill] sm:$0xff] }
 0x679   :  { %v4534_v25 = vsel %vm11532_vm5, %v12363_v30, %v12362_v21  ;;  %v4535_v57 = vsel %vm11532_vm5, %v12365_v42, %v12364_v4  ;;  %v4542_v63 = vsel %vm11531_vm2, %v4533_v8, %v12366_v5  ;;  %v4536_v46 = vsel %vm11532_vm5, %v12368_v35, %v12367_v9  ;;  %v12376_v21 = vld [vmem:[#allocation53_spill] sm:$0xff]  ;;  %v12378_v9 = vld [vmem:[#allocation43_spill] sm:$0xff] }
 0x67a   :  { %12355 = vst [vmem:[#allocation74_spill] sm:$0xff] %v10710_v2  ;;  %v4003_v19 = vsel %vm12358_vm1, %v10710_v2, %v4002_v12  ;;  %v4537_v45 = vsel %vm11532_vm5, %v12370_v40, %v12369_v39  ;;  %v4538_v56 = vsel %vm11532_vm5, %v12372_v50, %v12371_v47  ;;  %v4544_v26 = vsel %vm11531_vm2, %v4535_v57, %v12373_v31  ;;  %v12377_v57 = vld [vmem:[#allocation54_spill] sm:$0xff]  ;;  %v12380_v40 = vld [vmem:[#allocation57_spill] sm:$0xff] }
 0x67b   :  { %v4005_v6 = vsel %vm12359_vm3, %v11515_v13, %v4003_v19  ;;  %vm11530_vm0 = vcmask 1042432   ;;  %v4543_v30 = vsel %vm11531_vm2, %v4534_v25, %v12376_v21  ;;  %v4547_v47 = vsel %vm11531_vm2, %v4538_v56, %v12380_v40  ;;  %v12381_v50 = vld [vmem:[#allocation41_spill] sm:$0xff]  ;;  %v4615_v21 = vld [vmem:[#allocation11 + $0x60] sm:$0xff] }
 0x67c   :  { %4023 = vmatmul.f32.vlgmr.msrb.gmra.mxu3 %v4005_v6  ;;  %4043 = vmatmul.f32.vlgmr.msra.gmra.mxu0 %v4005_v6  ;;  %v12384_v31 = vld [vmem:[#allocation21_spill] sm:$0xff]  ;;  %vm11529_vm4 = vcmask 1043456   ;;  %vm4568_vm7 = vcmask 1044480   ;;  %vm4577_vm14 = vcmask 1045504  }
 0x67d   :  { %4063 = vmatmul.f32.vlgmr.msra.gmra.mxu1 %v4005_v6  ;;  %v12374_v6 = vld [vmem:[#allocation36_spill] sm:$0xff] }
 0x6f9   :  { %v4044_v43 = vpop.f32.mrf.mxu0 }
 0x6fa   :  { %v4244_v16 = vrot.slane %v4044_v43, 1  ;;  %v4245_v3 = vrot.slane %v4044_v43, 2  ;;  %v4246_v15 = vrot.slane %v4044_v43, 3  ;;  %v4247_v54 = vrot.slane %v4044_v43, 4 }
 0x6fb   :  { %v4248_v34 = vrot.slane %v4044_v43, 5  ;;  %v4249_v22 = vrot.slane %v4044_v43, 6  ;;  %v4250_v32 = vrot.slane %v4044_v43, 7 }
 0x6fc   :  { %v4259_v60 = vadd.f32 %v4244_v16, %v12277_v48  ;;  %v4260_v37 = vadd.f32 %v4245_v3, %v12278_v38  ;;  %v4261_v12 = vadd.f32 %v4246_v15, %v12279_v10  ;;  %v4262_v19 = vadd.f32 %v4247_v54, %v12280_v36  ;;  %v12379_v36 = vld [vmem:[#allocation56_spill] sm:$0xff]  ;;  %v4618_v15 = vld [vmem:[#allocation11 + $0x78] sm:$0xff]  ;;  %v4617_v54 = vld [vmem:[#allocation11 + $0x70] sm:$0xff] }
 0x6fd   :  { %v4263_v41 = vadd.f32 %v4248_v34, %v12374_v6  ;;  %v4264_v8 = vadd.f32 %v4249_v22, %v12375_v28  ;;  %v4545_v48 = vsel %vm11531_vm2, %v4536_v46, %v12377_v57  ;;  %v4266_v38 = vadd.f32 %v4044_v43, %v12378_v9  ;;  %4623 = vmatpush.msra.mxu2 %v4618_v15  ;;  %v12382_v43 = vld [vmem:[#allocation117_spill] sm:$0xff]  ;;  %v12383_v22 = vld [vmem:[#allocation42_spill] sm:$0xff]  ;;  %v12393_v15 = vld [vmem:[#allocation63_spill] sm:$0xff] }
 0x6fe   :  { %v4855_v4 = vmul.f32 -1.442695, %v4259_v60  ;;  %v4856_v42 = vmul.f32 -1.442695, %v4260_v37  ;;  %v4857_v5 = vmul.f32 -1.442695, %v4261_v12  ;;  %v4546_v39 = vsel %vm11531_vm2, %v4537_v45, %v12379_v36 }
 0x6ff   :  { %v4858_v35 = vmul.f32 -1.442695, %v4262_v19  ;;  %v10753_v10 = vpop.f32.mrf.mxu3  ;;  %v4265_v16 = vadd.f32 %v4250_v32, %v12381_v50  ;;  %v4859_v25 = vmul.f32 -1.442695, %v4263_v41  ;;  %v4860_v46 = vmul.f32 -1.442695, %v4264_v8  ;;  %4624 = vmatpush.msra.mxu2 %v4617_v54 }
 0x700   :  { %5438 = vpow2.f32 %v4855_v4  ;;  %v4068_v3 = vrot.slane %v10753_v10, 1  ;;  %v4551_v34 = vsel %vm11530_vm0, %v4542_v63, %v12382_v43  ;;  %v4554_v45 = vsel %vm11530_vm0, %v4545_v48, %v12383_v22  ;;  %v4616_v60 = vld [vmem:[#allocation11 + $0x68] sm:$0xff]  ;;  %v12385_v32 = vld [vmem:[#allocation35_spill] sm:$0xff]  ;;  %v12388_v4 = vld [vmem:[#allocation28_spill] sm:$0xff] }
 0x701   :  { %5440 = vpow2.f32 %v4856_v42  ;;  %v4552_v37 = vsel %vm11530_vm0, %v4543_v30, %v12385_v32  ;;  %v4862_v12 = vmul.f32 -1.442695, %v4266_v38  ;;  %v12386_v19 = vld [vmem:[#allocation37_spill] sm:$0xff]  ;;  %v12387_v41 = vld [vmem:[#allocation39_spill] sm:$0xff]  ;;  %v4861_v28 = vmul.f32 -1.442695, %v4265_v16  ;;  %4625 = vmatpush.msra.mxu2 %v4616_v60 }
 0x702   :  { %5442 = vpow2.f32 %v4857_v5  ;;  %v4083_v56 = vadd.f32 %v4068_v3, %v12384_v31  ;;  %v4553_v6 = vsel %vm11530_vm0, %v4544_v26, %v12386_v19  ;;  %v4555_v63 = vsel %vm11530_vm0, %v4546_v39, %v12387_v41  ;;  %v12389_v5 = vld [vmem:[#allocation60_spill] sm:$0xff]  ;;  %v12390_v48 = vld [vmem:[#allocation65_spill] sm:$0xff]  ;;  %v4614_v36 = vld [vmem:[#allocation11 + $0x58] sm:$0xff] }
 0x703   :  { %5444 = vpow2.f32 %v4858_v35  ;;  %v4069_v8 = vrot.slane %v10753_v10, 2  ;;  %v4556_v42 = vsel %vm11530_vm0, %v4547_v47, %v12388_v4  ;;  %v4070_v30 = vrot.slane %v10753_v10, 3  ;;  %v12391_v39 = vld [vmem:[#allocation61_spill] sm:$0xff]  ;;  %v12392_v47 = vld [vmem:[#allocation62_spill] sm:$0xff]  ;;  %4626 = vmatpush.msra.mxu2 %v4615_v21  ;;  %v12396_v41 = vld [vmem:[#allocation24_spill] sm:$0xff] }
 0x704   :  { %5446 = vpow2.f32 %v4859_v25  ;;  %v4560_v57 = vsel %vm11529_vm4, %v4551_v34, %v12389_v5  ;;  %v10780_v26 = vsel %vm11529_vm4, %v4555_v63, %v12390_v48  ;;  %v4071_v38 = vrot.slane %v10753_v10, 4  ;;  %v12394_v22 = vld [vmem:[#allocation22_spill] sm:$0xff]  ;;  %v12397_v21 = vld [vmem:[#allocation64_spill] sm:$0xff] }
 0x705   :  { %5448 = vpow2.f32 %v4860_v46  ;;  %v4847_v35 = vmul.f32 -1.442695, %v4083_v56  ;;  %v4561_v40 = vsel %vm11529_vm4, %v4552_v37, %v12391_v39  ;;  %v4562_v50 = vsel %vm11529_vm4, %v4553_v6, %v12392_v47  ;;  %v4613_v56 = vld [vmem:[#allocation11 + $0x50] sm:$0xff]  ;;  %4627 = vmatpush.msra.mxu2 %v4614_v36  ;;  %v12399_v48 = vld [vmem:[#allocation20_spill] sm:$0xff] }
 0x706   :  { %v5439_v9 = vpop.eup %5438  ;;  %5450 = vpow2.f32 %v4862_v12  ;;  %v4072_v3 = vrot.slane %v10753_v10, 5  ;;  %v4563_v54 = vsel %vm11529_vm4, %v4554_v45, %v12393_v15  ;;  %v4073_v34 = vrot.slane %v10753_v10, 6  ;;  %v12395_v12 = vld [vmem:[#allocation23_spill] sm:$0xff]  ;;  %v4611_v39 = vld [vmem:[#allocation11 + $0x40] sm:$0xff] }
 0x707   :  { %v5441_v16 = vpop.eup %5440  ;;  %v10787_v25 = vadd.f32 1.0, %v5439_v9  ;;  %5452 = vpow2.f32 %v4861_v28  ;;  %v4084_v31 = vadd.f32 %v4069_v8, %v12394_v22  ;;  %v4074_v37 = vrot.slane %v10753_v10, 7  ;;  %v4612_v28 = vld [vmem:[#allocation11 + $0x48] sm:$0xff]  ;;  %4628 = vmatpush.msra.mxu2 %v4613_v56  ;;  %v12402_v56 = vld [vmem:[#allocation38_spill] sm:$0xff] }
 0x708   :  { %v5443_v46 = vpop.eup %5442  ;;  %v10792_v43 = vadd.f32 1.0, %v5441_v16  ;;  %v4085_v19 = vadd.f32 %v4070_v30, %v12395_v12  ;;  %v4086_v63 = vadd.f32 %v4071_v38, %v12396_v41  ;;  %v10806_v8 = vsel %vm11529_vm4, %v4556_v42, %v12397_v21  ;;  %v12400_v38 = vld [vmem:[#allocation25_spill] sm:$0xff]  ;;  %v4064_v42 = vpop.f32.mrf.mxu1  ;;  %v12401_v16 = vld [vmem:[#allocation26_spill] sm:$0xff] }
 0x709   :  { %v5445_v60 = vpop.eup %5444  ;;  %v10796_v32 = vadd.f32 1.0, %v5443_v46  ;;  %5454 = vrcp.f32 %v10787_v25  ;;  %12398 = vst [vmem:[#allocation75_spill] sm:$0xff] %v10806_v8  ;;  %v4087_v9 = vadd.f32 %v4072_v3, %v12399_v48  ;;  %v4848_v36 = vmul.f32 -1.442695, %v4084_v31  ;;  %4629 = vmatpush.msra.mxu2 %v4612_v28  ;;  %v4610_v31 = vld [vmem:[#allocation11 + $0x38] sm:$0xff]  ;;  %v4609_v41 = vld [vmem:[#allocation11 + $0x30] sm:$0xff] }
 0x70a   :  { %v5447_v45 = vpop.eup %5446  ;;  %v10801_v6 = vadd.f32 1.0, %v5445_v60  ;;  %5456 = vpow2.f32 %v4847_v35  ;;  %v4088_v35 = vadd.f32 %v4073_v34, %v12400_v38  ;;  %v4089_v15 = vadd.f32 %v4074_v37, %v12401_v16  ;;  %v4608_v48 = vld [vmem:[#allocation11 + $0x28] sm:$0xff] }
 0x70b   :  { %v5449_v4 = vpop.eup %5448  ;;  %v10808_v5 = vadd.f32 1.0, %v5447_v45  ;;  %5458 = vrcp.f32 %v10792_v43  ;;  %v4849_v46 = vmul.f32 -1.442695, %v4085_v19  ;;  %v4569_v3 = vsel %vm4568_vm7, %v4560_v57, %v10110_v33  ;;  %4630 = vmatpush.msra.mxu2 %v4611_v39  ;;  %v5634_v19 = vld [vmem:[%s11296_s5] ss:$0 sm:$0xff]  ;;  %s5822_s5 = smov [#allocation13]  }
 0x70c   :  { %v10812_v30 = vadd.f32 1.0, %v5449_v4  ;;  %5460 = vrcp.f32 %v10796_v32  ;;  %v5451_v47 = vpop.eup %5450  ;;  %v4090_v60 = vadd.f32 %v10753_v10, %v12402_v56  ;;  %v4850_v34 = vmul.f32 -1.442695, %v4086_v63  ;;  %s4689_s22 = sshll.u32 %s5822_s5, 4  ;;  %s4690_s22 = int_to_ptr.vmem [resolvable:$true] %s4689_s22 }
 0x70d   :  { %5462 = vrcp.f32 %v10801_v6  ;;  %v5453_v22 = vpop.eup %5452  ;;  %v4570_v12 = vsel %vm4568_vm7, %v4561_v40, %v10115_v55  ;;  %v4851_v37 = vmul.f32 -1.442695, %v4087_v9  ;;  %v10830_v33 = vsel %vm4568_vm7, %v4562_v50, %v10119_v52  ;;  %4631 = vmatpush.msra.mxu2 %v4610_v31 }
 0x70e   :  { %5464 = vrcp.f32 %v10808_v5  ;;  %v10834_v57 = vsel %vm4568_vm7, %v4563_v54, %v10124_v59  ;;  %v10839_v55 = vadd.f32 %v5634_v19, %v4064_v42  ;;  %v4852_v40 = vmul.f32 -1.442695, %v4088_v35 }
 0x70f   :  { %v10825_v45 = vpop.eup %5454  ;;  %5466 = vrcp.f32 %v10812_v30  ;;  %v4308_v63 = vand.u32 2147483647, %v10787_v25  ;;  %v4853_v52 = vmul.f32 -1.442695, %v4089_v15  ;;  %v4476_v50 = vrot.slane %v10676_v61, 7  ;;  %4632 = vmatpush.msra.mxu2 %v4609_v41 }
 0x710   :  { %v5457_v10 = vpop.eup %5456  ;;  %5468 = vpow2.f32 %v4848_v36  ;;  %v4300_v59 = vmul.f32 %v10825_v45, %v10787_v25  ;;  %v10849_v21 = vadd.f32 1.0, %v5451_v47  ;;  %v4854_v4 = vmul.f32 -1.442695, %v4090_v60  ;;  %v4607_v47 = vld [vmem:[#allocation11 + $0x20] sm:$0xff] }
 0x711   :  { %v10842_v28 = vpop.eup %5458  ;;  %5470 = vpow2.f32 %v4849_v46  ;;  %v4310_v9 = vand.u32 2147483648, %v10787_v25  ;;  %v10854_v35 = vadd.f32 1.0, %v5457_v10  ;;  %vm4304_vm11 = vweird.f32 %v10787_v25  ;;  %4633 = vmatpush.msra.mxu2 %v4608_v48 }
 0x712   :  { %v10847_v54 = vpop.eup %5460  ;;  %5472 = vpow2.f32 %v4850_v34  ;;  %v4301_v36 = vsub.f32 1.0, %v4300_v59  ;;  %v10859_v42 = vadd.f32 1.0, %v5453_v22  ;;  %vm10861_vm10 = vcmp.eq.f32.partialorder %v4308_v63, 8.507059e+37  ;;  %v4606_v22 = vld [vmem:[#allocation11 + $0x18] sm:$0xff] }
 0x713   :  { %v10852_v38 = vpop.eup %5462  ;;  %5474 = vpow2.f32 %v4851_v37  ;;  %vm4305_vm15 = vweird.f32 %v10825_v45  ;;  %v4311_v34 = vor.u32 1.1754944e-38, %v4310_v9  ;;  %v10872_v31 = vsel %vm4577_vm14, %v4569_v3, %v10676_v61  ;;  %4634 = vmatpush.msra.mxu2 %v4607_v47  ;;  %v4605_v3 = vld [vmem:[#allocation11 + $0x10] sm:$0xff] }
 0x714   :  { %v10857_v39 = vpop.eup %5464  ;;  %12403 = vst [vmem:[#allocation76_spill] sm:$0xff] %v10859_v42  ;;  %5476 = vpow2.f32 %v4852_v40  ;;  %v4302_v56 = vmul.f32 %v10825_v45, %v4301_v36  ;;  %v10881_v41 = vsel %vm4577_vm14, %v4570_v12, %v10681_v58  ;;  %v4134_v59 = vand.u32 2147483648, %v10854_v35  ;;  %vm10891_vm6 = vmor %vm4304_vm11, %vm4305_vm15 }
 0x715   :  { %v10866_v46 = vpop.eup %5466  ;;  %5478 = vpow2.f32 %v4853_v52  ;;  %4635 = vmatpush.msra.mxu2 %v4606_v22  ;;  %v4315_v47 = vmul.f32 %v10842_v28, %v10792_v43  ;;  %vm4128_vm9 = vweird.f32 %v10854_v35  ;;  %vm4319_vm13 = vweird.f32 %v10792_v43 }
 0x716   :  { %v5469_v60 = vpop.eup %5468  ;;  %5480 = vpow2.f32 %v4854_v4  ;;  %v4303_v40 = vadd.f32 %v10825_v45, %v4302_v56  ;;  %v10923_v4 = vsel %vm4577_vm14, %v10834_v57, %v10690_v27  ;;  %vm4320_vm12 = vweird.f32 %v10842_v28 }
 0x717   :  { %v5471_v10 = vpop.eup %5470  ;;  %v10875_v19 = vadd.f32 1.0, %v5469_v60  ;;  %5482 = vrcp.f32 %v10854_v35  ;;  %v4604_v60 = vld [vmem:[#allocation11 + $0x8] sm:$0xff]  ;;  %4636 = vmatpush.msra.mxu2 %v4605_v3  ;;  %v4422_v62 = vrot.slane %v10839_v55, 2 }
 0x718   :  { %v5473_v63 = vpop.eup %5472  ;;  %5484 = vrcp.f32 %v10859_v42  ;;  %v10884_v52 = vadd.f32 1.0, %v5471_v10  ;;  %v4307_v36 = vsel %vm10891_vm6, %v10825_v45, %v4303_v40  ;;  %v4132_v10 = vand.u32 2147483647, %v10854_v35  ;;  %vm10979_vm6 = vmor %vm4319_vm13, %vm4320_vm12 }
 0x719   :  { %v5475_v12 = vpop.eup %5474  ;;  %v10896_v9 = vadd.f32 1.0, %v5473_v63  ;;  %5486 = vrcp.f32 %v10875_v19  ;;  %v10911_v63 = vsel %vm4577_vm14, %v10830_v33, %v10685_v29  ;;  %v10917_v45 = vsel %vm10861_vm10, %v4311_v34, %v4307_v36  ;;  %v4603_v33 = vld [vmem:[#allocation11] sm:$0xff]  ;;  %4637 = vmatpush.msra.mxu2 %v4604_v60 }
 0x71a   :  { %v5477_v25 = vpop.eup %5476  ;;  %v10904_v56 = vadd.f32 1.0, %v5475_v12  ;;  %5488 = vrcp.f32 %v10884_v52  ;;  %v4147_v3 = vand.u32 2147483647, %v10875_v19  ;;  %v4149_v34 = vand.u32 2147483648, %v10875_v19 }
 0x71b   :  { %v5479_v22 = vpop.eup %5478  ;;  %v10913_v13 = vadd.f32 1.0, %v5477_v25  ;;  %v4135_v25 = vor.u32 1.1754944e-38, %v4134_v59  ;;  %5490 = vrcp.f32 %v10896_v9  ;;  %v4316_v36 = vsub.f32 1.0, %v4315_v47  ;;  %4638 = vmatpush.msra.mxu2 %v4603_v33 }
 0x71c   :  { %v5481_v12 = vpop.eup %5480  ;;  %v10925_v48 = vadd.f32 1.0, %v5479_v22  ;;  %5492 = vrcp.f32 %v10904_v56  ;;  %vm10937_vm8 = vcmp.eq.f32.partialorder %v4132_v10, 8.507059e+37  ;;  %vm4143_vm1 = vweird.f32 %v10875_v19 }
 0x71d   :  { %v5483_v16 = vpop.eup %5482  ;;  %v4323_v60 = vand.u32 2147483647, %v10792_v43  ;;  %v10944_v47 = vadd.f32 1.0, %v5481_v12  ;;  %5494 = vrcp.f32 %v10913_v13  ;;  %v10950_v15 = vmul.f32 %v4476_v50, %v10917_v45 }
 0x71e   :  { %12408 = vst [vmem:[#allocation77_spill] sm:$0xff] %v10925_v48  ;;  %v10933_v57 = vpop.eup %5484  ;;  %v4124_v22 = vmul.f32 %v5483_v16, %v10854_v35  ;;  %v4317_v10 = vmul.f32 %v10842_v28, %v4316_v36  ;;  %5496 = vrcp.f32 %v10925_v48  ;;  %vm10955_vm3 = vcmp.eq.f32.partialorder %v4147_v3, 8.507059e+37 }
 0x71f   :  { %12409 = vst [vmem:[#allocation78_spill] sm:$0xff] %v10933_v57  ;;  %v5487_v37 = vpop.eup %5486  ;;  %v4325_v12 = vand.u32 2147483648, %v10792_v43  ;;  %vm4129_vm11 = vweird.f32 %v5483_v16  ;;  %v4150_v33 = vor.u32 1.1754944e-38, %v4149_v34  ;;  %vm10962_vm15 = vcmp.eq.f32.partialorder %v4323_v60, 8.507059e+37 }
 0x720   :  { %v5489_v49 = vpop.eup %5488  ;;  %v4125_v40 = vsub.f32 1.0, %v4124_v22  ;;  %v4139_v20 = vmul.f32 %v5487_v37, %v10875_v19  ;;  %v4318_v61 = vadd.f32 %v10842_v28, %v4317_v10  ;;  %vm4144_vm10 = vweird.f32 %v5487_v37  ;;  %vm4130_vm0 = vmor %vm4128_vm9, %vm4129_vm11 }
 0x721   :  { %v4154_v50 = vmul.f32 %v5489_v49, %v10884_v52  ;;  %v4162_v3 = vand.u32 2147483647, %v10884_v52  ;;  %v10967_v22 = vpop.eup %5490  ;;  %v4164_v34 = vand.u32 2147483648, %v10884_v52  ;;  %v4330_v10 = vmul.f32 %v10847_v54, %v10796_v32  ;;  %vm4145_vm9 = vmor %vm4143_vm1, %vm4144_vm10 }
 0x722   :  { %v4126_v2 = vmul.f32 %v5483_v16, %v4125_v40  ;;  %v4140_v36 = vsub.f32 1.0, %v4139_v20  ;;  %v10973_v42 = vpop.eup %5492  ;;  %v4326_v23 = vor.u32 1.1754944e-38, %v4325_v12  ;;  %vm4158_vm4 = vweird.f32 %v10884_v52 }
 0x723   :  { %v4155_v57 = vsub.f32 1.0, %v4154_v50  ;;  %v10984_v50 = vpop.eup %5494  ;;  %vm4159_vm2 = vweird.f32 %v5489_v49  ;;  %vm10992_vm5 = vcmp.eq.f32.partialorder %v4162_v3, 8.507059e+37  ;;  %v4165_v8 = vor.u32 1.1754944e-38, %v4164_v34 }
 0x724   :  { %v4127_v20 = vadd.f32 %v5483_v16, %v4126_v2  ;;  %v4141_v40 = vmul.f32 %v5487_v37, %v4140_v36  ;;  %v4322_v2 = vsel %vm10979_vm6, %v10842_v28, %v4318_v61  ;;  %v10996_v1 = vpop.eup %5496  ;;  %v4331_v17 = vsub.f32 1.0, %v4330_v10 }
 0x725   :  { %v4156_v36 = vmul.f32 %v5489_v49, %v4155_v57  ;;  %vm4335_vm13 = vweird.f32 %v10847_v54  ;;  %v4338_v57 = vand.u32 2147483647, %v10796_v32  ;;  %v12420_v61 = vrot.slane %v10839_v55, 1 }
 0x726   :  { %v4131_v12 = vsel %vm4130_vm0, %v5483_v16, %v4127_v20  ;;  %v4142_v48 = vadd.f32 %v5487_v37, %v4141_v40  ;;  %vm4160_vm0 = vmor %vm4158_vm4, %vm4159_vm2  ;;  %v4332_v16 = vmul.f32 %v10847_v54, %v4331_v17  ;;  %vm4334_vm12 = vweird.f32 %v10796_v32 }
 0x727   :  { %v4136_v35 = vsel %vm10937_vm8, %v4135_v25, %v4131_v12  ;;  %v4157_v28 = vadd.f32 %v5489_v49, %v4156_v36  ;;  %v4340_v25 = vand.u32 2147483648, %v10796_v32  ;;  %v4423_v34 = vrot.slane %v10839_v55, 3  ;;  %vm4336_vm2 = vmor %vm4334_vm12, %vm4335_vm13 }
 0x728   :  { %v4436_v3 = vmul.f32 %v12420_v61, %v4136_v35  ;;  %v4146_v60 = vsel %vm4145_vm9, %v5487_v37, %v4142_v48  ;;  %v4333_v52 = vadd.f32 %v10847_v54, %v4332_v16  ;;  %v4327_v17 = vsel %vm10962_vm15, %v4326_v23, %v4322_v2 }
 0x729   :  { %v4151_v19 = vsel %vm10955_vm3, %v4150_v33, %v4146_v60  ;;  %v4161_v59 = vsel %vm4160_vm0, %v5489_v49, %v4157_v28  ;;  %v4341_v51 = vor.u32 1.1754944e-38, %v4340_v25  ;;  %v4169_v32 = vmul.f32 %v10967_v22, %v10896_v9 }
 0x72a   :  { %v4444_v10 = vadd.f32 %v4436_v3, %v12000_v44  ;;  %v4437_v20 = vmul.f32 %v4422_v62, %v4151_v19  ;;  %v4166_v37 = vsel %vm10992_vm5, %v4165_v8, %v4161_v59  ;;  %v4337_v62 = vsel %vm4336_vm2, %v10847_v54, %v4333_v52 }
 0x72b   :  { %v4438_v49 = vmul.f32 %v4423_v34, %v4166_v37  ;;  %vm4339_vm4 = vcmp.eq.f32.partialorder %v4338_v57, 8.507059e+37  ;;  %v4170_v33 = vsub.f32 1.0, %v4169_v32  ;;  %v4177_v7 = vand.u32 2147483647, %v10896_v9 }
 0x72c   :  { %5498 = vtanh.f32 %v4444_v10  ;;  %v4445_v44 = vadd.f32 %v4437_v20, %v12001_v53  ;;  %v4342_v8 = vsel %vm4339_vm4, %v4341_v51, %v4337_v62  ;;  %vm4586_vm5 = vcmask 1046528  }
 0x72d   :  { %v4446_v48 = vadd.f32 %v4438_v49, %v12002_v24  ;;  %v4461_v23 = vsub.f32 1.0, %v4327_v17  ;;  %v12421_v40 = vrot.slane %v10681_v58, 7  ;;  %v4179_v36 = vand.u32 2147483648, %v10896_v9 }
 0x72e   :  { %5500 = vtanh.f32 %v4445_v44  ;;  %v4171_v53 = vmul.f32 %v10967_v22, %v4170_v33  ;;  %vm4174_vm8 = vweird.f32 %v10967_v22  ;;  %v4345_v54 = vmul.f32 %v10852_v38, %v10801_v6 }
 0x72f   :  { %v4492_v2 = vmul.f32 %v12421_v40, %v4327_v17  ;;  %5502 = vtanh.f32 %v4446_v48  ;;  %v4462_v24 = vsub.f32 1.0, %v4342_v8  ;;  %v12422_v43 = vrot.slane %v10685_v29, 7 }
 0x730   :  { %vm4173_vm1 = vweird.f32 %v10896_v9  ;;  %vm11039_vm3 = vcmp.eq.f32.partialorder %v4177_v7, 8.507059e+37  ;;  %v4172_v58 = vadd.f32 %v10967_v22, %v4171_v53  ;;  %v4180_v28 = vor.u32 1.1754944e-38, %v4179_v36 }
 0x731   :  { %v4493_v12 = vmul.f32 %v12422_v43, %v4342_v8  ;;  %v4346_v57 = vsub.f32 1.0, %v4345_v54  ;;  %vm4349_vm11 = vweird.f32 %v10801_v6  ;;  %vm4175_vm10 = vmor %vm4173_vm1, %vm4174_vm8  ;;  %vm4350_vm15 = vweird.f32 %v10852_v38 }
 0x732   :  { %v5499_v61 = vpop.eup %5498  ;;  %v4353_v3 = vand.u32 2147483647, %v10801_v6  ;;  %v4355_v29 = vand.u32 2147483648, %v10801_v6  ;;  %v4184_v9 = vmul.f32 %v10973_v42, %v10904_v56  ;;  %v12425_v60 = vsub.f32 1.0, %v10917_v45  ;;  %vm11065_vm9 = vmor %vm4349_vm11, %vm4350_vm15 }
 0x733   :  { %v4176_v25 = vsel %vm4175_vm10, %v10967_v22, %v4172_v58  ;;  %v4347_v19 = vmul.f32 %v10852_v38, %v4346_v57  ;;  %v4424_v59 = vrot.slane %v10839_v55, 4  ;;  %vm4189_vm6 = vweird.f32 %v10973_v42 }
 0x734   :  { %v4468_v16 = vmul.f32 %v5499_v61, %v12425_v60  ;;  %v5501_v34 = vpop.eup %5500  ;;  %v4181_v10 = vsel %vm11039_vm3, %v4180_v28, %v4176_v25  ;;  %v4185_v20 = vsub.f32 1.0, %v4184_v9  ;;  %v4194_v37 = vand.u32 2147483648, %v10904_v56 }
 0x735   :  { %v5503_v52 = vpop.eup %5502  ;;  %v4469_v45 = vmul.f32 %v5501_v34, %v4461_v23  ;;  %v4348_v51 = vadd.f32 %v10852_v38, %v4347_v19  ;;  %v4439_v22 = vmul.f32 %v4424_v59, %v4181_v10  ;;  %v4356_v44 = vor.u32 1.1754944e-38, %v4355_v29 }
 0x736   :  { %v4499_v17 = vadd.f32 %v10950_v15, %v4468_v16  ;;  %v4470_v49 = vmul.f32 %v5503_v52, %v4462_v24  ;;  %v4186_v62 = vmul.f32 %v10973_v42, %v4185_v20  ;;  %v4192_v8 = vand.u32 2147483647, %v10904_v56 }
 0x737   :  { %v11073_v48 = vadd.f32 %v4492_v2, %v4469_v45  ;;  %v4352_v33 = vsel %vm11065_vm9, %v10852_v38, %v4348_v51  ;;  %v4447_v6 = vadd.f32 %v4439_v22, %v12003_v18  ;;  %vm4354_vm13 = vcmp.eq.f32.partialorder %v4353_v3, 8.507059e+37 }
 0x738   :  { %4530 = vst [vmem:[#allocation2 - $0x7] sm:$0x80] %v4499_v17  ;;  %v4587_v15 = vsel %vm4586_vm5, %v10872_v31, %v4499_v17  ;;  %v11079_v7 = vadd.f32 %v4493_v12, %v4470_v49  ;;  %v4187_v23 = vadd.f32 %v10973_v42, %v4186_v62  ;;  %vm4188_vm0 = vweird.f32 %v10904_v56  ;;  %v12433_v62 = vld [vmem:[#allocation70_spill] sm:$0xff] }
 0x739   :  { %4595 = vst [vmem:[#allocation13] sm:$0xff] %v4587_v15  ;;  %4639 = vmatmul.f32.vlgmr.msra.gmra.mxu2 %v4587_v15  ;;  %v4588_v31 = vsel %vm4586_vm5, %v10881_v41, %v11073_v48  ;;  %v4357_v40 = vsel %vm4354_vm13, %v4356_v44, %v4352_v33  ;;  %5504 = vtanh.f32 %v4447_v6  ;;  %vm4190_vm12 = vmor %vm4188_vm0, %vm4189_vm6  ;;  %v4195_v38 = vor.u32 1.1754944e-38, %v4194_v37  ;;  %v12435_v6 = vld [vmem:[#allocation77_spill] sm:$0xff] }
 0x73a   :  { %5506 = vrcp.f32 %v10944_v47  ;;  %4596 = vst [vmem:[#allocation13 + $0x8] sm:$0xff] %v4588_v31  ;;  %v11092_v18 = vsel %vm4586_vm5, %v10911_v63, %v11079_v7  ;;  %v4191_v56 = vsel %vm4190_vm12, %v10973_v42, %v4187_v23  ;;  %vm4193_vm2 = vcmp.eq.f32.partialorder %v4192_v8, 8.507059e+37  ;;  %v12434_v8 = vld [vmem:[#allocation75_spill] sm:$0xff] }
 0x73b   :  { %4597 = vst [vmem:[#allocation13 + $0x10] sm:$0xff] %v11092_v18  ;;  %v4196_v41 = vsel %vm4193_vm2, %v4195_v38, %v4191_v56  ;;  %v4360_v2 = vmul.f32 %v10857_v39, %v10808_v5  ;;  %vm4364_vm4 = vweird.f32 %v10808_v5  ;;  %v4368_v36 = vand.u32 2147483647, %v10808_v5  ;;  %v12436_v38 = vld [vmem:[#allocation29_spill] sm:$0xff] }
 0x73c   :  { %v4463_v53 = vsub.f32 1.0, %v4357_v40  ;;  %v4370_v54 = vand.u32 2147483648, %v10808_v5  ;;  %v4425_v24 = vrot.slane %v10839_v55, 5  ;;  %v4199_v63 = vmul.f32 %v10984_v50, %v10913_v13 }
 0x73d   :  { %v12428_v42 = vrot.slane %v10690_v27, 7  ;;  %v4361_v12 = vsub.f32 1.0, %v4360_v2  ;;  %vm4365_vm8 = vweird.f32 %v10857_v39  ;;  %vm11107_vm1 = vcmp.eq.f32.partialorder %v4368_v36, 8.507059e+37 }
 0x73e   :  { %v4440_v58 = vmul.f32 %v4425_v24, %v4196_v41  ;;  %v4200_v28 = vsub.f32 1.0, %v4199_v63  ;;  %vm4203_vm3 = vweird.f32 %v10913_v13  ;;  %v4207_v57 = vand.u32 2147483647, %v10913_v13  ;;  %vm4366_vm15 = vmor %vm4364_vm4, %vm4365_vm8  ;;  %v12438_v63 = vld [vmem:[#allocation76_spill] sm:$0xff] }
 0x73f   :  { %v4494_v43 = vmul.f32 %v12428_v42, %v4357_v40  ;;  %v5505_v61 = vpop.eup %5504  ;;  %v4362_v3 = vmul.f32 %v10857_v39, %v4361_v12  ;;  %vm4204_vm11 = vweird.f32 %v10984_v50  ;;  %v4209_v27 = vand.u32 2147483648, %v10913_v13  ;;  %v12439_v42 = vld [vmem:[#allocation78_spill] sm:$0xff] }
 0x740   :  { %v4375_v29 = vmul.f32 %v10866_v46, %v10812_v30  ;;  %v11118_v9 = vpop.eup %5506  ;;  %v4471_v60 = vmul.f32 %v5505_v61, %v4463_v53  ;;  %v4371_v16 = vor.u32 1.1754944e-38, %v4370_v54  ;;  %v4448_v25 = vadd.f32 %v4440_v58, %v12006_v14  ;;  %vm4205_vm9 = vmor %vm4203_vm3, %vm4204_vm11 }
 0x741   :  { %4642 = vmatmul.f32.gmra.mxu2 %v4588_v31  ;;  %v4201_v19 = vmul.f32 %v10984_v50, %v4200_v28  ;;  %v4363_v59 = vadd.f32 %v10857_v39, %v4362_v3  ;;  %vm11123_vm10 = vcmp.eq.f32.partialorder %v4207_v57, 8.507059e+37  ;;  %v4210_v10 = vor.u32 1.1754944e-38, %v4209_v27 }
 0x742   :  { %v4376_v20 = vsub.f32 1.0, %v4375_v29  ;;  %v11127_v37 = vadd.f32 %v4494_v43, %v4471_v60  ;;  %5508 = vtanh.f32 %v4448_v25  ;;  %vm4380_vm6 = vweird.f32 %v10866_v46 }
 0x743   :  { %v4202_v14 = vadd.f32 %v10984_v50, %v4201_v19  ;;  %v4367_v52 = vsel %vm4366_vm15, %v10857_v39, %v4363_v59  ;;  %v4383_v45 = vand.u32 2147483647, %v10812_v30  ;;  %v4385_v51 = vand.u32 2147483648, %v10812_v30 }
 0x744   :  { %v4377_v17 = vmul.f32 %v10866_v46, %v4376_v20  ;;  %v4590_v5 = vsel %vm4586_vm5, %v10923_v4, %v11127_v37  ;;  %v4372_v22 = vsel %vm11107_vm1, %v4371_v16, %v4367_v52  ;;  %v4426_v49 = vrot.slane %v10839_v55, 6 }
 0x745   :  { %v4206_v39 = vsel %vm4205_vm9, %v10984_v50, %v4202_v14  ;;  %4598 = vst [vmem:[#allocation13 + $0x18] sm:$0xff] %v4590_v5  ;;  %v4573_v13 = vsel %vm4568_vm7, %v10780_v26, %v10129_v0  ;;  %vm4379_vm13 = vweird.f32 %v10812_v30  ;;  %5510 = vrcp.f32 %v10849_v21 }
 0x746   :  { %v4211_v32 = vsel %vm11123_vm10, %v4210_v10, %v4206_v39  ;;  %v4378_v44 = vadd.f32 %v10866_v46, %v4377_v17  ;;  %v4480_v4 = vrot.slane %v10695_v11, 7  ;;  %vm4381_vm0 = vmor %vm4379_vm13, %vm4380_vm6  ;;  %v4574_v15 = vsel %vm4568_vm7, %v12434_v8, %v12433_v62 }
 0x747   :  { %v4441_v50 = vmul.f32 %v4426_v49, %v4211_v32  ;;  %v4464_v0 = vsub.f32 1.0, %v4372_v22  ;;  %v4386_v33 = vor.u32 1.1754944e-38, %v4385_v51  ;;  %v4214_v23 = vmul.f32 %v10996_v1, %v12435_v6  ;;  %v12442_v32 = vld [vmem:[#allocation31_spill] sm:$0xff] }
 0x748   :  { %v4382_v26 = vsel %vm4381_vm0, %v10866_v46, %v4378_v44  ;;  %v5509_v30 = vpop.eup %5508  ;;  %v4495_v31 = vmul.f32 %v4480_v4, %v4372_v22  ;;  %v4582_v40 = vsel %vm4577_vm14, %v4573_v13, %v10695_v11  ;;  %vm4384_vm12 = vcmp.eq.f32.partialorder %v4383_v45, 8.507059e+37  ;;  %v12437_v46 = vld [vmem:[#allocation72_spill] sm:$0xff]  ;;  %v12470_v13 = vld [vmem:[#allocation67_spill] sm:$0xff] }
 0x749   :  { %4645 = vmatmul.f32.gmra.mxu2 %v11092_v18  ;;  %v4449_v56 = vadd.f32 %v4441_v50, %v12436_v38  ;;  %v4472_v41 = vmul.f32 %v5509_v30, %v4464_v0  ;;  %v4387_v2 = vsel %vm4384_vm12, %v4386_v33, %v4382_v26  ;;  %v4215_v36 = vsub.f32 1.0, %v4214_v23  ;;  %v12445_v38 = vld [vmem:[#allocation50_spill] sm:$0xff] }
 0x74a   :  { %v4222_v53 = vand.u32 2147483647, %v12435_v6  ;;  %v4481_v54 = vrot.slane %v12437_v46, 7  ;;  %v4224_v24 = vand.u32 2147483648, %v12435_v6  ;;  %v4390_v18 = vmul.f32 %v12439_v42, %v12438_v63 }
 0x74b   :  { %5512 = vtanh.f32 %v4449_v56  ;;  %v11176_v43 = vadd.f32 %v4495_v31, %v4472_v41  ;;  %v4583_v11 = vsel %vm4577_vm14, %v4574_v15, %v12437_v46  ;;  %v4216_v12 = vmul.f32 %v10996_v1, %v4215_v36  ;;  %v11182_v35 = vpop.eup %5510  ;;  %v12450_v36 = vld [vmem:[#allocation74_spill] sm:$0xff] }
 0x74c   :  { %vm4219_vm2 = vweird.f32 %v10996_v1  ;;  %v4465_v58 = vsub.f32 1.0, %v4387_v2  ;;  %v4496_v28 = vmul.f32 %v4481_v54, %v4387_v2  ;;  %vm4218_vm4 = vweird.f32 %v12435_v6  ;;  %v12451_v46 = vld [vmem:[#allocation58_spill] sm:$0xff] }
 0x74d   :  { %v4391_v57 = vsub.f32 1.0, %v4390_v18  ;;  %v4591_v61 = vsel %vm4586_vm5, %v4582_v40, %v11176_v43  ;;  %v4217_v3 = vadd.f32 %v10996_v1, %v4216_v12  ;;  %vm4223_vm8 = vcmp.eq.f32.partialorder %v4222_v53, 8.507059e+37  ;;  %vm4220_vm1 = vmor %vm4218_vm4, %vm4219_vm2  ;;  %v12444_v40 = vld [vmem:[#allocation102_spill] sm:$0xff] }
 0x74e   :  { %v4229_v27 = vmul.f32 %v11118_v9, %v10944_v47  ;;  %4599 = vst [vmem:[#allocation13 + $0x20] sm:$0xff] %v4591_v61  ;;  %v4225_v29 = vor.u32 1.1754944e-38, %v4224_v24  ;;  %vm4395_vm3 = vweird.f32 %v12439_v42  ;;  %v4400_v16 = vand.u32 2147483648, %v12438_v63 }
 0x74f   :  { %v4392_v60 = vmul.f32 %v12439_v42, %v4391_v57  ;;  %v4221_v25 = vsel %vm4220_vm1, %v10996_v1, %v4217_v3  ;;  %v4427_v19 = vrot.slane %v10839_v55, 7  ;;  %vm4234_vm11 = vweird.f32 %v11118_v9  ;;  %v12456_v57 = vld [vmem:[#allocation66_spill] sm:$0xff] }
 0x750   :  { %v4230_v59 = vsub.f32 1.0, %v4229_v27  ;;  %v4226_v10 = vsel %vm4223_vm8, %v4225_v29, %v4221_v25  ;;  %v4237_v14 = vand.u32 2147483647, %v10944_v47  ;;  %v4239_v52 = vand.u32 2147483648, %v10944_v47  ;;  %v12458_v29 = vld [vmem:[#allocation69_spill] sm:$0xff] }
 0x751   :  { %v5513_v34 = vpop.eup %5512  ;;  %4648 = vmatmul.f32.gmra.mxu2 %v4590_v5  ;;  %v4393_v20 = vadd.f32 %v12439_v42, %v4392_v60  ;;  %v4442_v45 = vmul.f32 %v4427_v19, %v4226_v10  ;;  %v4405_v1 = vmul.f32 %v11182_v35, %v10849_v21  ;;  %v4515_v22 = vrot.slane %v11073_v48, 7 }
 0x752   :  { %v4473_v17 = vmul.f32 %v5513_v34, %v4465_v58  ;;  %v4231_v51 = vmul.f32 %v11118_v9, %v4230_v59  ;;  %v4516_v39 = vrot.slane %v11079_v7, 6  ;;  %vm4394_vm10 = vweird.f32 %v12438_v63  ;;  %v12460_v34 = vld [vmem:[#allocation103_spill] sm:$0xff] }
 0x753   :  { %v4398_v5 = vand.u32 2147483647, %v12438_v63  ;;  %vm11208_vm15 = vmor %vm4394_vm10, %vm4395_vm3  ;;  %v4450_v44 = vadd.f32 %v4442_v45, %v12442_v32  ;;  %vm4233_vm6 = vweird.f32 %v10944_v47  ;;  %v4401_v7 = vor.u32 1.1754944e-38, %v4400_v16  ;;  %v12453_v63 = vld [vmem:[#allocation118_spill] sm:$0xff] }
 0x754   :  { %v4504_v49 = vadd.f32 %v4496_v28, %v4473_v17  ;;  %v4232_v4 = vadd.f32 %v11118_v9, %v4231_v51  ;;  %v4397_v48 = vsel %vm11208_vm15, %v12439_v42, %v4393_v20  ;;  %vm4235_vm9 = vmor %vm4233_vm6, %vm4234_vm11  ;;  %v4240_v50 = vor.u32 1.1754944e-38, %v4239_v52  ;;  %v12466_v51 = vld [vmem:[#allocation73_spill] sm:$0xff] }
 0x755   :  { %v4406_v62 = vsub.f32 1.0, %v4405_v1  ;;  %5514 = vtanh.f32 %v4450_v44  ;;  %vm4238_vm13 = vcmp.eq.f32.partialorder %v4237_v14, 8.507059e+37  ;;  %vm4399_vm0 = vcmp.eq.f32.partialorder %v4398_v5, 8.507059e+37  ;;  %v12463_v14 = vld [vmem:[#allocation59_spill] sm:$0xff] }
 0x756   :  { %v4592_v8 = vsel %vm4586_vm5, %v4583_v11, %v4504_v49  ;;  %v4236_v15 = vsel %vm4235_vm9, %v11118_v9, %v4232_v4  ;;  %vm4410_vm12 = vweird.f32 %v11182_v35  ;;  %v4402_v26 = vsel %vm4399_vm0, %v4401_v7, %v4397_v48  ;;  %v12472_v4 = vld [vmem:[#allocation71_spill] sm:$0xff] }
 0x757   :  { %4600 = vst [vmem:[#allocation13 + $0x28] sm:$0xff] %v4592_v8  ;;  %v4241_v0 = vsel %vm4238_vm13, %v4240_v50, %v4236_v15  ;;  %v4407_v47 = vmul.f32 %v11182_v35, %v4406_v62  ;;  %v4415_v33 = vand.u32 2147483648, %v10849_v21  ;;  %v4518_v23 = vrot.slane %v11127_v37, 5 }
 0x758   :  { %v4443_v6 = vmul.f32 %v10839_v55, %v4241_v0  ;;  %vm4409_vm2 = vweird.f32 %v10849_v21  ;;  %v4413_v9 = vand.u32 2147483647, %v10849_v21  ;;  %vm12443_vm4 = vcmask 1041409   ;;  %v12449_v55 = vld [vmem:[#allocation34_spill] sm:$0xff]  ;;  %v4877_v0 = vld [vmem:[%s11298_s7] ss:$0 sm:$0xff] }
 0x759   :  { %4651 = vmatmul.f32.gmra.mxu2 %v4591_v61  ;;  %v4408_v30 = vadd.f32 %v11182_v35, %v4407_v47  ;;  %v4517_v31 = vsel %vm12443_vm4, %v4516_v39, %v4515_v22  ;;  %vm12446_vm8 = vcmask 1040384   ;;  %vm11234_vm1 = vmor %vm4409_vm2, %vm4410_vm12  ;;  %v4466_v37 = vsub.f32 1.0, %v4402_v26  ;;  %v12468_v39 = vld [vmem:[#allocation119_spill] sm:$0xff]  ;;  %s5823_s7 = smov [#allocation12]  }
 0x75a   :  { %v4539_v56 = vsel %vm12446_vm8, %v12445_v38, %v12444_v40  ;;  %v4451_v2 = vadd.f32 %v4443_v6, %v12449_v55  ;;  %v4482_v53 = vrot.slane %v12450_v36, 7  ;;  %vm12452_vm3 = vcmask 1041408   ;;  %vm12462_vm13 = vmmov %vm12446_vm8  ;;  %s4676_s9 = sshll.u32 %s5823_s7, 4  ;;  %s4677_s9 = int_to_ptr.vmem [resolvable:$true] %s4676_s9 }
 0x75b   :  { %v4548_v54 = vsel %vm12452_vm3, %v4539_v56, %v12451_v46  ;;  %v4412_v21 = vsel %vm11234_vm1, %v11182_v35, %v4408_v30  ;;  %v5515_v24 = vpop.eup %5514  ;;  %vm12454_vm11 = vcmask 1042432   ;;  %v4416_v18 = vor.u32 1.1754944e-38, %v4415_v33  ;;  %vm12464_vm0 = vmmov %vm12452_vm3 }
 0x75c   :  { %v4557_v42 = vsel %vm12454_vm11, %v4548_v54, %v12453_v63  ;;  %5516 = vtanh.f32 %v4451_v2  ;;  %vm12455_vm10 = vcmask 1042434   ;;  %v4474_v12 = vmul.f32 %v5515_v24, %v4466_v37  ;;  %vm12469_vm2 = vmmov %vm12454_vm11 }
 0x75d   :  { %v4519_v11 = vsel %vm12455_vm10, %v4518_v23, %v4517_v31  ;;  %v4497_v58 = vmul.f32 %v4482_v53, %v4402_v26  ;;  %vm4414_vm15 = vcmp.eq.f32.partialorder %v4413_v9, 8.507059e+37  ;;  %v4520_v28 = vrot.slane %v11176_v43, 4  ;;  %v12461_v43 = vld [vmem:[#allocation51_spill] sm:$0xff] }
 0x75e   :  { %vm12457_vm6 = vcmask 1043456   ;;  %v4417_v3 = vsel %vm4414_vm15, %v4416_v18, %v4412_v21  ;;  %vm12459_vm9 = vcmask 1043459   ;;  %v4522_v25 = vrot.slane %v4504_v49, 3 }
 0x75f   :  { %v4566_v61 = vsel %vm12457_vm6, %v4557_v42, %v12456_v57  ;;  %v4505_v27 = vadd.f32 %v4497_v58, %v4474_v12  ;;  %v4521_v60 = vsel %vm12459_vm9, %v4520_v28, %v4519_v11  ;;  %v4467_v59 = vsub.f32 1.0, %v4417_v3  ;;  %vm12471_vm4 = vmmov %vm12457_vm6 }
 0x760   :  { %v4575_v35 = vsel %vm4568_vm7, %v4566_v61, %v12458_v29  ;;  %v4540_v10 = vsel %vm12462_vm13, %v12461_v43, %v12460_v34  ;;  %vm12465_vm12 = vcmask 1044484   ;;  %v12467_v1 = vrot.slane %v12466_v51, 7 }
 0x761   :  { %v4584_v16 = vsel %vm4577_vm14, %v4575_v35, %v12450_v36  ;;  %4654 = vmatmul.f32.gmra.mxu2 %v4592_v8  ;;  %v4549_v52 = vsel %vm12464_vm0, %v4540_v10, %v12463_v14  ;;  %v4523_v17 = vsel %vm12465_vm12, %v4522_v25, %v4521_v60  ;;  %v4524_v49 = vrot.slane %v4505_v27, 2 }
 0x762   :  { %v4593_v19 = vsel %vm4586_vm5, %v4584_v16, %v4505_v27  ;;  %v5517_v20 = vpop.eup %5516  ;;  %v4498_v22 = vmul.f32 %v4417_v3, %v12467_v1  ;;  %v4558_v5 = vsel %vm12469_vm2, %v4549_v52, %v12468_v39  ;;  %vm12473_vm8 = vcmask 1045509  }
 0x763   :  { %4601 = vst [vmem:[#allocation13 + $0x30] sm:$0xff] %v4593_v19  ;;  %v4475_v45 = vmul.f32 %v5517_v20, %v4467_v59  ;;  %v4567_v32 = vsel %vm12471_vm4, %v4558_v5, %v12470_v13  ;;  %v4525_v7 = vsel %vm12473_vm8, %v4524_v49, %v4523_v17  ;;  %vm12474_vm1 = vcmask 1046534  }
 0x764   :  { %v4576_v48 = vsel %vm4568_vm7, %v4567_v32, %v12472_v4 }
 0x765   :  { %v4506_v44 = vadd.f32 %v4498_v22, %v4475_v45  ;;  %v4585_v50 = vsel %vm4577_vm14, %v4576_v48, %v12466_v51 }
 0x767   :  { %v4526_v62 = vrot.slane %v4506_v44, 1  ;;  %v4594_v8 = vsel %vm4586_vm5, %v4585_v50, %v4506_v44 }
 0x768   :  { %4602 = vst [vmem:[#allocation13 + $0x38] sm:$0xff] %v4594_v8 }
 0x769   :  { %4657 = vmatmul.f32.gmra.mxu2 %v4593_v19  ;;  %v4527_v15 = vsel %vm12474_vm1, %v4526_v62, %v4525_v7  ;;  %4697 = dma.vmem_to_hbm [thread:$0]  %s4690_s22, 1024, %s4692_s25, [#allocation14], %s5818_s3, %s5818_s3, %s5819_s28  }
 0x76a   :  { %4531 = vst [vmem:[#allocation2 + $0x1] sm:$0x7f] %v4527_v15 }
 0x771   :  { %4660 = vmatmul.f32.gmra.mxu2 %v4594_v8 }
 0x7bc   :  { %v4640_v47 = vpop.f32.mrf.mxu2 }
 0x7bd   :  { %v4641_v26 = vadd.f32 %v4877_v0, %v4640_v47 }
 0x7bf   :  { %4664 = vst [vmem:[#allocation12] sm:$0xff] %v4641_v26 }
 0x7c4   :  { %v4643_v33 = vpop.f32.mrf.mxu2 }
 0x7c5   :  { %v4644_v6 = vadd.f32 %v4877_v0, %v4643_v33 }
 0x7c7   :  { %4665 = vst [vmem:[#allocation12 + $0x8] sm:$0xff] %v4644_v6 }
 0x7cc   :  { %v4646_v23 = vpop.f32.mrf.mxu2 }
 0x7cd   :  { %v4647_v30 = vadd.f32 %v4877_v0, %v4646_v23 }
 0x7cf   :  { %4666 = vst [vmem:[#allocation12 + $0x10] sm:$0xff] %v4647_v30 }
 0x7d4   :  { %v4649_v9 = vpop.f32.mrf.mxu2 }
 0x7d5   :  { %v4650_v31 = vadd.f32 %v4877_v0, %v4649_v9 }
 0x7d7   :  { %4667 = vst [vmem:[#allocation12 + $0x18] sm:$0xff] %v4650_v31 }
 0x7dc   :  { %v4652_v40 = vpop.f32.mrf.mxu2 }
 0x7dd   :  { %v4653_v38 = vadd.f32 %v4877_v0, %v4652_v40 }
 0x7df   :  { %4668 = vst [vmem:[#allocation12 + $0x20] sm:$0xff] %v4653_v38 }
 0x7e4   :  { %v4655_v56 = vpop.f32.mrf.mxu2 }
 0x7e5   :  { %v4656_v41 = vadd.f32 %v4877_v0, %v4655_v56 }
 0x7e7   :  { %4669 = vst [vmem:[#allocation12 + $0x28] sm:$0xff] %v4656_v41 }
 0x7ec   :  { %v4658_v55 = vpop.f32.mrf.mxu2 }
 0x7ed   :  { %v4659_v2 = vadd.f32 %v4877_v0, %v4658_v55 }
 0x7ef   :  { %4670 = vst [vmem:[#allocation12 + $0x30] sm:$0xff] %v4659_v2 }
 0x7f4   :  { %v4661_v37 = vpop.f32.mrf.mxu2 }
 0x7f5   :  { %v4662_v36 = vadd.f32 %v4877_v0, %v4661_v37 }
 0x7f7   :  { %4671 = vst [vmem:[#allocation12 + $0x38] sm:$0xff] %v4662_v36 }
 0x7f8   :  { %4684 = dma.vmem_to_hbm [thread:$0]  %s4677_s9, 1024, %s4679_s30, [#allocation5], %s5818_s3, %s5818_s3, %s5819_s28  }
 0x7f9   :  { %5809 = dma.done.wait [#allocation5], 1024  }
 0x7fa   :  { %5810 = vsyncadd [#allocation5], 4294966272 }
 0x7fb   :  { %5811 = dma.done.wait [#allocation14], 1024  }
 0x7fc   :  { %5812 = vsyncadd [#allocation14], 4294966272 }
 0x7fd   :  { %4706 = vsyncpa [#allocation4], 1 }
 0x7fe   :  { %4707 = vsyncpa [#allocation7], 1 }
 0x7ff   :  { %4708 = vsyncpa [#allocation10], 1 }
 0x800   :  { %4709 = vsyncpa [#allocation5], 1 }
 0x801   :  { %4710 = vsyncpa [#allocation14], 1 }

</bundles_post_ra>
